<compile_context>
chip_gen: v6e
topology: v6e:2x2x1
jax: 0.10.0
libtpu: 0.0.40
codegen_flags: <defaults>
</compile_context>

<pallas_src>
import functools

import jax
import jax.numpy as jnp
from jax.experimental import pallas as pl
from jax.experimental.pallas import tpu as pltpu


# ---------------------------------------------------------------------------
# small helpers
# ---------------------------------------------------------------------------
def _round_up(x, m):
    return (x + m - 1) // m * m


def _pick_bm(m):
    """M-tile (multiple of 8, MXU-aligned when tiled). Returns (bm, padded_M)."""
    if m <= 256:
        bm = _round_up(m, 8)
        return bm, bm
    bm = 256
    return bm, _round_up(m, bm)


def _pick_bn(n):
    """N-tile: n itself when small, else 256 (v6e/v7x MXU native)."""
    return n if n <= 256 else 256


def _pick_bk(k, bm, bn, budget_bytes=10 * 1024 * 1024):
    """Largest multiple of 128 dividing k whose double-buffered bf16 A/B tiles fit budget."""
    per_k_bytes = 2 * 2 * (bm + bn)          # 2 buffers * 2 bytes * (bm + bn) per K element
    cap = max(128, (budget_bytes // per_k_bytes) // 128 * 128)
    for bk in range(min(cap, k), 127, -128):
        if k % bk == 0:
            return bk
    return 128


# ---------------------------------------------------------------------------
# Pallas kernels
# ---------------------------------------------------------------------------
def _matmul_bias_1k_kernel(a_ref, b_ref, bias_ref, o_ref, *, relu):
    """Single-K-step fast path: out = relu?(A @ B + bias), no accumulator scratch."""
    out = jnp.dot(a_ref[...], b_ref[...],
                  preferred_element_type=jnp.float32) + bias_ref[...]
    if relu:
        out = jnp.maximum(out, 0.0)
    o_ref[...] = out.astype(o_ref.dtype)


def _matmul_bias_kernel(a_ref, b_ref, bias_ref, o_ref, acc_ref, *, relu):
    """Tiled out = relu?(A @ B + bias). K is the last (reduction) grid axis."""
    @pl.when(pl.program_id(2) == 0)
    def _():
        acc_ref[...] = jnp.zeros_like(acc_ref)

    acc_ref[...] += jnp.dot(a_ref[...], b_ref[...],
                            preferred_element_type=jnp.float32)

    @pl.when(pl.program_id(2) == pl.num_programs(2) - 1)
    def _():
        out = acc_ref[...] + bias_ref[...]            # (bm, bn) + (1, bn), f32
        if relu:
            out = jnp.maximum(out, 0.0)
        o_ref[...] = out.astype(o_ref.dtype)


def matmul_bias(a, b, bias, relu=False, out_dtype=jnp.float32):
    """a: (M, K); b: (K, N) bf16 with K % 128 == 0 and N % 128 == 0; bias: (N,) f32."""
    m, k = a.shape
    kb, n = b.shape
    assert k == kb and k % 128 == 0 and n % 128 == 0

    bm, mp = _pick_bm(m)
    bn = _pick_bn(n)
    assert n % bn == 0
    bk = _pick_bk(k, bm, bn)

    if a.dtype != jnp.bfloat16:
        a = a.astype(jnp.bfloat16)
    if mp != m:
        a = jnp.pad(a, ((0, mp - m), (0, 0)))
    bias2 = bias.reshape(1, n).astype(jnp.float32)

    if bk == k:                                        # single K step: no accumulator
        out = pl.pallas_call(
            functools.partial(_matmul_bias_1k_kernel, relu=relu),
            out_shape=jax.ShapeDtypeStruct((mp, n), out_dtype),
            grid=(mp // bm, n // bn),
            in_specs=[
                pl.BlockSpec((bm, k), lambda i, j: (i, 0)),
                pl.BlockSpec((k, bn), lambda i, j: (0, j)),
                pl.BlockSpec((1, bn), lambda i, j: (0, j)),
            ],
            out_specs=pl.BlockSpec((bm, bn), lambda i, j: (i, j)),
            compiler_params=pltpu.CompilerParams(
                dimension_semantics=("parallel", "parallel")),
        )(a, b, bias2)
    else:
        out = pl.pallas_call(
            functools.partial(_matmul_bias_kernel, relu=relu),
            out_shape=jax.ShapeDtypeStruct((mp, n), out_dtype),
            grid=(mp // bm, n // bn, k // bk),
            in_specs=[
                pl.BlockSpec((bm, bk), lambda i, j, kk: (i, kk)),
                pl.BlockSpec((bk, bn), lambda i, j, kk: (kk, j)),
                pl.BlockSpec((1, bn), lambda i, j, kk: (0, j)),
            ],
            out_specs=pl.BlockSpec((bm, bn), lambda i, j, kk: (i, j)),
            scratch_shapes=[pltpu.VMEM((bm, bn), jnp.float32)],
            compiler_params=pltpu.CompilerParams(
                dimension_semantics=("parallel", "parallel", "arbitrary")),
        )(a, b, bias2)
    return out[:m] if mp != m else out


def _fused_fc_head_kernel(flat_ref, w1_ref, b1_ref, w2_ref, b2_ref, o_ref, acc_ref,
                          *, real_n, out_size):
    """fc1 (both heads) + ReLU + final Linears + dueling combine, hid kept in VMEM.

    Grid axis 0 tiles fc1's K; the epilogue runs on the last K step.
    """
    kk = pl.program_id(0)

    @pl.when(kk == 0)
    def _():
        acc_ref[...] = jnp.zeros_like(acc_ref)

    acc_ref[...] += jnp.dot(flat_ref[...], w1_ref[...],
                            preferred_element_type=jnp.float32)

    @pl.when(kk == pl.num_programs(0) - 1)
    def _():
        hid = jnp.maximum(acc_ref[...] + b1_ref[...], 0.0).astype(jnp.bfloat16)
        logits = jnp.dot(hid, w2_ref[...],
                         preferred_element_type=jnp.float32) + b2_ref[...]
        # PyTorch `advantage.mean()` is the GLOBAL mean over batch and actions.
        # Mask out padded batch rows and padded lane columns.
        rows = jax.lax.broadcasted_iota(jnp.int32, logits.shape, 0)
        cols = jax.lax.broadcasted_iota(jnp.int32, logits.shape, 1)
        adv_mask = jnp.logical_and(rows < real_n, cols < out_size)
        mean = jnp.sum(jnp.where(adv_mask, logits, 0.0)) / (real_n * out_size)
        val = logits[:, out_size:out_size + 1]          # value column
        # Lane-dense write; only columns [0, out_size) are meaningful.
        o_ref[...] = val + logits - mean


def fused_fc_head(flat, w1, b1, w2, b2, out_size):
    """flat: (N, 6272) -> (N, out_size). Single fused pallas_call (small-batch path)."""
    n, k = flat.shape
    assert k == w1.shape[0] and k % 128 == 0
    h1 = w1.shape[1]                                    # 1024 (adv|value hidden)
    h2 = w2.shape[1]                                    # 128  (lane-padded head)

    np8 = _round_up(n, 8)
    flat = flat.astype(jnp.bfloat16)
    if np8 != n:
        flat = jnp.pad(flat, ((0, np8 - n), (0, 0)))

    bk = _pick_bk(k, np8, h1, budget_bytes=8 * 1024 * 1024)
    out = pl.pallas_call(
        functools.partial(_fused_fc_head_kernel, real_n=n, out_size=out_size),
        out_shape=jax.ShapeDtypeStruct((np8, h2), jnp.float32),
        grid=(k // bk,),
        in_specs=[
            pl.BlockSpec((np8, bk), lambda kk: (0, kk)),
            pl.BlockSpec((bk, h1), lambda kk: (kk, 0)),
            pl.BlockSpec((1, h1), lambda kk: (0, 0)),
            pl.BlockSpec((h1, h2), lambda kk: (0, 0)),
            pl.BlockSpec((1, h2), lambda kk: (0, 0)),
        ],
        out_specs=pl.BlockSpec((np8, h2), lambda kk: (0, 0)),
        scratch_shapes=[pltpu.VMEM((np8, h1), jnp.float32)],
        compiler_params=pltpu.CompilerParams(
            dimension_semantics=("arbitrary",)),
    )(flat, w1, b1.reshape(1, h1).astype(jnp.float32),
      w2, b2.reshape(1, h2).astype(jnp.float32))
    return out[:n, :out_size]


# ---------------------------------------------------------------------------
# Plain-JAX glue: NHWC im2col over the FULL (lane-dense) channel dim, bf16.
# ---------------------------------------------------------------------------
def im2col_nhwc(x, kh, kw, stride):
    """x: (N, H, W, C) -> patches (N*OH*OW, KH*KW*C), feature order (kh, kw, c)."""
    n, h, w, c = x.shape
    oh = (h - kh) // stride + 1
    ow = (w - kw) // stride + 1
    cols = [x[:, i:i + stride * oh:stride, j:j + stride * ow:stride, :]
            for i in range(kh) for j in range(kw)]
    patches = jnp.concatenate(cols, axis=-1)            # (N, OH, OW, KH*KW*C)
    return patches.reshape(n * oh * ow, kh * kw * c), oh, ow


def conv2d_relu(x_nhwc, w_prep, b_prep, *, kh, kw, stride):
    """NHWC conv via im2col + Pallas matmul. Output channels padded to 128 lanes."""
    n = x_nhwc.shape[0]
    patches, oh, ow = im2col_nhwc(x_nhwc, kh, kw, stride)
    out = matmul_bias(patches, w_prep, b_prep, relu=True, out_dtype=jnp.bfloat16)
    return out.reshape(n, oh, ow, w_prep.shape[1])       # (N, OH, OW, 128)


# ---------------------------------------------------------------------------
# Parameters: PyTorch-layout init + one-time kernel-friendly preparation
# ---------------------------------------------------------------------------
def init_params(key, out_size):
    def uniform(key, shape, fan_in):
        bound = 1.0 / jnp.sqrt(jnp.float32(fan_in))
        return jax.random.uniform(key, shape, jnp.float32, -bound, bound)

    keys = jax.random.split(key, 14)
    p = {}
    p["c1_w"] = uniform(keys[0], (32, 4, 8, 8), 4 * 8 * 8)
    p["c1_b"] = uniform(keys[1], (32,), 4 * 8 * 8)
    p["c2_w"] = uniform(keys[2], (64, 32, 4, 4), 32 * 4 * 4)
    p["c2_b"] = uniform(keys[3], (64,), 32 * 4 * 4)
    p["c3_w"] = uniform(keys[4], (64, 64, 3, 3), 64 * 3 * 3)
    p["c3_b"] = uniform(keys[5], (64,), 64 * 3 * 3)
    p["a1_w"] = uniform(keys[6], (512, 3136), 3136)
    p["a1_b"] = uniform(keys[7], (512,), 3136)
    p["a2_w"] = uniform(keys[8], (out_size, 512), 512)
    p["a2_b"] = uniform(keys[9], (out_size,), 512)
    p["v1_w"] = uniform(keys[10], (512, 3136), 3136)
    p["v1_b"] = uniform(keys[11], (512,), 3136)
    p["v2_w"] = uniform(keys[12], (1, 512), 512)
    p["v2_b"] = uniform(keys[13], (1,), 512)
    return p


def _prep_conv(w, b, c_pad):
    """(OC, C, KH, KW) -> (KH*KW*c_pad, 128) bf16, feature order (kh, kw, c_pad)."""
    oc, c, kh, kw = w.shape
    w2 = w.transpose(2, 3, 1, 0)                         # (kh, kw, c, oc)
    if c_pad != c:
        w2 = jnp.pad(w2, ((0, 0), (0, 0), (0, c_pad - c), (0, 0)))
    w2 = w2.reshape(kh * kw * c_pad, oc)
    assert w2.shape[0] % 128 == 0
    w2 = jnp.pad(w2, ((0, 0), (0, 128 - oc)))
    b2 = jnp.pad(b, (0, 128 - oc))
    return w2.astype(jnp.bfloat16), b2.astype(jnp.float32)


def prepare_params(p, out_size):
    """One-time: transpose / permute / fuse / channel-pad / bf16-cast all weights."""
    assert out_size + 1 <= 128
    f32, bf16 = jnp.float32, jnp.bfloat16
    q = {"out_size": out_size}

    q["c1_w"], q["c1_b"] = _prep_conv(p["c1_w"], p["c1_b"], c_pad=4)     # K = 256
    q["c2_w"], q["c2_b"] = _prep_conv(p["c2_w"], p["c2_b"], c_pad=128)   # K = 2048
    q["c3_w"], q["c3_b"] = _prep_conv(p["c3_w"], p["c3_b"], c_pad=128)   # K = 1152

    # fc1 of both heads fused; rows re-ordered from PyTorch (c,h,w) flatten to the
    # kernel's lane-dense (h, w, c128) flatten of conv3's 128-lane output; padded
    # channels (64..127) get zero rows, so no activation slice / K-pad is needed.
    def perm_fc1(w):                                     # (512, 3136) -> (512, 6272)
        w = w.reshape(512, 64, 7, 7)
        w = jnp.pad(w, ((0, 0), (0, 64), (0, 0), (0, 0)))    # c: 64 -> 128 (zero rows)
        return w.transpose(0, 2, 3, 1).reshape(512, 7 * 7 * 128)

    q["fc1_w"] = jnp.concatenate([perm_fc1(p["a1_w"]).T,
                                  perm_fc1(p["v1_w"]).T], axis=1).astype(bf16)  # (6272, 1024)
    q["fc1_b"] = jnp.concatenate([p["a1_b"], p["v1_b"]]).astype(f32)            # (1024,)

    # fused final head: columns [0..A-1] = advantage, column A = value, rest zero.
    top = jnp.concatenate([p["a2_w"].T, jnp.zeros((512, 1), f32)], axis=1)
    bot = jnp.concatenate([jnp.zeros((512, out_size), f32), p["v2_w"].T], axis=1)
    w_head = jnp.concatenate([top, bot], axis=0)                                # (1024, A+1)
    q["head_w"] = jnp.pad(w_head, ((0, 0), (0, 128 - (out_size + 1)))).astype(bf16)
    b_head = jnp.concatenate([p["a2_b"], p["v2_b"]])
    q["head_b"] = jnp.pad(b_head, (0, 128 - (out_size + 1))).astype(f32)
    return q


# ---------------------------------------------------------------------------
# Forward pass
# ---------------------------------------------------------------------------
def dueling_net_forward(params, x):
    """x: (N, 4, 84, 84) float32 -> (N, out_size) float32."""
    n = x.shape[0]
    out_size = params["out_size"]

    # bf16 once at the top (halves im2col HBM traffic), NCHW -> NHWC once.
    x = x.astype(jnp.bfloat16).transpose(0, 2, 3, 1)
    h = conv2d_relu(x, params["c1_w"], params["c1_b"], kh=8, kw=8, stride=4)
    h = conv2d_relu(h, params["c2_w"], params["c2_b"], kh=4, kw=4, stride=2)
    h = conv2d_relu(h, params["c3_w"], params["c3_b"], kh=3, kw=3, stride=1)
    flat = h.reshape(n, -1)                              # (N, 7*7*128), lane-dense

    if n <= 256:
        # Small batch (latency-bound): one fused fc1 + head + dueling-combine kernel.
        return fused_fc_head(flat, params["fc1_w"], params["fc1_b"],
                             params["head_w"], params["head_b"], out_size)

    # Large training batch: tiled matmuls; combine is a trivially small op.
    hid = matmul_bias(flat, params["fc1_w"], params["fc1_b"],
                      relu=True, out_dtype=jnp.bfloat16)
    logits = matmul_bias(hid, params["head_w"], params["head_b"])
    adv = logits[:, :out_size]
    val = logits[:, out_size:out_size + 1]
    # TODO(synk): for huge batches move this combine (two-pass global mean) into a
    #             tiled Pallas kernel with lane-dense output.
    return val + adv - jnp.mean(adv)


# ---------------------------------------------------------------------------
# main
# ---------------------------------------------------------------------------
if __name__ == "__main__":
    out_size = 6
    batch = 2

    key = jax.random.PRNGKey(0)
    k_params, k_x = jax.random.split(key)
    raw_params = init_params(k_params, out_size)
    params = prepare_params(raw_params, out_size)

    # NOTE: Linear(3136, 512) hard-codes the 84x84 Atari resolution, so the
    # spatial size cannot be shrunk without changing the module.
    x = jax.random.normal(k_x, (batch, 4, 84, 84), dtype=jnp.float32)

    fwd = jax.jit(functools.partial(dueling_net_forward, params))
    out = fwd(x)
    jax.block_until_ready(out)

    assert out.shape == (batch, out_size), out.shape
    assert out.dtype == jnp.float32
    assert bool(jnp.all(jnp.isfinite(out)))
    print("KERNEL_OK")
</pallas_src>

<mosaic_0001>
module attributes {stable_mosaic.version = 11 : i64} {
  func.func @_matmul_bias_1k_kernel(%arg0: i32, %arg1: i32, %arg2: memref<256x256xbf16, #tpu.memory_space<vmem>>, %arg3: memref<256x128xbf16, #tpu.memory_space<vmem>>, %arg4: memref<1x128xf32, #tpu.memory_space<vmem>>, %arg5: memref<256x128xbf16, #tpu.memory_space<vmem>>) attributes {dimension_semantics = [#tpu.dimension_semantics<parallel>, #tpu.dimension_semantics<parallel>], iteration_bounds = array<i64: 4, 1>, scalar_prefetch = 0 : i64, scratch_operands = 0 : i64, tpu.core_type = #tpu.core_type<tc>, window_params = [{transform_indices = @transform_0, window_bounds = array<i64: 256, 256>}, {transform_indices = @transform_1, window_bounds = array<i64: 256, 128>}, {transform_indices = @transform_2, window_bounds = array<i64: 1, 128>}, {transform_indices = @transform_3, window_bounds = array<i64: 256, 128>}]} {
    %c0 = arith.constant 0 : index
    %c0_0 = arith.constant 0 : index
    %0 = vector.load %arg2[%c0, %c0_0] : memref<256x256xbf16, #tpu.memory_space<vmem>>, vector<256x256xbf16>
    %c0_1 = arith.constant 0 : index
    %c0_2 = arith.constant 0 : index
    %1 = vector.load %arg3[%c0_1, %c0_2] : memref<256x128xbf16, #tpu.memory_space<vmem>>, vector<256x128xbf16>
    %cst = arith.constant dense<0.000000e+00> : vector<256x128xf32>
    %2 = tpu.matmul %0, %1, %cst {dimension_numbers = #tpu.dot_dimension_numbers<[1], [0], [0], [1], [0, 0, 1, 1], [], []>} : vector<256x256xbf16>, vector<256x128xbf16>, vector<256x128xf32> -> vector<256x128xf32>
    %c0_3 = arith.constant 0 : index
    %c0_4 = arith.constant 0 : index
    %3 = vector.load %arg4[%c0_3, %c0_4] : memref<1x128xf32, #tpu.memory_space<vmem>>, vector<1x128xf32>
    %4 = vector.broadcast %3 : vector<1x128xf32> to vector<256x128xf32>
    %5 = arith.addf %2, %4 : vector<256x128xf32>
    %cst_5 = arith.constant 0.000000e+00 : f32
    %6 = vector.broadcast %cst_5 : f32 to vector<256x128xf32>
    %7 = arith.maximumf %5, %6 : vector<256x128xf32>
    %8 = arith.truncf %7 : vector<256x128xf32> to vector<256x128xbf16>
    %c0_6 = arith.constant 0 : index
    %c0_7 = arith.constant 0 : index
    %9 = vector.load %arg5[%c0_6, %c0_7] : memref<256x128xbf16, #tpu.memory_space<vmem>>, vector<256x128xbf16>
    tpu.vector_store %arg5[%c0_6, %c0_7], %8 {strides = array<i32>} : memref<256x128xbf16, #tpu.memory_space<vmem>>, vector<256x128xbf16>,
    return
  }
  func.func @transform_0(%arg0: i32, %arg1: i32) -> (i32, i32) {
    %c0_i32 = arith.constant 0 : i32
    %c0_i32_0 = arith.constant 0 : i32
    return %arg0, %c0_i32 : i32, i32
  }
  func.func @transform_1(%arg0: i32, %arg1: i32) -> (i32, i32) {
    %c0_i32 = arith.constant 0 : i32
    %c0_i32_0 = arith.constant 0 : i32
    return %c0_i32, %arg1 : i32, i32
  }
  func.func @transform_2(%arg0: i32, %arg1: i32) -> (i32, i32) {
    %c0_i32 = arith.constant 0 : i32
    %c0_i32_0 = arith.constant 0 : i32
    return %c0_i32, %arg1 : i32, i32
  }
  func.func @transform_3(%arg0: i32, %arg1: i32) -> (i32, i32) {
    %c0_i32 = arith.constant 0 : i32
    return %arg0, %arg1 : i32, i32
  }
}

module attributes {stable_mosaic.version = 11 : i64} {
  func.func @_matmul_bias_1k_kernel(%arg0: i32, %arg1: i32, %arg2: memref<168x2048xbf16, #tpu.memory_space<vmem>>, %arg3: memref<2048x128xbf16, #tpu.memory_space<vmem>>, %arg4: memref<1x128xf32, #tpu.memory_space<vmem>>, %arg5: memref<168x128xbf16, #tpu.memory_space<vmem>>) attributes {dimension_semantics = [#tpu.dimension_semantics<parallel>, #tpu.dimension_semantics<parallel>], iteration_bounds = array<i64: 1, 1>, scalar_prefetch = 0 : i64, scratch_operands = 0 : i64, tpu.core_type = #tpu.core_type<tc>, window_params = [{transform_indices = @transform_0, window_bounds = array<i64: 168, 2048>}, {transform_indices = @transform_1, window_bounds = array<i64: 2048, 128>}, {transform_indices = @transform_2, window_bounds = array<i64: 1, 128>}, {transform_indices = @transform_3, window_bounds = array<i64: 168, 128>}]} {
    %c0 = arith.constant 0 : index
    %c0_0 = arith.constant 0 : index
    %0 = vector.load %arg2[%c0, %c0_0] : memref<168x2048xbf16, #tpu.memory_space<vmem>>, vector<168x2048xbf16>
    %c0_1 = arith.constant 0 : index
    %c0_2 = arith.constant 0 : index
    %1 = vector.load %arg3[%c0_1, %c0_2] : memref<2048x128xbf16, #tpu.memory_space<vmem>>, vector<2048x128xbf16>
    %cst = arith.constant dense<0.000000e+00> : vector<168x128xf32>
    %2 = tpu.matmul %0, %1, %cst {dimension_numbers = #tpu.dot_dimension_numbers<[1], [0], [0], [1], [0, 0, 1, 1], [], []>} : vector<168x2048xbf16>, vector<2048x128xbf16>, vector<168x128xf32> -> vector<168x128xf32>
    %c0_3 = arith.constant 0 : index
    %c0_4 = arith.constant 0 : index
    %3 = vector.load %arg4[%c0_3, %c0_4] : memref<1x128xf32, #tpu.memory_space<vmem>>, vector<1x128xf32>
    %4 = vector.broadcast %3 : vector<1x128xf32> to vector<168x128xf32>
    %5 = arith.addf %2, %4 : vector<168x128xf32>
    %cst_5 = arith.constant 0.000000e+00 : f32
    %6 = vector.broadcast %cst_5 : f32 to vector<168x128xf32>
    %7 = arith.maximumf %5, %6 : vector<168x128xf32>
    %8 = arith.truncf %7 : vector<168x128xf32> to vector<168x128xbf16>
    %c0_6 = arith.constant 0 : index
    %c0_7 = arith.constant 0 : index
    %9 = vector.load %arg5[%c0_6, %c0_7] : memref<168x128xbf16, #tpu.memory_space<vmem>>, vector<168x128xbf16>
    tpu.vector_store %arg5[%c0_6, %c0_7], %8 {strides = array<i32>} : memref<168x128xbf16, #tpu.memory_space<vmem>>, vector<168x128xbf16>,
    return
  }
  func.func @transform_0(%arg0: i32, %arg1: i32) -> (i32, i32) {
    %c0_i32 = arith.constant 0 : i32
    %c0_i32_0 = arith.constant 0 : i32
    return %arg0, %c0_i32 : i32, i32
  }
  func.func @transform_1(%arg0: i32, %arg1: i32) -> (i32, i32) {
    %c0_i32 = arith.constant 0 : i32
    %c0_i32_0 = arith.constant 0 : i32
    return %c0_i32, %arg1 : i32, i32
  }
  func.func @transform_2(%arg0: i32, %arg1: i32) -> (i32, i32) {
    %c0_i32 = arith.constant 0 : i32
    %c0_i32_0 = arith.constant 0 : i32
    return %c0_i32, %arg1 : i32, i32
  }
  func.func @transform_3(%arg0: i32, %arg1: i32) -> (i32, i32) {
    %c0_i32 = arith.constant 0 : i32
    return %arg0, %arg1 : i32, i32
  }
}

module attributes {stable_mosaic.version = 11 : i64} {
  func.func @_matmul_bias_1k_kernel(%arg0: i32, %arg1: i32, %arg2: memref<104x1152xbf16, #tpu.memory_space<vmem>>, %arg3: memref<1152x128xbf16, #tpu.memory_space<vmem>>, %arg4: memref<1x128xf32, #tpu.memory_space<vmem>>, %arg5: memref<104x128xbf16, #tpu.memory_space<vmem>>) attributes {dimension_semantics = [#tpu.dimension_semantics<parallel>, #tpu.dimension_semantics<parallel>], iteration_bounds = array<i64: 1, 1>, scalar_prefetch = 0 : i64, scratch_operands = 0 : i64, tpu.core_type = #tpu.core_type<tc>, window_params = [{transform_indices = @transform_0, window_bounds = array<i64: 104, 1152>}, {transform_indices = @transform_1, window_bounds = array<i64: 1152, 128>}, {transform_indices = @transform_2, window_bounds = array<i64: 1, 128>}, {transform_indices = @transform_3, window_bounds = array<i64: 104, 128>}]} {
    %c0 = arith.constant 0 : index
    %c0_0 = arith.constant 0 : index
    %0 = vector.load %arg2[%c0, %c0_0] : memref<104x1152xbf16, #tpu.memory_space<vmem>>, vector<104x1152xbf16>
    %c0_1 = arith.constant 0 : index
    %c0_2 = arith.constant 0 : index
    %1 = vector.load %arg3[%c0_1, %c0_2] : memref<1152x128xbf16, #tpu.memory_space<vmem>>, vector<1152x128xbf16>
    %cst = arith.constant dense<0.000000e+00> : vector<104x128xf32>
    %2 = tpu.matmul %0, %1, %cst {dimension_numbers = #tpu.dot_dimension_numbers<[1], [0], [0], [1], [0, 0, 1, 1], [], []>} : vector<104x1152xbf16>, vector<1152x128xbf16>, vector<104x128xf32> -> vector<104x128xf32>
    %c0_3 = arith.constant 0 : index
    %c0_4 = arith.constant 0 : index
    %3 = vector.load %arg4[%c0_3, %c0_4] : memref<1x128xf32, #tpu.memory_space<vmem>>, vector<1x128xf32>
    %4 = vector.broadcast %3 : vector<1x128xf32> to vector<104x128xf32>
    %5 = arith.addf %2, %4 : vector<104x128xf32>
    %cst_5 = arith.constant 0.000000e+00 : f32
    %6 = vector.broadcast %cst_5 : f32 to vector<104x128xf32>
    %7 = arith.maximumf %5, %6 : vector<104x128xf32>
    %8 = arith.truncf %7 : vector<104x128xf32> to vector<104x128xbf16>
    %c0_6 = arith.constant 0 : index
    %c0_7 = arith.constant 0 : index
    %9 = vector.load %arg5[%c0_6, %c0_7] : memref<104x128xbf16, #tpu.memory_space<vmem>>, vector<104x128xbf16>
    tpu.vector_store %arg5[%c0_6, %c0_7], %8 {strides = array<i32>} : memref<104x128xbf16, #tpu.memory_space<vmem>>, vector<104x128xbf16>,
    return
  }
  func.func @transform_0(%arg0: i32, %arg1: i32) -> (i32, i32) {
    %c0_i32 = arith.constant 0 : i32
    %c0_i32_0 = arith.constant 0 : i32
    return %arg0, %c0_i32 : i32, i32
  }
  func.func @transform_1(%arg0: i32, %arg1: i32) -> (i32, i32) {
    %c0_i32 = arith.constant 0 : i32
    %c0_i32_0 = arith.constant 0 : i32
    return %c0_i32, %arg1 : i32, i32
  }
  func.func @transform_2(%arg0: i32, %arg1: i32) -> (i32, i32) {
    %c0_i32 = arith.constant 0 : i32
    %c0_i32_0 = arith.constant 0 : i32
    return %c0_i32, %arg1 : i32, i32
  }
  func.func @transform_3(%arg0: i32, %arg1: i32) -> (i32, i32) {
    %c0_i32 = arith.constant 0 : i32
    return %arg0, %arg1 : i32, i32
  }
}

module attributes {stable_mosaic.version = 11 : i64} {
  func.func @_fused_fc_head_kernel(%arg0: i32, %arg1: memref<8x896xbf16, #tpu.memory_space<vmem>>, %arg2: memref<896x1024xbf16, #tpu.memory_space<vmem>>, %arg3: memref<1x1024xf32, #tpu.memory_space<vmem>>, %arg4: memref<1024x128xbf16, #tpu.memory_space<vmem>>, %arg5: memref<1x128xf32, #tpu.memory_space<vmem>>, %arg6: memref<8x128xf32, #tpu.memory_space<vmem>>, %arg7: memref<8x1024xf32, #tpu.memory_space<vmem>>) attributes {dimension_semantics = [#tpu.dimension_semantics<arbitrary>], iteration_bounds = array<i64: 7>, scalar_prefetch = 0 : i64, scratch_operands = 1 : i64, tpu.core_type = #tpu.core_type<tc>, window_params = [{transform_indices = @transform_0, window_bounds = array<i64: 8, 896>}, {transform_indices = @transform_1, window_bounds = array<i64: 896, 1024>}, {pipeline_mode = #tpu.pipeline_mode<synchronous>, transform_indices = @transform_2, window_bounds = array<i64: 1, 1024>}, {pipeline_mode = #tpu.pipeline_mode<synchronous>, transform_indices = @transform_3, window_bounds = array<i64: 1024, 128>}, {pipeline_mode = #tpu.pipeline_mode<synchronous>, transform_indices = @transform_4, window_bounds = array<i64: 1, 128>}, {pipeline_mode = #tpu.pipeline_mode<synchronous>, transform_indices = @transform_5, window_bounds = array<i64: 8, 128>}]} {
    %c0_i32 = arith.constant 0 : i32
    %0 = arith.cmpi eq, %arg0, %c0_i32 : i32
    %1 = arith.extui %0 : i1 to i32
    %c0_i32_0 = arith.constant 0 : i32
    %2 = arith.cmpi ne, %1, %c0_i32_0 : i32
    scf.if %2 {
      %cst_9 = arith.constant 0.000000e+00 : f32
      %12 = vector.broadcast %cst_9 : f32 to vector<8x1024xf32>
      %c0_10 = arith.constant 0 : index
      %c0_11 = arith.constant 0 : index
      %13 = vector.load %arg7[%c0_10, %c0_11] : memref<8x1024xf32, #tpu.memory_space<vmem>>, vector<8x1024xf32>
      tpu.vector_store %arg7[%c0_10, %c0_11], %12 {strides = array<i32>} : memref<8x1024xf32, #tpu.memory_space<vmem>>, vector<8x1024xf32>,
    } else {
    }
    %c0 = arith.constant 0 : index
    %c0_1 = arith.constant 0 : index
    %3 = vector.load %arg7[%c0, %c0_1] : memref<8x1024xf32, #tpu.memory_space<vmem>>, vector<8x1024xf32>
    %c0_2 = arith.constant 0 : index
    %c0_3 = arith.constant 0 : index
    %4 = vector.load %arg1[%c0_2, %c0_3] : memref<8x896xbf16, #tpu.memory_space<vmem>>, vector<8x896xbf16>
    %c0_4 = arith.constant 0 : index
    %c0_5 = arith.constant 0 : index
    %5 = vector.load %arg2[%c0_4, %c0_5] : memref<896x1024xbf16, #tpu.memory_space<vmem>>, vector<896x1024xbf16>
    %cst = arith.constant dense<0.000000e+00> : vector<8x1024xf32>
    %6 = tpu.matmul %4, %5, %cst {dimension_numbers = #tpu.dot_dimension_numbers<[1], [0], [0], [1], [0, 0, 1, 1], [], []>} : vector<8x896xbf16>, vector<896x1024xbf16>, vector<8x1024xf32> -> vector<8x1024xf32>
    %7 = arith.addf %3, %6 : vector<8x1024xf32>
    %c0_6 = arith.constant 0 : index
    %c0_7 = arith.constant 0 : index
    %8 = vector.load %arg7[%c0_6, %c0_7] : memref<8x1024xf32, #tpu.memory_space<vmem>>, vector<8x1024xf32>
    tpu.vector_store %arg7[%c0_6, %c0_7], %7 {strides = array<i32>} : memref<8x1024xf32, #tpu.memory_space<vmem>>, vector<8x1024xf32>,
    %c6_i32 = arith.constant 6 : i32
    %9 = arith.cmpi eq, %arg0, %c6_i32 : i32
    %10 = arith.extui %9 : i1 to i32
    %c0_i32_8 = arith.constant 0 : i32
    %11 = arith.cmpi ne, %10, %c0_i32_8 : i32
    scf.if %11 {
      %c0_9 = arith.constant 0 : index
      %c0_10 = arith.constant 0 : index
      %12 = vector.load %arg7[%c0_9, %c0_10] : memref<8x1024xf32, #tpu.memory_space<vmem>>, vector<8x1024xf32>
      %c0_11 = arith.constant 0 : index
      %c0_12 = arith.constant 0 : index
      %13 = vector.load %arg3[%c0_11, %c0_12] : memref<1x1024xf32, #tpu.memory_space<vmem>>, vector<1x1024xf32>
      %14 = vector.broadcast %13 : vector<1x1024xf32> to vector<8x1024xf32>
      %15 = arith.addf %12, %14 : vector<8x1024xf32>
      %cst_13 = arith.constant 0.000000e+00 : f32
      %16 = vector.broadcast %cst_13 : f32 to vector<8x1024xf32>
      %17 = arith.maximumf %15, %16 : vector<8x1024xf32>
      %18 = arith.truncf %17 : vector<8x1024xf32> to vector<8x1024xbf16>
      %c0_14 = arith.constant 0 : index
      %c0_15 = arith.constant 0 : index
      %19 = vector.load %arg4[%c0_14, %c0_15] : memref<1024x128xbf16, #tpu.memory_space<vmem>>, vector<1024x128xbf16>
      %cst_16 = arith.constant dense<0.000000e+00> : vector<8x128xf32>
      %20 = tpu.matmul %18, %19, %cst_16 {dimension_numbers = #tpu.dot_dimension_numbers<[1], [0], [0], [1], [0, 0, 1, 1], [], []>} : vector<8x1024xbf16>, vector<1024x128xbf16>, vector<8x128xf32> -> vector<8x128xf32>
      %c0_17 = arith.constant 0 : index
      %c0_18 = arith.constant 0 : index
      %21 = vector.load %arg5[%c0_17, %c0_18] : memref<1x128xf32, #tpu.memory_space<vmem>>, vector<1x128xf32>
      %22 = vector.broadcast %21 : vector<1x128xf32> to vector<8x128xf32>
      %23 = arith.addf %20, %22 : vector<8x128xf32>
      %24 = tpu.iota {dimensions = array<i32: 0>} : vector<8x128xi32>
      %25 = tpu.iota {dimensions = array<i32: 1>} : vector<8x128xi32>
      %c2_i32 = arith.constant 2 : i32
      %26 = vector.broadcast %c2_i32 : i32 to vector<8x128xi32>
      %27 = arith.cmpi slt, %24, %26 : vector<8x128xi32>
      %c6_i32_19 = arith.constant 6 : i32
      %28 = vector.broadcast %c6_i32_19 : i32 to vector<8x128xi32>
      %29 = arith.cmpi slt, %25, %28 : vector<8x128xi32>
      %30 = arith.andi %27, %29 : vector<8x128xi1>
      %cst_20 = arith.constant 0.000000e+00 : f32
      %31 = vector.broadcast %cst_20 : f32 to vector<8x128xf32>
      %32 = arith.select %30, %23, %31 : vector<8x128xi1>, vector<8x128xf32>
      %33 = vector.shape_cast %32 : vector<8x128xf32> to vector<1x8x128xf32>
      %cst_21 = arith.constant dense<0.000000e+00> : vector<1xf32>
      %34 = vector.multi_reduction <add>, %33, %cst_21 [1, 2] : vector<1x8x128xf32> to vector<1xf32>
      %35 = vector.shape_cast %34 : vector<1xf32> to vector<1x1x1xf32>
      %36 = vector.extract %35[0, 0, 0] : f32 from vector<1x1x1xf32>
      %cst_22 = arith.constant 1.200000e+01 : f32
      %37 = arith.divf %36, %cst_22 : f32
      %38 = vector.extract_strided_slice %23 {offsets = [0, 6], sizes = [8, 1], strides = [1, 1]} : vector<8x128xf32> to vector<8x1xf32>
      %39 = vector.broadcast %38 : vector<8x1xf32> to vector<8x128xf32>
      %40 = arith.addf %39, %23 : vector<8x128xf32>
      %41 = vector.broadcast %37 : f32 to vector<8x128xf32>
      %42 = arith.subf %40, %41 : vector<8x128xf32>
      %c0_23 = arith.constant 0 : index
      %c0_24 = arith.constant 0 : index
      %43 = vector.load %arg6[%c0_23, %c0_24] : memref<8x128xf32, #tpu.memory_space<vmem>>, vector<8x128xf32>
      tpu.vector_store %arg6[%c0_23, %c0_24], %42 {strides = array<i32>} : memref<8x128xf32, #tpu.memory_space<vmem>>, vector<8x128xf32>,
    } else {
    }
    return
  }
  func.func @transform_0(%arg0: i32) -> (i32, i32) {
    %c0_i32 = arith.constant 0 : i32
    %c0_i32_0 = arith.constant 0 : i32
    return %c0_i32, %arg0 : i32, i32
  }
  func.func @transform_1(%arg0: i32) -> (i32, i32) {
    %c0_i32 = arith.constant 0 : i32
    %c0_i32_0 = arith.constant 0 : i32
    return %arg0, %c0_i32 : i32, i32
  }
  func.func @transform_2(%arg0: i32) -> (i32, i32) {
    %c0_i32 = arith.constant 0 : i32
    %c0_i32_0 = arith.constant 0 : i32
    %c0_i32_1 = arith.constant 0 : i32
    return %c0_i32, %c0_i32_0 : i32, i32
  }
  func.func @transform_3(%arg0: i32) -> (i32, i32) {
    %c0_i32 = arith.constant 0 : i32
    %c0_i32_0 = arith.constant 0 : i32
    %c0_i32_1 = arith.constant 0 : i32
    return %c0_i32, %c0_i32_0 : i32, i32
  }
  func.func @transform_4(%arg0: i32) -> (i32, i32) {
    %c0_i32 = arith.constant 0 : i32
    %c0_i32_0 = arith.constant 0 : i32
    %c0_i32_1 = arith.constant 0 : i32
    return %c0_i32, %c0_i32_0 : i32, i32
  }
  func.func @transform_5(%arg0: i32) -> (i32, i32) {
    %c0_i32 = arith.constant 0 : i32
    %c0_i32_0 = arith.constant 0 : i32
    %c0_i32_1 = arith.constant 0 : i32
    return %c0_i32, %c0_i32_0 : i32, i32
  }
}

</mosaic_0001>

<bundles_post_ra>
// kernel: dueling_net_forward.4
= control target key start
LH: loop header
LB: loop body
LE: loop exit
PB: predicated region body
PF: predicated region fallthrough
CT: control target
= control target key end

     0   :  { %s1494_s12 = smov 0   ;;  %s1496_s13 = smov 0   ;;  %s1668_s0 = inlined_call_operand.vmem [shape: bf16[1024,256], index: 0, kind: input, shape index: {}]   ;;  %s1669_s1 = inlined_call_operand.vmem [shape: bf16[256,128], index: 1, kind: input, shape index: {}]   ;;  %s1670_s2 = inlined_call_operand.vmem [shape: f32[1,128], index: 2, kind: input, shape index: {}]   ;;  %s1671_s3 = inlined_call_operand.vmem [shape: bf16[1024,128], index: 3, kind: output, shape index: {}]  }
   0x1   :  { %s1498_s14 = smov 0  }
   0x2 LB: > { %s25_s15 = sadd.s32 1, %s1468_s13  ;;  %p1017_p0 = scmp.ge.s32.totalorder %s1472_s14, 1  ;;  %s1472_s14 = sphi %s1498_s14, %s13_s14   ;;  %s1468_s13 = sphi %s1496_s13, %s1673_s13   ;;  %s1464_s12 = sphi %s1494_s12, %s1672_s12  }
   0x3   : > { %p27_p1 = scmp.ge.s32.totalorder %s25_s15, 4  ;;  %p170_p2 = scmp.lt.s32.totalorder %s1472_s14, 5 }
   0x5   : > { %s1675_s15 = smov (%p27_p1, %s25_s15), 0  ;;  %p171_p3 = pnand %p1017_p0, %p170_p2 }
   0x6   : > { %s1018_s18 = sshll.u32 (!%p171_p3), %s1464_s12, 5 }
   0x7   : > { %174 = sbr.rel (%p171_p3) target bundleno = 309 (0x135), region = 32  ;;  %p206_p4 = scmp.lt.s32.totalorder (!%p171_p3), %s1018_s18, 127 }
   0xc   : > { %v1386_v0 = vld [vmem:[%s1669_s1 + $0x78] sm:$0xff]   ;;  %v1388_v2 = vld [vmem:[%s1669_s1 + $0x70] sm:$0xff]   ;;  %v1390_v4 = vld [vmem:[%s1669_s1 + $0x68] sm:$0xff]   ;;  %s1677_s18 = smov (!%p206_p4, %s1018_s18), 127 }
   0xd   : > { %v1387_v1 = vld [vmem:[%s1669_s1 + $0x38] sm:$0xff]   ;;  %1234 = vmatprep.subr.bf16.mxu0 %v1386_v0  ;;  %1346 = vmatprep.subr.bf16.mxu1 %v1386_v0  ;;  %v1389_v3 = vld [vmem:[%s1669_s1 + $0x30] sm:$0xff]   ;;  %v1391_v5 = vld [vmem:[%s1669_s1 + $0x28] sm:$0xff]   ;;  %s1106_s6 = sshll.u32 %s1677_s18, 3  ;;  %s1022_s5 = sshll.u32 %s1677_s18, 2 }
   0xe   : > { %1235 = vmatpush3.bf16.msra.mxu0 %v1387_v1  ;;  %1354 = vmatpush3.bf16.msra.mxu1 %v1387_v1  ;;  %v1392_v6 = vld [vmem:[%s1669_s1 + $0x60] sm:$0xff]   ;;  %v1394_v8 = vld [vmem:[%s1669_s1 + $0x58] sm:$0xff]   ;;  %s1545_s11 = scalar_lea.vmem %s1668_s0, %s1106_s6  ;;  %v1396_v10 = vld [vmem:[%s1669_s1 + $0x50] sm:$0xff]   ;;  %s1613_s8 = scalar_lea.vmem %s1671_s3, %s1022_s5 }
   0xf   : > { %1236 = vmatprep.subr.bf16.mxu0 %v1388_v2  ;;  %1347 = vmatprep.subr.bf16.mxu1 %v1388_v2  ;;  %v1393_v7 = vld [vmem:[%s1669_s1 + $0x20] sm:$0xff]   ;;  %v1395_v9 = vld [vmem:[%s1669_s1 + $0x18] sm:$0xff]   ;;  %v1397_v13 = vld [vmem:[%s1669_s1 + $0x10] sm:$0xff]  }
  0x10   : > { %v1404_v11 = vld [vmem:[%s1545_s11 + $0x4] ss:$8 sps:$4 sm:$0xff]   ;;  %v1402_v18 = vld [vmem:[%s1545_s11] ss:$8 sps:$4 sm:$0xff]   ;;  %v1408_v20 = vld [vmem:[%s1545_s11 + $0x14] ss:$8 sps:$4 sm:$0xff]  }
  0x11   : > { %v1407_v12 = vld [vmem:[%s1545_s11 + $0x84] ss:$8 sps:$4 sm:$0xff]   ;;  %588 = vmatprep.mubr.bf16.mxu0 %v1404_v11  ;;  %v1405_v19 = vld [vmem:[%s1545_s11 + $0x80] ss:$8 sps:$4 sm:$0xff]   ;;  %v1410_v21 = vld [vmem:[%s1545_s11 + $0x94] ss:$8 sps:$4 sm:$0xff]  }
  0x12   : > { %1237 = vmatpush3.bf16.msra.mxu0 %v1389_v3  ;;  %1355 = vmatpush3.bf16.msra.mxu1 %v1389_v3  ;;  %v1398_v14 = vld [vmem:[%s1669_s1 + $0x48] sm:$0xff]   ;;  %v1400_v16 = vld [vmem:[%s1669_s1 + $0x40] sm:$0xff]   ;;  %v1412_v22 = vld [vmem:[%s1545_s11 + $0x10] ss:$8 sps:$4 sm:$0xff]  }
  0x13   : > { %1238 = vmatprep.subr.bf16.mxu0 %v1390_v4  ;;  %1348 = vmatprep.subr.bf16.mxu1 %v1390_v4  ;;  %v1399_v15 = vld [vmem:[%s1669_s1 + $0x8] sm:$0xff]   ;;  %v1401_v17 = vld [vmem:[%s1669_s1] sm:$0xff]   ;;  %v1413_v23 = vld [vmem:[%s1545_s11 + $0x90] ss:$8 sps:$4 sm:$0xff]  }
  0x14   : > { %652 = vmatprep.mubr.bf16.mxu1 %v1407_v12  ;;  %v1414_v24 = vld [vmem:[%s1545_s11 + $0x24] ss:$8 sps:$4 sm:$0xff]   ;;  %v1418_v26 = vld [vmem:[%s1545_s11 + $0x20] ss:$8 sps:$4 sm:$0xff]   ;;  %v1420_v28 = vld [vmem:[%s1545_s11 + $0x34] ss:$8 sps:$4 sm:$0xff]  }
  0x15   : > { %v1416_v25 = vld [vmem:[%s1545_s11 + $0xa4] ss:$8 sps:$4 sm:$0xff]   ;;  %v1419_v27 = vld [vmem:[%s1545_s11 + $0xa0] ss:$8 sps:$4 sm:$0xff]   ;;  %v1422_v29 = vld [vmem:[%s1545_s11 + $0xb4] ss:$8 sps:$4 sm:$0xff]  }
  0x16   : > { %1239 = vmatpush3.bf16.msra.mxu0 %v1391_v5  ;;  %1356 = vmatpush3.bf16.msra.mxu1 %v1391_v5  ;;  %v1424_v30 = vld [vmem:[%s1545_s11 + $0x30] ss:$8 sps:$4 sm:$0xff]   ;;  %v1426_v32 = vld [vmem:[%s1545_s11 + $0x44] ss:$8 sps:$4 sm:$0xff]   ;;  %v1430_v34 = vld [vmem:[%s1545_s11 + $0x40] ss:$8 sps:$4 sm:$0xff]  }
  0x17   : > { %1240 = vmatprep.subr.bf16.mxu0 %v1392_v6  ;;  %1349 = vmatprep.subr.bf16.mxu1 %v1392_v6  ;;  %v1425_v31 = vld [vmem:[%s1545_s11 + $0xb0] ss:$8 sps:$4 sm:$0xff]   ;;  %v1428_v33 = vld [vmem:[%s1545_s11 + $0xc4] ss:$8 sps:$4 sm:$0xff]   ;;  %v1431_v35 = vld [vmem:[%s1545_s11 + $0xc0] ss:$8 sps:$4 sm:$0xff]  }
  0x18   : > { %v1432_v36 = vld [vmem:[%s1545_s11 + $0x54] ss:$8 sps:$4 sm:$0xff]   ;;  %v1436_v38 = vld [vmem:[%s1545_s11 + $0x50] ss:$8 sps:$4 sm:$0xff]   ;;  %v1438_v40 = vld [vmem:[%s1545_s11 + $0x64] ss:$8 sps:$4 sm:$0xff]  }
  0x19   : > { %v1434_v37 = vld [vmem:[%s1545_s11 + $0xd4] ss:$8 sps:$4 sm:$0xff]   ;;  %v1437_v39 = vld [vmem:[%s1545_s11 + $0xd0] ss:$8 sps:$4 sm:$0xff]   ;;  %v1440_v41 = vld [vmem:[%s1545_s11 + $0xe4] ss:$8 sps:$4 sm:$0xff]  }
  0x1a   : > { %1241 = vmatpush3.bf16.msra.mxu0 %v1393_v7  ;;  %1357 = vmatpush3.bf16.msra.mxu1 %v1393_v7  ;;  %v1442_v42 = vld [vmem:[%s1545_s11 + $0x60] ss:$8 sps:$4 sm:$0xff]   ;;  %v1444_v44 = vld [vmem:[%s1545_s11 + $0x74] ss:$8 sps:$4 sm:$0xff]   ;;  %v1448_v46 = vld [vmem:[%s1545_s11 + $0x70] ss:$8 sps:$4 sm:$0xff]  }
  0x1b   : > { %1242 = vmatprep.subr.bf16.mxu0 %v1394_v8  ;;  %1350 = vmatprep.subr.bf16.mxu1 %v1394_v8  ;;  %v1443_v43 = vld [vmem:[%s1545_s11 + $0xe0] ss:$8 sps:$4 sm:$0xff]   ;;  %v1446_v45 = vld [vmem:[%s1545_s11 + $0xf4] ss:$8 sps:$4 sm:$0xff]   ;;  %v1449_v47 = vld [vmem:[%s1545_s11 + $0xf0] ss:$8 sps:$4 sm:$0xff]  }
  0x1c   : > { %v1603_v52 = vld [vmem:[%s1670_s2] ss:$0 sm:$0xff] }
  0x1e   : > { %1243 = vmatpush3.bf16.msra.mxu0 %v1395_v9  ;;  %1358 = vmatpush3.bf16.msra.mxu1 %v1395_v9 }
  0x1f   : > { %1244 = vmatprep.subr.bf16.mxu0 %v1396_v10  ;;  %1351 = vmatprep.subr.bf16.mxu1 %v1396_v10 }
  0x22   : > { %1245 = vmatpush3.bf16.msra.mxu0 %v1397_v13  ;;  %1359 = vmatpush3.bf16.msra.mxu1 %v1397_v13 }
  0x23   : > { %1246 = vmatprep.subr.bf16.mxu0 %v1398_v14  ;;  %1352 = vmatprep.subr.bf16.mxu1 %v1398_v14 }
  0x26   : > { %1247 = vmatpush3.bf16.msra.mxu0 %v1399_v15  ;;  %1360 = vmatpush3.bf16.msra.mxu1 %v1399_v15 }
  0x27   : > { %1248 = vmatprep.subr.bf16.mxu0 %v1400_v16  ;;  %1353 = vmatprep.subr.bf16.mxu1 %v1400_v16 }
  0x2a   : > { %1249 = vmatpush3.bf16.msra.mxu0 %v1401_v17  ;;  %1361 = vmatpush3.bf16.msra.mxu1 %v1401_v17 }
  0x2d   : > { %589 = vmatmul.mubr.bf16.vlgmr.msra.gmra.mxu0 %v1402_v18  ;;  %653 = vmatmul.mubr.bf16.vlgmr.msra.gmra.mxu1 %v1405_v19 }
  0x2e   : > { %596 = vmatprep.mubr.bf16.mxu0 %v1408_v20  ;;  %660 = vmatprep.mubr.bf16.mxu1 %v1410_v21 }
  0x35   : > { %597 = vmatmul.mubr.bf16.gmra.mxu0 %v1412_v22  ;;  %661 = vmatmul.mubr.bf16.gmra.mxu1 %v1413_v23 }
  0x36   : > { %604 = vmatprep.mubr.bf16.mxu0 %v1414_v24  ;;  %668 = vmatprep.mubr.bf16.mxu1 %v1416_v25 }
  0x3d   : > { %605 = vmatmul.mubr.bf16.gmra.mxu0 %v1418_v26  ;;  %669 = vmatmul.mubr.bf16.gmra.mxu1 %v1419_v27 }
  0x3e   : > { %612 = vmatprep.mubr.bf16.mxu0 %v1420_v28  ;;  %676 = vmatprep.mubr.bf16.mxu1 %v1422_v29 }
  0x45   : > { %613 = vmatmul.mubr.bf16.gmra.mxu0 %v1424_v30  ;;  %677 = vmatmul.mubr.bf16.gmra.mxu1 %v1425_v31 }
  0x46   : > { %620 = vmatprep.mubr.bf16.mxu0 %v1426_v32  ;;  %684 = vmatprep.mubr.bf16.mxu1 %v1428_v33 }
  0x4d   : > { %621 = vmatmul.mubr.bf16.gmra.mxu0 %v1430_v34  ;;  %685 = vmatmul.mubr.bf16.gmra.mxu1 %v1431_v35 }
  0x4e   : > { %628 = vmatprep.mubr.bf16.mxu0 %v1432_v36  ;;  %692 = vmatprep.mubr.bf16.mxu1 %v1434_v37 }
  0x55   : > { %629 = vmatmul.mubr.bf16.gmra.mxu0 %v1436_v38  ;;  %693 = vmatmul.mubr.bf16.gmra.mxu1 %v1437_v39 }
  0x56   : > { %636 = vmatprep.mubr.bf16.mxu0 %v1438_v40  ;;  %700 = vmatprep.mubr.bf16.mxu1 %v1440_v41 }
  0x5d   : > { %637 = vmatmul.mubr.bf16.gmra.mxu0 %v1442_v42  ;;  %701 = vmatmul.mubr.bf16.gmra.mxu1 %v1443_v43 }
  0x5e   : > { %644 = vmatprep.mubr.bf16.mxu0 %v1444_v44  ;;  %708 = vmatprep.mubr.bf16.mxu1 %v1446_v45 }
  0x65   : > { %645 = vmatmul.mubr.bf16.gmra.mxu0 %v1448_v46  ;;  %709 = vmatmul.mubr.bf16.gmra.mxu1 %v1449_v47 }
  0xed   : > { %v1250_v48 = vpop.f32.mrf.mxu0  ;;  %v1298_v49 = vpop.f32.mrf.mxu1 }
  0xef   : > { %v1251_v50 = vpop.f32.mrf.mxu0  ;;  %v1299_v51 = vpop.f32.mrf.mxu1 }
  0xf0   : > { %v1252_v53 = vadd.f32 %v1251_v50, %v1250_v48  ;;  %v1300_v54 = vadd.f32 %v1299_v51, %v1298_v49 }
  0xf1   : > { %v1253_v55 = vpop.f32.mrf.mxu0  ;;  %v1301_v56 = vpop.f32.mrf.mxu1 }
  0xf2   : > { %v591_v57 = vadd.f32 %v1252_v53, %v1603_v52  ;;  %v655_v58 = vadd.f32 %v1300_v54, %v1603_v52 }
  0xf3   : > { %v1254_v59 = vpop.f32.mrf.mxu0  ;;  %v1302_v60 = vpop.f32.mrf.mxu1 }
  0xf4   : > { %v1255_v61 = vadd.f32 %v1254_v59, %v1253_v55  ;;  %v1303_v62 = vadd.f32 %v1302_v60, %v1301_v56  ;;  %v717_v3 = vmax.f32 %v591_v57, 0.0  ;;  %v733_v4 = vmax.f32 %v655_v58, 0.0 }
  0xf5   : > { %v1256_v63 = vpop.f32.mrf.mxu0  ;;  %v1304_v0 = vpop.f32.mrf.mxu1 }
  0xf6   : > { %v594_v1 = vadd.f32 %v1255_v61, %v1603_v52  ;;  %v658_v2 = vadd.f32 %v1303_v62, %v1603_v52 }
  0xf7   : > { %v1257_v5 = vpop.f32.mrf.mxu0  ;;  %v1305_v6 = vpop.f32.mrf.mxu1 }
  0xf8   : > { %v718_v7 = vmax.f32 %v594_v1, 0.0  ;;  %v734_v8 = vmax.f32 %v658_v2, 0.0  ;;  %v1258_v9 = vadd.f32 %v1257_v5, %v1256_v63  ;;  %v1306_v10 = vadd.f32 %v1305_v6, %v1304_v0 }
  0xf9   : > { %v1259_v11 = vpop.f32.mrf.mxu0  ;;  %v1307_v12 = vpop.f32.mrf.mxu1 }
  0xfa   : > { %v1142_v13 = vpack.c.bf16 %v718_v7, %v717_v3  ;;  %v1182_v14 = vpack.c.bf16 %v734_v8, %v733_v4  ;;  %v599_v15 = vadd.f32 %v1258_v9, %v1603_v52  ;;  %v663_v16 = vadd.f32 %v1306_v10, %v1603_v52 }
  0xfb   : > { %v1260_v17 = vpop.f32.mrf.mxu0  ;;  %v1308_v18 = vpop.f32.mrf.mxu1 }
  0xfc   : > { %1143 = vst [vmem:[%s1613_s8] sm:$0xff] %v1142_v13   ;;  %1226 = vst [vmem:[%s1613_s8 + $0x40] sm:$0xff] %v1182_v14   ;;  %v1261_v19 = vadd.f32 %v1260_v17, %v1259_v11  ;;  %v1309_v20 = vadd.f32 %v1308_v18, %v1307_v12  ;;  %v719_v25 = vmax.f32 %v599_v15, 0.0  ;;  %v735_v26 = vmax.f32 %v663_v16, 0.0 }
  0xfd   : > { %v1262_v21 = vpop.f32.mrf.mxu0  ;;  %v1310_v22 = vpop.f32.mrf.mxu1 }
  0xfe   : > { %v602_v23 = vadd.f32 %v1261_v19, %v1603_v52  ;;  %v666_v24 = vadd.f32 %v1309_v20, %v1603_v52 }
  0xff   : > { %v1263_v27 = vpop.f32.mrf.mxu0  ;;  %v1311_v28 = vpop.f32.mrf.mxu1 }
 0x100   : > { %v720_v29 = vmax.f32 %v602_v23, 0.0  ;;  %v736_v30 = vmax.f32 %v666_v24, 0.0  ;;  %v1264_v31 = vadd.f32 %v1263_v27, %v1262_v21  ;;  %v1312_v32 = vadd.f32 %v1311_v28, %v1310_v22 }
 0x101   : > { %v1265_v33 = vpop.f32.mrf.mxu0  ;;  %v1313_v34 = vpop.f32.mrf.mxu1 }
 0x102   : > { %v1147_v35 = vpack.c.bf16 %v720_v29, %v719_v25  ;;  %v1187_v36 = vpack.c.bf16 %v736_v30, %v735_v26  ;;  %v607_v37 = vadd.f32 %v1264_v31, %v1603_v52  ;;  %v671_v38 = vadd.f32 %v1312_v32, %v1603_v52 }
 0x103   : > { %v1266_v39 = vpop.f32.mrf.mxu0  ;;  %v1314_v40 = vpop.f32.mrf.mxu1 }
 0x104   : > { %1219 = vst [vmem:[%s1613_s8 + $0x8] sm:$0xff] %v1147_v35   ;;  %1227 = vst [vmem:[%s1613_s8 + $0x48] sm:$0xff] %v1187_v36   ;;  %v1267_v41 = vadd.f32 %v1266_v39, %v1265_v33  ;;  %v1315_v42 = vadd.f32 %v1314_v40, %v1313_v34  ;;  %v721_v47 = vmax.f32 %v607_v37, 0.0  ;;  %v737_v48 = vmax.f32 %v671_v38, 0.0 }
 0x105   : > { %v1268_v43 = vpop.f32.mrf.mxu0  ;;  %v1316_v44 = vpop.f32.mrf.mxu1 }
 0x106   : > { %v610_v45 = vadd.f32 %v1267_v41, %v1603_v52  ;;  %v674_v46 = vadd.f32 %v1315_v42, %v1603_v52 }
 0x107   : > { %v1269_v49 = vpop.f32.mrf.mxu0  ;;  %v1317_v50 = vpop.f32.mrf.mxu1 }
 0x108   : > { %v722_v51 = vmax.f32 %v610_v45, 0.0  ;;  %v738_v53 = vmax.f32 %v674_v46, 0.0  ;;  %v1270_v54 = vadd.f32 %v1269_v49, %v1268_v43  ;;  %v1318_v55 = vadd.f32 %v1317_v50, %v1316_v44 }
 0x109   : > { %v1271_v56 = vpop.f32.mrf.mxu0  ;;  %v1319_v57 = vpop.f32.mrf.mxu1 }
 0x10a   : > { %v1152_v58 = vpack.c.bf16 %v722_v51, %v721_v47  ;;  %v1192_v59 = vpack.c.bf16 %v738_v53, %v737_v48  ;;  %v615_v60 = vadd.f32 %v1270_v54, %v1603_v52  ;;  %v679_v61 = vadd.f32 %v1318_v55, %v1603_v52 }
 0x10b   : > { %v1272_v62 = vpop.f32.mrf.mxu0  ;;  %v1320_v63 = vpop.f32.mrf.mxu1 }
 0x10c   : > { %1220 = vst [vmem:[%s1613_s8 + $0x10] sm:$0xff] %v1152_v58   ;;  %1228 = vst [vmem:[%s1613_s8 + $0x50] sm:$0xff] %v1192_v59   ;;  %v1273_v0 = vadd.f32 %v1272_v62, %v1271_v56  ;;  %v1321_v1 = vadd.f32 %v1320_v63, %v1319_v57  ;;  %v723_v6 = vmax.f32 %v615_v60, 0.0  ;;  %v739_v7 = vmax.f32 %v679_v61, 0.0 }
 0x10d   : > { %v1274_v2 = vpop.f32.mrf.mxu0  ;;  %v1322_v3 = vpop.f32.mrf.mxu1 }
 0x10e   : > { %v618_v4 = vadd.f32 %v1273_v0, %v1603_v52  ;;  %v682_v5 = vadd.f32 %v1321_v1, %v1603_v52 }
 0x10f   : > { %v1275_v8 = vpop.f32.mrf.mxu0  ;;  %v1323_v9 = vpop.f32.mrf.mxu1 }
 0x110   : > { %v724_v10 = vmax.f32 %v618_v4, 0.0  ;;  %v740_v11 = vmax.f32 %v682_v5, 0.0  ;;  %v1276_v12 = vadd.f32 %v1275_v8, %v1274_v2  ;;  %v1324_v13 = vadd.f32 %v1323_v9, %v1322_v3 }
 0x111   : > { %v1277_v14 = vpop.f32.mrf.mxu0  ;;  %v1325_v15 = vpop.f32.mrf.mxu1 }
 0x112   : > { %v1157_v16 = vpack.c.bf16 %v724_v10, %v723_v6  ;;  %v1197_v17 = vpack.c.bf16 %v740_v11, %v739_v7  ;;  %v623_v18 = vadd.f32 %v1276_v12, %v1603_v52  ;;  %v687_v19 = vadd.f32 %v1324_v13, %v1603_v52 }
 0x113   : > { %v1278_v20 = vpop.f32.mrf.mxu0  ;;  %v1326_v21 = vpop.f32.mrf.mxu1 }
 0x114   : > { %1221 = vst [vmem:[%s1613_s8 + $0x18] sm:$0xff] %v1157_v16   ;;  %1229 = vst [vmem:[%s1613_s8 + $0x58] sm:$0xff] %v1197_v17   ;;  %v1279_v22 = vadd.f32 %v1278_v20, %v1277_v14  ;;  %v1327_v23 = vadd.f32 %v1326_v21, %v1325_v15  ;;  %v725_v28 = vmax.f32 %v623_v18, 0.0  ;;  %v741_v29 = vmax.f32 %v687_v19, 0.0 }
 0x115   : > { %v1280_v24 = vpop.f32.mrf.mxu0  ;;  %v1328_v25 = vpop.f32.mrf.mxu1 }
 0x116   : > { %v626_v26 = vadd.f32 %v1279_v22, %v1603_v52  ;;  %v690_v27 = vadd.f32 %v1327_v23, %v1603_v52 }
 0x117   : > { %v1281_v30 = vpop.f32.mrf.mxu0  ;;  %v1329_v31 = vpop.f32.mrf.mxu1 }
 0x118   : > { %v726_v32 = vmax.f32 %v626_v26, 0.0  ;;  %v742_v33 = vmax.f32 %v690_v27, 0.0  ;;  %v1282_v34 = vadd.f32 %v1281_v30, %v1280_v24  ;;  %v1330_v35 = vadd.f32 %v1329_v31, %v1328_v25 }
 0x119   : > { %v1283_v36 = vpop.f32.mrf.mxu0  ;;  %v1331_v37 = vpop.f32.mrf.mxu1 }
 0x11a   : > { %v1162_v38 = vpack.c.bf16 %v726_v32, %v725_v28  ;;  %v1202_v39 = vpack.c.bf16 %v742_v33, %v741_v29  ;;  %v631_v40 = vadd.f32 %v1282_v34, %v1603_v52  ;;  %v695_v41 = vadd.f32 %v1330_v35, %v1603_v52 }
 0x11b   : > { %v1284_v42 = vpop.f32.mrf.mxu0  ;;  %v1332_v43 = vpop.f32.mrf.mxu1 }
 0x11c   : > { %1222 = vst [vmem:[%s1613_s8 + $0x20] sm:$0xff] %v1162_v38   ;;  %1230 = vst [vmem:[%s1613_s8 + $0x60] sm:$0xff] %v1202_v39   ;;  %v1285_v44 = vadd.f32 %v1284_v42, %v1283_v36  ;;  %v1333_v45 = vadd.f32 %v1332_v43, %v1331_v37  ;;  %v727_v50 = vmax.f32 %v631_v40, 0.0  ;;  %v743_v51 = vmax.f32 %v695_v41, 0.0 }
 0x11d   : > { %v1286_v46 = vpop.f32.mrf.mxu0  ;;  %v1334_v47 = vpop.f32.mrf.mxu1 }
 0x11e   : > { %v634_v48 = vadd.f32 %v1285_v44, %v1603_v52  ;;  %v698_v49 = vadd.f32 %v1333_v45, %v1603_v52 }
 0x11f   : > { %v1287_v53 = vpop.f32.mrf.mxu0  ;;  %v1335_v54 = vpop.f32.mrf.mxu1 }
 0x120   : > { %v728_v55 = vmax.f32 %v634_v48, 0.0  ;;  %v744_v56 = vmax.f32 %v698_v49, 0.0  ;;  %v1288_v57 = vadd.f32 %v1287_v53, %v1286_v46  ;;  %v1336_v58 = vadd.f32 %v1335_v54, %v1334_v47 }
 0x121   : > { %v1289_v59 = vpop.f32.mrf.mxu0  ;;  %v1337_v60 = vpop.f32.mrf.mxu1 }
 0x122   : > { %v1167_v61 = vpack.c.bf16 %v728_v55, %v727_v50  ;;  %v1207_v62 = vpack.c.bf16 %v744_v56, %v743_v51  ;;  %v639_v63 = vadd.f32 %v1288_v57, %v1603_v52  ;;  %v703_v0 = vadd.f32 %v1336_v58, %v1603_v52 }
 0x123   : > { %v1290_v1 = vpop.f32.mrf.mxu0  ;;  %v1338_v2 = vpop.f32.mrf.mxu1 }
 0x124   : > { %1223 = vst [vmem:[%s1613_s8 + $0x28] sm:$0xff] %v1167_v61   ;;  %1231 = vst [vmem:[%s1613_s8 + $0x68] sm:$0xff] %v1207_v62   ;;  %v1291_v3 = vadd.f32 %v1290_v1, %v1289_v59  ;;  %v1339_v4 = vadd.f32 %v1338_v2, %v1337_v60  ;;  %v729_v9 = vmax.f32 %v639_v63, 0.0  ;;  %v745_v10 = vmax.f32 %v703_v0, 0.0 }
 0x125   : > { %v1292_v5 = vpop.f32.mrf.mxu0  ;;  %v1340_v6 = vpop.f32.mrf.mxu1 }
 0x126   : > { %v642_v7 = vadd.f32 %v1291_v3, %v1603_v52  ;;  %v706_v8 = vadd.f32 %v1339_v4, %v1603_v52 }
 0x127   : > { %v1293_v11 = vpop.f32.mrf.mxu0  ;;  %v1341_v12 = vpop.f32.mrf.mxu1 }
 0x128   : > { %v730_v13 = vmax.f32 %v642_v7, 0.0  ;;  %v746_v14 = vmax.f32 %v706_v8, 0.0  ;;  %v1294_v15 = vadd.f32 %v1293_v11, %v1292_v5  ;;  %v1342_v16 = vadd.f32 %v1341_v12, %v1340_v6 }
 0x129   : > { %v1295_v17 = vpop.f32.mrf.mxu0  ;;  %v1343_v18 = vpop.f32.mrf.mxu1 }
 0x12a   : > { %v1172_v19 = vpack.c.bf16 %v730_v13, %v729_v9  ;;  %v1212_v20 = vpack.c.bf16 %v746_v14, %v745_v10  ;;  %v647_v23 = vadd.f32 %v1294_v15, %v1603_v52  ;;  %v711_v24 = vadd.f32 %v1342_v16, %v1603_v52 }
 0x12b   : > { %v1296_v21 = vpop.f32.mrf.mxu0  ;;  %v1344_v22 = vpop.f32.mrf.mxu1 }
 0x12c   : > { %1224 = vst [vmem:[%s1613_s8 + $0x30] sm:$0xff] %v1172_v19   ;;  %1232 = vst [vmem:[%s1613_s8 + $0x70] sm:$0xff] %v1212_v20   ;;  %v1297_v25 = vadd.f32 %v1296_v21, %v1295_v17  ;;  %v1345_v26 = vadd.f32 %v1344_v22, %v1343_v18  ;;  %v731_v29 = vmax.f32 %v647_v23, 0.0  ;;  %v747_v30 = vmax.f32 %v711_v24, 0.0 }
 0x12e   : > { %v650_v27 = vadd.f32 %v1297_v25, %v1603_v52  ;;  %v714_v28 = vadd.f32 %v1345_v26, %v1603_v52 }
 0x130   : > { %v732_v31 = vmax.f32 %v650_v27, 0.0  ;;  %v748_v32 = vmax.f32 %v714_v28, 0.0 }
 0x132   : > { %v1177_v33 = vpack.c.bf16 %v732_v31, %v731_v29  ;;  %v1217_v34 = vpack.c.bf16 %v748_v32, %v747_v30 }
 0x134   : > { %1225 = vst [vmem:[%s1613_s8 + $0x38] sm:$0xff] %v1177_v33   ;;  %1233 = vst [vmem:[%s1613_s8 + $0x78] sm:$0xff] %v1217_v34  }
 0x135 PF: > { %s13_s14 = sadd.s32 1, %s1472_s14   ;;  %s1672_s12 = smov %s1468_s13 }
 0x136   : > { %p10_p5 = scmp.ge.s32.totalorder %s13_s14, 6   ;;  %s1673_s13 = smov %s1675_s15 }
 0x138   :  { %12 = sbr.rel (!%p10_p5) target bundleno = 2 (0x2), region = 68 }

// kernel: dueling_net_forward.5
= control target key start
LH: loop header
LB: loop body
LE: loop exit
PB: predicated region body
PF: predicated region fallthrough
CT: control target
= control target key end

     0   :  { %s5555_s1 = inlined_call_operand.vmem [shape: bf16[2048,128], index: 1, kind: input, shape index: {}]   ;;  %s5556_s0 = inlined_call_operand.vmem [shape: bf16[168,2048], index: 0, kind: input, shape index: {}]   ;;  %s5557_s2 = inlined_call_operand.vmem [shape: f32[1,128], index: 2, kind: input, shape index: {}]   ;;  %s5558_s3 = inlined_call_operand.vmem [shape: bf16[168,128], index: 3, kind: output, shape index: {}]  }
   0x1   :  { %v4223_v0 = vld [vmem:[%s5555_s1 + $0x78] sm:$0xff]   ;;  %v4227_v4 = vld [vmem:[%s5555_s1 + $0x70] sm:$0xff]   ;;  %v4231_v8 = vld [vmem:[%s5555_s1 + $0x68] sm:$0xff]  }
   0x2   :  { %v4224_v1 = vld [vmem:[%s5555_s1 + $0xf8] sm:$0xff]   ;;  %3567 = vmatprep.subr.bf16.mxu0 %v4223_v0  ;;  %v4228_v5 = vld [vmem:[%s5555_s1 + $0xf0] sm:$0xff]   ;;  %v4232_v9 = vld [vmem:[%s5555_s1 + $0xe8] sm:$0xff]  }
   0x3   :  { %v4225_v2 = vld [vmem:[%s5555_s1 + $0x38] sm:$0xff]   ;;  %3649 = vmatprep.subr.bf16.mxu1 %v4224_v1  ;;  %v4229_v6 = vld [vmem:[%s5555_s1 + $0x30] sm:$0xff]   ;;  %v4233_v10 = vld [vmem:[%s5555_s1 + $0x28] sm:$0xff]  }
   0x4   :  { %v4226_v3 = vld [vmem:[%s5555_s1 + $0xb8] sm:$0xff]   ;;  %3568 = vmatpush3.bf16.msra.mxu0 %v4225_v2  ;;  %v4230_v7 = vld [vmem:[%s5555_s1 + $0xb0] sm:$0xff]   ;;  %v4234_v11 = vld [vmem:[%s5555_s1 + $0xa8] sm:$0xff]  }
   0x5   :  { %3650 = vmatpush3.bf16.msra.mxu1 %v4226_v3  ;;  %3569 = vmatprep.subr.bf16.mxu0 %v4227_v4  ;;  %v4235_v12 = vld [vmem:[%s5555_s1 + $0x60] sm:$0xff]   ;;  %v4239_v16 = vld [vmem:[%s5555_s1 + $0x58] sm:$0xff]   ;;  %v4243_v20 = vld [vmem:[%s5555_s1 + $0x50] sm:$0xff]  }
   0x6   :  { %3651 = vmatprep.subr.bf16.mxu1 %v4228_v5  ;;  %v4236_v13 = vld [vmem:[%s5555_s1 + $0xe0] sm:$0xff]   ;;  %v4240_v17 = vld [vmem:[%s5555_s1 + $0xd8] sm:$0xff]   ;;  %v4244_v21 = vld [vmem:[%s5555_s1 + $0xd0] sm:$0xff]  }
   0x7   :  { %v4237_v14 = vld [vmem:[%s5555_s1 + $0x20] sm:$0xff]   ;;  %v4241_v18 = vld [vmem:[%s5555_s1 + $0x18] sm:$0xff]   ;;  %v4245_v22 = vld [vmem:[%s5555_s1 + $0x10] sm:$0xff]  }
   0x8   :  { %3570 = vmatpush3.bf16.msra.mxu0 %v4229_v6  ;;  %v4238_v15 = vld [vmem:[%s5555_s1 + $0xa0] sm:$0xff]   ;;  %v4242_v19 = vld [vmem:[%s5555_s1 + $0x98] sm:$0xff]   ;;  %v4246_v23 = vld [vmem:[%s5555_s1 + $0x90] sm:$0xff]  }
   0x9   :  { %3652 = vmatpush3.bf16.msra.mxu1 %v4230_v7  ;;  %3571 = vmatprep.subr.bf16.mxu0 %v4231_v8  ;;  %v4247_v24 = vld [vmem:[%s5555_s1 + $0x48] sm:$0xff]   ;;  %v4251_v28 = vld [vmem:[%s5555_s1 + $0x40] sm:$0xff]   ;;  %v4255_v40 = vld [vmem:[%s5555_s1 + $0x178] sm:$0xff]  }
   0xa   :  { %3653 = vmatprep.subr.bf16.mxu1 %v4232_v9  ;;  %v4248_v25 = vld [vmem:[%s5555_s1 + $0xc8] sm:$0xff]   ;;  %v4252_v29 = vld [vmem:[%s5555_s1 + $0xc0] sm:$0xff]   ;;  %v4256_v41 = vld [vmem:[%s5555_s1 + $0x138] sm:$0xff]  }
   0xb   :  { %v4249_v26 = vld [vmem:[%s5555_s1 + $0x8] sm:$0xff]   ;;  %v4253_v30 = vld [vmem:[%s5555_s1] sm:$0xff]   ;;  %v4257_v42 = vld [vmem:[%s5555_s1 + $0x1f8] sm:$0xff]  }
   0xc   :  { %3572 = vmatpush3.bf16.msra.mxu0 %v4233_v10  ;;  %v4250_v27 = vld [vmem:[%s5555_s1 + $0x88] sm:$0xff]   ;;  %v4254_v31 = vld [vmem:[%s5555_s1 + $0x80] sm:$0xff]   ;;  %v4258_v43 = vld [vmem:[%s5555_s1 + $0x1b8] sm:$0xff]  }
   0xd   :  { %3654 = vmatpush3.bf16.msra.mxu1 %v4234_v11  ;;  %3573 = vmatprep.subr.bf16.mxu0 %v4235_v12  ;;  %v15_v32 = vld [vmem:[%s5556_s0] sm:$0xff]  ;;  %v16_v34 = vld [vmem:[%s5556_s0 + $0x8] sm:$0xff]  ;;  %v4259_v50 = vld [vmem:[%s5555_s1 + $0x170] sm:$0xff]  }
   0xe   :  { %3655 = vmatprep.subr.bf16.mxu1 %v4236_v13  ;;  %v23_v33 = vld [vmem:[%s5556_s0 + $0x40] sm:$0xff]  ;;  %v24_v37 = vld [vmem:[%s5556_s0 + $0x48] sm:$0xff]  ;;  %v4260_v52 = vld [vmem:[%s5555_s1 + $0x130] sm:$0xff]  }
   0xf   :  { %v3162_v35 = vcombine.low %v15_v32, %v23_v33  ;;  %v3163_v36 = vcombine.high %v15_v32, %v23_v33  ;;  %v3164_v38 = vcombine.low %v16_v34, %v24_v37  ;;  %v3165_v39 = vcombine.high %v16_v34, %v24_v37  ;;  %v31_v44 = vld [vmem:[%s5556_s0 + $0x80] sm:$0xff]  ;;  %v32_v47 = vld [vmem:[%s5556_s0 + $0x88] sm:$0xff]  ;;  %v4261_v54 = vld [vmem:[%s5555_s1 + $0x1f0] sm:$0xff]  }
  0x10   :  { %3574 = vmatpush3.bf16.msra.mxu0 %v4237_v14  ;;  %v39_v45 = vld [vmem:[%s5556_s0 + $0xc0] sm:$0xff]  ;;  %v40_v48 = vld [vmem:[%s5556_s0 + $0xc8] sm:$0xff]  ;;  %v4262_v55 = vld [vmem:[%s5555_s1 + $0x1b0] sm:$0xff]  }
  0x11   :  { %3656 = vmatpush3.bf16.msra.mxu1 %v4238_v15  ;;  %3575 = vmatprep.subr.bf16.mxu0 %v4239_v16  ;;  %v3179_v46 = vcombine.high %v31_v44, %v39_v45  ;;  %v3181_v49 = vcombine.high %v32_v47, %v40_v48  ;;  %v3178_v51 = vcombine.low %v31_v44, %v39_v45  ;;  %v47_v56 = vld [vmem:[%s5556_s0 + $0x100] sm:$0xff]  ;;  %v48_v58 = vld [vmem:[%s5556_s0 + $0x108] sm:$0xff]  ;;  %v4276_v32 = vld [vmem:[%s5555_s1 + $0x110] sm:$0xff]  }
  0x12   :  { %3657 = vmatprep.subr.bf16.mxu1 %v4240_v17  ;;  %2102 = vmatprep.mubr.bf16.mxu0 %v3163_v36  ;;  %v3180_v53 = vcombine.low %v32_v47, %v40_v48  ;;  %v55_v57 = vld [vmem:[%s5556_s0 + $0x140] sm:$0xff]  ;;  %v56_v59 = vld [vmem:[%s5556_s0 + $0x148] sm:$0xff]  ;;  %v4278_v37 = vld [vmem:[%s5555_s1 + $0x190] sm:$0xff]  }
  0x13   :  { %2222 = vmatprep.mubr.bf16.mxu1 %v3165_v39  ;;  %v3195_v60 = vcombine.high %v47_v56, %v55_v57  ;;  %v3197_v61 = vcombine.high %v48_v58, %v56_v59  ;;  %v4263_v62 = vld [vmem:[%s5555_s1 + $0x168] sm:$0xff]   ;;  %v63_v63 = vld [vmem:[%s5556_s0 + $0x180] sm:$0xff]  ;;  %v3194_v4 = vcombine.low %v47_v56, %v55_v57  ;;  %v3196_v6 = vcombine.low %v48_v58, %v56_v59  ;;  %v4291_v59 = vld [vmem:[%s5555_s1 + $0x278] sm:$0xff]  }
  0x14   :  { %3576 = vmatpush3.bf16.msra.mxu0 %v4241_v18  ;;  %v71_v0 = vld [vmem:[%s5556_s0 + $0x1c0] sm:$0xff]  ;;  %v64_v1 = vld [vmem:[%s5556_s0 + $0x188] sm:$0xff] }
  0x15   :  { %3658 = vmatpush3.bf16.msra.mxu1 %v4242_v19  ;;  %3577 = vmatprep.subr.bf16.mxu0 %v4243_v20  ;;  %v72_v2 = vld [vmem:[%s5556_s0 + $0x1c8] sm:$0xff]  ;;  %v3211_v7 = vcombine.high %v63_v63, %v71_v0  ;;  %v4267_v10 = vld [vmem:[%s5555_s1 + $0x160] sm:$0xff]   ;;  %v3210_v18 = vcombine.low %v63_v63, %v71_v0  ;;  %v4271_v19 = vld [vmem:[%s5555_s1 + $0x158] sm:$0xff]  }
  0x16   :  { %3659 = vmatprep.subr.bf16.mxu1 %v4244_v21  ;;  %v4264_v3 = vld [vmem:[%s5555_s1 + $0x128] sm:$0xff]   ;;  %v3213_v9 = vcombine.high %v64_v1, %v72_v2  ;;  %v79_v11 = vld [vmem:[%s5556_s0 + $0x200] sm:$0xff]  ;;  %v3212_v20 = vcombine.low %v64_v1, %v72_v2  ;;  %v4293_v63 = vld [vmem:[%s5555_s1 + $0x2f8] sm:$0xff]  }
  0x17   :  { %v4265_v5 = vld [vmem:[%s5555_s1 + $0x1e8] sm:$0xff]   ;;  %v4268_v12 = vld [vmem:[%s5555_s1 + $0x120] sm:$0xff]  }
  0x18   :  { %3578 = vmatpush3.bf16.msra.mxu0 %v4245_v22  ;;  %v4266_v8 = vld [vmem:[%s5555_s1 + $0x1a8] sm:$0xff]   ;;  %v4269_v13 = vld [vmem:[%s5555_s1 + $0x1e0] sm:$0xff]   ;;  %v4272_v22 = vld [vmem:[%s5555_s1 + $0x118] sm:$0xff]  }
  0x19   :  { %3660 = vmatpush3.bf16.msra.mxu1 %v4246_v23  ;;  %3579 = vmatprep.subr.bf16.mxu0 %v4247_v24  ;;  %v87_v14 = vld [vmem:[%s5556_s0 + $0x240] sm:$0xff]  ;;  %v80_v16 = vld [vmem:[%s5556_s0 + $0x208] sm:$0xff]  ;;  %v4273_v24 = vld [vmem:[%s5555_s1 + $0x1d8] sm:$0xff]  }
  0x1a   :  { %3661 = vmatprep.subr.bf16.mxu1 %v4248_v25  ;;  %v4270_v15 = vld [vmem:[%s5555_s1 + $0x1a0] sm:$0xff]   ;;  %v88_v17 = vld [vmem:[%s5556_s0 + $0x248] sm:$0xff]  ;;  %v3227_v21 = vcombine.high %v79_v11, %v87_v14 }
  0x1b   :  { %v3229_v23 = vcombine.high %v80_v16, %v88_v17  ;;  %v95_v25 = vld [vmem:[%s5556_s0 + $0x280] sm:$0xff]  ;;  %v3228_v33 = vcombine.low %v80_v16, %v88_v17  ;;  %v4281_v44 = vld [vmem:[%s5555_s1 + $0x1c8] sm:$0xff]  }
  0x1c   :  { %3580 = vmatpush3.bf16.msra.mxu0 %v4249_v26  ;;  %v103_v26 = vld [vmem:[%s5556_s0 + $0x2c0] sm:$0xff]  ;;  %v4282_v45 = vld [vmem:[%s5555_s1 + $0x188] sm:$0xff]  }
  0x1d   :  { %3662 = vmatpush3.bf16.msra.mxu1 %v4250_v27  ;;  %3581 = vmatprep.subr.bf16.mxu0 %v4251_v28  ;;  %v4274_v27 = vld [vmem:[%s5555_s1 + $0x198] sm:$0xff]   ;;  %v96_v28 = vld [vmem:[%s5556_s0 + $0x288] sm:$0xff]  ;;  %v3243_v34 = vcombine.high %v95_v25, %v103_v26  ;;  %v119_v39 = vld [vmem:[%s5556_s0 + $0x340] sm:$0xff] }
  0x1e   :  { %3663 = vmatprep.subr.bf16.mxu1 %v4252_v29  ;;  %v104_v29 = vld [vmem:[%s5556_s0 + $0x2c8] sm:$0xff]  ;;  %v143_v0 = vld [vmem:[%s5556_s0 + $0x400] sm:$0xff] }
  0x1f   :  { %v3245_v36 = vcombine.high %v96_v28, %v104_v29  ;;  %v3244_v47 = vcombine.low %v96_v28, %v104_v29  ;;  %v128_v56 = vld [vmem:[%s5556_s0 + $0x388] sm:$0xff]  ;;  %v151_v1 = vld [vmem:[%s5556_s0 + $0x440] sm:$0xff] }
  0x20   :  { %3582 = vmatpush3.bf16.msra.mxu0 %v4253_v30  ;;  %v4275_v30 = vld [vmem:[%s5555_s1 + $0x150] sm:$0xff]   ;;  %v136_v57 = vld [vmem:[%s5556_s0 + $0x3c8] sm:$0xff]  ;;  %v175_v16 = vld [vmem:[%s5556_s0 + $0x500] sm:$0xff] }
  0x21   :  { %3664 = vmatpush3.bf16.msra.mxu1 %v4254_v31  ;;  %3731 = vmatprep.subr.bf16.mxu0 %v4255_v40  ;;  %v3226_v31 = vcombine.low %v79_v11, %v87_v14  ;;  %v4279_v40 = vld [vmem:[%s5555_s1 + $0x148] sm:$0xff]  }
  0x22   :  { %3813 = vmatprep.subr.bf16.mxu1 %v4257_v42  ;;  %v120_v42 = vld [vmem:[%s5556_s0 + $0x348] sm:$0xff] }
  0x23   :  { %2103 = vmatmul.mubr.bf16.vlgmr.msra.gmra.mxu0 %v3162_v35  ;;  %v4277_v35 = vld [vmem:[%s5555_s1 + $0x1d0] sm:$0xff]   ;;  %v144_v2 = vld [vmem:[%s5556_s0 + $0x408] sm:$0xff] }
  0x24   :  { %2223 = vmatmul.mubr.bf16.vlgmr.msra.gmra.mxu1 %v3164_v38  ;;  %3732 = vmatpush3.bf16.msra.mxu0 %v4256_v41  ;;  %v111_v38 = vld [vmem:[%s5556_s0 + $0x300] sm:$0xff]  ;;  %v112_v41 = vld [vmem:[%s5556_s0 + $0x308] sm:$0xff] }
  0x25   :  { %3814 = vmatpush3.bf16.msra.mxu1 %v4258_v43  ;;  %2110 = vmatprep.mubr.bf16.mxu0 %v3179_v46  ;;  %v4280_v43 = vld [vmem:[%s5555_s1 + $0x108] sm:$0xff]   ;;  %v3242_v46 = vcombine.low %v95_v25, %v103_v26  ;;  %v3259_v48 = vcombine.high %v111_v38, %v119_v39  ;;  %v3258_v58 = vcombine.low %v111_v38, %v119_v39  ;;  %v26_v25 = vld [vmem:[%s5556_s0 + $0x58] sm:$0xff]  ;;  %v4295_v39 = vld [vmem:[%s5555_s1 + $0x270] sm:$0xff]  }
  0x26   :  { %2230 = vmatprep.mubr.bf16.mxu1 %v3181_v49  ;;  %3733 = vmatprep.subr.bf16.mxu0 %v4259_v50  ;;  %v3261_v49 = vcombine.high %v112_v41, %v120_v42  ;;  %v4283_v50 = vld [vmem:[%s5555_s1 + $0x140] sm:$0xff]   ;;  %v168_v11 = vld [vmem:[%s5556_s0 + $0x4c8] sm:$0xff]  ;;  %v3322_v26 = vcombine.low %v175_v16, %v175_v16 }
  0x27   :  { %3815 = vmatprep.subr.bf16.mxu1 %v4261_v54  ;;  %v127_v54 = vld [vmem:[%s5556_s0 + $0x380] sm:$0xff]  ;;  %v176_v17 = vld [vmem:[%s5556_s0 + $0x508] sm:$0xff] }
  0x28   :  { %3734 = vmatpush3.bf16.msra.mxu0 %v4260_v52  ;;  %v4287_v52 = vld [vmem:[%s5555_s1 + $0x1c0] sm:$0xff]  }
  0x29   :  { %3816 = vmatpush3.bf16.msra.mxu1 %v4262_v55  ;;  %3735 = vmatprep.subr.bf16.mxu0 %v4263_v62  ;;  %v135_v55 = vld [vmem:[%s5556_s0 + $0x3c0] sm:$0xff]  ;;  %v3277_v62 = vcombine.high %v128_v56, %v136_v57 }
  0x2a   :  { %3817 = vmatprep.subr.bf16.mxu1 %v4265_v5  ;;  %v3276_v5 = vcombine.low %v128_v56, %v136_v57  ;;  %v4303_v56 = vld [vmem:[%s5555_s1 + $0x260] sm:$0xff]   ;;  %v65_v57 = vld [vmem:[%s5556_s0 + $0x190] sm:$0xff] }
  0x2b   :  { %2111 = vmatmul.mubr.bf16.gmra.mxu0 %v3178_v51  ;;  %v4284_v51 = vld [vmem:[%s5555_s1 + $0x100] sm:$0xff]  }
  0x2c   :  { %2231 = vmatmul.mubr.bf16.gmra.mxu1 %v3180_v53  ;;  %2118 = vmatprep.mubr.bf16.mxu0 %v3195_v60  ;;  %v4290_v53 = vld [vmem:[%s5555_s1 + $0x180] sm:$0xff]   ;;  %v3260_v60 = vcombine.low %v112_v41, %v120_v42  ;;  %v4296_v41 = vld [vmem:[%s5555_s1 + $0x230] sm:$0xff]  }
  0x2d   :  { %2238 = vmatprep.mubr.bf16.mxu1 %v3197_v61  ;;  %3736 = vmatpush3.bf16.msra.mxu0 %v4264_v3  ;;  %v3275_v61 = vcombine.high %v127_v54, %v135_v55  ;;  %v152_v3 = vld [vmem:[%s5556_s0 + $0x448] sm:$0xff]  ;;  %v4297_v42 = vld [vmem:[%s5555_s1 + $0x2f0] sm:$0xff]  }
  0x2e   :  { %3818 = vmatpush3.bf16.msra.mxu1 %v4266_v8  ;;  %3737 = vmatprep.subr.bf16.mxu0 %v4267_v10  ;;  %v159_v8 = vld [vmem:[%s5556_s0 + $0x480] sm:$0xff]  ;;  %v160_v10 = vld [vmem:[%s5556_s0 + $0x488] sm:$0xff] }
  0x2f   :  { %3819 = vmatprep.subr.bf16.mxu1 %v4269_v13  ;;  %v3292_v13 = vcombine.low %v144_v2, %v152_v3 }
  0x31   :  { %3738 = vmatpush3.bf16.msra.mxu0 %v4268_v12  ;;  %v3290_v12 = vcombine.low %v143_v0, %v151_v1 }
  0x32   :  { %3820 = vmatpush3.bf16.msra.mxu1 %v4270_v15  ;;  %3739 = vmatprep.subr.bf16.mxu0 %v4271_v19  ;;  %v3309_v15 = vcombine.high %v160_v10, %v168_v11  ;;  %v3308_v19 = vcombine.low %v160_v10, %v168_v11  ;;  %v4313_v10 = vld [vmem:[%s5555_s1 + $0x2d0] sm:$0xff]  }
  0x33   :  { %2119 = vmatmul.mubr.bf16.gmra.mxu0 %v3194_v4  ;;  %3821 = vmatprep.subr.bf16.mxu1 %v4273_v24  ;;  %v3274_v4 = vcombine.low %v127_v54, %v135_v55  ;;  %v18_v24 = vld [vmem:[%s5556_s0 + $0x18] sm:$0xff]  ;;  %v4300_v54 = vld [vmem:[%s5555_s1 + $0x228] sm:$0xff]   ;;  %v89_v11 = vld [vmem:[%s5556_s0 + $0x250] sm:$0xff] }
  0x34   :  { %2239 = vmatmul.mubr.bf16.gmra.mxu1 %v3196_v6  ;;  %2126 = vmatprep.mubr.bf16.mxu0 %v3211_v7  ;;  %v3291_v6 = vcombine.high %v143_v0, %v151_v1  ;;  %v3293_v7 = vcombine.high %v144_v2, %v152_v3  ;;  %v3169_v29 = vcombine.high %v18_v24, %v26_v25  ;;  %v4302_v55 = vld [vmem:[%s5555_s1 + $0x2a8] sm:$0xff]   ;;  %v4307_v0 = vld [vmem:[%s5555_s1 + $0x258] sm:$0xff]  }
  0x35   :  { %2246 = vmatprep.mubr.bf16.mxu1 %v3213_v9  ;;  %3740 = vmatpush3.bf16.msra.mxu0 %v4272_v22  ;;  %v167_v9 = vld [vmem:[%s5556_s0 + $0x4c0] sm:$0xff]  ;;  %v17_v22 = vld [vmem:[%s5556_s0 + $0x10] sm:$0xff]  ;;  %v4309_v2 = vld [vmem:[%s5555_s1 + $0x2d8] sm:$0xff]  }
  0x36   :  { %3822 = vmatpush3.bf16.msra.mxu1 %v4274_v27  ;;  %3741 = vmatprep.subr.bf16.mxu0 %v4275_v30  ;;  %v3307_v14 = vcombine.high %v159_v8, %v167_v9  ;;  %v3324_v27 = vcombine.low %v176_v17, %v176_v17  ;;  %v33_v30 = vld [vmem:[%s5556_s0 + $0x90] sm:$0xff] }
  0x37   :  { %3823 = vmatprep.subr.bf16.mxu1 %v4277_v35  ;;  %v3168_v35 = vcombine.low %v18_v24, %v26_v25  ;;  %v4319_v24 = vld [vmem:[%s5555_s1 + $0x240] sm:$0xff]   ;;  %v97_v25 = vld [vmem:[%s5556_s0 + $0x290] sm:$0xff] }
  0x39   :  { %3742 = vmatpush3.bf16.msra.mxu0 %v4276_v32  ;;  %v34_v32 = vld [vmem:[%s5556_s0 + $0x98] sm:$0xff] }
  0x3a   :  { %3824 = vmatpush3.bf16.msra.mxu1 %v4278_v37  ;;  %3743 = vmatprep.subr.bf16.mxu0 %v4279_v40  ;;  %v4294_v37 = vld [vmem:[%s5555_s1 + $0x2b8] sm:$0xff]  }
  0x3b   :  { %2127 = vmatmul.mubr.bf16.gmra.mxu0 %v3210_v18  ;;  %3825 = vmatprep.subr.bf16.mxu1 %v4281_v44  ;;  %v3306_v18 = vcombine.low %v159_v8, %v167_v9  ;;  %v49_v44 = vld [vmem:[%s5556_s0 + $0x110] sm:$0xff] }
  0x3c   :  { %2247 = vmatmul.mubr.bf16.gmra.mxu1 %v3212_v20  ;;  %2134 = vmatprep.mubr.bf16.mxu0 %v3227_v21  ;;  %v3323_v20 = vcombine.high %v175_v16, %v175_v16  ;;  %v3325_v21 = vcombine.high %v176_v17, %v176_v17  ;;  %v4311_v8 = vld [vmem:[%s5555_s1 + $0x250] sm:$0xff]   ;;  %v4315_v16 = vld [vmem:[%s5555_s1 + $0x248] sm:$0xff]  }
  0x3d   :  { %2254 = vmatprep.mubr.bf16.mxu1 %v3229_v23  ;;  %3744 = vmatpush3.bf16.msra.mxu0 %v4280_v43  ;;  %v25_v23 = vld [vmem:[%s5556_s0 + $0x50] sm:$0xff] }
  0x3e   :  { %3826 = vmatpush3.bf16.msra.mxu1 %v4282_v45  ;;  %3745 = vmatprep.subr.bf16.mxu0 %v4283_v50  ;;  %v3167_v28 = vcombine.high %v17_v22, %v25_v23  ;;  %v4298_v43 = vld [vmem:[%s5555_s1 + $0x2b0] sm:$0xff]  }
  0x3f   :  { %3827 = vmatprep.subr.bf16.mxu1 %v4287_v52  ;;  %v57_v45 = vld [vmem:[%s5556_s0 + $0x150] sm:$0xff] }
  0x40   :  { %v3199_v52 = vcombine.high %v49_v44, %v57_v45  ;;  %v3198_v1 = vcombine.low %v49_v44, %v57_v45  ;;  %v81_v9 = vld [vmem:[%s5556_s0 + $0x210] sm:$0xff] }
  0x41   :  { %3746 = vmatpush3.bf16.msra.mxu0 %v4284_v51 }
  0x42   :  { %3828 = vmatpush3.bf16.msra.mxu1 %v4290_v53  ;;  %3895 = vmatprep.subr.bf16.mxu0 %v4291_v59  ;;  %v73_v59 = vld [vmem:[%s5556_s0 + $0x1d0] sm:$0xff] }
  0x43   :  { %2135 = vmatmul.mubr.bf16.gmra.mxu0 %v3226_v31  ;;  %3977 = vmatprep.subr.bf16.mxu1 %v4293_v63  ;;  %v41_v31 = vld [vmem:[%s5556_s0 + $0xd0] sm:$0xff]  ;;  %v4306_v63 = vld [vmem:[%s5555_s1 + $0x2a0] sm:$0xff]   ;;  %v3214_v17 = vcombine.low %v65_v57, %v73_v59 }
  0x44   :  { %2255 = vmatmul.mubr.bf16.gmra.mxu1 %v3228_v33  ;;  %2142 = vmatprep.mubr.bf16.mxu0 %v3243_v34  ;;  %v3166_v33 = vcombine.low %v17_v22, %v25_v23  ;;  %v42_v34 = vld [vmem:[%s5556_s0 + $0xd8] sm:$0xff]  ;;  %v3183_v38 = vcombine.high %v33_v30, %v41_v31  ;;  %v3182_v50 = vcombine.low %v33_v30, %v41_v31  ;;  %v4316_v22 = vld [vmem:[%s5555_s1 + $0x208] sm:$0xff]   ;;  %v4326_v31 = vld [vmem:[%s5555_s1 + $0x280] sm:$0xff]  }
  0x45   :  { %2262 = vmatprep.mubr.bf16.mxu1 %v3245_v36  ;;  %v4292_v36 = vld [vmem:[%s5555_s1 + $0x238] sm:$0xff]   ;;  %v3185_v40 = vcombine.high %v34_v32, %v42_v34  ;;  %v3184_v51 = vcombine.low %v34_v32, %v42_v34  ;;  %v4318_v23 = vld [vmem:[%s5555_s1 + $0x288] sm:$0xff]  }
  0x46   :  { %v106_v30 = vld [vmem:[%s5556_s0 + $0x2d8] sm:$0xff] }
  0x47   :  { %v4327_v32 = vld [vmem:[%s5555_s1 + $0x378] sm:$0xff]  }
  0x48   :  { %v4329_v34 = vld [vmem:[%s5555_s1 + $0x3f8] sm:$0xff]  }
  0x4b   :  { %2143 = vmatmul.mubr.bf16.gmra.mxu0 %v3242_v46  ;;  %v50_v46 = vld [vmem:[%s5556_s0 + $0x118] sm:$0xff] }
  0x4c   :  { %2263 = vmatmul.mubr.bf16.gmra.mxu1 %v3244_v47  ;;  %2150 = vmatprep.mubr.bf16.mxu0 %v3259_v48  ;;  %v58_v47 = vld [vmem:[%s5556_s0 + $0x158] sm:$0xff]  ;;  %v4299_v48 = vld [vmem:[%s5555_s1 + $0x268] sm:$0xff]  }
  0x4d   :  { %2270 = vmatprep.mubr.bf16.mxu1 %v3261_v49  ;;  %v4301_v49 = vld [vmem:[%s5555_s1 + $0x2e8] sm:$0xff]   ;;  %v3201_v53 = vcombine.high %v50_v46, %v58_v47  ;;  %v3200_v3 = vcombine.low %v50_v46, %v58_v47  ;;  %v129_v46 = vld [vmem:[%s5556_s0 + $0x390] sm:$0xff] }
  0x4e   :  { %v137_v47 = vld [vmem:[%s5556_s0 + $0x3d0] sm:$0xff] }
  0x53   :  { %2151 = vmatmul.mubr.bf16.gmra.mxu0 %v3258_v58  ;;  %v4305_v58 = vld [vmem:[%s5555_s1 + $0x2e0] sm:$0xff]  }
  0x54   :  { %2271 = vmatmul.mubr.bf16.gmra.mxu1 %v3260_v60  ;;  %2158 = vmatprep.mubr.bf16.mxu0 %v3275_v61  ;;  %v66_v60 = vld [vmem:[%s5556_s0 + $0x198] sm:$0xff]  ;;  %v4304_v61 = vld [vmem:[%s5555_s1 + $0x220] sm:$0xff]  }
  0x55   :  { %2278 = vmatprep.mubr.bf16.mxu1 %v3277_v62  ;;  %v74_v62 = vld [vmem:[%s5556_s0 + $0x1d8] sm:$0xff] }
  0x5b   :  { %2159 = vmatmul.mubr.bf16.gmra.mxu0 %v3274_v4  ;;  %v3215_v4 = vcombine.high %v65_v57, %v73_v59  ;;  %v154_v57 = vld [vmem:[%s5556_s0 + $0x458] sm:$0xff] }
  0x5c   :  { %2279 = vmatmul.mubr.bf16.gmra.mxu1 %v3276_v5  ;;  %2166 = vmatprep.mubr.bf16.mxu0 %v3291_v6  ;;  %v3217_v5 = vcombine.high %v66_v60, %v74_v62  ;;  %v4308_v6 = vld [vmem:[%s5555_s1 + $0x218] sm:$0xff]  }
  0x5d   :  { %2286 = vmatprep.mubr.bf16.mxu1 %v3293_v7  ;;  %v4310_v7 = vld [vmem:[%s5555_s1 + $0x298] sm:$0xff]  }
  0x63   :  { %2167 = vmatmul.mubr.bf16.gmra.mxu0 %v3290_v12  ;;  %v82_v12 = vld [vmem:[%s5556_s0 + $0x218] sm:$0xff] }
  0x64   :  { %2287 = vmatmul.mubr.bf16.gmra.mxu1 %v3292_v13  ;;  %2174 = vmatprep.mubr.bf16.mxu0 %v3307_v14  ;;  %v90_v13 = vld [vmem:[%s5556_s0 + $0x258] sm:$0xff]  ;;  %v4312_v14 = vld [vmem:[%s5555_s1 + $0x210] sm:$0xff]  }
  0x65   :  { %2294 = vmatprep.mubr.bf16.mxu1 %v3309_v15  ;;  %v4314_v15 = vld [vmem:[%s5555_s1 + $0x290] sm:$0xff]  }
  0x6b   :  { %2175 = vmatmul.mubr.bf16.gmra.mxu0 %v3306_v18  ;;  %v4317_v18 = vld [vmem:[%s5555_s1 + $0x2c8] sm:$0xff]  }
  0x6c   :  { %2295 = vmatmul.mubr.bf16.gmra.mxu1 %v3308_v19  ;;  %2182 = vmatprep.mubr.bf16.mxu0 %v3323_v20  ;;  %v3216_v19 = vcombine.low %v66_v60, %v74_v62  ;;  %v3231_v20 = vcombine.high %v81_v9, %v89_v11  ;;  %v161_v62 = vld [vmem:[%s5556_s0 + $0x490] sm:$0xff] }
  0x6d   :  { %2302 = vmatprep.mubr.bf16.mxu1 %v3325_v21  ;;  %v3233_v21 = vcombine.high %v82_v12, %v90_v13 }
  0x73   :  { %2183 = vmatmul.mubr.bf16.gmra.mxu0 %v3322_v26  ;;  %v105_v26 = vld [vmem:[%s5556_s0 + $0x2d0] sm:$0xff] }
  0x74   :  { %2303 = vmatmul.mubr.bf16.gmra.mxu1 %v3324_v27  ;;  %2342 = vmatprep.mubr.bf16.mxu0 %v3167_v28  ;;  %v4323_v27 = vld [vmem:[%s5555_s1 + $0x2c0] sm:$0xff]   ;;  %v98_v28 = vld [vmem:[%s5556_s0 + $0x298] sm:$0xff] }
  0x75   :  { %2462 = vmatprep.mubr.bf16.mxu1 %v3169_v29  ;;  %v4320_v29 = vld [vmem:[%s5555_s1 + $0x200] sm:$0xff]  }
  0x7b   :  { %2343 = vmatmul.mubr.bf16.vlgmr.msra.gmra.mxu0 %v3166_v33  ;;  %v3230_v33 = vcombine.low %v81_v9, %v89_v11 }
  0x7c   :  { %2463 = vmatmul.mubr.bf16.vlgmr.msra.gmra.mxu1 %v3168_v35  ;;  %3896 = vmatpush3.bf16.msra.mxu0 %v4292_v36  ;;  %v3232_v35 = vcombine.low %v82_v12, %v90_v13  ;;  %v3247_v36 = vcombine.high %v97_v25, %v105_v26  ;;  %v19_v12 = vld [vmem:[%s5556_s0 + $0x20] sm:$0xff] }
  0x7d   :  { %3978 = vmatpush3.bf16.msra.mxu1 %v4294_v37  ;;  %2350 = vmatprep.mubr.bf16.mxu0 %v3183_v38  ;;  %v3249_v37 = vcombine.high %v98_v28, %v106_v30  ;;  %v113_v38 = vld [vmem:[%s5556_s0 + $0x310] sm:$0xff]  ;;  %v27_v13 = vld [vmem:[%s5556_s0 + $0x60] sm:$0xff] }
  0x7e   :  { %2470 = vmatprep.mubr.bf16.mxu1 %v3185_v40  ;;  %3897 = vmatprep.subr.bf16.mxu0 %v4295_v39  ;;  %v121_v39 = vld [vmem:[%s5556_s0 + $0x350] sm:$0xff]  ;;  %v114_v40 = vld [vmem:[%s5556_s0 + $0x318] sm:$0xff] }
  0x7f   :  { %3979 = vmatprep.subr.bf16.mxu1 %v4297_v42  ;;  %v3246_v42 = vcombine.low %v97_v25, %v105_v26  ;;  %v3263_v44 = vcombine.high %v113_v38, %v121_v39  ;;  %v4328_v26 = vld [vmem:[%s5555_s1 + $0x338] sm:$0xff]  }
  0x80   :  { %3898 = vmatpush3.bf16.msra.mxu0 %v4296_v41  ;;  %v122_v41 = vld [vmem:[%s5556_s0 + $0x358] sm:$0xff] }
  0x81   :  { %3980 = vmatpush3.bf16.msra.mxu1 %v4298_v43  ;;  %3899 = vmatprep.subr.bf16.mxu0 %v4299_v48  ;;  %v3248_v43 = vcombine.low %v98_v28, %v106_v30  ;;  %v3265_v45 = vcombine.high %v114_v40, %v122_v41  ;;  %v130_v48 = vld [vmem:[%s5556_s0 + $0x398] sm:$0xff]  ;;  %v4331_v30 = vld [vmem:[%s5555_s1 + $0x370] sm:$0xff]  }
  0x82   :  { %3981 = vmatprep.subr.bf16.mxu1 %v4301_v49  ;;  %v138_v49 = vld [vmem:[%s5556_s0 + $0x3d8] sm:$0xff] }
  0x83   :  { %2351 = vmatmul.mubr.bf16.gmra.mxu0 %v3182_v50  ;;  %v3262_v50 = vcombine.low %v113_v38, %v121_v39  ;;  %v3280_v59 = vcombine.low %v130_v48, %v138_v49  ;;  %v60_v38 = vld [vmem:[%s5556_s0 + $0x168] sm:$0xff] }
  0x84   :  { %2471 = vmatmul.mubr.bf16.gmra.mxu1 %v3184_v51  ;;  %2358 = vmatprep.mubr.bf16.mxu0 %v3199_v52  ;;  %v3264_v51 = vcombine.low %v114_v40, %v122_v41  ;;  %v3279_v52 = vcombine.high %v129_v46, %v137_v47  ;;  %v4337_v39 = vld [vmem:[%s5555_s1 + $0x3e8] sm:$0xff]  }
  0x85   :  { %2478 = vmatprep.mubr.bf16.mxu1 %v3201_v53  ;;  %3900 = vmatpush3.bf16.msra.mxu0 %v4300_v54  ;;  %v3281_v53 = vcombine.high %v130_v48, %v138_v49  ;;  %v145_v54 = vld [vmem:[%s5556_s0 + $0x410] sm:$0xff]  ;;  %v5008_v48 = vld [vmem:[%s5556_s0 + $0x1a0] sm:$0xff] }
  0x86   :  { %3982 = vmatpush3.bf16.msra.mxu1 %v4302_v55  ;;  %3901 = vmatprep.subr.bf16.mxu0 %v4303_v56  ;;  %v153_v55 = vld [vmem:[%s5556_s0 + $0x450] sm:$0xff]  ;;  %v146_v56 = vld [vmem:[%s5556_s0 + $0x418] sm:$0xff]  ;;  %v5013_v49 = vld [vmem:[%s5556_s0 + $0x1e0] sm:$0xff] }
  0x87   :  { %3983 = vmatprep.subr.bf16.mxu1 %v4305_v58  ;;  %v3278_v58 = vcombine.low %v129_v46, %v137_v47  ;;  %v3295_v60 = vcombine.high %v145_v54, %v153_v55  ;;  %v4339_v46 = vld [vmem:[%s5555_s1 + $0x360] sm:$0xff]  }
  0x88   :  { %v4341_v47 = vld [vmem:[%s5555_s1 + $0x3e0] sm:$0xff]  }
  0x89   :  { %3902 = vmatpush3.bf16.msra.mxu0 %v4304_v61  ;;  %v3297_v61 = vcombine.high %v146_v56, %v154_v57 }
  0x8a   :  { %3984 = vmatpush3.bf16.msra.mxu1 %v4306_v63  ;;  %3903 = vmatprep.subr.bf16.mxu0 %v4307_v0  ;;  %v169_v63 = vld [vmem:[%s5556_s0 + $0x4d0] sm:$0xff]  ;;  %v162_v0 = vld [vmem:[%s5556_s0 + $0x498] sm:$0xff] }
  0x8b   :  { %2359 = vmatmul.mubr.bf16.gmra.mxu0 %v3198_v1  ;;  %3985 = vmatprep.subr.bf16.mxu1 %v4309_v2  ;;  %v170_v1 = vld [vmem:[%s5556_s0 + $0x4d8] sm:$0xff]  ;;  %v3294_v2 = vcombine.low %v145_v54, %v153_v55 }
  0x8c   :  { %2479 = vmatmul.mubr.bf16.gmra.mxu1 %v3200_v3  ;;  %2366 = vmatprep.mubr.bf16.mxu0 %v3215_v4  ;;  %v3296_v3 = vcombine.low %v146_v56, %v154_v57  ;;  %v3311_v4 = vcombine.high %v161_v62, %v169_v63  ;;  %v3312_v9 = vcombine.low %v162_v0, %v170_v1  ;;  %v4343_v54 = vld [vmem:[%s5555_s1 + $0x358] sm:$0xff]  }
  0x8d   :  { %2486 = vmatprep.mubr.bf16.mxu1 %v3217_v5  ;;  %3904 = vmatpush3.bf16.msra.mxu0 %v4308_v6  ;;  %v3313_v5 = vcombine.high %v162_v0, %v170_v1  ;;  %v177_v6 = vld [vmem:[%s5556_s0 + $0x510] sm:$0xff]  ;;  %v4345_v56 = vld [vmem:[%s5555_s1 + $0x3d8] sm:$0xff]  }
  0x8e   :  { %3986 = vmatpush3.bf16.msra.mxu1 %v4310_v7  ;;  %3905 = vmatprep.subr.bf16.mxu0 %v4311_v8  ;;  %v178_v7 = vld [vmem:[%s5556_s0 + $0x518] sm:$0xff]  ;;  %v3310_v8 = vcombine.low %v161_v62, %v169_v63  ;;  %v4347_v62 = vld [vmem:[%s5555_s1 + $0x350] sm:$0xff]  }
  0x8f   :  { %3987 = vmatprep.subr.bf16.mxu1 %v4313_v10  ;;  %v3327_v10 = vcombine.high %v177_v6, %v177_v6  ;;  %v3329_v11 = vcombine.high %v178_v7, %v178_v7  ;;  %v4349_v0 = vld [vmem:[%s5555_s1 + $0x3d0] sm:$0xff]  }
  0x91   :  { %3906 = vmatpush3.bf16.msra.mxu0 %v4312_v14  ;;  %v20_v14 = vld [vmem:[%s5556_s0 + $0x28] sm:$0xff] }
  0x92   :  { %3988 = vmatpush3.bf16.msra.mxu1 %v4314_v15  ;;  %3907 = vmatprep.subr.bf16.mxu0 %v4315_v16  ;;  %v28_v15 = vld [vmem:[%s5556_s0 + $0x68] sm:$0xff]  ;;  %v3326_v16 = vcombine.low %v177_v6, %v177_v6 }
  0x93   :  { %2367 = vmatmul.mubr.bf16.gmra.mxu0 %v3214_v17  ;;  %3989 = vmatprep.subr.bf16.mxu1 %v4317_v18  ;;  %v3328_v17 = vcombine.low %v178_v7, %v178_v7  ;;  %v3171_v18 = vcombine.high %v19_v12, %v27_v13  ;;  %v3172_v25 = vcombine.low %v20_v14, %v28_v15  ;;  %v5071_v6 = vld [vmem:[%s5556_s0 + $0x228] sm:$0xff]  ;;  %v4348_v7 = vld [vmem:[%s5555_s1 + $0x310] sm:$0xff]  }
  0x94   :  { %2487 = vmatmul.mubr.bf16.gmra.mxu1 %v3216_v19  ;;  %2374 = vmatprep.mubr.bf16.mxu0 %v3231_v20  ;;  %v3173_v19 = vcombine.high %v20_v14, %v28_v15  ;;  %v35_v20 = vld [vmem:[%s5556_s0 + $0xa0] sm:$0xff]  ;;  %v3218_v15 = vcombine.low %v5008_v48, %v5013_v49 }
  0x95   :  { %2494 = vmatprep.mubr.bf16.mxu1 %v3233_v21  ;;  %3908 = vmatpush3.bf16.msra.mxu0 %v4316_v22  ;;  %v43_v21 = vld [vmem:[%s5556_s0 + $0xe0] sm:$0xff]  ;;  %v3170_v22 = vcombine.low %v19_v12, %v27_v13  ;;  %v4351_v12 = vld [vmem:[%s5555_s1 + $0x348] sm:$0xff]  }
  0x96   :  { %3990 = vmatpush3.bf16.msra.mxu1 %v4318_v23  ;;  %3909 = vmatprep.subr.bf16.mxu0 %v4319_v24  ;;  %v36_v23 = vld [vmem:[%s5556_s0 + $0xa8] sm:$0xff]  ;;  %v3187_v28 = vcombine.high %v35_v20, %v43_v21  ;;  %v3186_v40 = vcombine.low %v35_v20, %v43_v21 }
  0x97   :  { %3991 = vmatprep.subr.bf16.mxu1 %v4323_v27  ;;  %v44_v24 = vld [vmem:[%s5556_s0 + $0xe8] sm:$0xff]  ;;  %v4330_v27 = vld [vmem:[%s5555_s1 + $0x3b8] sm:$0xff]  }
  0x98   :  { %v3188_v41 = vcombine.low %v36_v23, %v44_v24 }
  0x99   :  { %3910 = vmatpush3.bf16.msra.mxu0 %v4320_v29  ;;  %v3189_v29 = vcombine.high %v36_v23, %v44_v24  ;;  %v4352_v23 = vld [vmem:[%s5555_s1 + $0x308] sm:$0xff]  }
  0x9a   :  { %3992 = vmatpush3.bf16.msra.mxu1 %v4326_v31  ;;  %4059 = vmatprep.subr.bf16.mxu0 %v4327_v32  ;;  %v4333_v31 = vld [vmem:[%s5555_s1 + $0x3f0] sm:$0xff]  }
  0x9b   :  { %2375 = vmatmul.mubr.bf16.gmra.mxu0 %v3230_v33  ;;  %4141 = vmatprep.subr.bf16.mxu1 %v4329_v34  ;;  %v4332_v32 = vld [vmem:[%s5555_s1 + $0x330] sm:$0xff]   ;;  %v51_v34 = vld [vmem:[%s5556_s0 + $0x120] sm:$0xff] }
  0x9c   :  { %2495 = vmatmul.mubr.bf16.gmra.mxu1 %v3232_v35  ;;  %2382 = vmatprep.mubr.bf16.mxu0 %v3247_v36  ;;  %v4334_v33 = vld [vmem:[%s5555_s1 + $0x3b0] sm:$0xff]   ;;  %v59_v35 = vld [vmem:[%s5556_s0 + $0x160] sm:$0xff]  ;;  %v4335_v36 = vld [vmem:[%s5555_s1 + $0x368] sm:$0xff]  }
  0x9d   :  { %2502 = vmatprep.mubr.bf16.mxu1 %v3249_v37  ;;  %v52_v37 = vld [vmem:[%s5556_s0 + $0x128] sm:$0xff]  ;;  %v3202_v55 = vcombine.low %v51_v34, %v59_v35 }
  0x9e   :  { %v3204_v57 = vcombine.low %v52_v37, %v60_v38 }
  0xa3   :  { %2383 = vmatmul.mubr.bf16.gmra.mxu0 %v3246_v42  ;;  %v3203_v42 = vcombine.high %v51_v34, %v59_v35  ;;  %v99_v35 = vld [vmem:[%s5556_s0 + $0x2a0] sm:$0xff] }
  0xa4   :  { %2503 = vmatmul.mubr.bf16.gmra.mxu1 %v3248_v43  ;;  %2390 = vmatprep.mubr.bf16.mxu0 %v3263_v44  ;;  %v3205_v43 = vcombine.high %v52_v37, %v60_v38  ;;  %v4336_v44 = vld [vmem:[%s5555_s1 + $0x328] sm:$0xff]   ;;  %v4356_v37 = vld [vmem:[%s5555_s1 + $0x300] sm:$0xff]  }
  0xa5   :  { %2510 = vmatprep.mubr.bf16.mxu1 %v3265_v45  ;;  %v4338_v45 = vld [vmem:[%s5555_s1 + $0x3a8] sm:$0xff]  }
  0xab   :  { %2391 = vmatmul.mubr.bf16.gmra.mxu0 %v3262_v50  ;;  %v5018_v50 = vld [vmem:[%s5556_s0 + $0x1a8] sm:$0xff] }
  0xac   :  { %2511 = vmatmul.mubr.bf16.gmra.mxu1 %v3264_v51  ;;  %2398 = vmatprep.mubr.bf16.mxu0 %v3279_v52  ;;  %v4340_v51 = vld [vmem:[%s5555_s1 + $0x320] sm:$0xff]   ;;  %v5026_v52 = vld [vmem:[%s5556_s0 + $0x1e8] sm:$0xff] }
  0xad   :  { %2518 = vmatprep.mubr.bf16.mxu1 %v3281_v53  ;;  %v4342_v53 = vld [vmem:[%s5555_s1 + $0x3a0] sm:$0xff]  }
  0xb3   :  { %2399 = vmatmul.mubr.bf16.gmra.mxu0 %v3278_v58  ;;  %v3219_v58 = vcombine.high %v5008_v48, %v5013_v49 }
  0xb4   :  { %2519 = vmatmul.mubr.bf16.gmra.mxu1 %v3280_v59  ;;  %2406 = vmatprep.mubr.bf16.mxu0 %v3295_v60  ;;  %v3221_v59 = vcombine.high %v5018_v50, %v5026_v52  ;;  %v4344_v60 = vld [vmem:[%s5555_s1 + $0x318] sm:$0xff]  }
  0xb5   :  { %2526 = vmatprep.mubr.bf16.mxu1 %v3297_v61  ;;  %v4346_v61 = vld [vmem:[%s5555_s1 + $0x398] sm:$0xff]  }
  0xbb   :  { %2407 = vmatmul.mubr.bf16.gmra.mxu0 %v3294_v2  ;;  %v5056_v2 = vld [vmem:[%s5557_s2] ss:$0 sm:$0xff] }
  0xbc   :  { %2527 = vmatmul.mubr.bf16.gmra.mxu1 %v3296_v3  ;;  %2414 = vmatprep.mubr.bf16.mxu0 %v3311_v4  ;;  %v5061_v3 = vld [vmem:[%s5556_s0 + $0x220] sm:$0xff] }
  0xbd   :  { %2534 = vmatprep.mubr.bf16.mxu1 %v3313_v5  ;;  %v5066_v5 = vld [vmem:[%s5556_s0 + $0x260] sm:$0xff] }
  0xbe   :  { %v3235_v20 = vcombine.high %v5061_v3, %v5066_v5 }
  0xc3   :  { %2415 = vmatmul.mubr.bf16.gmra.mxu0 %v3310_v8 }
  0xc4   :  { %2535 = vmatmul.mubr.bf16.gmra.mxu1 %v3312_v9  ;;  %2422 = vmatprep.mubr.bf16.mxu0 %v3327_v10  ;;  %v5079_v10 = vld [vmem:[%s5556_s0 + $0x268] sm:$0xff] }
  0xc5   :  { %2542 = vmatprep.mubr.bf16.mxu1 %v3329_v11  ;;  %v4350_v11 = vld [vmem:[%s5555_s1 + $0x390] sm:$0xff]   ;;  %v3236_v49 = vcombine.low %v5071_v6, %v5079_v10 }
  0xcb   :  { %2423 = vmatmul.mubr.bf16.gmra.mxu0 %v3326_v16  ;;  %v4353_v16 = vld [vmem:[%s5555_s1 + $0x3c8] sm:$0xff]  }
  0xcc   :  { %2543 = vmatmul.mubr.bf16.gmra.mxu1 %v3328_v17  ;;  %2582 = vmatprep.mubr.bf16.mxu0 %v3171_v18 }
  0xcd   :  { %2702 = vmatprep.mubr.bf16.mxu1 %v3173_v19  ;;  %v3220_v19 = vcombine.low %v5018_v50, %v5026_v52 }
  0xd3   :  { %2583 = vmatmul.mubr.bf16.vlgmr.msra.gmra.mxu0 %v3170_v22  ;;  %v3237_v22 = vcombine.high %v5071_v6, %v5079_v10 }
  0xd4   :  { %2703 = vmatmul.mubr.bf16.vlgmr.msra.gmra.mxu1 %v3172_v25  ;;  %4060 = vmatpush3.bf16.msra.mxu0 %v4328_v26 }
  0xd5   :  { %4142 = vmatpush3.bf16.msra.mxu1 %v4330_v27  ;;  %2590 = vmatprep.mubr.bf16.mxu0 %v3187_v28  ;;  %v4354_v27 = vld [vmem:[%s5555_s1 + $0x388] sm:$0xff]   ;;  %v4355_v28 = vld [vmem:[%s5555_s1 + $0x340] sm:$0xff]  }
  0xd6   :  { %2710 = vmatprep.mubr.bf16.mxu1 %v3189_v29  ;;  %4061 = vmatprep.subr.bf16.mxu0 %v4331_v30 }
  0xd7   :  { %4143 = vmatprep.subr.bf16.mxu1 %v4333_v31  ;;  %v4361_v31 = vld [vmem:[%s5555_s1 + $0x3c0] sm:$0xff]  }
  0xd8   :  { %4062 = vmatpush3.bf16.msra.mxu0 %v4332_v32 }
  0xd9   :  { %4144 = vmatpush3.bf16.msra.mxu1 %v4334_v33  ;;  %4063 = vmatprep.subr.bf16.mxu0 %v4335_v36  ;;  %v107_v36 = vld [vmem:[%s5556_s0 + $0x2e0] sm:$0xff] }
  0xda   :  { %4145 = vmatprep.subr.bf16.mxu1 %v4337_v39  ;;  %v3251_v50 = vcombine.high %v99_v35, %v107_v36 }
  0xdb   :  { %2591 = vmatmul.mubr.bf16.gmra.mxu0 %v3186_v40 }
  0xdc   :  { %2711 = vmatmul.mubr.bf16.gmra.mxu1 %v3188_v41  ;;  %2598 = vmatprep.mubr.bf16.mxu0 %v3203_v42  ;;  %v100_v41 = vld [vmem:[%s5556_s0 + $0x2a8] sm:$0xff] }
  0xdd   :  { %2718 = vmatprep.mubr.bf16.mxu1 %v3205_v43  ;;  %4064 = vmatpush3.bf16.msra.mxu0 %v4336_v44  ;;  %v108_v42 = vld [vmem:[%s5556_s0 + $0x2e8] sm:$0xff]  ;;  %v4362_v43 = vld [vmem:[%s5555_s1 + $0x380] sm:$0xff]  }
  0xde   :  { %4146 = vmatpush3.bf16.msra.mxu1 %v4338_v45  ;;  %4065 = vmatprep.subr.bf16.mxu0 %v4339_v46  ;;  %v3234_v46 = vcombine.low %v5061_v3, %v5066_v5  ;;  %v3253_v52 = vcombine.high %v100_v41, %v108_v42  ;;  %v116_v3 = vld [vmem:[%s5556_s0 + $0x328] sm:$0xff]  ;;  %v3252_v10 = vcombine.low %v100_v41, %v108_v42 }
  0xdf   :  { %4147 = vmatprep.subr.bf16.mxu1 %v4341_v47 }
  0xe1   :  { %4066 = vmatpush3.bf16.msra.mxu0 %v4340_v51 }
  0xe2   :  { %4148 = vmatpush3.bf16.msra.mxu1 %v4342_v53  ;;  %4067 = vmatprep.subr.bf16.mxu0 %v4343_v54 }
  0xe3   :  { %v3583_v63 = vpop.f32.mrf.mxu0  ;;  %2599 = vmatmul.mubr.bf16.gmra.mxu0 %v3202_v55  ;;  %4149 = vmatprep.subr.bf16.mxu1 %v4345_v56 }
  0xe4   :  { %v3665_v1 = vpop.f32.mrf.mxu1  ;;  %2719 = vmatmul.mubr.bf16.gmra.mxu1 %v3204_v57  ;;  %2606 = vmatprep.mubr.bf16.mxu0 %v3219_v58 }
  0xe5   :  { %v3584_v4 = vpop.f32.mrf.mxu0  ;;  %2726 = vmatprep.mubr.bf16.mxu1 %v3221_v59  ;;  %4068 = vmatpush3.bf16.msra.mxu0 %v4344_v60 }
  0xe6   :  { %v3585_v8 = vadd.f32 %v3584_v4, %v3583_v63  ;;  %v3666_v9 = vpop.f32.mrf.mxu1  ;;  %4150 = vmatpush3.bf16.msra.mxu1 %v4346_v61  ;;  %4069 = vmatprep.subr.bf16.mxu0 %v4347_v62  ;;  %v115_v61 = vld [vmem:[%s5556_s0 + $0x320] sm:$0xff]  ;;  %v124_v4 = vld [vmem:[%s5556_s0 + $0x368] sm:$0xff] }
  0xe7   :  { %v3667_v13 = vadd.f32 %v3666_v9, %v3665_v1  ;;  %v3586_v14 = vpop.f32.mrf.mxu0  ;;  %4151 = vmatprep.subr.bf16.mxu1 %v4349_v0  ;;  %v123_v62 = vld [vmem:[%s5556_s0 + $0x360] sm:$0xff] }
  0xe8   :  { %v2105_v17 = vadd.f32 %v3585_v8, %v5056_v2  ;;  %v3668_v18 = vpop.f32.mrf.mxu1 }
  0xe9   :  { %v3587_v21 = vpop.f32.mrf.mxu0  ;;  %4070 = vmatpush3.bf16.msra.mxu0 %v4348_v7  ;;  %v3250_v7 = vcombine.low %v99_v35, %v107_v36  ;;  %v3268_v35 = vcombine.low %v116_v3, %v124_v4 }
  0xea   :  { %v5102_v24 = vadd.f32 %v3667_v13, %v2105_v17  ;;  %v3588_v25 = vadd.f32 %v3587_v21, %v3586_v14  ;;  %v3669_v26 = vpop.f32.mrf.mxu1  ;;  %4152 = vmatpush3.bf16.msra.mxu1 %v4350_v11  ;;  %4071 = vmatprep.subr.bf16.mxu0 %v4351_v12  ;;  %v3267_v11 = vcombine.high %v115_v61, %v123_v62 }
  0xeb   :  { %v3670_v29 = vadd.f32 %v3669_v26, %v3668_v18  ;;  %v3589_v30 = vpop.f32.mrf.mxu0  ;;  %2607 = vmatmul.mubr.bf16.gmra.mxu0 %v3218_v15  ;;  %4153 = vmatprep.subr.bf16.mxu1 %v4353_v16  ;;  %v3269_v13 = vcombine.high %v116_v3, %v124_v4 }
  0xec   :  { %v2108_v32 = vadd.f32 %v3588_v25, %v5056_v2  ;;  %v3671_v33 = vpop.f32.mrf.mxu1  ;;  %2727 = vmatmul.mubr.bf16.gmra.mxu1 %v3220_v19  ;;  %2614 = vmatprep.mubr.bf16.mxu0 %v3235_v20 }
  0xed   :  { %v3590_v34 = vpop.f32.mrf.mxu0  ;;  %2734 = vmatprep.mubr.bf16.mxu1 %v3237_v22  ;;  %4072 = vmatpush3.bf16.msra.mxu0 %v4352_v23  ;;  %v131_v22 = vld [vmem:[%s5556_s0 + $0x3a0] sm:$0xff] }
  0xee   :  { %v5123_v38 = vadd.f32 %v3670_v29, %v2108_v32  ;;  %v3591_v39 = vadd.f32 %v3590_v34, %v3589_v30  ;;  %v3672_v40 = vpop.f32.mrf.mxu1  ;;  %4154 = vmatpush3.bf16.msra.mxu1 %v4354_v27  ;;  %4073 = vmatprep.subr.bf16.mxu0 %v4355_v28  ;;  %v139_v23 = vld [vmem:[%s5556_s0 + $0x3e0] sm:$0xff]  ;;  %v132_v28 = vld [vmem:[%s5556_s0 + $0x3a8] sm:$0xff]  ;;  %v3266_v32 = vcombine.low %v115_v61, %v123_v62 }
  0xef   :  { %v3673_v44 = vadd.f32 %v3672_v40, %v3671_v33  ;;  %v3592_v45 = vpop.f32.mrf.mxu0  ;;  %4155 = vmatprep.subr.bf16.mxu1 %v4361_v31  ;;  %v140_v29 = vld [vmem:[%s5556_s0 + $0x3e8] sm:$0xff]  ;;  %v3283_v36 = vcombine.high %v131_v22, %v139_v23 }
  0xf0   :  { %v2113_v47 = vadd.f32 %v3591_v39, %v5056_v2  ;;  %v3674_v48 = vpop.f32.mrf.mxu1  ;;  %v3285_v39 = vcombine.high %v132_v28, %v140_v29  ;;  %v3284_v61 = vcombine.low %v132_v28, %v140_v29 }
  0xf1   :  { %v3593_v51 = vpop.f32.mrf.mxu0  ;;  %4074 = vmatpush3.bf16.msra.mxu0 %v4356_v37 }
  0xf2   :  { %v5139_v53 = vadd.f32 %v3673_v44, %v2113_v47  ;;  %v3594_v54 = vadd.f32 %v3593_v51, %v3592_v45  ;;  %v3675_v55 = vpop.f32.mrf.mxu1  ;;  %4156 = vmatpush3.bf16.msra.mxu1 %v4362_v43 }
  0xf3   :  { %v3676_v56 = vadd.f32 %v3675_v55, %v3674_v48  ;;  %v3595_v57 = vpop.f32.mrf.mxu0  ;;  %2615 = vmatmul.mubr.bf16.gmra.mxu0 %v3234_v46  ;;  %v147_v48 = vld [vmem:[%s5556_s0 + $0x420] sm:$0xff]  ;;  %v156_v55 = vld [vmem:[%s5556_s0 + $0x468] sm:$0xff] }
  0xf4   :  { %v2116_v58 = vadd.f32 %v3594_v54, %v5056_v2  ;;  %v3677_v59 = vpop.f32.mrf.mxu1  ;;  %2735 = vmatmul.mubr.bf16.gmra.mxu1 %v3236_v49  ;;  %2622 = vmatprep.mubr.bf16.mxu0 %v3251_v50  ;;  %v155_v49 = vld [vmem:[%s5556_s0 + $0x460] sm:$0xff]  ;;  %v148_v54 = vld [vmem:[%s5556_s0 + $0x428] sm:$0xff] }
  0xf5   :  { %v3596_v60 = vpop.f32.mrf.mxu0  ;;  %2742 = vmatprep.mubr.bf16.mxu1 %v3253_v52  ;;  %v3299_v62 = vcombine.high %v147_v48, %v155_v49 }
  0xf6   :  { %v5148_v63 = vadd.f32 %v3676_v56, %v2116_v58  ;;  %v3597_v0 = vadd.f32 %v3596_v60, %v3595_v57  ;;  %v3678_v1 = vpop.f32.mrf.mxu1  ;;  %v3282_v58 = vcombine.low %v131_v22, %v139_v23 }
  0xf7   :  { %v3679_v5 = vadd.f32 %v3678_v1, %v3677_v59  ;;  %v3598_v6 = vpop.f32.mrf.mxu0  ;;  %v3301_v1 = vcombine.high %v148_v54, %v156_v55 }
  0xf8   :  { %v2121_v8 = vadd.f32 %v3597_v0, %v5056_v2  ;;  %v3680_v9 = vpop.f32.mrf.mxu1 }
  0xf9   :  { %v3599_v12 = vpop.f32.mrf.mxu0 }
  0xfa   :  { %v5157_v14 = vadd.f32 %v3679_v5, %v2121_v8  ;;  %v3600_v15 = vadd.f32 %v3599_v12, %v3598_v6  ;;  %v3681_v16 = vpop.f32.mrf.mxu1  ;;  %v171_v12 = vld [vmem:[%s5556_s0 + $0x4e0] sm:$0xff] }
  0xfb   :  { %v3682_v17 = vadd.f32 %v3681_v16, %v3680_v9  ;;  %v3601_v18 = vpop.f32.mrf.mxu0  ;;  %2623 = vmatmul.mubr.bf16.gmra.mxu0 %v3250_v7 }
  0xfc   :  { %v2124_v19 = vadd.f32 %v3600_v15, %v5056_v2  ;;  %v3683_v20 = vpop.f32.mrf.mxu1  ;;  %2743 = vmatmul.mubr.bf16.gmra.mxu1 %v3252_v10  ;;  %2630 = vmatprep.mubr.bf16.mxu0 %v3267_v11  ;;  %v163_v11 = vld [vmem:[%s5556_s0 + $0x4a0] sm:$0xff] }
  0xfd   :  { %v3602_v21 = vpop.f32.mrf.mxu0  ;;  %2750 = vmatprep.mubr.bf16.mxu1 %v3269_v13 }
  0xfe   :  { %v5166_v25 = vadd.f32 %v3682_v17, %v2124_v19  ;;  %v3603_v26 = vadd.f32 %v3602_v21, %v3601_v18  ;;  %v3684_v27 = vpop.f32.mrf.mxu1  ;;  %v164_v17 = vld [vmem:[%s5556_s0 + $0x4a8] sm:$0xff]  ;;  %v3298_v21 = vcombine.low %v147_v48, %v155_v49 }
  0xff   :  { %v3685_v30 = vadd.f32 %v3684_v27, %v3683_v20  ;;  %v3604_v31 = vpop.f32.mrf.mxu0  ;;  %v172_v18 = vld [vmem:[%s5556_s0 + $0x4e8] sm:$0xff]  ;;  %v3315_v27 = vcombine.high %v163_v11, %v171_v12 }
 0x100   :  { %v2129_v33 = vadd.f32 %v3603_v26, %v5056_v2  ;;  %v3686_v34 = vpop.f32.mrf.mxu1  ;;  %v3300_v26 = vcombine.low %v148_v54, %v156_v55  ;;  %v3317_v29 = vcombine.high %v164_v17, %v172_v18 }
 0x101   :  { %v3605_v37 = vpop.f32.mrf.mxu0 }
 0x102   :  { %v5175_v40 = vadd.f32 %v3685_v30, %v2129_v33  ;;  %v3606_v41 = vadd.f32 %v3605_v37, %v3604_v31  ;;  %v3687_v42 = vpop.f32.mrf.mxu1 }
 0x103   :  { %v3688_v43 = vadd.f32 %v3687_v42, %v3686_v34  ;;  %v3607_v44 = vpop.f32.mrf.mxu0  ;;  %2631 = vmatmul.mubr.bf16.gmra.mxu0 %v3266_v32 }
 0x104   :  { %v2132_v45 = vadd.f32 %v3606_v41, %v5056_v2  ;;  %v3689_v46 = vpop.f32.mrf.mxu1  ;;  %2751 = vmatmul.mubr.bf16.gmra.mxu1 %v3268_v35  ;;  %2638 = vmatprep.mubr.bf16.mxu0 %v3283_v36 }
 0x105   :  { %v3608_v47 = vpop.f32.mrf.mxu0  ;;  %2758 = vmatprep.mubr.bf16.mxu1 %v3285_v39  ;;  %v179_v39 = vld [vmem:[%s5556_s0 + $0x520] sm:$0xff] }
 0x106   :  { %v5184_v50 = vadd.f32 %v3688_v43, %v2132_v45  ;;  %v3609_v51 = vadd.f32 %v3608_v47, %v3607_v44  ;;  %v3690_v52 = vpop.f32.mrf.mxu1  ;;  %v180_v44 = vld [vmem:[%s5556_s0 + $0x528] sm:$0xff]  ;;  %v3314_v47 = vcombine.low %v163_v11, %v171_v12  ;;  %v3330_v12 = vcombine.low %v179_v39, %v179_v39 }
 0x107   :  { %v3691_v56 = vadd.f32 %v3690_v52, %v3689_v46  ;;  %v3610_v57 = vpop.f32.mrf.mxu0  ;;  %v3331_v52 = vcombine.high %v179_v39, %v179_v39  ;;  %v3333_v55 = vcombine.high %v180_v44, %v180_v44  ;;  %v46_v39 = vld [vmem:[%s5556_s0 + $0xf8] sm:$0xff] }
 0x108   :  { %v2137_v59 = vadd.f32 %v3609_v51, %v5056_v2  ;;  %v3692_v60 = vpop.f32.mrf.mxu1  ;;  %v3316_v51 = vcombine.low %v164_v17, %v172_v18  ;;  %v3332_v17 = vcombine.low %v180_v44, %v180_v44 }
 0x109   :  { %v3611_v0 = vpop.f32.mrf.mxu0 }
 0x10a   :  { %v5193_v3 = vadd.f32 %v3691_v56, %v2137_v59  ;;  %v3612_v4 = vadd.f32 %v3611_v0, %v3610_v57  ;;  %v3693_v5 = vpop.f32.mrf.mxu1 }
 0x10b   :  { %v3694_v6 = vadd.f32 %v3693_v5, %v3692_v60  ;;  %v3613_v7 = vpop.f32.mrf.mxu0  ;;  %2639 = vmatmul.mubr.bf16.gmra.mxu0 %v3282_v58 }
 0x10c   :  { %v2140_v8 = vadd.f32 %v3612_v4, %v5056_v2  ;;  %v3695_v9 = vpop.f32.mrf.mxu1  ;;  %2759 = vmatmul.mubr.bf16.gmra.mxu1 %v3284_v61  ;;  %2646 = vmatprep.mubr.bf16.mxu0 %v3299_v62  ;;  %v29_v4 = vld [vmem:[%s5556_s0 + $0x70] sm:$0xff] }
 0x10d   :  { %v3614_v10 = vpop.f32.mrf.mxu0  ;;  %2766 = vmatprep.mubr.bf16.mxu1 %v3301_v1  ;;  %v21_v1 = vld [vmem:[%s5556_s0 + $0x30] sm:$0xff] }
 0x10e   :  { %v5202_v13 = vadd.f32 %v3694_v6, %v2140_v8  ;;  %v3615_v15 = vadd.f32 %v3614_v10, %v3613_v7  ;;  %v3696_v16 = vpop.f32.mrf.mxu1  ;;  %v22_v8 = vld [vmem:[%s5556_s0 + $0x38] sm:$0xff]  ;;  %v3175_v18 = vcombine.high %v21_v1, %v29_v4  ;;  %v3174_v44 = vcombine.low %v21_v1, %v29_v4 }
 0x10f   :  { %v3697_v19 = vadd.f32 %v3696_v16, %v3695_v9  ;;  %v3616_v20 = vpop.f32.mrf.mxu0  ;;  %v30_v9 = vld [vmem:[%s5556_s0 + $0x78] sm:$0xff] }
 0x110   :  { %v2145_v22 = vadd.f32 %v3615_v15, %v5056_v2  ;;  %v3698_v23 = vpop.f32.mrf.mxu1 }
 0x111   :  { %v3617_v28 = vpop.f32.mrf.mxu0 }
 0x112   :  { %v5211_v30 = vadd.f32 %v3697_v19, %v2145_v22  ;;  %v3618_v31 = vadd.f32 %v3617_v28, %v3616_v20  ;;  %v3699_v32 = vpop.f32.mrf.mxu1  ;;  %v3177_v20 = vcombine.high %v22_v8, %v30_v9 }
 0x113   :  { %v3700_v33 = vadd.f32 %v3699_v32, %v3698_v23  ;;  %v3619_v34 = vpop.f32.mrf.mxu0  ;;  %2647 = vmatmul.mubr.bf16.gmra.mxu0 %v3298_v21  ;;  %v37_v32 = vld [vmem:[%s5556_s0 + $0xb0] sm:$0xff] }
 0x114   :  { %v2148_v35 = vadd.f32 %v3618_v31, %v5056_v2  ;;  %v3701_v36 = vpop.f32.mrf.mxu1  ;;  %2767 = vmatmul.mubr.bf16.gmra.mxu1 %v3300_v26  ;;  %2654 = vmatprep.mubr.bf16.mxu0 %v3315_v27 }
 0x115   :  { %v3620_v37 = vpop.f32.mrf.mxu0  ;;  %2774 = vmatprep.mubr.bf16.mxu1 %v3317_v29 }
 0x116   :  { %v5217_v41 = vadd.f32 %v3700_v33, %v2148_v35  ;;  %v3621_v42 = vadd.f32 %v3620_v37, %v3619_v34  ;;  %v3702_v43 = vpop.f32.mrf.mxu1  ;;  %v45_v33 = vld [vmem:[%s5556_s0 + $0xf0] sm:$0xff]  ;;  %v38_v37 = vld [vmem:[%s5556_s0 + $0xb8] sm:$0xff] }
 0x117   :  { %v3703_v45 = vadd.f32 %v3702_v43, %v3701_v36  ;;  %v3622_v46 = vpop.f32.mrf.mxu0 }
 0x118   :  { %v2153_v48 = vadd.f32 %v3621_v42, %v5056_v2  ;;  %v3704_v49 = vpop.f32.mrf.mxu1 }
 0x119   :  { %v3623_v54 = vpop.f32.mrf.mxu0 }
 0x11a   :  { %v5223_v56 = vadd.f32 %v3703_v45, %v2153_v48  ;;  %v3624_v57 = vadd.f32 %v3623_v54, %v3622_v46  ;;  %v3705_v58 = vpop.f32.mrf.mxu1  ;;  %v3191_v48 = vcombine.high %v37_v32, %v45_v33 }
 0x11b   :  { %v3706_v59 = vadd.f32 %v3705_v58, %v3704_v49  ;;  %v3625_v60 = vpop.f32.mrf.mxu0  ;;  %2655 = vmatmul.mubr.bf16.gmra.mxu0 %v3314_v47  ;;  %v3176_v47 = vcombine.low %v22_v8, %v30_v9  ;;  %v62_v8 = vld [vmem:[%s5556_s0 + $0x178] sm:$0xff] }
 0x11c   :  { %v2156_v61 = vadd.f32 %v3624_v57, %v5056_v2  ;;  %v3707_v62 = vpop.f32.mrf.mxu1  ;;  %2775 = vmatmul.mubr.bf16.gmra.mxu1 %v3316_v51  ;;  %2662 = vmatprep.mubr.bf16.mxu0 %v3331_v52  ;;  %v3193_v51 = vcombine.high %v38_v37, %v46_v39 }
 0x11d   :  { %v3626_v0 = vpop.f32.mrf.mxu0  ;;  %2782 = vmatprep.mubr.bf16.mxu1 %v3333_v55 }
 0x11e   :  { %v5232_v5 = vadd.f32 %v3706_v59, %v2156_v61  ;;  %v3627_v6 = vadd.f32 %v3626_v0, %v3625_v60  ;;  %v3708_v7 = vpop.f32.mrf.mxu1  ;;  %v61_v0 = vld [vmem:[%s5556_s0 + $0x170] sm:$0xff] }
 0x11f   :  { %v3709_v10 = vadd.f32 %v3708_v7, %v3707_v62  ;;  %v3628_v11 = vpop.f32.mrf.mxu0  ;;  %v53_v62 = vld [vmem:[%s5556_s0 + $0x130] sm:$0xff]  ;;  %v54_v7 = vld [vmem:[%s5556_s0 + $0x138] sm:$0xff] }
 0x120   :  { %v2161_v15 = vadd.f32 %v3627_v6, %v5056_v2  ;;  %v3710_v16 = vpop.f32.mrf.mxu1 }
 0x121   :  { %v3629_v19 = vpop.f32.mrf.mxu0 }
 0x122   :  { %v5241_v21 = vadd.f32 %v3709_v10, %v2161_v15  ;;  %v3630_v22 = vadd.f32 %v3629_v19, %v3628_v11  ;;  %v3711_v23 = vpop.f32.mrf.mxu1  ;;  %v3190_v11 = vcombine.low %v37_v32, %v45_v33  ;;  %v3209_v19 = vcombine.high %v54_v7, %v62_v8  ;;  %v69_v32 = vld [vmem:[%s5556_s0 + $0x1b0] sm:$0xff] }
 0x123   :  { %v3712_v26 = vadd.f32 %v3711_v23, %v3710_v16  ;;  %v3631_v27 = vpop.f32.mrf.mxu0  ;;  %2663 = vmatmul.mubr.bf16.gmra.mxu0 %v3330_v12  ;;  %v3192_v16 = vcombine.low %v38_v37, %v46_v39  ;;  %v77_v33 = vld [vmem:[%s5556_s0 + $0x1f0] sm:$0xff]  ;;  %v70_v39 = vld [vmem:[%s5556_s0 + $0x1b8] sm:$0xff] }
 0x124   :  { %v2164_v28 = vadd.f32 %v3630_v22, %v5056_v2  ;;  %v3713_v29 = vpop.f32.mrf.mxu1  ;;  %2783 = vmatmul.mubr.bf16.gmra.mxu1 %v3332_v17  ;;  %2822 = vmatprep.mubr.bf16.mxu0 %v3175_v18  ;;  %v3207_v17 = vcombine.high %v53_v62, %v61_v0 }
 0x125   :  { %v3632_v31 = vpop.f32.mrf.mxu0  ;;  %2942 = vmatprep.mubr.bf16.mxu1 %v3177_v20 }
 0x126   :  { %v5250_v34 = vadd.f32 %v3712_v26, %v2164_v28  ;;  %v3633_v35 = vadd.f32 %v3632_v31, %v3631_v27  ;;  %v3714_v36 = vpop.f32.mrf.mxu1 }
 0x127   :  { %v3715_v42 = vadd.f32 %v3714_v36, %v3713_v29  ;;  %v3634_v43 = vpop.f32.mrf.mxu0 }
 0x128   :  { %v2169_v45 = vadd.f32 %v3633_v35, %v5056_v2  ;;  %v3716_v46 = vpop.f32.mrf.mxu1 }
 0x129   :  { %v3635_v49 = vpop.f32.mrf.mxu0 }
 0x12a   :  { %v5259_v52 = vadd.f32 %v3715_v42, %v2169_v45  ;;  %v3636_v54 = vadd.f32 %v3635_v49, %v3634_v43  ;;  %v3717_v55 = vpop.f32.mrf.mxu1  ;;  %v78_v42 = vld [vmem:[%s5556_s0 + $0x1f8] sm:$0xff]  ;;  %v3206_v45 = vcombine.low %v53_v62, %v61_v0  ;;  %v3223_v49 = vcombine.high %v69_v32, %v77_v33 }
 0x12b   :  { %v3718_v57 = vadd.f32 %v3717_v55, %v3716_v46  ;;  %v3637_v58 = vpop.f32.mrf.mxu0  ;;  %2823 = vmatmul.mubr.bf16.vlgmr.msra.gmra.mxu0 %v3174_v44 }
 0x12c   :  { %v2172_v59 = vadd.f32 %v3636_v54, %v5056_v2  ;;  %v3719_v60 = vpop.f32.mrf.mxu1  ;;  %2943 = vmatmul.mubr.bf16.vlgmr.msra.gmra.mxu1 %v3176_v47  ;;  %2830 = vmatprep.mubr.bf16.mxu0 %v3191_v48  ;;  %v3208_v48 = vcombine.low %v54_v7, %v62_v8  ;;  %v3225_v54 = vcombine.high %v70_v39, %v78_v42 }
 0x12d   :  { %v3638_v61 = vpop.f32.mrf.mxu0  ;;  %2950 = vmatprep.mubr.bf16.mxu1 %v3193_v51 }
 0x12e   :  { %v5268_v1 = vadd.f32 %v3718_v57, %v2172_v59  ;;  %v3639_v4 = vadd.f32 %v3638_v61, %v3637_v58  ;;  %v3720_v6 = vpop.f32.mrf.mxu1  ;;  %v85_v61 = vld [vmem:[%s5556_s0 + $0x230] sm:$0xff] }
 0x12f   :  { %v3721_v9 = vadd.f32 %v3720_v6, %v3719_v60  ;;  %v3640_v10 = vpop.f32.mrf.mxu0  ;;  %v94_v6 = vld [vmem:[%s5556_s0 + $0x278] sm:$0xff] }
 0x130   :  { %v2177_v12 = vadd.f32 %v3639_v4, %v5056_v2  ;;  %v3722_v15 = vpop.f32.mrf.mxu1  ;;  %v86_v4 = vld [vmem:[%s5556_s0 + $0x238] sm:$0xff] }
 0x131   :  { %v3641_v18 = vpop.f32.mrf.mxu0 }
 0x132   :  { %v5277_v20 = vadd.f32 %v3721_v9, %v2177_v12  ;;  %v3642_v22 = vadd.f32 %v3641_v18, %v3640_v10  ;;  %v3723_v23 = vpop.f32.mrf.mxu1  ;;  %v3222_v9 = vcombine.low %v69_v32, %v77_v33  ;;  %v3224_v12 = vcombine.low %v70_v39, %v78_v42 }
 0x133   :  { %v3724_v26 = vadd.f32 %v3723_v23, %v3722_v15  ;;  %v3643_v27 = vpop.f32.mrf.mxu0  ;;  %2831 = vmatmul.mubr.bf16.gmra.mxu0 %v3190_v11 }
 0x134   :  { %v2180_v28 = vadd.f32 %v3642_v22, %v5056_v2  ;;  %v3725_v29 = vpop.f32.mrf.mxu1  ;;  %2951 = vmatmul.mubr.bf16.gmra.mxu1 %v3192_v16  ;;  %2838 = vmatprep.mubr.bf16.mxu0 %v3207_v17  ;;  %v3241_v17 = vcombine.high %v86_v4, %v94_v6 }
 0x135   :  { %v3644_v31 = vpop.f32.mrf.mxu0  ;;  %2958 = vmatprep.mubr.bf16.mxu1 %v3209_v19 }
 0x136   :  { %v5286_v35 = vadd.f32 %v3724_v26, %v2180_v28  ;;  %v3645_v36 = vadd.f32 %v3644_v31, %v3643_v27  ;;  %v3726_v37 = vpop.f32.mrf.mxu1  ;;  %v109_v31 = vld [vmem:[%s5556_s0 + $0x2f0] sm:$0xff] }
 0x137   :  { %v3727_v43 = vadd.f32 %v3726_v37, %v3725_v29  ;;  %v3646_v44 = vpop.f32.mrf.mxu0  ;;  %v110_v37 = vld [vmem:[%s5556_s0 + $0x2f8] sm:$0xff] }
 0x138   :  { %v2185_v46 = vadd.f32 %v3645_v36, %v5056_v2  ;;  %v3728_v47 = vpop.f32.mrf.mxu1  ;;  %v93_v2 = vld [vmem:[%s5556_s0 + $0x270] sm:$0xff] }
 0x139   :  { %v3647_v51 = vpop.f32.mrf.mxu0  ;;  %v3239_v15 = vcombine.high %v85_v61, %v93_v2 }
 0x13a   :  { %v5295_v55 = vadd.f32 %v3727_v43, %v2185_v46  ;;  %v3729_v57 = vpop.f32.mrf.mxu1  ;;  %v3238_v43 = vcombine.low %v85_v61, %v93_v2  ;;  %v3240_v46 = vcombine.low %v86_v4, %v94_v6  ;;  %v125_v2 = vld [vmem:[%s5556_s0 + $0x370] sm:$0xff] }
 0x13b   :  { %v3747_v58 = vpop.f32.mrf.mxu0  ;;  %2839 = vmatmul.mubr.bf16.gmra.mxu0 %v3206_v45 }
 0x13c   :  { %v3829_v59 = vpop.f32.mrf.mxu1  ;;  %2959 = vmatmul.mubr.bf16.gmra.mxu1 %v3208_v48  ;;  %2846 = vmatprep.mubr.bf16.mxu0 %v3223_v49 }
 0x13d   :  { %v3748_v60 = vpop.f32.mrf.mxu0  ;;  %2966 = vmatprep.mubr.bf16.mxu1 %v3225_v54 }
 0x13e   :  { %v3749_v62 = vadd.f32 %v3748_v60, %v3747_v58  ;;  %v3830_v0 = vpop.f32.mrf.mxu1 }
 0x13f   :  { %v3831_v7 = vadd.f32 %v3830_v0, %v3829_v59  ;;  %v3750_v8 = vpop.f32.mrf.mxu0 }
 0x140   :  { %v2345_v10 = vadd.f32 %v3749_v62, %v5102_v24  ;;  %v3832_v11 = vpop.f32.mrf.mxu1  ;;  %v101_v24 = vld [vmem:[%s5556_s0 + $0x2b0] sm:$0xff] }
 0x141   :  { %v3751_v16 = vpop.f32.mrf.mxu0  ;;  %v3255_v47 = vcombine.high %v101_v24, %v109_v31 }
 0x142   :  { %v5310_v18 = vadd.f32 %v3831_v7, %v2345_v10  ;;  %v3752_v19 = vadd.f32 %v3751_v16, %v3750_v8  ;;  %v3833_v22 = vpop.f32.mrf.mxu1  ;;  %v126_v7 = vld [vmem:[%s5556_s0 + $0x378] sm:$0xff]  ;;  %v3254_v10 = vcombine.low %v101_v24, %v109_v31  ;;  %v141_v31 = vld [vmem:[%s5556_s0 + $0x3f0] sm:$0xff] }
 0x143   :  { %v3834_v23 = vadd.f32 %v3833_v22, %v3832_v11  ;;  %v3753_v26 = vpop.f32.mrf.mxu0  ;;  %2847 = vmatmul.mubr.bf16.gmra.mxu0 %v3222_v9 }
 0x144   :  { %v2348_v27 = vadd.f32 %v3752_v19, %v5123_v38  ;;  %v3835_v28 = vpop.f32.mrf.mxu1  ;;  %2967 = vmatmul.mubr.bf16.gmra.mxu1 %v3224_v12  ;;  %2854 = vmatprep.mubr.bf16.mxu0 %v3239_v15  ;;  %v102_v38 = vld [vmem:[%s5556_s0 + $0x2b8] sm:$0xff] }
 0x145   :  { %v3754_v29 = vpop.f32.mrf.mxu0  ;;  %2974 = vmatprep.mubr.bf16.mxu1 %v3241_v17  ;;  %v3257_v49 = vcombine.high %v102_v38, %v110_v37  ;;  %v3256_v15 = vcombine.low %v102_v38, %v110_v37 }
 0x146   :  { %v5319_v32 = vadd.f32 %v3834_v23, %v2348_v27  ;;  %v3755_v33 = vadd.f32 %v3754_v29, %v3753_v26  ;;  %v3836_v36 = vpop.f32.mrf.mxu1 }
 0x147   :  { %v3837_v39 = vadd.f32 %v3836_v36, %v3835_v28  ;;  %v3756_v42 = vpop.f32.mrf.mxu0 }
 0x148   :  { %v2353_v44 = vadd.f32 %v3755_v33, %v5139_v53  ;;  %v3838_v45 = vpop.f32.mrf.mxu1  ;;  %v117_v53 = vld [vmem:[%s5556_s0 + $0x330] sm:$0xff] }
 0x149   :  { %v3757_v48 = vpop.f32.mrf.mxu0  ;;  %v3271_v16 = vcombine.high %v117_v53, %v125_v2 }
 0x14a   :  { %v5328_v51 = vadd.f32 %v3837_v39, %v2353_v44  ;;  %v3758_v54 = vadd.f32 %v3757_v48, %v3756_v42  ;;  %v3839_v57 = vpop.f32.mrf.mxu1  ;;  %v142_v39 = vld [vmem:[%s5556_s0 + $0x3f8] sm:$0xff]  ;;  %v3270_v44 = vcombine.low %v117_v53, %v125_v2  ;;  %v157_v2 = vld [vmem:[%s5556_s0 + $0x470] sm:$0xff] }
 0x14b   :  { %v3840_v58 = vadd.f32 %v3839_v57, %v3838_v45  ;;  %v3759_v59 = vpop.f32.mrf.mxu0  ;;  %2855 = vmatmul.mubr.bf16.gmra.mxu0 %v3238_v43 }
 0x14c   :  { %v2356_v60 = vadd.f32 %v3758_v54, %v5148_v63  ;;  %v3841_v62 = vpop.f32.mrf.mxu1  ;;  %2975 = vmatmul.mubr.bf16.gmra.mxu1 %v3240_v46  ;;  %2862 = vmatprep.mubr.bf16.mxu0 %v3255_v47  ;;  %v118_v63 = vld [vmem:[%s5556_s0 + $0x338] sm:$0xff] }
 0x14d   :  { %v3760_v61 = vpop.f32.mrf.mxu0  ;;  %2982 = vmatprep.mubr.bf16.mxu1 %v3257_v49  ;;  %v3273_v19 = vcombine.high %v118_v63, %v126_v7  ;;  %v3272_v47 = vcombine.low %v118_v63, %v126_v7 }
 0x14e   :  { %v5337_v0 = vadd.f32 %v3840_v58, %v2356_v60  ;;  %v3761_v4 = vadd.f32 %v3760_v61, %v3759_v59  ;;  %v3842_v6 = vpop.f32.mrf.mxu1 }
 0x14f   :  { %v3843_v8 = vadd.f32 %v3842_v6, %v3841_v62  ;;  %v3762_v9 = vpop.f32.mrf.mxu0 }
 0x150   :  { %v2361_v11 = vadd.f32 %v3761_v4, %v5157_v14  ;;  %v3844_v12 = vpop.f32.mrf.mxu1  ;;  %v133_v14 = vld [vmem:[%s5556_s0 + $0x3b0] sm:$0xff] }
 0x151   :  { %v3763_v17 = vpop.f32.mrf.mxu0  ;;  %v3287_v48 = vcombine.high %v133_v14, %v141_v31 }
 0x152   :  { %v5346_v22 = vadd.f32 %v3843_v8, %v2361_v11  ;;  %v3764_v23 = vadd.f32 %v3763_v17, %v3762_v9  ;;  %v3845_v26 = vpop.f32.mrf.mxu1  ;;  %v158_v8 = vld [vmem:[%s5556_s0 + $0x478] sm:$0xff]  ;;  %v3286_v11 = vcombine.low %v133_v14, %v141_v31  ;;  %v173_v31 = vld [vmem:[%s5556_s0 + $0x4f0] sm:$0xff] }
 0x153   :  { %v3846_v27 = vadd.f32 %v3845_v26, %v3844_v12  ;;  %v3765_v28 = vpop.f32.mrf.mxu0  ;;  %2863 = vmatmul.mubr.bf16.gmra.mxu0 %v3254_v10 }
 0x154   :  { %v2364_v29 = vadd.f32 %v3764_v23, %v5166_v25  ;;  %v3847_v33 = vpop.f32.mrf.mxu1  ;;  %2983 = vmatmul.mubr.bf16.gmra.mxu1 %v3256_v15  ;;  %2870 = vmatprep.mubr.bf16.mxu0 %v3271_v16  ;;  %v134_v25 = vld [vmem:[%s5556_s0 + $0x3b8] sm:$0xff] }
 0x155   :  { %v3766_v24 = vpop.f32.mrf.mxu0  ;;  %2990 = vmatprep.mubr.bf16.mxu1 %v3273_v19  ;;  %v3289_v54 = vcombine.high %v134_v25, %v142_v39  ;;  %v3288_v16 = vcombine.low %v134_v25, %v142_v39 }
 0x156   :  { %v5355_v36 = vadd.f32 %v3846_v27, %v2364_v29  ;;  %v3767_v38 = vadd.f32 %v3766_v24, %v3765_v28  ;;  %v3848_v37 = vpop.f32.mrf.mxu1 }
 0x157   :  { %v3849_v42 = vadd.f32 %v3848_v37, %v3847_v33  ;;  %v3768_v43 = vpop.f32.mrf.mxu0 }
 0x158   :  { %v2369_v45 = vadd.f32 %v3767_v38, %v5175_v40  ;;  %v3850_v46 = vpop.f32.mrf.mxu1  ;;  %v149_v40 = vld [vmem:[%s5556_s0 + $0x430] sm:$0xff] }
 0x159   :  { %v3769_v49 = vpop.f32.mrf.mxu0  ;;  %v3303_v17 = vcombine.high %v149_v40, %v157_v2 }
 0x15a   :  { %v5364_v57 = vadd.f32 %v3849_v42, %v2369_v45  ;;  %v3770_v58 = vadd.f32 %v3769_v49, %v3768_v43  ;;  %v3851_v59 = vpop.f32.mrf.mxu1  ;;  %v174_v42 = vld [vmem:[%s5556_s0 + $0x4f8] sm:$0xff]  ;;  %v3302_v45 = vcombine.low %v149_v40, %v157_v2 }
 0x15b   :  { %v3852_v60 = vadd.f32 %v3851_v59, %v3850_v46  ;;  %v3771_v62 = vpop.f32.mrf.mxu0  ;;  %2871 = vmatmul.mubr.bf16.gmra.mxu0 %v3270_v44 }
 0x15c   :  { %v2372_v61 = vadd.f32 %v3770_v58, %v5184_v50  ;;  %v3853_v4 = vpop.f32.mrf.mxu1  ;;  %2991 = vmatmul.mubr.bf16.gmra.mxu1 %v3272_v47  ;;  %2878 = vmatprep.mubr.bf16.mxu0 %v3287_v48  ;;  %v150_v50 = vld [vmem:[%s5556_s0 + $0x438] sm:$0xff] }
 0x15d   :  { %v3772_v53 = vpop.f32.mrf.mxu0  ;;  %2998 = vmatprep.mubr.bf16.mxu1 %v3289_v54  ;;  %v3305_v23 = vcombine.high %v150_v50, %v158_v8  ;;  %v3304_v48 = vcombine.low %v150_v50, %v158_v8  ;;  %v182_v8 = vld [vmem:[%s5556_s0 + $0x538] sm:$0xff] }
 0x15e   :  { %v5373_v6 = vadd.f32 %v3852_v60, %v2372_v61  ;;  %v3773_v63 = vadd.f32 %v3772_v53, %v3771_v62  ;;  %v3854_v7 = vpop.f32.mrf.mxu1 }
 0x15f   :  { %v3855_v9 = vadd.f32 %v3854_v7, %v3853_v4  ;;  %v3774_v10 = vpop.f32.mrf.mxu0 }
 0x160   :  { %v2377_v12 = vadd.f32 %v3773_v63, %v5193_v3  ;;  %v3856_v15 = vpop.f32.mrf.mxu1  ;;  %v165_v3 = vld [vmem:[%s5556_s0 + $0x4b0] sm:$0xff] }
 0x161   :  { %v3775_v19 = vpop.f32.mrf.mxu0  ;;  %v3319_v49 = vcombine.high %v165_v3, %v173_v31 }
 0x162   :  { %v5382_v26 = vadd.f32 %v3855_v9, %v2377_v12  ;;  %v3776_v27 = vadd.f32 %v3775_v19, %v3774_v10  ;;  %v3857_v28 = vpop.f32.mrf.mxu1  ;;  %v3337_v19 = vcombine.high %v182_v8, %v182_v8 }
 0x163   :  { %v3858_v29 = vadd.f32 %v3857_v28, %v3856_v15  ;;  %v3777_v33 = vpop.f32.mrf.mxu0  ;;  %2879 = vmatmul.mubr.bf16.gmra.mxu0 %v3286_v11 }
 0x164   :  { %v2380_v24 = vadd.f32 %v3776_v27, %v5202_v13  ;;  %v3859_v38 = vpop.f32.mrf.mxu1  ;;  %2999 = vmatmul.mubr.bf16.gmra.mxu1 %v3288_v16  ;;  %2886 = vmatprep.mubr.bf16.mxu0 %v3303_v17  ;;  %v166_v13 = vld [vmem:[%s5556_s0 + $0x4b8] sm:$0xff] }
 0x165   :  { %v3778_v14 = vpop.f32.mrf.mxu0  ;;  %3006 = vmatprep.mubr.bf16.mxu1 %v3305_v23  ;;  %v3321_v58 = vcombine.high %v166_v13, %v174_v42  ;;  %v3320_v15 = vcombine.low %v166_v13, %v174_v42 }
 0x166   :  { %v5391_v37 = vadd.f32 %v3858_v29, %v2380_v24  ;;  %v3779_v25 = vadd.f32 %v3778_v14, %v3777_v33  ;;  %v3860_v39 = vpop.f32.mrf.mxu1 }
 0x167   :  { %v3861_v43 = vadd.f32 %v3860_v39, %v3859_v38  ;;  %v3780_v44 = vpop.f32.mrf.mxu0 }
 0x168   :  { %v2385_v46 = vadd.f32 %v3779_v25, %v5211_v30  ;;  %v3862_v47 = vpop.f32.mrf.mxu1  ;;  %v181_v30 = vld [vmem:[%s5556_s0 + $0x530] sm:$0xff] }
 0x169   :  { %v3781_v54 = vpop.f32.mrf.mxu0  ;;  %v3335_v16 = vcombine.high %v181_v30, %v181_v30  ;;  %v3334_v13 = vcombine.low %v181_v30, %v181_v30 }
 0x16a   :  { %v5400_v59 = vadd.f32 %v3861_v43, %v2385_v46  ;;  %v3782_v60 = vadd.f32 %v3781_v54, %v3780_v44  ;;  %v3863_v62 = vpop.f32.mrf.mxu1  ;;  %v3336_v44 = vcombine.low %v182_v8, %v182_v8 }
 0x16b   :  { %v3864_v61 = vadd.f32 %v3863_v62, %v3862_v47  ;;  %v3783_v4 = vpop.f32.mrf.mxu0  ;;  %2887 = vmatmul.mubr.bf16.gmra.mxu0 %v3302_v45 }
 0x16c   :  { %v2388_v53 = vadd.f32 %v3782_v60, %v5217_v41  ;;  %v3865_v63 = vpop.f32.mrf.mxu1  ;;  %3007 = vmatmul.mubr.bf16.gmra.mxu1 %v3304_v48  ;;  %2894 = vmatprep.mubr.bf16.mxu0 %v3319_v49  ;;  %v3318_v41 = vcombine.low %v165_v3, %v173_v31 }
 0x16d   :  { %v3784_v40 = vpop.f32.mrf.mxu0  ;;  %3014 = vmatprep.mubr.bf16.mxu1 %v3321_v58 }
 0x16e   :  { %v5406_v2 = vadd.f32 %v3864_v61, %v2388_v53  ;;  %v3785_v7 = vadd.f32 %v3784_v40, %v3783_v4  ;;  %v3866_v50 = vpop.f32.mrf.mxu1 }
 0x16f   :  { %v3867_v9 = vadd.f32 %v3866_v50, %v3865_v63  ;;  %v3786_v10 = vpop.f32.mrf.mxu0 }
 0x170   :  { %v2393_v11 = vadd.f32 %v3785_v7, %v5223_v56  ;;  %v3868_v12 = vpop.f32.mrf.mxu1 }
 0x171   :  { %v3787_v17 = vpop.f32.mrf.mxu0 }
 0x172   :  { %v5412_v23 = vadd.f32 %v3867_v9, %v2393_v11  ;;  %v3788_v27 = vadd.f32 %v3787_v17, %v3786_v10  ;;  %v3869_v28 = vpop.f32.mrf.mxu1 }
 0x173   :  { %v3870_v29 = vadd.f32 %v3869_v28, %v3868_v12  ;;  %v3789_v33 = vpop.f32.mrf.mxu0  ;;  %2895 = vmatmul.mubr.bf16.gmra.mxu0 %v3318_v41 }
 0x174   :  { %v2396_v24 = vadd.f32 %v3788_v27, %v5232_v5  ;;  %v3871_v38 = vpop.f32.mrf.mxu1  ;;  %3015 = vmatmul.mubr.bf16.gmra.mxu1 %v3320_v15  ;;  %2902 = vmatprep.mubr.bf16.mxu0 %v3335_v16 }
 0x175   :  { %v3790_v14 = vpop.f32.mrf.mxu0  ;;  %3022 = vmatprep.mubr.bf16.mxu1 %v3337_v19 }
 0x176   :  { %v5415_v56 = vadd.f32 %v3870_v29, %v2396_v24  ;;  %v3791_v3 = vadd.f32 %v3790_v14, %v3789_v33  ;;  %v3872_v31 = vpop.f32.mrf.mxu1 }
 0x177   :  { %v3873_v25 = vadd.f32 %v3872_v31, %v3871_v38  ;;  %v3792_v39 = vpop.f32.mrf.mxu0 }
 0x178   :  { %v2401_v42 = vadd.f32 %v3791_v3, %v5241_v21  ;;  %v3874_v43 = vpop.f32.mrf.mxu1 }
 0x179   :  { %v3793_v45 = vpop.f32.mrf.mxu0 }
 0x17a   :  { %v5418_v46 = vadd.f32 %v3873_v25, %v2401_v42  ;;  %v3794_v5 = vadd.f32 %v3793_v45, %v3792_v39  ;;  %v3875_v47 = vpop.f32.mrf.mxu1 }
 0x17b   :  { %v3876_v48 = vadd.f32 %v3875_v47, %v3874_v43  ;;  %v3795_v49 = vpop.f32.mrf.mxu0  ;;  %2903 = vmatmul.mubr.bf16.gmra.mxu0 %v3334_v13 }
 0x17c   :  { %v2404_v54 = vadd.f32 %v3794_v5, %v5250_v34  ;;  %v3877_v58 = vpop.f32.mrf.mxu1  ;;  %3023 = vmatmul.mubr.bf16.gmra.mxu1 %v3336_v44 }
 0x17d   :  { %v3796_v60 = vpop.f32.mrf.mxu0 }
 0x17e   :  { %v5421_v62 = vadd.f32 %v3876_v48, %v2404_v54  ;;  %v3797_v61 = vadd.f32 %v3796_v60, %v3795_v49  ;;  %v3878_v4 = vpop.f32.mrf.mxu1 }
 0x17f   :  { %v3879_v21 = vadd.f32 %v3878_v4, %v3877_v58  ;;  %v3798_v53 = vpop.f32.mrf.mxu0 }
 0x180   :  { %v2409_v63 = vadd.f32 %v3797_v61, %v5259_v52  ;;  %v3880_v40 = vpop.f32.mrf.mxu1 }
 0x181   :  { %v3799_v30 = vpop.f32.mrf.mxu0 }
 0x182   :  { %v5424_v7 = vadd.f32 %v3879_v21, %v2409_v63  ;;  %v3800_v50 = vadd.f32 %v3799_v30, %v3798_v53  ;;  %v3881_v8 = vpop.f32.mrf.mxu1 }
 0x183   :  { %v3882_v9 = vadd.f32 %v3881_v8, %v3880_v40  ;;  %v3801_v10 = vpop.f32.mrf.mxu0 }
 0x184   :  { %v2412_v34 = vadd.f32 %v3800_v50, %v5268_v1  ;;  %v3883_v41 = vpop.f32.mrf.mxu1 }
 0x185   :  { %v3802_v11 = vpop.f32.mrf.mxu0 }
 0x186   :  { %v5427_v12 = vadd.f32 %v3882_v9, %v2412_v34  ;;  %v3803_v15 = vadd.f32 %v3802_v11, %v3801_v10  ;;  %v3884_v16 = vpop.f32.mrf.mxu1 }
 0x187   :  { %v3885_v17 = vadd.f32 %v3884_v16, %v3883_v41  ;;  %v3804_v19 = vpop.f32.mrf.mxu0 }
 0x188   :  { %v2417_v52 = vadd.f32 %v3803_v15, %v5277_v20  ;;  %v3886_v27 = vpop.f32.mrf.mxu1 }
 0x189   :  { %v3805_v28 = vpop.f32.mrf.mxu0 }
 0x18a   :  { %v5430_v29 = vadd.f32 %v3885_v17, %v2417_v52  ;;  %v3806_v33 = vadd.f32 %v3805_v28, %v3804_v19  ;;  %v3887_v24 = vpop.f32.mrf.mxu1 }
 0x18b   :  { %v3888_v38 = vadd.f32 %v3887_v24, %v3886_v27  ;;  %v3807_v14 = vpop.f32.mrf.mxu0 }
 0x18c   :  { %v2420_v1 = vadd.f32 %v3806_v33, %v5286_v35  ;;  %v3889_v3 = vpop.f32.mrf.mxu1 }
 0x18d   :  { %v3808_v31 = vpop.f32.mrf.mxu0 }
 0x18e   :  { %v5433_v25 = vadd.f32 %v3888_v38, %v2420_v1  ;;  %v3809_v39 = vadd.f32 %v3808_v31, %v3807_v14  ;;  %v3890_v13 = vpop.f32.mrf.mxu1 }
 0x18f   :  { %v3891_v42 = vadd.f32 %v3890_v13, %v3889_v3  ;;  %v3810_v43 = vpop.f32.mrf.mxu0 }
 0x190   :  { %v2425_v20 = vadd.f32 %v3809_v39, %v5295_v55  ;;  %v3892_v44 = vpop.f32.mrf.mxu1 }
 0x191   :  { %v3811_v45 = vpop.f32.mrf.mxu0 }
 0x192   :  { %v5436_v5 = vadd.f32 %v3891_v42, %v2425_v20  ;;  %v3893_v47 = vpop.f32.mrf.mxu1 }
 0x193   :  { %v3911_v48 = vpop.f32.mrf.mxu0 }
 0x194   :  { %v3993_v49 = vpop.f32.mrf.mxu1 }
 0x195   :  { %v3912_v54 = vpop.f32.mrf.mxu0 }
 0x196   :  { %v3913_v58 = vadd.f32 %v3912_v54, %v3911_v48  ;;  %v3994_v35 = vpop.f32.mrf.mxu1 }
 0x197   :  { %v3995_v60 = vadd.f32 %v3994_v35, %v3993_v49  ;;  %v3914_v61 = vpop.f32.mrf.mxu0 }
 0x198   :  { %v2585_v4 = vadd.f32 %v3913_v58, %v5310_v18  ;;  %v3996_v21 = vpop.f32.mrf.mxu1 }
 0x199   :  { %v3915_v53 = vpop.f32.mrf.mxu0 }
 0x19a   :  { %v5439_v63 = vadd.f32 %v3995_v60, %v2585_v4  ;;  %v3916_v40 = vadd.f32 %v3915_v53, %v3914_v61  ;;  %v3997_v55 = vpop.f32.mrf.mxu1 }
 0x19b   :  { %v3998_v30 = vadd.f32 %v3997_v55, %v3996_v21  ;;  %v3917_v50 = vpop.f32.mrf.mxu0 }
 0x19c   :  { %v2588_v8 = vadd.f32 %v3916_v40, %v5319_v32  ;;  %v3999_v9 = vpop.f32.mrf.mxu1 }
 0x19d   :  { %v3918_v10 = vpop.f32.mrf.mxu0 }
 0x19e   :  { %v5442_v34 = vadd.f32 %v3998_v30, %v2588_v8  ;;  %v3919_v41 = vadd.f32 %v3918_v10, %v3917_v50  ;;  %v4000_v11 = vpop.f32.mrf.mxu1 }
 0x19f   :  { %v4001_v15 = vadd.f32 %v4000_v11, %v3999_v9  ;;  %v3920_v16 = vpop.f32.mrf.mxu0 }
 0x1a0   :  { %v2593_v18 = vadd.f32 %v3919_v41, %v5328_v51  ;;  %v4002_v17 = vpop.f32.mrf.mxu1 }
 0x1a1   :  { %v3921_v19 = vpop.f32.mrf.mxu0 }
 0x1a2   :  { %v5445_v52 = vadd.f32 %v4001_v15, %v2593_v18  ;;  %v3922_v27 = vadd.f32 %v3921_v19, %v3920_v16  ;;  %v4003_v28 = vpop.f32.mrf.mxu1 }
 0x1a3   :  { %v4004_v33 = vadd.f32 %v4003_v28, %v4002_v17  ;;  %v3923_v24 = vpop.f32.mrf.mxu0 }
 0x1a4   :  { %v2596_v32 = vadd.f32 %v3922_v27, %v5337_v0  ;;  %v4005_v38 = vpop.f32.mrf.mxu1 }
 0x1a5   :  { %v3924_v14 = vpop.f32.mrf.mxu0 }
 0x1a6   :  { %v5448_v1 = vadd.f32 %v4004_v33, %v2596_v32  ;;  %v3925_v3 = vadd.f32 %v3924_v14, %v3923_v24  ;;  %v4006_v31 = vpop.f32.mrf.mxu1 }
 0x1a7   :  { %v4007_v39 = vadd.f32 %v4006_v31, %v4005_v38  ;;  %v3926_v13 = vpop.f32.mrf.mxu0 }
 0x1a8   :  { %v2601_v51 = vadd.f32 %v3925_v3, %v5346_v22  ;;  %v4008_v42 = vpop.f32.mrf.mxu1 }
 0x1a9   :  { %v3927_v43 = vpop.f32.mrf.mxu0 }
 0x1aa   :  { %v5451_v20 = vadd.f32 %v4007_v39, %v2601_v51  ;;  %v3928_v44 = vadd.f32 %v3927_v43, %v3926_v13  ;;  %v4009_v45 = vpop.f32.mrf.mxu1 }
 0x1ab   :  { %v4010_v47 = vadd.f32 %v4009_v45, %v4008_v42  ;;  %v3929_v48 = vpop.f32.mrf.mxu0 }
 0x1ac   :  { %v2604_v0 = vadd.f32 %v3928_v44, %v5355_v36  ;;  %v4011_v49 = vpop.f32.mrf.mxu1 }
 0x1ad   :  { %v3930_v54 = vpop.f32.mrf.mxu0 }
 0x1ae   :  { %v5454_v58 = vadd.f32 %v4010_v47, %v2604_v0  ;;  %v3931_v35 = vadd.f32 %v3930_v54, %v3929_v48  ;;  %v4012_v60 = vpop.f32.mrf.mxu1 }
 0x1af   :  { %v4013_v61 = vadd.f32 %v4012_v60, %v4011_v49  ;;  %v3932_v4 = vpop.f32.mrf.mxu0 }
 0x1b0   :  { %v2609_v22 = vadd.f32 %v3931_v35, %v5364_v57  ;;  %v4014_v21 = vpop.f32.mrf.mxu1 }
 0x1b1   :  { %v3933_v53 = vpop.f32.mrf.mxu0 }
 0x1b2   :  { %v5457_v40 = vadd.f32 %v4013_v61, %v2609_v22  ;;  %v3934_v55 = vadd.f32 %v3933_v53, %v3932_v4  ;;  %v4015_v30 = vpop.f32.mrf.mxu1 }
 0x1b3   :  { %v4016_v50 = vadd.f32 %v4015_v30, %v4014_v21  ;;  %v3935_v8 = vpop.f32.mrf.mxu0 }
 0x1b4   :  { %v2612_v36 = vadd.f32 %v3934_v55, %v5373_v6  ;;  %v4017_v9 = vpop.f32.mrf.mxu1 }
 0x1b5   :  { %v3936_v10 = vpop.f32.mrf.mxu0 }
 0x1b6   :  { %v5460_v41 = vadd.f32 %v4016_v50, %v2612_v36  ;;  %v3937_v11 = vadd.f32 %v3936_v10, %v3935_v8  ;;  %v4018_v15 = vpop.f32.mrf.mxu1 }
 0x1b7   :  { %v4019_v16 = vadd.f32 %v4018_v15, %v4017_v9  ;;  %v3938_v18 = vpop.f32.mrf.mxu0 }
 0x1b8   :  { %v2617_v57 = vadd.f32 %v3937_v11, %v5382_v26  ;;  %v4020_v17 = vpop.f32.mrf.mxu1 }
 0x1b9   :  { %v3939_v19 = vpop.f32.mrf.mxu0 }
 0x1ba   :  { %v5463_v27 = vadd.f32 %v4019_v16, %v2617_v57  ;;  %v3940_v28 = vadd.f32 %v3939_v19, %v3938_v18  ;;  %v4021_v33 = vpop.f32.mrf.mxu1 }
 0x1bb   :  { %v4022_v24 = vadd.f32 %v4021_v33, %v4020_v17  ;;  %v3941_v32 = vpop.f32.mrf.mxu0 }
 0x1bc   :  { %v2620_v6 = vadd.f32 %v3940_v28, %v5391_v37  ;;  %v4023_v38 = vpop.f32.mrf.mxu1 }
 0x1bd   :  { %v3942_v14 = vpop.f32.mrf.mxu0 }
 0x1be   :  { %v5466_v3 = vadd.f32 %v4022_v24, %v2620_v6  ;;  %v3943_v31 = vadd.f32 %v3942_v14, %v3941_v32  ;;  %v4024_v39 = vpop.f32.mrf.mxu1 }
 0x1bf   :  { %v4025_v13 = vadd.f32 %v4024_v39, %v4023_v38  ;;  %v3944_v51 = vpop.f32.mrf.mxu0 }
 0x1c0   :  { %v2625_v26 = vadd.f32 %v3943_v31, %v5400_v59  ;;  %v4026_v42 = vpop.f32.mrf.mxu1 }
 0x1c1   :  { %v3945_v43 = vpop.f32.mrf.mxu0 }
 0x1c2   :  { %v5469_v44 = vadd.f32 %v4025_v13, %v2625_v26  ;;  %v3946_v45 = vadd.f32 %v3945_v43, %v3944_v51  ;;  %v4027_v47 = vpop.f32.mrf.mxu1 }
 0x1c3   :  { %v4028_v48 = vadd.f32 %v4027_v47, %v4026_v42  ;;  %v3947_v0 = vpop.f32.mrf.mxu0 }
 0x1c4   :  { %v2628_v37 = vadd.f32 %v3946_v45, %v5406_v2  ;;  %v4029_v49 = vpop.f32.mrf.mxu1 }
 0x1c5   :  { %v3948_v54 = vpop.f32.mrf.mxu0 }
 0x1c6   :  { %v5472_v35 = vadd.f32 %v4028_v48, %v2628_v37  ;;  %v3949_v60 = vadd.f32 %v3948_v54, %v3947_v0  ;;  %v4030_v61 = vpop.f32.mrf.mxu1 }
 0x1c7   :  { %v4031_v4 = vadd.f32 %v4030_v61, %v4029_v49  ;;  %v3950_v22 = vpop.f32.mrf.mxu0 }
 0x1c8   :  { %v2633_v59 = vadd.f32 %v3949_v60, %v5412_v23  ;;  %v4032_v21 = vpop.f32.mrf.mxu1 }
 0x1c9   :  { %v3951_v53 = vpop.f32.mrf.mxu0 }
 0x1ca   :  { %v5475_v55 = vadd.f32 %v4031_v4, %v2633_v59  ;;  %v3952_v30 = vadd.f32 %v3951_v53, %v3950_v22  ;;  %v4033_v50 = vpop.f32.mrf.mxu1 }
 0x1cb   :  { %v4034_v8 = vadd.f32 %v4033_v50, %v4032_v21  ;;  %v3953_v36 = vpop.f32.mrf.mxu0 }
 0x1cc   :  { %v2636_v2 = vadd.f32 %v3952_v30, %v5415_v56  ;;  %v4035_v9 = vpop.f32.mrf.mxu1 }
 0x1cd   :  { %v3954_v10 = vpop.f32.mrf.mxu0 }
 0x1ce   :  { %v5478_v11 = vadd.f32 %v4034_v8, %v2636_v2  ;;  %v3955_v15 = vadd.f32 %v3954_v10, %v3953_v36  ;;  %v4036_v16 = vpop.f32.mrf.mxu1 }
 0x1cf   :  { %v4037_v18 = vadd.f32 %v4036_v16, %v4035_v9  ;;  %v3956_v57 = vpop.f32.mrf.mxu0 }
 0x1d0   :  { %v2641_v23 = vadd.f32 %v3955_v15, %v5418_v46  ;;  %v4038_v17 = vpop.f32.mrf.mxu1 }
 0x1d1   :  { %v3957_v19 = vpop.f32.mrf.mxu0 }
 0x1d2   :  { %v5481_v28 = vadd.f32 %v4037_v18, %v2641_v23  ;;  %v3958_v33 = vadd.f32 %v3957_v19, %v3956_v57  ;;  %v4039_v24 = vpop.f32.mrf.mxu1 }
 0x1d3   :  { %v4040_v32 = vadd.f32 %v4039_v24, %v4038_v17  ;;  %v3959_v6 = vpop.f32.mrf.mxu0 }
 0x1d4   :  { %v2644_v56 = vadd.f32 %v3958_v33, %v5421_v62  ;;  %v4041_v38 = vpop.f32.mrf.mxu1 }
 0x1d5   :  { %v3960_v14 = vpop.f32.mrf.mxu0 }
 0x1d6   :  { %v5484_v31 = vadd.f32 %v4040_v32, %v2644_v56  ;;  %v3961_v39 = vadd.f32 %v3960_v14, %v3959_v6  ;;  %v4042_v13 = vpop.f32.mrf.mxu1 }
 0x1d7   :  { %v4043_v51 = vadd.f32 %v4042_v13, %v4041_v38  ;;  %v3962_v26 = vpop.f32.mrf.mxu0 }
 0x1d8   :  { %v2649_v46 = vadd.f32 %v3961_v39, %v5424_v7  ;;  %v4044_v42 = vpop.f32.mrf.mxu1 }
 0x1d9   :  { %v3963_v43 = vpop.f32.mrf.mxu0 }
 0x1da   :  { %v5487_v45 = vadd.f32 %v4043_v51, %v2649_v46  ;;  %v3964_v47 = vadd.f32 %v3963_v43, %v3962_v26  ;;  %v4045_v48 = vpop.f32.mrf.mxu1 }
 0x1db   :  { %v4046_v0 = vadd.f32 %v4045_v48, %v4044_v42  ;;  %v3965_v37 = vpop.f32.mrf.mxu0 }
 0x1dc   :  { %v2652_v62 = vadd.f32 %v3964_v47, %v5427_v12  ;;  %v4047_v49 = vpop.f32.mrf.mxu1 }
 0x1dd   :  { %v3966_v54 = vpop.f32.mrf.mxu0 }
 0x1de   :  { %v5490_v60 = vadd.f32 %v4046_v0, %v2652_v62  ;;  %v3967_v61 = vadd.f32 %v3966_v54, %v3965_v37  ;;  %v4048_v4 = vpop.f32.mrf.mxu1 }
 0x1df   :  { %v4049_v22 = vadd.f32 %v4048_v4, %v4047_v49  ;;  %v3968_v59 = vpop.f32.mrf.mxu0 }
 0x1e0   :  { %v2657_v7 = vadd.f32 %v3967_v61, %v5430_v29  ;;  %v4050_v21 = vpop.f32.mrf.mxu1 }
 0x1e1   :  { %v3969_v53 = vpop.f32.mrf.mxu0 }
 0x1e2   :  { %v5493_v30 = vadd.f32 %v4049_v22, %v2657_v7  ;;  %v3970_v50 = vadd.f32 %v3969_v53, %v3968_v59  ;;  %v4051_v8 = vpop.f32.mrf.mxu1 }
 0x1e3   :  { %v4052_v36 = vadd.f32 %v4051_v8, %v4050_v21  ;;  %v3971_v2 = vpop.f32.mrf.mxu0 }
 0x1e4   :  { %v2660_v12 = vadd.f32 %v3970_v50, %v5433_v25  ;;  %v4053_v9 = vpop.f32.mrf.mxu1 }
 0x1e5   :  { %v3972_v10 = vpop.f32.mrf.mxu0 }
 0x1e6   :  { %v5496_v15 = vadd.f32 %v4052_v36, %v2660_v12  ;;  %v3973_v16 = vadd.f32 %v3972_v10, %v3971_v2  ;;  %v4054_v18 = vpop.f32.mrf.mxu1 }
 0x1e7   :  { %v4055_v57 = vadd.f32 %v4054_v18, %v4053_v9  ;;  %v3974_v23 = vpop.f32.mrf.mxu0 }
 0x1e8   :  { %v2665_v29 = vadd.f32 %v3973_v16, %v5436_v5  ;;  %v4056_v17 = vpop.f32.mrf.mxu1 }
 0x1e9   :  { %v3975_v19 = vpop.f32.mrf.mxu0 }
 0x1ea   :  { %v5499_v33 = vadd.f32 %v4055_v57, %v2665_v29  ;;  %v4057_v24 = vpop.f32.mrf.mxu1 }
 0x1eb   :  { %v4075_v32 = vpop.f32.mrf.mxu0 }
 0x1ec   :  { %v4157_v6 = vpop.f32.mrf.mxu1 }
 0x1ed   :  { %v4076_v56 = vpop.f32.mrf.mxu0 }
 0x1ee   :  { %v4077_v38 = vadd.f32 %v4076_v56, %v4075_v32  ;;  %v4158_v25 = vpop.f32.mrf.mxu1 }
 0x1ef   :  { %v4078_v14 = vpop.f32.mrf.mxu0  ;;  %v4159_v26 = vadd.f32 %v4158_v25, %v4157_v6 }
 0x1f0   :  { %v2825_v39 = vadd.f32 %v4077_v38, %v5439_v63  ;;  %v4160_v13 = vpop.f32.mrf.mxu1 }
 0x1f1   :  { %v4079_v51 = vpop.f32.mrf.mxu0 }
 0x1f2   :  { %v4080_v46 = vadd.f32 %v4079_v51, %v4078_v14  ;;  %v4161_v42 = vpop.f32.mrf.mxu1  ;;  %v2945_v5 = vadd.f32 %v4159_v26, %v2825_v39 }
 0x1f3   :  { %v4081_v43 = vpop.f32.mrf.mxu0  ;;  %v4162_v48 = vadd.f32 %v4161_v42, %v4160_v13 }
 0x1f4   :  { %v2828_v47 = vadd.f32 %v4080_v46, %v5442_v34  ;;  %v4163_v0 = vpop.f32.mrf.mxu1  ;;  %v3030_v4 = vmax.f32 %v2945_v5, 0.0 }
 0x1f5   :  { %v4082_v37 = vpop.f32.mrf.mxu0 }
 0x1f6   :  { %v2948_v62 = vadd.f32 %v4162_v48, %v2828_v47  ;;  %v4083_v49 = vadd.f32 %v4082_v37, %v4081_v43  ;;  %v4164_v54 = vpop.f32.mrf.mxu1 }
 0x1f7   :  { %v4084_v61 = vpop.f32.mrf.mxu0  ;;  %v4165_v53 = vadd.f32 %v4164_v54, %v4163_v0 }
 0x1f8   :  { %v3031_v22 = vmax.f32 %v2948_v62, 0.0  ;;  %v2833_v63 = vadd.f32 %v4083_v49, %v5445_v52  ;;  %v4166_v59 = vpop.f32.mrf.mxu1 }
 0x1f9   :  { %v4085_v7 = vpop.f32.mrf.mxu0 }
 0x1fa   :  { %v3511_v21 = vpack.c.bf16 %v3031_v22, %v3030_v4  ;;  %v4086_v50 = vadd.f32 %v4085_v7, %v4084_v61  ;;  %v4167_v8 = vpop.f32.mrf.mxu1  ;;  %v2953_v34 = vadd.f32 %v4165_v53, %v2833_v63 }
 0x1fb   :  { %v4087_v36 = vpop.f32.mrf.mxu0  ;;  %v4168_v12 = vadd.f32 %v4167_v8, %v4166_v59 }
 0x1fc   :  { %3512 = vst [vmem:[%s5558_s3] sm:$0xff] %v3511_v21   ;;  %v2836_v2 = vadd.f32 %v4086_v50, %v5448_v1  ;;  %v4169_v9 = vpop.f32.mrf.mxu1  ;;  %v3032_v23 = vmax.f32 %v2953_v34, 0.0 }
 0x1fd   :  { %v4088_v10 = vpop.f32.mrf.mxu0 }
 0x1fe   :  { %v2956_v16 = vadd.f32 %v4168_v12, %v2836_v2  ;;  %v4089_v18 = vadd.f32 %v4088_v10, %v4087_v36  ;;  %v4170_v52 = vpop.f32.mrf.mxu1 }
 0x1ff   :  { %v4090_v57 = vpop.f32.mrf.mxu0  ;;  %v4171_v6 = vadd.f32 %v4170_v52, %v4169_v9 }
 0x200   :  { %v3033_v29 = vmax.f32 %v2956_v16, 0.0  ;;  %v2841_v17 = vadd.f32 %v4089_v18, %v5451_v20  ;;  %v4172_v19 = vpop.f32.mrf.mxu1 }
 0x201   :  { %v4091_v24 = vpop.f32.mrf.mxu0 }
 0x202   :  { %v3516_v32 = vpack.c.bf16 %v3033_v29, %v3032_v23  ;;  %v4092_v56 = vadd.f32 %v4091_v24, %v4090_v57  ;;  %v4173_v38 = vpop.f32.mrf.mxu1  ;;  %v2961_v1 = vadd.f32 %v4171_v6, %v2841_v17 }
 0x203   :  { %v4093_v25 = vpop.f32.mrf.mxu0  ;;  %v4174_v39 = vadd.f32 %v4173_v38, %v4172_v19 }
 0x204   :  { %3558 = vst [vmem:[%s5558_s3 + $0x8] sm:$0xff] %v3516_v32   ;;  %v2844_v14 = vadd.f32 %v4092_v56, %v5454_v58  ;;  %v4175_v13 = vpop.f32.mrf.mxu1  ;;  %v3034_v43 = vmax.f32 %v2961_v1, 0.0 }
 0x205   :  { %v4094_v51 = vpop.f32.mrf.mxu0 }
 0x206   :  { %v2964_v26 = vadd.f32 %v4174_v39, %v2844_v14  ;;  %v4095_v46 = vadd.f32 %v4094_v51, %v4093_v25  ;;  %v4176_v20 = vpop.f32.mrf.mxu1 }
 0x207   :  { %v4096_v42 = vpop.f32.mrf.mxu0  ;;  %v4177_v62 = vadd.f32 %v4176_v20, %v4175_v13 }
 0x208   :  { %v3035_v5 = vmax.f32 %v2964_v26, 0.0  ;;  %v2849_v47 = vadd.f32 %v4095_v46, %v5457_v40  ;;  %v4178_v48 = vpop.f32.mrf.mxu1 }
 0x209   :  { %v4097_v0 = vpop.f32.mrf.mxu0 }
 0x20a   :  { %v3521_v37 = vpack.c.bf16 %v3035_v5, %v3034_v43  ;;  %v4098_v49 = vadd.f32 %v4097_v0, %v4096_v42  ;;  %v4179_v54 = vpop.f32.mrf.mxu1  ;;  %v2969_v58 = vadd.f32 %v4177_v62, %v2849_v47 }
 0x20b   :  { %v4099_v61 = vpop.f32.mrf.mxu0  ;;  %v4180_v22 = vadd.f32 %v4179_v54, %v4178_v48 }
 0x20c   :  { %3559 = vst [vmem:[%s5558_s3 + $0x10] sm:$0xff] %v3521_v37   ;;  %v2852_v4 = vadd.f32 %v4098_v49, %v5460_v41  ;;  %v4181_v63 = vpop.f32.mrf.mxu1  ;;  %v3036_v50 = vmax.f32 %v2969_v58, 0.0 }
 0x20d   :  { %v4100_v59 = vpop.f32.mrf.mxu0 }
 0x20e   :  { %v2972_v7 = vadd.f32 %v4180_v22, %v2852_v4  ;;  %v4101_v21 = vadd.f32 %v4100_v59, %v4099_v61  ;;  %v4182_v40 = vpop.f32.mrf.mxu1 }
 0x20f   :  { %v4102_v53 = vpop.f32.mrf.mxu0  ;;  %v4183_v9 = vadd.f32 %v4182_v40, %v4181_v63 }
 0x210   :  { %v3037_v8 = vmax.f32 %v2972_v7, 0.0  ;;  %v2857_v36 = vadd.f32 %v4101_v21, %v5463_v27  ;;  %v4184_v34 = vpop.f32.mrf.mxu1 }
 0x211   :  { %v4103_v2 = vpop.f32.mrf.mxu0 }
 0x212   :  { %v3526_v12 = vpack.c.bf16 %v3037_v8, %v3036_v50  ;;  %v4104_v10 = vadd.f32 %v4103_v2, %v4102_v53  ;;  %v4185_v16 = vpop.f32.mrf.mxu1  ;;  %v2977_v41 = vadd.f32 %v4183_v9, %v2857_v36 }
 0x213   :  { %v4105_v18 = vpop.f32.mrf.mxu0  ;;  %v4186_v57 = vadd.f32 %v4185_v16, %v4184_v34 }
 0x214   :  { %3560 = vst [vmem:[%s5558_s3 + $0x18] sm:$0xff] %v3526_v12   ;;  %v2860_v52 = vadd.f32 %v4104_v10, %v5466_v3  ;;  %v4187_v23 = vpop.f32.mrf.mxu1  ;;  %v3038_v32 = vmax.f32 %v2977_v41, 0.0 }
 0x215   :  { %v4106_v29 = vpop.f32.mrf.mxu0 }
 0x216   :  { %v2980_v17 = vadd.f32 %v4186_v57, %v2860_v52  ;;  %v4107_v19 = vadd.f32 %v4106_v29, %v4105_v18  ;;  %v4188_v27 = vpop.f32.mrf.mxu1 }
 0x217   :  { %v4108_v24 = vpop.f32.mrf.mxu0  ;;  %v4189_v14 = vadd.f32 %v4188_v27, %v4187_v23 }
 0x218   :  { %v3039_v6 = vmax.f32 %v2980_v17, 0.0  ;;  %v2865_v56 = vadd.f32 %v4107_v19, %v5469_v44  ;;  %v4190_v38 = vpop.f32.mrf.mxu1 }
 0x219   :  { %v4109_v25 = vpop.f32.mrf.mxu0 }
 0x21a   :  { %v3531_v1 = vpack.c.bf16 %v3039_v6, %v3038_v32  ;;  %v4110_v39 = vadd.f32 %v4109_v25, %v4108_v24  ;;  %v4191_v13 = vpop.f32.mrf.mxu1  ;;  %v2985_v3 = vadd.f32 %v4189_v14, %v2865_v56 }
 0x21b   :  { %v4111_v51 = vpop.f32.mrf.mxu0  ;;  %v4192_v46 = vadd.f32 %v4191_v13, %v4190_v38 }
 0x21c   :  { %3561 = vst [vmem:[%s5558_s3 + $0x20] sm:$0xff] %v3531_v1   ;;  %v2868_v26 = vadd.f32 %v4110_v39, %v5472_v35  ;;  %v4193_v20 = vpop.f32.mrf.mxu1  ;;  %v3040_v48 = vmax.f32 %v2985_v3, 0.0 }
 0x21d   :  { %v4112_v42 = vpop.f32.mrf.mxu0 }
 0x21e   :  { %v2988_v43 = vadd.f32 %v4192_v46, %v2868_v26  ;;  %v4113_v5 = vadd.f32 %v4112_v42, %v4111_v51  ;;  %v4194_v44 = vpop.f32.mrf.mxu1 }
 0x21f   :  { %v4114_v47 = vpop.f32.mrf.mxu0  ;;  %v4195_v61 = vadd.f32 %v4194_v44, %v4193_v20 }
 0x220   :  { %v3041_v0 = vmax.f32 %v2988_v43, 0.0  ;;  %v2873_v37 = vadd.f32 %v4113_v5, %v5475_v55  ;;  %v4196_v62 = vpop.f32.mrf.mxu1 }
 0x221   :  { %v4115_v49 = vpop.f32.mrf.mxu0 }
 0x222   :  { %v3536_v54 = vpack.c.bf16 %v3041_v0, %v3040_v48  ;;  %v4116_v58 = vadd.f32 %v4115_v49, %v4114_v47  ;;  %v4197_v4 = vpop.f32.mrf.mxu1  ;;  %v2993_v35 = vadd.f32 %v4195_v61, %v2873_v37 }
 0x223   :  { %v4117_v22 = vpop.f32.mrf.mxu0  ;;  %v4198_v59 = vadd.f32 %v4197_v4, %v4196_v62 }
 0x224   :  { %3562 = vst [vmem:[%s5558_s3 + $0x28] sm:$0xff] %v3536_v54   ;;  %v2876_v63 = vadd.f32 %v4116_v58, %v5478_v11  ;;  %v4199_v7 = vpop.f32.mrf.mxu1  ;;  %v3042_v8 = vmax.f32 %v2993_v35, 0.0 }
 0x225   :  { %v4118_v21 = vpop.f32.mrf.mxu0 }
 0x226   :  { %v2996_v40 = vadd.f32 %v4198_v59, %v2876_v63  ;;  %v4119_v53 = vadd.f32 %v4118_v21, %v4117_v22  ;;  %v4200_v55 = vpop.f32.mrf.mxu1 }
 0x227   :  { %v4120_v50 = vpop.f32.mrf.mxu0  ;;  %v4201_v10 = vadd.f32 %v4200_v55, %v4199_v7 }
 0x228   :  { %v3043_v36 = vmax.f32 %v2996_v40, 0.0  ;;  %v2881_v34 = vadd.f32 %v4119_v53, %v5481_v28  ;;  %v4202_v2 = vpop.f32.mrf.mxu1 }
 0x229   :  { %v4121_v12 = vpop.f32.mrf.mxu0 }
 0x22a   :  { %v3541_v9 = vpack.c.bf16 %v3043_v36, %v3042_v8  ;;  %v4122_v16 = vadd.f32 %v4121_v12, %v4120_v50  ;;  %v4203_v18 = vpop.f32.mrf.mxu1  ;;  %v3001_v11 = vadd.f32 %v4201_v10, %v2881_v34 }
 0x22b   :  { %v4123_v41 = vpop.f32.mrf.mxu0  ;;  %v4204_v57 = vadd.f32 %v4203_v18, %v4202_v2 }
 0x22c   :  { %3563 = vst [vmem:[%s5558_s3 + $0x30] sm:$0xff] %v3541_v9   ;;  %v2884_v52 = vadd.f32 %v4122_v16, %v5484_v31  ;;  %v4205_v23 = vpop.f32.mrf.mxu1  ;;  %v3044_v24 = vmax.f32 %v3001_v11, 0.0 }
 0x22d   :  { %v4124_v29 = vpop.f32.mrf.mxu0 }
 0x22e   :  { %v3004_v17 = vadd.f32 %v4204_v57, %v2884_v52  ;;  %v4125_v19 = vadd.f32 %v4124_v29, %v4123_v41  ;;  %v4206_v28 = vpop.f32.mrf.mxu1 }
 0x22f   :  { %v4126_v27 = vpop.f32.mrf.mxu0  ;;  %v4207_v1 = vadd.f32 %v4206_v28, %v4205_v23 }
 0x230   :  { %v3045_v32 = vmax.f32 %v3004_v17, 0.0  ;;  %v2889_v6 = vadd.f32 %v4125_v19, %v5487_v45  ;;  %v4208_v56 = vpop.f32.mrf.mxu1 }
 0x231   :  { %v4127_v38 = vpop.f32.mrf.mxu0 }
 0x232   :  { %v3546_v25 = vpack.c.bf16 %v3045_v32, %v3044_v24  ;;  %v4128_v14 = vadd.f32 %v4127_v38, %v4126_v27  ;;  %v4209_v39 = vpop.f32.mrf.mxu1  ;;  %v3009_v31 = vadd.f32 %v4207_v1, %v2889_v6 }
 0x233   :  { %v4129_v13 = vpop.f32.mrf.mxu0  ;;  %v4210_v3 = vadd.f32 %v4209_v39, %v4208_v56 }
 0x234   :  { %3564 = vst [vmem:[%s5558_s3 + $0x38] sm:$0xff] %v3546_v25   ;;  %v2892_v51 = vadd.f32 %v4128_v14, %v5490_v60  ;;  %v4211_v26 = vpop.f32.mrf.mxu1  ;;  %v3046_v5 = vmax.f32 %v3009_v31, 0.0 }
 0x235   :  { %v4130_v46 = vpop.f32.mrf.mxu0 }
 0x236   :  { %v3012_v20 = vadd.f32 %v4210_v3, %v2892_v51  ;;  %v4131_v42 = vadd.f32 %v4130_v46, %v4129_v13  ;;  %v4212_v45 = vpop.f32.mrf.mxu1 }
 0x237   :  { %v4132_v43 = vpop.f32.mrf.mxu0  ;;  %v4213_v62 = vadd.f32 %v4212_v45, %v4211_v26 }
 0x238   :  { %v3047_v44 = vmax.f32 %v3012_v20, 0.0  ;;  %v2897_v47 = vadd.f32 %v4131_v42, %v5493_v30  ;;  %v4214_v48 = vpop.f32.mrf.mxu1 }
 0x239   :  { %v4133_v0 = vpop.f32.mrf.mxu0 }
 0x23a   :  { %v3551_v37 = vpack.c.bf16 %v3047_v44, %v3046_v5  ;;  %v4134_v49 = vadd.f32 %v4133_v0, %v4132_v43  ;;  %v4215_v54 = vpop.f32.mrf.mxu1  ;;  %v3017_v60 = vadd.f32 %v4213_v62, %v2897_v47 }
 0x23b   :  { %v4135_v61 = vpop.f32.mrf.mxu0  ;;  %v4216_v4 = vadd.f32 %v4215_v54, %v4214_v48 }
 0x23c   :  { %3565 = vst [vmem:[%s5558_s3 + $0x40] sm:$0xff] %v3551_v37   ;;  %v2900_v58 = vadd.f32 %v4134_v49, %v5496_v15  ;;  %v4217_v22 = vpop.f32.mrf.mxu1  ;;  %v3048_v21 = vmax.f32 %v3017_v60, 0.0 }
 0x23d   :  { %v4136_v35 = vpop.f32.mrf.mxu0 }
 0x23e   :  { %v3020_v63 = vadd.f32 %v4216_v4, %v2900_v58  ;;  %v4137_v59 = vadd.f32 %v4136_v35, %v4135_v61  ;;  %v4218_v30 = vpop.f32.mrf.mxu1 }
 0x23f   :  { %v4138_v7 = vpop.f32.mrf.mxu0  ;;  %v4219_v55 = vadd.f32 %v4218_v30, %v4217_v22 }
 0x240   :  { %v3049_v40 = vmax.f32 %v3020_v63, 0.0  ;;  %v2905_v53 = vadd.f32 %v4137_v59, %v5499_v33  ;;  %v4220_v50 = vpop.f32.mrf.mxu1 }
 0x241   :  { %v4139_v8 = vpop.f32.mrf.mxu0 }
 0x242   :  { %v3556_v36 = vpack.c.bf16 %v3049_v40, %v3048_v21  ;;  %v3025_v34 = vadd.f32 %v4219_v55, %v2905_v53  ;;  %v4221_v2 = vpop.f32.mrf.mxu1 }
 0x244   :  { %3566 = vst [vmem:[%s5558_s3 + $0x48] sm:$0xff] %v3556_v36   ;;  %v3050_v15 = vmax.f32 %v3025_v34, 0.0 }
 0x246   :  { %v3507_v12 = vpack.c.bf16 %v3050_v15, %v3050_v15 }
 0x248   :  { %3156 = vst [vmem:[%s5558_s3 + $0x50] sm:$0xf] %v3507_v12 }

// kernel: dueling_net_forward.6
= control target key start
LH: loop header
LB: loop body
LE: loop exit
PB: predicated region body
PF: predicated region fallthrough
CT: control target
= control target key end

     0   :  { %vm2160_vm0 = vmmov 0   ;;  %s2806_s1 = inlined_call_operand.vmem [shape: bf16[1152,128], index: 1, kind: input, shape index: {}]   ;;  %s2807_s0 = inlined_call_operand.vmem [shape: bf16[104,1152], index: 0, kind: input, shape index: {}]   ;;  %s2808_s2 = inlined_call_operand.vmem [shape: f32[1,128], index: 2, kind: input, shape index: {}]   ;;  %s2809_s3 = inlined_call_operand.vmem [shape: bf16[104,128], index: 3, kind: output, shape index: {}]  }
   0x1   :  { %v2000_v0 = vld [vmem:[%s2806_s1 + $0x78] sm:$0xff]   ;;  %v2002_v2 = vld [vmem:[%s2806_s1 + $0x70] sm:$0xff]   ;;  %v2004_v4 = vld [vmem:[%s2806_s1 + $0x68] sm:$0xff]  }
   0x2   :  { %v2001_v1 = vld [vmem:[%s2806_s1 + $0x38] sm:$0xff]   ;;  %1982 = vmatprep.subr.bf16.mxu1 %v2000_v0  ;;  %1691 = vmatprep.subr.bf16.mxu0 %v2000_v0  ;;  %v2003_v3 = vld [vmem:[%s2806_s1 + $0x30] sm:$0xff]   ;;  %v2005_v5 = vld [vmem:[%s2806_s1 + $0x28] sm:$0xff]  }
   0x3   :  { %1990 = vmatpush3.bf16.msra.mxu1 %v2001_v1  ;;  %1692 = vmatpush3.bf16.msra.mxu0 %v2001_v1  ;;  %v2006_v6 = vld [vmem:[%s2806_s1 + $0x60] sm:$0xff]   ;;  %v2008_v8 = vld [vmem:[%s2806_s1 + $0x58] sm:$0xff]   ;;  %v2010_v10 = vld [vmem:[%s2806_s1 + $0x50] sm:$0xff]  }
   0x4   :  { %1983 = vmatprep.subr.bf16.mxu1 %v2002_v2  ;;  %1693 = vmatprep.subr.bf16.mxu0 %v2002_v2  ;;  %v2007_v7 = vld [vmem:[%s2806_s1 + $0x20] sm:$0xff]   ;;  %v2009_v9 = vld [vmem:[%s2806_s1 + $0x18] sm:$0xff]   ;;  %v2011_v13 = vld [vmem:[%s2806_s1 + $0x10] sm:$0xff]  }
   0x5   :  { %v2018_v11 = vld [vmem:[%s2807_s0 + $0x124] ss:$36 sps:$4 sm:$0xff]   ;;  %v2022_v20 = vld [vmem:[%s2806_s1 + $0xf8] sm:$0xff]   ;;  %v2026_v24 = vld [vmem:[%s2806_s1 + $0xf0] sm:$0xff]  }
   0x6   :  { %v2021_v12 = vld [vmem:[%s2807_s0 + $0x4] ss:$36 sps:$4 sm:$0xff]   ;;  %1035 = vmatprep.mubr.bf16.mxu1 %v2018_v11  ;;  %v2024_v21 = vld [vmem:[%s2806_s1 + $0x178] sm:$0xff]   ;;  %v2028_v25 = vld [vmem:[%s2806_s1 + $0x170] sm:$0xff]  }
   0x7   :  { %1991 = vmatpush3.bf16.msra.mxu1 %v2003_v3  ;;  %1694 = vmatpush3.bf16.msra.mxu0 %v2003_v3  ;;  %v2012_v14 = vld [vmem:[%s2806_s1 + $0x48] sm:$0xff]   ;;  %v2014_v16 = vld [vmem:[%s2806_s1 + $0x40] sm:$0xff]   ;;  %v2023_v22 = vld [vmem:[%s2806_s1 + $0xb8] sm:$0xff]  }
   0x8   :  { %1984 = vmatprep.subr.bf16.mxu1 %v2004_v4  ;;  %1695 = vmatprep.subr.bf16.mxu0 %v2004_v4  ;;  %v2013_v15 = vld [vmem:[%s2806_s1 + $0x8] sm:$0xff]   ;;  %v2015_v17 = vld [vmem:[%s2806_s1] sm:$0xff]   ;;  %v2025_v23 = vld [vmem:[%s2806_s1 + $0x138] sm:$0xff]  }
   0x9   :  { %1003 = vmatprep.mubr.bf16.mxu0 %v2021_v12  ;;  %v2016_v18 = vld [vmem:[%s2807_s0 + $0x120] ss:$36 sps:$4 sm:$0xff]   ;;  %v2030_v26 = vld [vmem:[%s2807_s0 + $0x4c] ss:$36 sps:$4 sm:$0xff]   ;;  %v2044_v39 = vld [vmem:[%s2807_s0 + $0x94] ss:$36 sps:$4 sm:$0xff]  }
   0xa   :  { %v2019_v19 = vld [vmem:[%s2807_s0] ss:$36 sps:$4 sm:$0xff]   ;;  %v2027_v27 = vld [vmem:[%s2806_s1 + $0xb0] sm:$0xff]   ;;  %v2032_v30 = vld [vmem:[%s2806_s1 + $0xe8] sm:$0xff]  }
   0xb   :  { %1992 = vmatpush3.bf16.msra.mxu1 %v2005_v5  ;;  %1696 = vmatpush3.bf16.msra.mxu0 %v2005_v5  ;;  %v2036_v28 = vld [vmem:[%s2807_s0 + $0x16c] ss:$36 sps:$4 sm:$0xff]   ;;  %v2040_v36 = vld [vmem:[%s2806_s1 + $0xe0] sm:$0xff]   ;;  %v2046_v43 = vld [vmem:[%s2806_s1 + $0xd8] sm:$0xff]  }
   0xc   :  { %1985 = vmatprep.subr.bf16.mxu1 %v2006_v6  ;;  %1697 = vmatprep.subr.bf16.mxu0 %v2006_v6  ;;  %v2029_v29 = vld [vmem:[%s2806_s1 + $0x130] sm:$0xff]   ;;  %v2033_v31 = vld [vmem:[%s2807_s0 + $0x48] ss:$36 sps:$4 sm:$0xff]   ;;  %v2042_v37 = vld [vmem:[%s2806_s1 + $0x160] sm:$0xff]  }
   0xd   :  { %v2035_v32 = vld [vmem:[%s2806_s1 + $0x168] sm:$0xff]   ;;  %v2041_v38 = vld [vmem:[%s2806_s1 + $0xa0] sm:$0xff]   ;;  %v75_v40 = vld [vmem:[%s2807_s0 + $0x1b0] sm:$0xff] }
   0xe   :  { %v2034_v33 = vld [vmem:[%s2806_s1 + $0xa8] sm:$0xff]   ;;  %v2043_v41 = vld [vmem:[%s2806_s1 + $0x120] sm:$0xff]   ;;  %v1550_v42 = vcombine.high %v75_v40, %v75_v40  ;;  %v2047_v44 = vld [vmem:[%s2807_s0 + $0x90] ss:$36 sps:$4 sm:$0xff]   ;;  %v1549_v48 = vcombine.low %v75_v40, %v75_v40 }
   0xf   :  { %1993 = vmatpush3.bf16.msra.mxu1 %v2007_v7  ;;  %1698 = vmatpush3.bf16.msra.mxu0 %v2007_v7  ;;  %v2039_v34 = vld [vmem:[%s2807_s0 + $0x168] ss:$36 sps:$4 sm:$0xff]   ;;  %v2049_v45 = vld [vmem:[%s2806_s1 + $0x158] sm:$0xff]   ;;  %v2053_v49 = vld [vmem:[%s2806_s1 + $0xd0] sm:$0xff]   ;;  %v2159_v7 = vmov 0.0  }
  0x10   :  { %1986 = vmatprep.subr.bf16.mxu1 %v2008_v8  ;;  %1699 = vmatprep.subr.bf16.mxu0 %v2008_v8  ;;  %v2038_v35 = vld [vmem:[%s2806_s1 + $0x128] sm:$0xff]   ;;  %v2048_v46 = vld [vmem:[%s2806_s1 + $0x98] sm:$0xff]   ;;  %v2055_v50 = vld [vmem:[%s2806_s1 + $0x150] sm:$0xff]  }
  0x11   :  { %v2051_v47 = vld [vmem:[%s2806_s1 + $0x118] sm:$0xff]   ;;  %v2054_v51 = vld [vmem:[%s2806_s1 + $0x90] sm:$0xff]   ;;  %v2059_v54 = vld [vmem:[%s2806_s1 + $0xc8] sm:$0xff]  }
  0x12   :  { %v2057_v52 = vld [vmem:[%s2807_s0 + $0xdc] ss:$36 sps:$4 sm:$0xff]   ;;  %v2056_v53 = vld [vmem:[%s2806_s1 + $0x110] sm:$0xff]   ;;  %v2062_v56 = vld [vmem:[%s2806_s1 + $0x148] sm:$0xff]  }
  0x13   :  { %1994 = vmatpush3.bf16.msra.mxu1 %v2009_v9  ;;  %1700 = vmatpush3.bf16.msra.mxu0 %v2009_v9  ;;  %v2060_v55 = vld [vmem:[%s2807_s0 + $0xd8] ss:$36 sps:$4 sm:$0xff]   ;;  %v2061_v57 = vld [vmem:[%s2806_s1 + $0x88] sm:$0xff]   ;;  %v2064_v59 = vld [vmem:[%s2806_s1 + $0xc0] sm:$0xff]  }
  0x14   :  { %1987 = vmatprep.subr.bf16.mxu1 %v2010_v10  ;;  %1701 = vmatprep.subr.bf16.mxu0 %v2010_v10  ;;  %v2063_v58 = vld [vmem:[%s2806_s1 + $0x108] sm:$0xff]   ;;  %v2066_v60 = vld [vmem:[%s2806_s1 + $0x140] sm:$0xff]   ;;  %v2073_v63 = vld [vmem:[%s2807_s0 + $0x14] ss:$36 sps:$4 sm:$0xff]  }
  0x15   :  { %v2070_v61 = vld [vmem:[%s2807_s0 + $0xc] ss:$36 sps:$4 sm:$0xff]   ;;  %v2065_v62 = vld [vmem:[%s2806_s1 + $0x80] sm:$0xff]   ;;  %v2074_v3 = vld [vmem:[%s2806_s1 + $0x1f8] sm:$0xff]  }
  0x16   :  { %v2067_v0 = vld [vmem:[%s2806_s1 + $0x100] sm:$0xff]   ;;  %v2068_v1 = vld [vmem:[%s2807_s0 + $0x8] ss:$36 sps:$4 sm:$0xff]   ;;  %v2071_v2 = vld [vmem:[%s2807_s0 + $0x10] ss:$36 sps:$4 sm:$0xff]  }
  0x17   :  { %1995 = vmatpush3.bf16.msra.mxu1 %v2011_v13  ;;  %1702 = vmatpush3.bf16.msra.mxu0 %v2011_v13  ;;  %v2075_v4 = vld [vmem:[%s2806_s1 + $0x1b8] sm:$0xff]   ;;  %v2078_v6 = vld [vmem:[%s2806_s1 + $0x1f0] sm:$0xff]   ;;  %v2085_v11 = vld [vmem:[%s2806_s1 + $0x1e8] sm:$0xff]  }
  0x18   :  { %1988 = vmatprep.subr.bf16.mxu1 %v2012_v14  ;;  %1703 = vmatprep.subr.bf16.mxu0 %v2012_v14  ;;  %v2076_v5 = vld [vmem:[%s2807_s0 + $0x54] ss:$36 sps:$4 sm:$0xff]   ;;  %v2081_v9 = vld [vmem:[%s2807_s0 + $0x5c] ss:$36 sps:$4 sm:$0xff]  }
  0x19   :  { %v2079_v8 = vld [vmem:[%s2806_s1 + $0x238] sm:$0xff]   ;;  %v2083_v10 = vld [vmem:[%s2806_s1 + $0x1b0] sm:$0xff]  }
  0x1a   :  { %v2086_v12 = vld [vmem:[%s2806_s1 + $0x230] sm:$0xff]   ;;  %v2084_v14 = vld [vmem:[%s2807_s0 + $0x58] ss:$36 sps:$4 sm:$0xff]  }
  0x1b   :  { %1996 = vmatpush3.bf16.msra.mxu1 %v2013_v15  ;;  %1704 = vmatpush3.bf16.msra.mxu0 %v2013_v15  ;;  %v2080_v13 = vld [vmem:[%s2807_s0 + $0x50] ss:$36 sps:$4 sm:$0xff]   ;;  %v2087_v15 = vld [vmem:[%s2807_s0 + $0x9c] ss:$36 sps:$4 sm:$0xff]  }
  0x1c   :  { %1989 = vmatprep.subr.bf16.mxu1 %v2014_v16  ;;  %1705 = vmatprep.subr.bf16.mxu0 %v2014_v16  ;;  %v2089_v16 = vld [vmem:[%s2806_s1 + $0x1a8] sm:$0xff]   ;;  %v2115_v40 = vld [vmem:[%s2807_s0 + $0x174] ss:$36 sps:$4 sm:$0xff]  }
  0x1f   :  { %1997 = vmatpush3.bf16.msra.mxu1 %v2015_v17  ;;  %1706 = vmatpush3.bf16.msra.mxu0 %v2015_v17  ;;  %v2091_v17 = vld [vmem:[%s2807_s0 + $0xa4] ss:$36 sps:$4 sm:$0xff]  }
  0x20   :  { %1749 = vmatprep.subr.bf16.mxu1 %v2022_v20  ;;  %1807 = vmatprep.subr.bf16.mxu0 %v2024_v21  ;;  %v2096_v20 = vld [vmem:[%s2806_s1 + $0x1a0] sm:$0xff]   ;;  %v2090_v21 = vld [vmem:[%s2807_s0 + $0x98] ss:$36 sps:$4 sm:$0xff]  }
  0x22   :  { %1036 = vmatmul.mubr.bf16.vlgmr.msra.gmra.mxu1 %v2016_v18  ;;  %1004 = vmatmul.mubr.bf16.vlgmr.msra.gmra.mxu0 %v2019_v19  ;;  %v2094_v18 = vld [vmem:[%s2806_s1 + $0x1e0] sm:$0xff]   ;;  %v2095_v19 = vld [vmem:[%s2806_s1 + $0x228] sm:$0xff]  }
  0x23   :  { %1750 = vmatpush3.bf16.msra.mxu1 %v2023_v22  ;;  %1808 = vmatpush3.bf16.msra.mxu0 %v2025_v23  ;;  %v2093_v22 = vld [vmem:[%s2807_s0 + $0xa0] ss:$36 sps:$4 sm:$0xff]  }
  0x24   :  { %1751 = vmatprep.subr.bf16.mxu1 %v2026_v24  ;;  %1809 = vmatprep.subr.bf16.mxu0 %v2028_v25  ;;  %v2097_v23 = vld [vmem:[%s2807_s0 + $0xe4] ss:$36 sps:$4 sm:$0xff]   ;;  %v2100_v24 = vld [vmem:[%s2807_s0 + $0xec] ss:$36 sps:$4 sm:$0xff]   ;;  %v2103_v25 = vld [vmem:[%s2806_s1 + $0x1d8] sm:$0xff]  }
  0x25   :  { %1011 = vmatprep.mubr.bf16.mxu0 %v2030_v26  ;;  %1043 = vmatprep.mubr.bf16.mxu1 %v2036_v28  ;;  %v2104_v26 = vld [vmem:[%s2806_s1 + $0x220] sm:$0xff]  }
  0x26   :  { %v2099_v28 = vld [vmem:[%s2807_s0 + $0xe0] ss:$36 sps:$4 sm:$0xff]  }
  0x27   :  { %1752 = vmatpush3.bf16.msra.mxu1 %v2027_v27  ;;  %1810 = vmatpush3.bf16.msra.mxu0 %v2029_v29  ;;  %v2105_v27 = vld [vmem:[%s2806_s1 + $0x198] sm:$0xff]   ;;  %v2102_v29 = vld [vmem:[%s2807_s0 + $0xe8] ss:$36 sps:$4 sm:$0xff]  }
  0x28   :  { %1753 = vmatprep.subr.bf16.mxu1 %v2032_v30  ;;  %1811 = vmatprep.subr.bf16.mxu0 %v2035_v32  ;;  %v2112_v30 = vld [vmem:[%s2806_s1 + $0x1d0] sm:$0xff]  }
  0x29   :  { %v2114_v32 = vld [vmem:[%s2806_s1 + $0x190] sm:$0xff]  }
  0x2a   :  { %1012 = vmatmul.mubr.bf16.gmra.mxu0 %v2033_v31  ;;  %1044 = vmatmul.mubr.bf16.gmra.mxu1 %v2039_v34  ;;  %v2113_v31 = vld [vmem:[%s2806_s1 + $0x218] sm:$0xff]  }
  0x2b   :  { %1754 = vmatpush3.bf16.msra.mxu1 %v2034_v33  ;;  %1812 = vmatpush3.bf16.msra.mxu0 %v2038_v35  ;;  %v2106_v33 = vld [vmem:[%s2807_s0 + $0x12c] ss:$36 sps:$4 sm:$0xff]   ;;  %v2109_v34 = vld [vmem:[%s2807_s0 + $0x134] ss:$36 sps:$4 sm:$0xff]  }
  0x2c   :  { %1755 = vmatprep.subr.bf16.mxu1 %v2040_v36  ;;  %1813 = vmatprep.subr.bf16.mxu0 %v2042_v37  ;;  %v2121_v35 = vld [vmem:[%s2806_s1 + $0x1c8] sm:$0xff]   ;;  %v2122_v36 = vld [vmem:[%s2806_s1 + $0x210] sm:$0xff]  }
  0x2d   :  { %1019 = vmatprep.mubr.bf16.mxu0 %v2044_v39  ;;  %1051 = vmatprep.mubr.bf16.mxu1 %v1550_v42  ;;  %v2108_v37 = vld [vmem:[%s2807_s0 + $0x128] ss:$36 sps:$4 sm:$0xff]  }
  0x2e   :  { %v2123_v39 = vld [vmem:[%s2806_s1 + $0x188] sm:$0xff]  }
  0x2f   :  { %1756 = vmatpush3.bf16.msra.mxu1 %v2041_v38  ;;  %1814 = vmatpush3.bf16.msra.mxu0 %v2043_v41  ;;  %v2111_v38 = vld [vmem:[%s2807_s0 + $0x130] ss:$36 sps:$4 sm:$0xff]   ;;  %v2128_v41 = vld [vmem:[%s2806_s1 + $0x1c0] sm:$0xff]   ;;  %v2129_v42 = vld [vmem:[%s2806_s1 + $0x208] sm:$0xff]  }
  0x30   :  { %1757 = vmatprep.subr.bf16.mxu1 %v2046_v43  ;;  %1815 = vmatprep.subr.bf16.mxu0 %v2049_v45  ;;  %v2118_v43 = vld [vmem:[%s2807_s0 + $0x17c] ss:$36 sps:$4 sm:$0xff]  }
  0x31   :  { %v2131_v45 = vld [vmem:[%s2806_s1 + $0x200] sm:$0xff]  }
  0x32   :  { %1020 = vmatmul.mubr.bf16.gmra.mxu0 %v2047_v44  ;;  %1052 = vmatmul.mubr.bf16.gmra.mxu1 %v1549_v48  ;;  %v2130_v44 = vld [vmem:[%s2806_s1 + $0x180] sm:$0xff]   ;;  %v2117_v48 = vld [vmem:[%s2807_s0 + $0x170] ss:$36 sps:$4 sm:$0xff]  }
  0x33   :  { %1758 = vmatpush3.bf16.msra.mxu1 %v2048_v46  ;;  %1816 = vmatpush3.bf16.msra.mxu0 %v2051_v47  ;;  %v76_v46 = vld [vmem:[%s2807_s0 + $0x1b8] sm:$0xff]  ;;  %v77_v47 = vld [vmem:[%s2807_s0 + $0x1c0] sm:$0xff] }
  0x34   :  { %1759 = vmatprep.subr.bf16.mxu1 %v2053_v49  ;;  %1817 = vmatprep.subr.bf16.mxu0 %v2055_v50  ;;  %v2120_v49 = vld [vmem:[%s2807_s0 + $0x178] ss:$36 sps:$4 sm:$0xff]   ;;  %v1552_v50 = vcombine.high %v76_v46, %v76_v46 }
  0x35   :  { %1027 = vmatprep.mubr.bf16.mxu0 %v2057_v52  ;;  %1091 = vmatprep.mubr.bf16.mxu1 %v2070_v61  ;;  %v1551_v52 = vcombine.low %v76_v46, %v76_v46  ;;  %v2142_v61 = vld [vmem:[%s2807_s0 + $0xa8] ss:$36 sps:$4 sm:$0xff]  }
  0x37   :  { %1760 = vmatpush3.bf16.msra.mxu1 %v2054_v51  ;;  %1818 = vmatpush3.bf16.msra.mxu0 %v2056_v53  ;;  %v1554_v51 = vcombine.high %v77_v47, %v77_v47  ;;  %v1553_v53 = vcombine.low %v77_v47, %v77_v47 }
  0x38   :  { %1761 = vmatprep.subr.bf16.mxu1 %v2059_v54  ;;  %1819 = vmatprep.subr.bf16.mxu0 %v2062_v56  ;;  %v2134_v54 = vld [vmem:[%s2807_s0 + $0x1c] ss:$36 sps:$4 sm:$0xff]  }
  0x39   :  { %v2135_v56 = vld [vmem:[%s2807_s0 + $0x20] ss:$36 sps:$4 sm:$0xff]  }
  0x3a   :  { %1028 = vmatmul.mubr.bf16.gmra.mxu0 %v2060_v55  ;;  %v2132_v55 = vld [vmem:[%s2807_s0 + $0x18] ss:$36 sps:$4 sm:$0xff]  }
  0x3b   :  { %1762 = vmatpush3.bf16.msra.mxu1 %v2061_v57  ;;  %1820 = vmatpush3.bf16.msra.mxu0 %v2063_v58  ;;  %v2136_v57 = vld [vmem:[%s2807_s0 + $0x64] ss:$36 sps:$4 sm:$0xff]  }
  0x3c   :  { %1763 = vmatprep.subr.bf16.mxu1 %v2064_v59  ;;  %1821 = vmatprep.subr.bf16.mxu0 %v2066_v60  ;;  %v2138_v58 = vld [vmem:[%s2807_s0 + $0x60] ss:$36 sps:$4 sm:$0xff]   ;;  %v2139_v59 = vld [vmem:[%s2807_s0 + $0x68] ss:$36 sps:$4 sm:$0xff]  }
  0x3d   :  { %1179 = vmatprep.mubr.bf16.mxu0 %v2073_v63  ;;  %v2140_v60 = vld [vmem:[%s2807_s0 + $0xac] ss:$36 sps:$4 sm:$0xff]   ;;  %v2144_v63 = vld [vmem:[%s2807_s0 + $0xf4] ss:$36 sps:$4 sm:$0xff]  }
  0x3f   :  { %1764 = vmatpush3.bf16.msra.mxu1 %v2065_v62  ;;  %1822 = vmatpush3.bf16.msra.mxu0 %v2067_v0  ;;  %v2143_v62 = vld [vmem:[%s2807_s0 + $0xb0] ss:$36 sps:$4 sm:$0xff]  }
  0x40   :  { %1865 = vmatprep.subr.bf16.mxu1 %v2074_v3  ;;  %1938 = vmatprep.subr.bf16.mxu0 %v2159_v7  ;;  %v2146_v0 = vld [vmem:[%s2807_s0 + $0xf0] ss:$36 sps:$4 sm:$0xff]   ;;  %v2150_v3 = vld [vmem:[%s2807_s0 + $0x138] ss:$36 sps:$4 sm:$0xff]  }
  0x42   :  { %1092 = vmatmul.mubr.bf16.vlgmr.msra.gmra.mxu1 %v2068_v1  ;;  %1180 = vmatmul.mubr.bf16.vlgmr.msra.gmra.mxu0 %v2071_v2  ;;  %v2147_v1 = vld [vmem:[%s2807_s0 + $0xf8] ss:$36 sps:$4 sm:$0xff]  }
  0x43   :  { %1866 = vmatpush3.bf16.msra.mxu1 %v2075_v4  ;;  %1099 = vmatprep.mubr.bf16.mxu1 %v2076_v5  ;;  %v2148_v2 = vld [vmem:[%s2807_s0 + $0x13c] ss:$36 sps:$4 sm:$0xff]   ;;  %v2152_v5 = vld [vmem:[%s2807_s0 + $0x184] ss:$36 sps:$4 sm:$0xff]  }
  0x44   :  { %1867 = vmatprep.subr.bf16.mxu1 %v2078_v6  ;;  %1939 = vmatpush3.bf16.msra.mxu0 %v2079_v8  ;;  %v2151_v4 = vld [vmem:[%s2807_s0 + $0x140] ss:$36 sps:$4 sm:$0xff]   ;;  %v78_v6 = vld [vmem:[%s2807_s0 + $0x1c8] sm:$0xff] }
  0x45   :  { %1187 = vmatprep.mubr.bf16.mxu0 %v2081_v9  ;;  %1940 = vmatprep.subr.bf16.mxu0 %v2159_v7  ;;  %v2154_v8 = vld [vmem:[%s2807_s0 + $0x180] ss:$36 sps:$4 sm:$0xff]   ;;  %v2155_v9 = vld [vmem:[%s2807_s0 + $0x188] ss:$36 sps:$4 sm:$0xff]  }
  0x47   :  { %1868 = vmatpush3.bf16.msra.mxu1 %v2083_v10  ;;  %v1556_v10 = vcombine.high %v78_v6, %v78_v6 }
  0x48   :  { %1869 = vmatprep.subr.bf16.mxu1 %v2085_v11  ;;  %1941 = vmatpush3.bf16.msra.mxu0 %v2086_v12  ;;  %v1555_v11 = vcombine.low %v78_v6, %v78_v6  ;;  %v2158_v12 = vld [vmem:[%s2807_s0 + $0x1d0] ss:$0 sps:$4 sm:$0xff]  }
  0x49   :  { %1942 = vmatprep.subr.bf16.mxu0 %v2159_v7 }
  0x4a   :  { %1100 = vmatmul.mubr.bf16.gmra.mxu1 %v2080_v13  ;;  %1188 = vmatmul.mubr.bf16.gmra.mxu0 %v2084_v14 }
  0x4b   :  { %1107 = vmatprep.mubr.bf16.mxu1 %v2087_v15  ;;  %1870 = vmatpush3.bf16.msra.mxu1 %v2089_v16 }
  0x4c   :  { %1195 = vmatprep.mubr.bf16.mxu0 %v2091_v17  ;;  %1871 = vmatprep.subr.bf16.mxu1 %v2094_v18 }
  0x4d   :  { %1943 = vmatpush3.bf16.msra.mxu0 %v2095_v19 }
  0x4e   :  { %1944 = vmatprep.subr.bf16.mxu0 %v2159_v7 }
  0x4f   :  { %1872 = vmatpush3.bf16.msra.mxu1 %v2096_v20 }
  0x50   :  { %1873 = vmatprep.subr.bf16.mxu1 %v2103_v25 }
  0x51   :  { %1945 = vmatpush3.bf16.msra.mxu0 %v2104_v26 }
  0x52   :  { %1108 = vmatmul.mubr.bf16.gmra.mxu1 %v2090_v21  ;;  %1196 = vmatmul.mubr.bf16.gmra.mxu0 %v2093_v22 }
  0x53   :  { %1115 = vmatprep.mubr.bf16.mxu1 %v2097_v23  ;;  %1203 = vmatprep.mubr.bf16.mxu0 %v2100_v24 }
  0x54   :  { %1874 = vmatpush3.bf16.msra.mxu1 %v2105_v27  ;;  %1946 = vmatprep.subr.bf16.mxu0 %v2159_v7 }
  0x55   :  { %1875 = vmatprep.subr.bf16.mxu1 %v2112_v30  ;;  %1947 = vmatpush3.bf16.msra.mxu0 %v2113_v31 }
  0x56   :  { %1948 = vmatprep.subr.bf16.mxu0 %v2159_v7 }
  0x58   :  { %1876 = vmatpush3.bf16.msra.mxu1 %v2114_v32 }
  0x59   :  { %1877 = vmatprep.subr.bf16.mxu1 %v2121_v35  ;;  %1949 = vmatpush3.bf16.msra.mxu0 %v2122_v36 }
  0x5a   :  { %1116 = vmatmul.mubr.bf16.gmra.mxu1 %v2099_v28  ;;  %1204 = vmatmul.mubr.bf16.gmra.mxu0 %v2102_v29 }
  0x5b   :  { %1123 = vmatprep.mubr.bf16.mxu1 %v2106_v33  ;;  %1211 = vmatprep.mubr.bf16.mxu0 %v2109_v34 }
  0x5c   :  { %1878 = vmatpush3.bf16.msra.mxu1 %v2123_v39  ;;  %1950 = vmatprep.subr.bf16.mxu0 %v2159_v7 }
  0x5d   :  { %1879 = vmatprep.subr.bf16.mxu1 %v2128_v41  ;;  %1951 = vmatpush3.bf16.msra.mxu0 %v2129_v42 }
  0x5e   :  { %1952 = vmatprep.subr.bf16.mxu0 %v2159_v7 }
  0x60   :  { %1880 = vmatpush3.bf16.msra.mxu1 %v2130_v44 }
  0x61   :  { %1953 = vmatpush3.bf16.msra.mxu0 %v2131_v45 }
  0x62   :  { %1124 = vmatmul.mubr.bf16.gmra.mxu1 %v2108_v37  ;;  %1212 = vmatmul.mubr.bf16.gmra.mxu0 %v2111_v38 }
  0x63   :  { %1131 = vmatprep.mubr.bf16.mxu1 %v2115_v40  ;;  %1219 = vmatprep.mubr.bf16.mxu0 %v2118_v43 }
  0x6a   :  { %1132 = vmatmul.mubr.bf16.gmra.mxu1 %v2117_v48  ;;  %1220 = vmatmul.mubr.bf16.gmra.mxu0 %v2120_v49 }
  0x6b   :  { %1139 = vmatprep.mubr.bf16.mxu1 %v1552_v50  ;;  %1227 = vmatprep.mubr.bf16.mxu0 %v1554_v51 }
  0x72   :  { %1140 = vmatmul.mubr.bf16.gmra.mxu1 %v1551_v52  ;;  %1228 = vmatmul.mubr.bf16.gmra.mxu0 %v1553_v53 }
  0x73   :  { %1267 = vmatprep.mubr.bf16.mxu1 %v2134_v54  ;;  %1954 = vmatprep.mubr.msk.bf16.mxu0 %vm2160_vm0, %v2159_v7 }
  0x7a   :  { %1268 = vmatmul.mubr.bf16.vlgmr.msra.gmra.mxu1 %v2132_v55  ;;  %1955 = vmatmul.mubr.bf16.vlgmr.msra.gmra.mxu0 %v2135_v56 }
  0x7b   :  { %1275 = vmatprep.mubr.bf16.mxu1 %v2136_v57  ;;  %1958 = vmatprep.mubr.msk.bf16.mxu0 %vm2160_vm0, %v2159_v7 }
  0x82   :  { %1276 = vmatmul.mubr.bf16.gmra.mxu1 %v2138_v58  ;;  %1959 = vmatmul.mubr.bf16.gmra.mxu0 %v2139_v59 }
  0x83   :  { %1283 = vmatprep.mubr.bf16.mxu1 %v2140_v60  ;;  %1962 = vmatprep.mubr.msk.bf16.mxu0 %vm2160_vm0, %v2159_v7 }
  0x8a   :  { %1284 = vmatmul.mubr.bf16.gmra.mxu1 %v2142_v61  ;;  %1963 = vmatmul.mubr.bf16.gmra.mxu0 %v2143_v62 }
  0x8b   :  { %1291 = vmatprep.mubr.bf16.mxu1 %v2144_v63  ;;  %1966 = vmatprep.mubr.msk.bf16.mxu0 %vm2160_vm0, %v2159_v7 }
  0x92   :  { %1292 = vmatmul.mubr.bf16.gmra.mxu1 %v2146_v0  ;;  %1967 = vmatmul.mubr.bf16.gmra.mxu0 %v2147_v1 }
  0x93   :  { %1299 = vmatprep.mubr.bf16.mxu1 %v2148_v2  ;;  %1970 = vmatprep.mubr.msk.bf16.mxu0 %vm2160_vm0, %v2159_v7 }
  0x9a   :  { %1300 = vmatmul.mubr.bf16.gmra.mxu1 %v2150_v3  ;;  %1971 = vmatmul.mubr.bf16.gmra.mxu0 %v2151_v4 }
  0x9b   :  { %1307 = vmatprep.mubr.bf16.mxu1 %v2152_v5  ;;  %1974 = vmatprep.mubr.msk.bf16.mxu0 %vm2160_vm0, %v2159_v7 }
  0xa2   :  { %1308 = vmatmul.mubr.bf16.gmra.mxu1 %v2154_v8  ;;  %1975 = vmatmul.mubr.bf16.gmra.mxu0 %v2155_v9 }
  0xa3   :  { %1315 = vmatprep.mubr.bf16.mxu1 %v1556_v10  ;;  %1978 = vmatprep.mubr.msk.bf16.mxu0 %vm2160_vm0, %v2159_v7 }
  0xaa   :  { %1316 = vmatmul.mubr.bf16.gmra.mxu1 %v1555_v11  ;;  %1979 = vmatmul.mubr.bf16.gmra.mxu0 %v2158_v12 }
  0xe2   :  { %v1731_v13 = vpop.f32.mrf.mxu1  ;;  %v1707_v14 = vpop.f32.mrf.mxu0 }
  0xe4   :  { %v1732_v15 = vpop.f32.mrf.mxu1  ;;  %v1708_v16 = vpop.f32.mrf.mxu0 }
  0xe5   :  { %v2596_v17 = vadd.f32 %v1732_v15, %v1731_v13  ;;  %v2598_v18 = vadd.f32 %v1708_v16, %v1707_v14 }
  0xe6   :  { %v1734_v19 = vpop.f32.mrf.mxu1  ;;  %v1710_v20 = vpop.f32.mrf.mxu0 }
  0xe8   :  { %v1735_v21 = vpop.f32.mrf.mxu1  ;;  %v1711_v22 = vpop.f32.mrf.mxu0 }
  0xe9   :  { %v2600_v7 = vadd.f32 %v1735_v21, %v1734_v19  ;;  %v2602_v23 = vadd.f32 %v1711_v22, %v1710_v20 }
  0xea   :  { %v1713_v24 = vpop.f32.mrf.mxu0  ;;  %v1737_v25 = vpop.f32.mrf.mxu1 }
  0xeb   :  { %2810 = vst [vmem:[#allocation2_spill] sm:$0xff] %v2600_v7 }
  0xec   :  { %v1714_v26 = vpop.f32.mrf.mxu0  ;;  %v1738_v27 = vpop.f32.mrf.mxu1 }
  0xed   :  { %v2604_v28 = vadd.f32 %v1714_v26, %v1713_v24  ;;  %v2606_v29 = vadd.f32 %v1738_v27, %v1737_v25 }
  0xee   :  { %v1716_v30 = vpop.f32.mrf.mxu0  ;;  %v1740_v31 = vpop.f32.mrf.mxu1 }
  0xef   :  { %2811 = vst [vmem:[#allocation3_spill] sm:$0xff] %v2606_v29 }
  0xf0   :  { %v1717_v32 = vpop.f32.mrf.mxu0  ;;  %v1741_v33 = vpop.f32.mrf.mxu1 }
  0xf1   :  { %v2608_v34 = vadd.f32 %v1717_v32, %v1716_v30  ;;  %v2610_v35 = vadd.f32 %v1741_v33, %v1740_v31 }
  0xf2   :  { %v1719_v36 = vpop.f32.mrf.mxu0  ;;  %v1743_v37 = vpop.f32.mrf.mxu1 }
  0xf3   :  { %2812 = vst [vmem:[#allocation4_spill] sm:$0xff] %v2610_v35 }
  0xf4   :  { %v1720_v38 = vpop.f32.mrf.mxu0  ;;  %v1744_v39 = vpop.f32.mrf.mxu1 }
  0xf5   :  { %v2612_v40 = vadd.f32 %v1720_v38, %v1719_v36  ;;  %v2614_v41 = vadd.f32 %v1744_v39, %v1743_v37 }
  0xf6   :  { %v1722_v42 = vpop.f32.mrf.mxu0  ;;  %v1746_v43 = vpop.f32.mrf.mxu1 }
  0xf7   :  { %2813 = vst [vmem:[#allocation5_spill] sm:$0xff] %v2614_v41 }
  0xf8   :  { %v1723_v44 = vpop.f32.mrf.mxu0  ;;  %v1747_v45 = vpop.f32.mrf.mxu1 }
  0xf9   :  { %v2616_v46 = vadd.f32 %v1723_v44, %v1722_v42 }
  0xfa   :  { %v1725_v47 = vpop.f32.mrf.mxu0 }
  0xfc   :  { %v1726_v48 = vpop.f32.mrf.mxu0 }
  0xfd   :  { %v2618_v49 = vadd.f32 %v1726_v48, %v1725_v47 }
  0xfe   :  { %v1728_v50 = vpop.f32.mrf.mxu0 }
 0x100   :  { %v1729_v51 = vpop.f32.mrf.mxu0 }
 0x101   :  { %v2620_v52 = vadd.f32 %v1729_v51, %v1728_v50 }
 0x102   :  { %v1765_v53 = vpop.f32.mrf.mxu1  ;;  %v1823_v54 = vpop.f32.mrf.mxu0 }
 0x104   :  { %v1766_v55 = vpop.f32.mrf.mxu1  ;;  %v1824_v56 = vpop.f32.mrf.mxu0 }
 0x105   :  { %v1767_v35 = vadd.f32 %v1766_v55, %v1765_v53  ;;  %v1825_v29 = vadd.f32 %v1824_v56, %v1823_v54 }
 0x106   :  { %v1768_v57 = vpop.f32.mrf.mxu1  ;;  %v2622_v58 = vpop.f32.mrf.mxu0 }
 0x108   :  { %v1769_v59 = vpop.f32.mrf.mxu1  ;;  %v2624_v60 = vpop.f32.mrf.mxu0 }
 0x10a   :  { %v1771_v61 = vpop.f32.mrf.mxu1  ;;  %v2626_v62 = vpop.f32.mrf.mxu0 }
 0x10c   :  { %v1772_v63 = vpop.f32.mrf.mxu1  ;;  %v2628_v0 = vpop.f32.mrf.mxu0 }
 0x10e   :  { %v2630_v1 = vpop.f32.mrf.mxu1  ;;  %v2632_v2 = vpop.f32.mrf.mxu0 }
 0x110   :  { %v2634_v3 = vpop.f32.mrf.mxu1  ;;  %v2636_v4 = vpop.f32.mrf.mxu0 }
 0x111   :  { %v1776_v56 = vadd.f32 %v2634_v3, %v2630_v1 }
 0x112   :  { %v2638_v5 = vpop.f32.mrf.mxu1  ;;  %v2640_v6 = vpop.f32.mrf.mxu0 }
 0x114   :  { %v2642_v8 = vpop.f32.mrf.mxu1  ;;  %v2644_v9 = vpop.f32.mrf.mxu0 }
 0x115   :  { %v1779_v1 = vadd.f32 %v2642_v8, %v2638_v5 }
 0x116   :  { %v2646_v10 = vpop.f32.mrf.mxu1  ;;  %v2648_v11 = vpop.f32.mrf.mxu0 }
 0x118   :  { %v2650_v12 = vpop.f32.mrf.mxu1  ;;  %v2652_v13 = vpop.f32.mrf.mxu0 }
 0x11a   :  { %v2654_v14 = vpop.f32.mrf.mxu1  ;;  %v2656_v15 = vpop.f32.mrf.mxu0 }
 0x11c   :  { %v2658_v16 = vpop.f32.mrf.mxu1  ;;  %v2660_v19 = vpop.f32.mrf.mxu0 }
 0x11e   :  { %v2662_v20 = vpop.f32.mrf.mxu1  ;;  %v2664_v21 = vpop.f32.mrf.mxu0 }
 0x120   :  { %v2666_v22 = vpop.f32.mrf.mxu1  ;;  %v2668_v24 = vpop.f32.mrf.mxu0 }
 0x122   :  { %v2670_v25 = vpop.f32.mrf.mxu1  ;;  %v2672_v26 = vpop.f32.mrf.mxu0 }
 0x124   :  { %v2674_v27 = vpop.f32.mrf.mxu1  ;;  %v2676_v30 = vpop.f32.mrf.mxu0 }
 0x126   :  { %v2678_v31 = vpop.f32.mrf.mxu1  ;;  %v2680_v32 = vpop.f32.mrf.mxu0 }
 0x127   :  { %2814 = vst [vmem:[#allocation6_spill] sm:$0xff] %v2680_v32 }
 0x128   :  { %v2682_v33 = vpop.f32.mrf.mxu1  ;;  %v2684_v36 = vpop.f32.mrf.mxu0 }
 0x129   :  { %2815 = vst [vmem:[#allocation7_spill] sm:$0xff] %v2684_v36 }
 0x12a   :  { %v2686_v37 = vpop.f32.mrf.mxu1  ;;  %v2688_v38 = vpop.f32.mrf.mxu0 }
 0x12b   :  { %2816 = vst [vmem:[#allocation8_spill] sm:$0xff] %v2686_v37  ;;  %2817 = vst [vmem:[#allocation9_spill] sm:$0xff] %v2688_v38  ;;  %v1773_v37 = vadd.f32 %v1772_v63, %v1771_v61 }
 0x12c   :  { %v2690_v39 = vpop.f32.mrf.mxu1  ;;  %v2692_v42 = vpop.f32.mrf.mxu0 }
 0x12d   :  { %2818 = vst [vmem:[#allocation10_spill] sm:$0xff] %v2690_v39  ;;  %2819 = vst [vmem:[#allocation11_spill] sm:$0xff] %v2692_v42  ;;  %v2713_v42 = vld [vmem:[%s2808_s2] ss:$0 sm:$0xff] }
 0x12e   :  { %v2694_v43 = vpop.f32.mrf.mxu1  ;;  %v2696_v44 = vpop.f32.mrf.mxu0  ;;  %v1009_v53 = vadd.f32 %v2602_v23, %v2713_v42  ;;  %v1017_v63 = vadd.f32 %v2608_v34, %v2713_v42  ;;  %v1022_v34 = vadd.f32 %v2612_v40, %v2713_v42 }
 0x12f   :  { %2820 = vst [vmem:[#allocation12_spill] sm:$0xff] %v2694_v43  ;;  %2821 = vst [vmem:[#allocation13_spill] sm:$0xff] %v2696_v44 }
 0x130   :  { %v2698_v45 = vpop.f32.mrf.mxu1  ;;  %v2700_v47 = vpop.f32.mrf.mxu0  ;;  %v1110_v5 = vadd.f32 %v1779_v1, %v1022_v34  ;;  %v1038_v34 = vadd.f32 %v2596_v17, %v2713_v42 }
 0x131   :  { %2822 = vst [vmem:[#allocation14_spill] sm:$0xff] %v2698_v45  ;;  %2823 = vst [vmem:[#allocation15_spill] sm:$0xff] %v2700_v47  ;;  %v1006_v45 = vadd.f32 %v2598_v18, %v2713_v42  ;;  %v1014_v18 = vadd.f32 %v2604_v28, %v2713_v42 }
 0x132   :  { %v2702_v48 = vpop.f32.mrf.mxu1  ;;  %v2704_v50 = vpop.f32.mrf.mxu0 }
 0x133   :  { %2824 = vst [vmem:[#allocation16_spill] sm:$0xff] %v2702_v48  ;;  %2825 = vst [vmem:[#allocation17_spill] sm:$0xff] %v2704_v50  ;;  %v1094_v48 = vadd.f32 %v1767_v35, %v1006_v45  ;;  %v1770_v50 = vadd.f32 %v1769_v59, %v1768_v57  ;;  %v1828_v35 = vadd.f32 %v2624_v60, %v2622_v58 }
 0x134   :  { %v2706_v51 = vpop.f32.mrf.mxu1  ;;  %v2708_v41 = vpop.f32.mrf.mxu0  ;;  %v1105_v58 = vadd.f32 %v1776_v56, %v1017_v63 }
 0x135   :  { %2826 = vst [vmem:[#allocation18_spill] sm:$0xff] %v2706_v51  ;;  %2827 = vst [vmem:[#allocation19_spill] sm:$0xff] %v2708_v41  ;;  %v1182_v32 = vadd.f32 %v1825_v29, %v1094_v48  ;;  %v1097_v39 = vadd.f32 %v1770_v50, %v1009_v53  ;;  %v1831_v29 = vadd.f32 %v2628_v0, %v2626_v62 }
 0x136   :  { %v1804_v38 = vpop.f32.mrf.mxu1  ;;  %v1862_v44 = vpop.f32.mrf.mxu0  ;;  %v1834_v62 = vadd.f32 %v2636_v4, %v2632_v2  ;;  %v1025_v4 = vadd.f32 %v2616_v46, %v2713_v42  ;;  %v1840_v46 = vadd.f32 %v2652_v13, %v2648_v11  ;;  %v1033_v13 = vadd.f32 %v2620_v52, %v2713_v42 }
 0x137   :  { %v1185_v59 = vadd.f32 %v1828_v35, %v1097_v39  ;;  %v1846_v52 = vadd.f32 %v2668_v24, %v2664_v21  ;;  %v2828_v24 = vld [vmem:[#allocation2_spill] sm:$0xff] }
 0x138   :  { %v1805_v47 = vpop.f32.mrf.mxu1  ;;  %v1863_v43 = vpop.f32.mrf.mxu0  ;;  %v1193_v53 = vadd.f32 %v1834_v62, %v1105_v58 }
 0x13a   :  { %v1881_v36 = vpop.f32.mrf.mxu1  ;;  %v1357_v51 = vpop.f32.mrf.mxu0 }
 0x13c   :  { %v1882_v55 = vpop.f32.mrf.mxu1  ;;  %v1956_v41 = vpop.f32.mrf.mxu0 }
 0x13d   :  { %v1883_v38 = vadd.f32 %v1882_v55, %v1881_v36  ;;  %v1102_v41 = vadd.f32 %v1773_v37, %v1014_v18  ;;  %v1782_v55 = vadd.f32 %v2650_v12, %v2646_v10 }
 0x13e   :  { %v1884_v44 = vpop.f32.mrf.mxu1  ;;  %v1360_v7 = vpop.f32.mrf.mxu0 }
 0x13f   :  { %v1270_v54 = vadd.f32 %v1883_v38, %v1182_v32  ;;  %v1190_v47 = vadd.f32 %v1831_v29, %v1102_v41  ;;  %v1113_v10 = vadd.f32 %v1782_v55, %v1025_v4  ;;  %v1030_v29 = vadd.f32 %v2618_v49, %v2713_v42 }
 0x140   :  { %v1885_v57 = vpop.f32.mrf.mxu1  ;;  %v1957_v23 = vpop.f32.mrf.mxu0  ;;  %v1794_v55 = vadd.f32 %v2682_v33, %v2678_v31 }
 0x141   :  { %v1886_v61 = vadd.f32 %v1885_v57, %v1884_v44  ;;  %v1358_v43 = vadd.f32 %v1357_v51, %v1270_v54 }
 0x142   :  { %v1887_v36 = vpop.f32.mrf.mxu1  ;;  %v1365_v28 = vpop.f32.mrf.mxu0 }
 0x143   :  { %v1273_v45 = vadd.f32 %v1886_v61, %v1185_v59  ;;  %v1411_v48 = vmax.f32 %v1358_v43, 0.0  ;;  %v1788_v43 = vadd.f32 %v2666_v22, %v2662_v20 }
 0x144   :  { %v1888_v60 = vpop.f32.mrf.mxu1  ;;  %v1960_v32 = vpop.f32.mrf.mxu0 }
 0x145   :  { %v1361_v3 = vadd.f32 %v1360_v7, %v1273_v45  ;;  %v1889_v37 = vadd.f32 %v1888_v60, %v1887_v36  ;;  %v1837_v7 = vadd.f32 %v2644_v9, %v2640_v6  ;;  %v1785_v6 = vadd.f32 %v2658_v16, %v2654_v14 }
 0x146   :  { %v1890_v0 = vpop.f32.mrf.mxu1  ;;  %v1368_v39 = vpop.f32.mrf.mxu0  ;;  %v1843_v16 = vadd.f32 %v2660_v19, %v2656_v15  ;;  %v1121_v20 = vadd.f32 %v1788_v43, %v1033_v13  ;;  %v1791_v15 = vadd.f32 %v2674_v27, %v2670_v25  ;;  %v1849_v27 = vadd.f32 %v2676_v30, %v2672_v26 }
 0x147   :  { %v1412_v50 = vmax.f32 %v1361_v3, 0.0  ;;  %v1278_v51 = vadd.f32 %v1889_v37, %v1190_v47  ;;  %v1198_v57 = vadd.f32 %v1837_v7, %v1110_v5  ;;  %v1118_v14 = vadd.f32 %v1785_v6, %v1030_v29 }
 0x148   :  { %v1891_v38 = vpop.f32.mrf.mxu1  ;;  %v1961_v44 = vpop.f32.mrf.mxu0  ;;  %v1126_v25 = vadd.f32 %v1791_v15, %v1038_v34  ;;  %v1041_v7 = vadd.f32 %v2828_v24, %v2713_v42 }
 0x149   :  { %v1659_v8 = vpack.c.bf16 %v1412_v50, %v1411_v48  ;;  %v1892_v2 = vadd.f32 %v1891_v38, %v1890_v0  ;;  %v1366_v35 = vadd.f32 %v1365_v28, %v1278_v51  ;;  %v1201_v28 = vadd.f32 %v1840_v46, %v1113_v10 }
 0x14a   :  { %v1893_v18 = vpop.f32.mrf.mxu1  ;;  %v1373_v40 = vpop.f32.mrf.mxu0  ;;  %v1206_v37 = vadd.f32 %v1843_v16, %v1118_v14  ;;  %v1129_v31 = vadd.f32 %v1794_v55, %v1041_v7  ;;  %v2836_v14 = vld [vmem:[#allocation9_spill] sm:$0xff]  ;;  %v2837_v16 = vld [vmem:[#allocation11_spill] sm:$0xff] }
 0x14b   :  { %1660 = vst [vmem:[%s2809_s3] sm:$0xff] %v1659_v8   ;;  %v1281_v54 = vadd.f32 %v1892_v2, %v1193_v53  ;;  %v1413_v61 = vmax.f32 %v1366_v35, 0.0  ;;  %v1209_v53 = vadd.f32 %v1846_v52, %v1121_v20  ;;  %v2829_v35 = vld [vmem:[#allocation8_spill] sm:$0xff]  ;;  %v2840_v52 = vld [vmem:[#allocation18_spill] sm:$0xff] }
 0x14c   :  { %v1894_v12 = vpop.f32.mrf.mxu1  ;;  %v1964_v56 = vpop.f32.mrf.mxu0 }
 0x14d   :  { %v1369_v9 = vadd.f32 %v1368_v39, %v1281_v54  ;;  %v1895_v23 = vadd.f32 %v1894_v12, %v1893_v18  ;;  %v2830_v54 = vld [vmem:[#allocation10_spill] sm:$0xff]  ;;  %v2832_v56 = vld [vmem:[#allocation7_spill] sm:$0xff] }
 0x14e   :  { %v1896_v59 = vpop.f32.mrf.mxu1  ;;  %v1376_v41 = vpop.f32.mrf.mxu0  ;;  %v1797_v26 = vadd.f32 %v2830_v54, %v2829_v35  ;;  %v2831_v12 = vld [vmem:[#allocation6_spill] sm:$0xff] }
 0x14f   :  { %v1414_v63 = vmax.f32 %v1369_v9, 0.0  ;;  %v1286_v36 = vadd.f32 %v1895_v23, %v1198_v57  ;;  %v1852_v57 = vadd.f32 %v2832_v56, %v2831_v12  ;;  %v2833_v23 = vld [vmem:[#allocation3_spill] sm:$0xff] }
 0x150   :  { %v1897_v45 = vpop.f32.mrf.mxu1  ;;  %v1965_v58 = vpop.f32.mrf.mxu0  ;;  %v1046_v46 = vadd.f32 %v2833_v23, %v2713_v42 }
 0x151   :  { %v1664_v60 = vpack.c.bf16 %v1414_v63, %v1413_v61  ;;  %v1898_v11 = vadd.f32 %v1897_v45, %v1896_v59  ;;  %v1374_v47 = vadd.f32 %v1373_v40, %v1286_v36  ;;  %v1214_v40 = vadd.f32 %v1849_v27, %v1126_v25  ;;  %v2834_v63 = vld [vmem:[#allocation12_spill] sm:$0xff]  ;;  %v2835_v36 = vld [vmem:[#allocation14_spill] sm:$0xff] }
 0x152   :  { %v1899_v32 = vpop.f32.mrf.mxu1  ;;  %v1381_v49 = vpop.f32.mrf.mxu0  ;;  %v1217_v61 = vadd.f32 %v1852_v57, %v1129_v31  ;;  %v1134_v58 = vadd.f32 %v1797_v26, %v1046_v46 }
 0x153   :  { %1686 = vst [vmem:[%s2809_s3 + $0x8] sm:$0xff] %v1664_v60   ;;  %v1289_v1 = vadd.f32 %v1898_v11, %v1201_v28  ;;  %v1415_v48 = vmax.f32 %v1374_v47, 0.0  ;;  %v1800_v28 = vadd.f32 %v2835_v36, %v2834_v63  ;;  %v1855_v60 = vadd.f32 %v2837_v16, %v2836_v14 }
 0x154   :  { %v1900_v22 = vpop.f32.mrf.mxu1  ;;  %v1968_v3 = vpop.f32.mrf.mxu0 }
 0x155   :  { %v1377_v19 = vadd.f32 %v1376_v41, %v1289_v1  ;;  %v1901_v62 = vadd.f32 %v1900_v22, %v1899_v32  ;;  %v2838_v32 = vld [vmem:[#allocation4_spill] sm:$0xff] }
 0x156   :  { %v1902_v0 = vpop.f32.mrf.mxu1  ;;  %v1384_v39 = vpop.f32.mrf.mxu0 }
 0x157   :  { %v1416_v50 = vmax.f32 %v1377_v19, 0.0  ;;  %v1294_v51 = vadd.f32 %v1901_v62, %v1206_v37  ;;  %v1222_v19 = vadd.f32 %v1855_v60, %v1134_v58  ;;  %v2839_v62 = vld [vmem:[#allocation16_spill] sm:$0xff] }
 0x158   :  { %v1903_v38 = vpop.f32.mrf.mxu1  ;;  %v1969_v44 = vpop.f32.mrf.mxu0 }
 0x159   :  { %v1669_v5 = vpack.c.bf16 %v1416_v50, %v1415_v48  ;;  %v1904_v21 = vadd.f32 %v1903_v38, %v1902_v0  ;;  %v1382_v2 = vadd.f32 %v1381_v49, %v1294_v51  ;;  %v1049_v49 = vadd.f32 %v2838_v32, %v2713_v42  ;;  %v2841_v48 = vld [vmem:[#allocation13_spill] sm:$0xff]  ;;  %v2842_v50 = vld [vmem:[#allocation15_spill] sm:$0xff] }
 0x15a   :  { %v1905_v8 = vpop.f32.mrf.mxu1  ;;  %v1389_v17 = vpop.f32.mrf.mxu0  ;;  %v1803_v0 = vadd.f32 %v2840_v52, %v2839_v62  ;;  %v1858_v51 = vadd.f32 %v2842_v50, %v2841_v48  ;;  %v2843_v38 = vld [vmem:[#allocation5_spill] sm:$0xff] }
 0x15b   :  { %1687 = vst [vmem:[%s2809_s3 + $0x10] sm:$0xff] %v1669_v5   ;;  %v1297_v4 = vadd.f32 %v1904_v21, %v1209_v53  ;;  %v1417_v59 = vmax.f32 %v1382_v2, 0.0  ;;  %v1137_v3 = vadd.f32 %v1800_v28, %v1049_v49  ;;  %v1054_v44 = vadd.f32 %v2843_v38, %v2713_v42  ;;  %v2845_v2 = vld [vmem:[#allocation19_spill] sm:$0xff] }
 0x15c   :  { %v1906_v33 = vpop.f32.mrf.mxu1  ;;  %v1972_v18 = vpop.f32.mrf.mxu0 }
 0x15d   :  { %v1385_v30 = vadd.f32 %v1384_v39, %v1297_v4  ;;  %v1907_v10 = vadd.f32 %v1906_v33, %v1905_v8  ;;  %v1225_v21 = vadd.f32 %v1858_v51, %v1137_v3  ;;  %v1142_v8 = vadd.f32 %v1803_v0, %v1054_v44 }
 0x15e   :  { %v1908_v6 = vpop.f32.mrf.mxu1  ;;  %v1392_v9 = vpop.f32.mrf.mxu0 }
 0x15f   :  { %v1418_v41 = vmax.f32 %v1385_v30, 0.0  ;;  %v1302_v29 = vadd.f32 %v1907_v10, %v1214_v40 }
 0x160   :  { %v1909_v43 = vpop.f32.mrf.mxu1  ;;  %v1973_v45 = vpop.f32.mrf.mxu0 }
 0x161   :  { %v1674_v11 = vpack.c.bf16 %v1418_v41, %v1417_v59  ;;  %v1910_v13 = vadd.f32 %v1909_v43, %v1908_v6  ;;  %v1390_v20 = vadd.f32 %v1389_v17, %v1302_v29  ;;  %v2844_v17 = vld [vmem:[#allocation17_spill] sm:$0xff] }
 0x162   :  { %v1911_v47 = vpop.f32.mrf.mxu1  ;;  %v1397_v1 = vpop.f32.mrf.mxu0  ;;  %v1861_v4 = vadd.f32 %v2845_v2, %v2844_v17 }
 0x163   :  { %1688 = vst [vmem:[%s2809_s3 + $0x18] sm:$0xff] %v1674_v11   ;;  %v1305_v22 = vadd.f32 %v1910_v13, %v1217_v61  ;;  %v1419_v25 = vmax.f32 %v1390_v20, 0.0 }
 0x164   :  { %v1912_v37 = vpop.f32.mrf.mxu1  ;;  %v1976_v15 = vpop.f32.mrf.mxu0  ;;  %v1230_v30 = vadd.f32 %v1861_v4, %v1142_v8 }
 0x165   :  { %v1393_v39 = vadd.f32 %v1392_v9, %v1305_v22  ;;  %v1913_v34 = vadd.f32 %v1912_v37, %v1911_v47 }
 0x166   :  { %v1914_v53 = vpop.f32.mrf.mxu1  ;;  %v1400_v55 = vpop.f32.mrf.mxu0 }
 0x167   :  { %v1420_v27 = vmax.f32 %v1393_v39, 0.0  ;;  %v1310_v5 = vadd.f32 %v1913_v34, %v1222_v19 }
 0x168   :  { %v1915_v24 = vpop.f32.mrf.mxu1  ;;  %v1977_v7 = vpop.f32.mrf.mxu0 }
 0x169   :  { %v1679_v31 = vpack.c.bf16 %v1420_v27, %v1419_v25  ;;  %v1916_v33 = vadd.f32 %v1915_v24, %v1914_v53  ;;  %v1398_v35 = vadd.f32 %v1397_v1, %v1310_v5 }
 0x16a   :  { %v1917_v18 = vpop.f32.mrf.mxu1  ;;  %v1405_v40 = vpop.f32.mrf.mxu0 }
 0x16b   :  { %1689 = vst [vmem:[%s2809_s3 + $0x20] sm:$0xff] %v1679_v31   ;;  %v1313_v42 = vadd.f32 %v1916_v33, %v1225_v21  ;;  %v1421_v6 = vmax.f32 %v1398_v35, 0.0 }
 0x16c   :  { %v1918_v54 = vpop.f32.mrf.mxu1  ;;  %v1980_v26 = vpop.f32.mrf.mxu0 }
 0x16d   :  { %v1401_v10 = vadd.f32 %v1400_v55, %v1313_v42  ;;  %v1919_v12 = vadd.f32 %v1918_v54, %v1917_v18 }
 0x16e   :  { %v1920_v56 = vpop.f32.mrf.mxu1  ;;  %v1408_v57 = vpop.f32.mrf.mxu0 }
 0x16f   :  { %v1422_v9 = vmax.f32 %v1401_v10, 0.0  ;;  %v1318_v23 = vadd.f32 %v1919_v12, %v1230_v30 }
 0x170   :  { %v1921_v46 = vpop.f32.mrf.mxu1  ;;  %v1981_v59 = vpop.f32.mrf.mxu0 }
 0x171   :  { %v1684_v41 = vpack.c.bf16 %v1422_v9, %v1421_v6  ;;  %v1406_v29 = vadd.f32 %v1405_v40, %v1318_v23 }
 0x173   :  { %1690 = vst [vmem:[%s2809_s3 + $0x28] sm:$0xff] %v1684_v41   ;;  %v1423_v61 = vmax.f32 %v1406_v29, 0.0 }
 0x175   :  { %v1655_v63 = vpack.c.bf16 %v1423_v61, %v1423_v61 }
 0x177   :  { %1489 = vst [vmem:[%s2809_s3 + $0x30] sm:$0xf] %v1655_v63 }

// kernel: dueling_net_forward.7
= control target key start
LH: loop header
LB: loop body
LE: loop exit
PB: predicated region body
PF: predicated region fallthrough
CT: control target
= control target key end

     0   :  { %s5220_s18 = smov 0   ;;  %s6020_s0 = inlined_call_operand.vmem [shape: bf16[8,6272], index: 0, kind: input, shape index: {}]   ;;  %s6021_s1 = inlined_call_operand.vmem [shape: bf16[6272,1024], index: 1, kind: input, shape index: {}]   ;;  %s6022_s2 = inlined_call_operand.vmem [shape: f32[1,1024], index: 2, kind: input, shape index: {}]   ;;  %s6023_s3 = inlined_call_operand.vmem [shape: bf16[1024,128], index: 3, kind: input, shape index: {}]   ;;  %s6024_s4 = inlined_call_operand.vmem [shape: f32[1,128], index: 4, kind: input, shape index: {}]   ;;  %s6025_s5 = inlined_call_operand.vmem [shape: f32[8,128], index: 5, kind: output, shape index: {}]  }
   0x1 LB: > { %s5226_s19 = sadd.s32 4294967295, %s5185_s18   ;;  %p4476_p0 = scmp.ge.s32.totalorder %s5185_s18, 1  ;;  %s5185_s18 = sphi %s5220_s18, %s15_s18  }
   0x2   : > { %p195_p1 = scmp.lt.s32.totalorder %s5185_s18, 8 }
   0x4   : > { %p196_p2 = pnand %p4476_p0, %p195_p1 }
   0x5   : > { %s224_s20 = smul.u32 (!%p196_p2), 7, %s5226_s19  ;;  %p4480_p5 = scmp.ne.s32.totalorder (!%p196_p2), %s5226_s19, 0 }
   0x6   : > { %199 = sbr.rel (%p196_p2) target bundleno = 1155 (0x483), region = 40 }
   0x7   : > { %s230_s21 = smul.u32 (!%p196_p2), 112, %s5226_s19  ;;  %p225_p3 = scmp.lt.s32.totalorder (!%p196_p2), %s224_s20, 48 }
   0x9   : > { %p231_p4 = scmp.lt.s32.totalorder (!%p196_p2), %s230_s21, 783 }
   0xb   : > { %s6027_s20 = smov (!%p225_p3, %s224_s20), 48  ;;  %s6029_s21 = smov (!%p231_p4, %s230_s21), 783 }
   0xc   : > { %s4477_s22 = sshll.u32 %s6027_s20, 2  ;;  %s5004_s26 = sshll.u32 %s6029_s21, 5 }
   0xd   : > { %s5235_s25 = scalar_lea.vmem %s6020_s0, %s4477_s22  ;;  %s5240_s29 = scalar_lea.vmem %s6021_s1, %s5004_s26 }
   0xe   : > { %241 = sbr.rel (%p4480_p5) target bundleno = 24 (0x18), region = 44 }
  0x13   : > { %v5187_v0 = vmov 0.0  }
  0x14   : > { %242 = vst [vmem:[#allocation2 + $0x30] sm:$0xff] %v5187_v0  ;;  %243 = vst [vmem:[#allocation2] sm:$0xff] %v5187_v0 }
  0x15   : > { %244 = vst [vmem:[#allocation2 + $0x18] sm:$0xff] %v5187_v0  ;;  %245 = vst [vmem:[#allocation2 + $0x10] sm:$0xff] %v5187_v0 }
  0x16   : > { %246 = vst [vmem:[#allocation2 + $0x8] sm:$0xff] %v5187_v0  ;;  %247 = vst [vmem:[#allocation2 + $0x20] sm:$0xff] %v5187_v0 }
  0x17   : > { %248 = vst [vmem:[#allocation2 + $0x28] sm:$0xff] %v5187_v0  ;;  %249 = vst [vmem:[#allocation2 + $0x38] sm:$0xff] %v5187_v0 }
  0x18 PF: > { %v318_v1 = vld [vmem:[%s5240_s29 + $0x1c0] sm:$0xff]  ;;  %v5275_v55 = vld [vmem:[%s5235_s25 + $0x8] sm:$0xff]  ;;  %p4936_p6 = scmp.ne.s32.totalorder %s5226_s19, 6 }
  0x19   : > { %v322_v2 = vld [vmem:[%s5240_s29 + $0x1e0] sm:$0xff]  ;;  %v5285_v60 = vcombine.high %v5275_v55, %v5275_v55 }
  0x1a   : > { %v446_v3 = vld [vmem:[%s5240_s29 + $0x5c0] sm:$0xff]  ;;  %v4545_v4 = vcombine.high %v318_v1, %v322_v2  ;;  %v4544_v6 = vcombine.low %v318_v1, %v322_v2 }
  0x1b   : > { %v450_v5 = vld [vmem:[%s5240_s29 + $0x5e0] sm:$0xff]  ;;  %3048 = vmatprep.mubr.bf16.mxu1 %v5285_v60 }
  0x1c   : > { %v310_v7 = vld [vmem:[%s5240_s29 + $0x180] sm:$0xff]  ;;  %v4673_v9 = vcombine.high %v446_v3, %v450_v5  ;;  %v4672_v10 = vcombine.low %v446_v3, %v450_v5  ;;  %2975 = vmatprep.subr.bf16.mxu0 %v4545_v4 }
  0x1d   : > { %v314_v8 = vld [vmem:[%s5240_s29 + $0x1a0] sm:$0xff]  ;;  %2976 = vmatpush1.bf16.msra.mxu0 %v4544_v6 }
  0x1e   : > { %v4537_v11 = vcombine.high %v310_v7, %v314_v8  ;;  %v438_v12 = vld [vmem:[%s5240_s29 + $0x580] sm:$0xff]  ;;  %3016 = vmatprep.subr.bf16.mxu1 %v4673_v9  ;;  %v4536_v19 = vcombine.low %v310_v7, %v314_v8 }
  0x1f   : > { %v442_v13 = vld [vmem:[%s5240_s29 + $0x5a0] sm:$0xff]  ;;  %3017 = vmatpush1.bf16.msra.mxu1 %v4672_v10 }
  0x20   : > { %v302_v14 = vld [vmem:[%s5240_s29 + $0x140] sm:$0xff]  ;;  %v4665_v15 = vcombine.high %v438_v12, %v442_v13  ;;  %2977 = vmatprep.subr.bf16.mxu0 %v4537_v11  ;;  %v4664_v20 = vcombine.low %v438_v12, %v442_v13 }
  0x21   : > { %v306_v16 = vld [vmem:[%s5240_s29 + $0x160] sm:$0xff]  ;;  %2978 = vmatpush1.bf16.msra.mxu0 %v4536_v19 }
  0x22   : > { %v430_v17 = vld [vmem:[%s5240_s29 + $0x540] sm:$0xff]  ;;  %v4529_v21 = vcombine.high %v302_v14, %v306_v16  ;;  %3018 = vmatprep.subr.bf16.mxu1 %v4665_v15  ;;  %v4528_v27 = vcombine.low %v302_v14, %v306_v16 }
  0x23   : > { %v434_v18 = vld [vmem:[%s5240_s29 + $0x560] sm:$0xff]  ;;  %3019 = vmatpush1.bf16.msra.mxu1 %v4664_v20 }
  0x24   : > { %v4657_v22 = vcombine.high %v430_v17, %v434_v18  ;;  %v294_v23 = vld [vmem:[%s5240_s29 + $0x100] sm:$0xff]  ;;  %2979 = vmatprep.subr.bf16.mxu0 %v4529_v21  ;;  %v4656_v28 = vcombine.low %v430_v17, %v434_v18 }
  0x25   : > { %v298_v24 = vld [vmem:[%s5240_s29 + $0x120] sm:$0xff]  ;;  %2980 = vmatpush1.bf16.msra.mxu0 %v4528_v27 }
  0x26   : > { %v422_v25 = vld [vmem:[%s5240_s29 + $0x500] sm:$0xff]  ;;  %v4521_v29 = vcombine.high %v294_v23, %v298_v24  ;;  %3020 = vmatprep.subr.bf16.mxu1 %v4657_v22  ;;  %v4520_v35 = vcombine.low %v294_v23, %v298_v24 }
  0x27   : > { %v426_v26 = vld [vmem:[%s5240_s29 + $0x520] sm:$0xff]  ;;  %3021 = vmatpush1.bf16.msra.mxu1 %v4656_v28 }
  0x28   : > { %v4649_v30 = vcombine.high %v422_v25, %v426_v26  ;;  %v286_v31 = vld [vmem:[%s5240_s29 + $0xc0] sm:$0xff]  ;;  %2981 = vmatprep.subr.bf16.mxu0 %v4521_v29  ;;  %v4648_v36 = vcombine.low %v422_v25, %v426_v26 }
  0x29   : > { %v290_v32 = vld [vmem:[%s5240_s29 + $0xe0] sm:$0xff]  ;;  %2982 = vmatpush1.bf16.msra.mxu0 %v4520_v35 }
  0x2a   : > { %v414_v33 = vld [vmem:[%s5240_s29 + $0x4c0] sm:$0xff]  ;;  %v4513_v37 = vcombine.high %v286_v31, %v290_v32  ;;  %3022 = vmatprep.subr.bf16.mxu1 %v4649_v30  ;;  %v4512_v43 = vcombine.low %v286_v31, %v290_v32 }
  0x2b   : > { %v418_v34 = vld [vmem:[%s5240_s29 + $0x4e0] sm:$0xff]  ;;  %3023 = vmatpush1.bf16.msra.mxu1 %v4648_v36 }
  0x2c   : > { %v4641_v38 = vcombine.high %v414_v33, %v418_v34  ;;  %v278_v39 = vld [vmem:[%s5240_s29 + $0x80] sm:$0xff]  ;;  %2983 = vmatprep.subr.bf16.mxu0 %v4513_v37  ;;  %v4640_v44 = vcombine.low %v414_v33, %v418_v34 }
  0x2d   : > { %v282_v40 = vld [vmem:[%s5240_s29 + $0xa0] sm:$0xff]  ;;  %2984 = vmatpush1.bf16.msra.mxu0 %v4512_v43 }
  0x2e   : > { %v406_v41 = vld [vmem:[%s5240_s29 + $0x480] sm:$0xff]  ;;  %v4505_v45 = vcombine.high %v278_v39, %v282_v40  ;;  %3024 = vmatprep.subr.bf16.mxu1 %v4641_v38  ;;  %v4504_v51 = vcombine.low %v278_v39, %v282_v40 }
  0x2f   : > { %v410_v42 = vld [vmem:[%s5240_s29 + $0x4a0] sm:$0xff]  ;;  %3025 = vmatpush1.bf16.msra.mxu1 %v4640_v44 }
  0x30   : > { %v4633_v46 = vcombine.high %v406_v41, %v410_v42  ;;  %v270_v47 = vld [vmem:[%s5240_s29 + $0x40] sm:$0xff]  ;;  %2985 = vmatprep.subr.bf16.mxu0 %v4505_v45  ;;  %v4632_v52 = vcombine.low %v406_v41, %v410_v42 }
  0x31   : > { %v274_v48 = vld [vmem:[%s5240_s29 + $0x60] sm:$0xff]  ;;  %2986 = vmatpush1.bf16.msra.mxu0 %v4504_v51 }
  0x32   : > { %v398_v49 = vld [vmem:[%s5240_s29 + $0x440] sm:$0xff]  ;;  %v4497_v53 = vcombine.high %v270_v47, %v274_v48  ;;  %3026 = vmatprep.subr.bf16.mxu1 %v4633_v46  ;;  %v4496_v63 = vcombine.low %v270_v47, %v274_v48 }
  0x33   : > { %v402_v50 = vld [vmem:[%s5240_s29 + $0x460] sm:$0xff]  ;;  %3027 = vmatpush1.bf16.msra.mxu1 %v4632_v52 }
  0x34   : > { %v5272_v54 = vld [vmem:[%s5235_s25] sm:$0xff]  ;;  %v4625_v56 = vcombine.high %v398_v49, %v402_v50  ;;  %2987 = vmatprep.subr.bf16.mxu0 %v4497_v53  ;;  %v4624_v0 = vcombine.low %v398_v49, %v402_v50 }
  0x35   : > { %v262_v57 = vld [vmem:[%s5240_s29] sm:$0xff]  ;;  %v5281_v59 = vcombine.high %v5272_v54, %v5272_v54  ;;  %2988 = vmatpush1.bf16.msra.mxu0 %v4496_v63 }
  0x36   : > { %v266_v58 = vld [vmem:[%s5240_s29 + $0x20] sm:$0xff]  ;;  %3028 = vmatprep.subr.bf16.mxu1 %v4625_v56 }
  0x37   : > { %v390_v61 = vld [vmem:[%s5240_s29 + $0x400] sm:$0xff]  ;;  %3007 = vmatprep.mubr.bf16.mxu0 %v5281_v59  ;;  %v4489_v1 = vcombine.high %v262_v57, %v266_v58  ;;  %v4488_v7 = vcombine.low %v262_v57, %v266_v58  ;;  %3029 = vmatpush1.bf16.msra.mxu1 %v4624_v0 }
  0x38   : > { %v394_v62 = vld [vmem:[%s5240_s29 + $0x420] sm:$0xff] }
  0x39   : > { %v4617_v2 = vcombine.high %v390_v61, %v394_v62  ;;  %v382_v3 = vld [vmem:[%s5240_s29 + $0x3c0] sm:$0xff]  ;;  %2989 = vmatprep.subr.bf16.mxu0 %v4489_v1  ;;  %v4616_v8 = vcombine.low %v390_v61, %v394_v62 }
  0x3a   : > { %v386_v4 = vld [vmem:[%s5240_s29 + $0x3e0] sm:$0xff]  ;;  %2990 = vmatpush1.bf16.msra.mxu0 %v4488_v7 }
  0x3b   : > { %v510_v5 = vld [vmem:[%s5240_s29 + $0x7c0] sm:$0xff]  ;;  %v4609_v9 = vcombine.high %v382_v3, %v386_v4  ;;  %3030 = vmatprep.subr.bf16.mxu1 %v4617_v2  ;;  %v4608_v15 = vcombine.low %v382_v3, %v386_v4 }
  0x3c   : > { %v514_v6 = vld [vmem:[%s5240_s29 + $0x7e0] sm:$0xff]  ;;  %3031 = vmatpush1.bf16.msra.mxu1 %v4616_v8 }
  0x3d   : > { %v4737_v10 = vcombine.high %v510_v5, %v514_v6  ;;  %v374_v11 = vld [vmem:[%s5240_s29 + $0x380] sm:$0xff]  ;;  %2991 = vmatprep.subr.bf16.mxu0 %v4609_v9  ;;  %v4736_v16 = vcombine.low %v510_v5, %v514_v6 }
  0x3e   : > { %v378_v12 = vld [vmem:[%s5240_s29 + $0x3a0] sm:$0xff]  ;;  %2992 = vmatpush2.bf16.msra.mxu0 %v4608_v15 }
  0x3f   : > { %v502_v13 = vld [vmem:[%s5240_s29 + $0x780] sm:$0xff]  ;;  %v4601_v17 = vcombine.high %v374_v11, %v378_v12  ;;  %3032 = vmatprep.subr.bf16.mxu1 %v4737_v10  ;;  %v4600_v23 = vcombine.low %v374_v11, %v378_v12 }
  0x40   : > { %v506_v14 = vld [vmem:[%s5240_s29 + $0x7a0] sm:$0xff]  ;;  %3033 = vmatpush2.bf16.msra.mxu1 %v4736_v16 }
  0x41   : > { %v4729_v18 = vcombine.high %v502_v13, %v506_v14  ;;  %v366_v19 = vld [vmem:[%s5240_s29 + $0x340] sm:$0xff]  ;;  %2993 = vmatprep.subr.bf16.mxu0 %v4601_v17  ;;  %v4728_v24 = vcombine.low %v502_v13, %v506_v14  ;;  %v5331_v17 = vcombine.low %v5272_v54, %v5272_v54 }
  0x42   : > { %v370_v20 = vld [vmem:[%s5240_s29 + $0x360] sm:$0xff]  ;;  %2994 = vmatpush2.bf16.msra.mxu0 %v4600_v23 }
  0x43   : > { %v494_v21 = vld [vmem:[%s5240_s29 + $0x740] sm:$0xff]  ;;  %v4593_v25 = vcombine.high %v366_v19, %v370_v20  ;;  %3034 = vmatprep.subr.bf16.mxu1 %v4729_v18  ;;  %v4592_v31 = vcombine.low %v366_v19, %v370_v20  ;;  %v5337_v20 = vcombine.low %v5275_v55, %v5275_v55 }
  0x44   : > { %v498_v22 = vld [vmem:[%s5240_s29 + $0x760] sm:$0xff]  ;;  %3035 = vmatpush2.bf16.msra.mxu1 %v4728_v24 }
  0x45   : > { %v4721_v26 = vcombine.high %v494_v21, %v498_v22  ;;  %v358_v27 = vld [vmem:[%s5240_s29 + $0x300] sm:$0xff]  ;;  %2995 = vmatprep.subr.bf16.mxu0 %v4593_v25  ;;  %v4720_v32 = vcombine.low %v494_v21, %v498_v22  ;;  %v5340_v22 = vld [vmem:[%s5235_s25 + $0x10] sm:$0xff] }
  0x46   : > { %v362_v28 = vld [vmem:[%s5240_s29 + $0x320] sm:$0xff]  ;;  %2996 = vmatpush2.bf16.msra.mxu0 %v4592_v31  ;;  %v5349_v55 = vcombine.high %v5340_v22, %v5340_v22 }
  0x47   : > { %v486_v29 = vld [vmem:[%s5240_s29 + $0x700] sm:$0xff]  ;;  %v4585_v33 = vcombine.high %v358_v27, %v362_v28  ;;  %3036 = vmatprep.subr.bf16.mxu1 %v4721_v26  ;;  %v4584_v39 = vcombine.low %v358_v27, %v362_v28 }
  0x48   : > { %v490_v30 = vld [vmem:[%s5240_s29 + $0x720] sm:$0xff]  ;;  %3037 = vmatpush2.bf16.msra.mxu1 %v4720_v32 }
  0x49   : > { %v4713_v34 = vcombine.high %v486_v29, %v490_v30  ;;  %v350_v35 = vld [vmem:[%s5240_s29 + $0x2c0] sm:$0xff]  ;;  %2997 = vmatprep.subr.bf16.mxu0 %v4585_v33  ;;  %v4712_v40 = vcombine.low %v486_v29, %v490_v30 }
  0x4a   : > { %v354_v36 = vld [vmem:[%s5240_s29 + $0x2e0] sm:$0xff]  ;;  %2998 = vmatpush2.bf16.msra.mxu0 %v4584_v39 }
  0x4b   : > { %v478_v37 = vld [vmem:[%s5240_s29 + $0x6c0] sm:$0xff]  ;;  %v4577_v41 = vcombine.high %v350_v35, %v354_v36  ;;  %3038 = vmatprep.subr.bf16.mxu1 %v4713_v34  ;;  %v4576_v47 = vcombine.low %v350_v35, %v354_v36  ;;  %v5188_v35 = vmov 0  }
  0x4c   : > { %v482_v38 = vld [vmem:[%s5240_s29 + $0x6e0] sm:$0xff]  ;;  %3039 = vmatpush2.bf16.msra.mxu1 %v4712_v40 }
  0x4d   : > { %v4705_v42 = vcombine.high %v478_v37, %v482_v38  ;;  %v342_v43 = vld [vmem:[%s5240_s29 + $0x280] sm:$0xff]  ;;  %2999 = vmatprep.subr.bf16.mxu0 %v4577_v41  ;;  %v4704_v48 = vcombine.low %v478_v37, %v482_v38 }
  0x4e   : > { %v346_v44 = vld [vmem:[%s5240_s29 + $0x2a0] sm:$0xff]  ;;  %3000 = vmatpush2.bf16.msra.mxu0 %v4576_v47 }
  0x4f   : > { %v470_v45 = vld [vmem:[%s5240_s29 + $0x680] sm:$0xff]  ;;  %v4569_v49 = vcombine.high %v342_v43, %v346_v44  ;;  %3040 = vmatprep.subr.bf16.mxu1 %v4705_v42  ;;  %v4568_v57 = vcombine.low %v342_v43, %v346_v44 }
  0x50   : > { %v474_v46 = vld [vmem:[%s5240_s29 + $0x6a0] sm:$0xff]  ;;  %3041 = vmatpush2.bf16.msra.mxu1 %v4704_v48 }
  0x51   : > { %v4697_v50 = vcombine.high %v470_v45, %v474_v46  ;;  %v334_v51 = vld [vmem:[%s5240_s29 + $0x240] sm:$0xff]  ;;  %3001 = vmatprep.subr.bf16.mxu0 %v4569_v49  ;;  %v4696_v58 = vcombine.low %v470_v45, %v474_v46 }
  0x52   : > { %v338_v52 = vld [vmem:[%s5240_s29 + $0x260] sm:$0xff]  ;;  %3002 = vmatpush2.bf16.msra.mxu0 %v4568_v57 }
  0x53   : > { %v462_v53 = vld [vmem:[%s5240_s29 + $0x640] sm:$0xff]  ;;  %v4561_v61 = vcombine.high %v334_v51, %v338_v52  ;;  %3042 = vmatprep.subr.bf16.mxu1 %v4697_v50  ;;  %v4560_v3 = vcombine.low %v334_v51, %v338_v52 }
  0x54   : > { %v466_v56 = vld [vmem:[%s5240_s29 + $0x660] sm:$0xff]  ;;  %3043 = vmatpush2.bf16.msra.mxu1 %v4696_v58 }
  0x55   : > { %v4689_v62 = vcombine.high %v462_v53, %v466_v56  ;;  %v326_v63 = vld [vmem:[%s5240_s29 + $0x200] sm:$0xff]  ;;  %3003 = vmatprep.subr.bf16.mxu0 %v4561_v61  ;;  %v4688_v4 = vcombine.low %v462_v53, %v466_v56 }
  0x56   : > { %v330_v0 = vld [vmem:[%s5240_s29 + $0x220] sm:$0xff]  ;;  %3004 = vmatpush2.bf16.msra.mxu0 %v4560_v3 }
  0x57   : > { %v454_v1 = vld [vmem:[%s5240_s29 + $0x600] sm:$0xff]  ;;  %v4553_v5 = vcombine.high %v326_v63, %v330_v0  ;;  %3044 = vmatprep.subr.bf16.mxu1 %v4689_v62  ;;  %v4552_v11 = vcombine.low %v326_v63, %v330_v0 }
  0x58   : > { %v458_v2 = vld [vmem:[%s5240_s29 + $0x620] sm:$0xff]  ;;  %3045 = vmatpush2.bf16.msra.mxu1 %v4688_v4 }
  0x59   : > { %v4681_v6 = vcombine.high %v454_v1, %v458_v2  ;;  %v574_v7 = vld [vmem:[%s5240_s29 + $0x9c0] sm:$0xff]  ;;  %3005 = vmatprep.subr.bf16.mxu0 %v4553_v5  ;;  %v4680_v12 = vcombine.low %v454_v1, %v458_v2 }
  0x5a   : > { %v578_v8 = vld [vmem:[%s5240_s29 + $0x9e0] sm:$0xff]  ;;  %3006 = vmatpush2.bf16.msra.mxu0 %v4552_v11 }
  0x5b   : > { %v702_v9 = vld [vmem:[%s5240_s29 + $0xdc0] sm:$0xff]  ;;  %v4801_v13 = vcombine.high %v574_v7, %v578_v8  ;;  %3046 = vmatprep.subr.bf16.mxu1 %v4681_v6  ;;  %v4800_v21 = vcombine.low %v574_v7, %v578_v8 }
  0x5c   : > { %v706_v10 = vld [vmem:[%s5240_s29 + $0xde0] sm:$0xff]  ;;  %3047 = vmatpush2.bf16.msra.mxu1 %v4680_v12 }
  0x5d   : > { %v4929_v14 = vcombine.high %v702_v9, %v706_v10  ;;  %v566_v15 = vld [vmem:[%s5240_s29 + $0x980] sm:$0xff]  ;;  %3057 = vmatprep.subr.bf16.mxu0 %v4801_v13  ;;  %v4928_v23 = vcombine.low %v702_v9, %v706_v10  ;;  %3008 = vmatmul.mubr.bf16.vlgmr.msra.gmra.mxu0 %v5331_v17 }
  0x5e   : > { %v570_v16 = vld [vmem:[%s5240_s29 + $0x9a0] sm:$0xff]  ;;  %3058 = vmatpush1.bf16.msra.mxu0 %v4800_v21  ;;  %3089 = vmatprep.mubr.bf16.mxu0 %v5349_v55 }
  0x5f   : > { %v694_v18 = vld [vmem:[%s5240_s29 + $0xd80] sm:$0xff]  ;;  %v4793_v24 = vcombine.high %v566_v15, %v570_v16  ;;  %3098 = vmatprep.subr.bf16.mxu1 %v4929_v14  ;;  %3049 = vmatmul.mubr.bf16.vlgmr.msra.gmra.mxu1 %v5337_v20  ;;  %v4792_v29 = vcombine.low %v566_v15, %v570_v16  ;;  %v319_v16 = vld [vmem:[%s5240_s29 + $0x1c8] sm:$0xff] }
  0x60   : > { %v698_v19 = vld [vmem:[%s5240_s29 + $0xda0] sm:$0xff]  ;;  %3099 = vmatpush1.bf16.msra.mxu1 %v4928_v23  ;;  %3130 = vmatprep.mubr.bf16.mxu1 %v5188_v35 }
  0x61   : > { %v4921_v25 = vcombine.high %v694_v18, %v698_v19  ;;  %v558_v54 = vld [vmem:[%s5240_s29 + $0x940] sm:$0xff]  ;;  %3059 = vmatprep.subr.bf16.mxu0 %v4793_v24  ;;  %v4920_v30 = vcombine.low %v694_v18, %v698_v19  ;;  %v323_v18 = vld [vmem:[%s5240_s29 + $0x1e8] sm:$0xff] }
  0x62   : > { %v562_v26 = vld [vmem:[%s5240_s29 + $0x960] sm:$0xff]  ;;  %3060 = vmatpush1.bf16.msra.mxu0 %v4792_v29  ;;  %v4547_v24 = vcombine.high %v319_v16, %v323_v18  ;;  %v5383_v29 = vld [vmem:[%s5235_s25 + $0x18] ss:$0 sps:$4 sm:$0xff]  }
  0x63   : > { %v686_v27 = vld [vmem:[%s5240_s29 + $0xd40] sm:$0xff]  ;;  %v4785_v31 = vcombine.high %v558_v54, %v562_v26  ;;  %3100 = vmatprep.subr.bf16.mxu1 %v4921_v25  ;;  %v4784_v38 = vcombine.low %v558_v54, %v562_v26  ;;  %v311_v26 = vld [vmem:[%s5240_s29 + $0x188] sm:$0xff] }
  0x64   : > { %v690_v28 = vld [vmem:[%s5240_s29 + $0xd60] sm:$0xff]  ;;  %3101 = vmatpush1.bf16.msra.mxu1 %v4920_v30  ;;  %v4546_v30 = vcombine.low %v319_v16, %v323_v18  ;;  %v263_v16 = vld [vmem:[%s5240_s29 + $0x8] sm:$0xff] }
  0x65   : > { %v4913_v32 = vcombine.high %v686_v27, %v690_v28  ;;  %v550_v33 = vld [vmem:[%s5240_s29 + $0x900] sm:$0xff]  ;;  %3061 = vmatprep.subr.bf16.mxu0 %v4785_v31  ;;  %v4912_v39 = vcombine.low %v686_v27, %v690_v28  ;;  %v315_v27 = vld [vmem:[%s5240_s29 + $0x1a8] sm:$0xff] }
  0x66   : > { %v554_v34 = vld [vmem:[%s5240_s29 + $0x920] sm:$0xff]  ;;  %3062 = vmatpush1.bf16.msra.mxu0 %v4784_v38  ;;  %v267_v18 = vld [vmem:[%s5240_s29 + $0x28] sm:$0xff] }
  0x67   : > { %v678_v36 = vld [vmem:[%s5240_s29 + $0xd00] sm:$0xff]  ;;  %v4777_v40 = vcombine.high %v550_v33, %v554_v34  ;;  %3102 = vmatprep.subr.bf16.mxu1 %v4913_v32  ;;  %v4776_v46 = vcombine.low %v550_v33, %v554_v34  ;;  %v4539_v32 = vcombine.high %v311_v26, %v315_v27 }
  0x68   : > { %v682_v37 = vld [vmem:[%s5240_s29 + $0xd20] sm:$0xff]  ;;  %3103 = vmatpush1.bf16.msra.mxu1 %v4912_v39  ;;  %v4538_v39 = vcombine.low %v311_v26, %v315_v27  ;;  %v383_v26 = vld [vmem:[%s5240_s29 + $0x3c8] sm:$0xff] }
  0x69   : > { %v4905_v41 = vcombine.high %v678_v36, %v682_v37  ;;  %v542_v42 = vld [vmem:[%s5240_s29 + $0x8c0] sm:$0xff]  ;;  %3063 = vmatprep.subr.bf16.mxu0 %v4777_v40  ;;  %v4904_v47 = vcombine.low %v678_v36, %v682_v37  ;;  %v303_v36 = vld [vmem:[%s5240_s29 + $0x148] sm:$0xff] }
  0x6a   : > { %v546_v43 = vld [vmem:[%s5240_s29 + $0x8e0] sm:$0xff]  ;;  %3064 = vmatpush1.bf16.msra.mxu0 %v4776_v46  ;;  %v307_v37 = vld [vmem:[%s5240_s29 + $0x168] sm:$0xff] }
  0x6b   : > { %v670_v44 = vld [vmem:[%s5240_s29 + $0xcc0] sm:$0xff]  ;;  %v4769_v48 = vcombine.high %v542_v42, %v546_v43  ;;  %3104 = vmatprep.subr.bf16.mxu1 %v4905_v41  ;;  %v4768_v56 = vcombine.low %v542_v42, %v546_v43  ;;  %v4531_v41 = vcombine.high %v303_v36, %v307_v37  ;;  %v387_v27 = vld [vmem:[%s5240_s29 + $0x3e8] sm:$0xff] }
  0x6c   : > { %v674_v45 = vld [vmem:[%s5240_s29 + $0xce0] sm:$0xff]  ;;  %3105 = vmatpush1.bf16.msra.mxu1 %v4904_v47  ;;  %v4530_v47 = vcombine.low %v303_v36, %v307_v37  ;;  %v5419_v36 = vcombine.low %v5340_v22, %v5340_v22  ;;  %v375_v37 = vld [vmem:[%s5240_s29 + $0x388] sm:$0xff] }
  0x6d   : > { %v4897_v49 = vcombine.high %v670_v44, %v674_v45  ;;  %v534_v50 = vld [vmem:[%s5240_s29 + $0x880] sm:$0xff]  ;;  %3065 = vmatprep.subr.bf16.mxu0 %v4769_v48  ;;  %v4896_v57 = vcombine.low %v670_v44, %v674_v45  ;;  %v295_v44 = vld [vmem:[%s5240_s29 + $0x108] sm:$0xff] }
  0x6e   : > { %v538_v51 = vld [vmem:[%s5240_s29 + $0x8a0] sm:$0xff]  ;;  %3066 = vmatpush1.bf16.msra.mxu0 %v4768_v56  ;;  %v299_v45 = vld [vmem:[%s5240_s29 + $0x128] sm:$0xff] }
  0x6f   : > { %v662_v52 = vld [vmem:[%s5240_s29 + $0xc80] sm:$0xff]  ;;  %v4761_v58 = vcombine.high %v534_v50, %v538_v51  ;;  %3106 = vmatprep.subr.bf16.mxu1 %v4897_v49  ;;  %v4760_v2 = vcombine.low %v534_v50, %v538_v51  ;;  %v4523_v49 = vcombine.high %v295_v44, %v299_v45  ;;  %v367_v22 = vld [vmem:[%s5240_s29 + $0x348] sm:$0xff] }
  0x70   : > { %v666_v53 = vld [vmem:[%s5240_s29 + $0xca0] sm:$0xff]  ;;  %3107 = vmatpush1.bf16.msra.mxu1 %v4896_v57  ;;  %v4522_v57 = vcombine.low %v295_v44, %v299_v45  ;;  %v435_v44 = vld [vmem:[%s5240_s29 + $0x568] sm:$0xff] }
  0x71   : > { %v4889_v61 = vcombine.high %v662_v52, %v666_v53  ;;  %v526_v62 = vld [vmem:[%s5240_s29 + $0x840] sm:$0xff]  ;;  %3067 = vmatprep.subr.bf16.mxu0 %v4761_v58  ;;  %v4888_v3 = vcombine.low %v662_v52, %v666_v53  ;;  %v287_v52 = vld [vmem:[%s5240_s29 + $0xc8] sm:$0xff] }
  0x72   : > { %v530_v63 = vld [vmem:[%s5240_s29 + $0x860] sm:$0xff]  ;;  %3068 = vmatpush1.bf16.msra.mxu0 %v4760_v2  ;;  %v291_v53 = vld [vmem:[%s5240_s29 + $0xe8] sm:$0xff] }
  0x73   : > { %v654_v0 = vld [vmem:[%s5240_s29 + $0xc40] sm:$0xff]  ;;  %v4753_v4 = vcombine.high %v526_v62, %v530_v63  ;;  %3108 = vmatprep.subr.bf16.mxu1 %v4889_v61  ;;  %v4752_v10 = vcombine.low %v526_v62, %v530_v63  ;;  %v4515_v61 = vcombine.high %v287_v52, %v291_v53  ;;  %v371_v45 = vld [vmem:[%s5240_s29 + $0x368] sm:$0xff] }
  0x74   : > { %v658_v1 = vld [vmem:[%s5240_s29 + $0xc60] sm:$0xff]  ;;  %3109 = vmatpush1.bf16.msra.mxu1 %v4888_v3  ;;  %v4514_v3 = vcombine.low %v287_v52, %v291_v53  ;;  %v359_v52 = vld [vmem:[%s5240_s29 + $0x308] sm:$0xff] }
  0x75   : > { %v4881_v5 = vcombine.high %v654_v0, %v658_v1  ;;  %v518_v6 = vld [vmem:[%s5240_s29 + $0x800] sm:$0xff]  ;;  %3069 = vmatprep.subr.bf16.mxu0 %v4753_v4  ;;  %v4880_v11 = vcombine.low %v654_v0, %v658_v1  ;;  %v279_v0 = vld [vmem:[%s5240_s29 + $0x88] sm:$0xff] }
  0x76   : > { %v522_v7 = vld [vmem:[%s5240_s29 + $0x820] sm:$0xff]  ;;  %3070 = vmatpush1.bf16.msra.mxu0 %v4752_v10  ;;  %v283_v1 = vld [vmem:[%s5240_s29 + $0xa8] sm:$0xff] }
  0x77   : > { %v646_v8 = vld [vmem:[%s5240_s29 + $0xc00] sm:$0xff]  ;;  %v4745_v12 = vcombine.high %v518_v6, %v522_v7  ;;  %3110 = vmatprep.subr.bf16.mxu1 %v4881_v5  ;;  %v4744_v19 = vcombine.low %v518_v6, %v522_v7  ;;  %v4507_v5 = vcombine.high %v279_v0, %v283_v1  ;;  %v363_v53 = vld [vmem:[%s5240_s29 + $0x328] sm:$0xff] }
  0x78   : > { %v650_v9 = vld [vmem:[%s5240_s29 + $0xc20] sm:$0xff]  ;;  %3111 = vmatpush1.bf16.msra.mxu1 %v4880_v11  ;;  %v4506_v11 = vcombine.low %v279_v0, %v283_v1  ;;  %v351_v0 = vld [vmem:[%s5240_s29 + $0x2c8] sm:$0xff] }
  0x79   : > { %v4873_v13 = vcombine.high %v646_v8, %v650_v9  ;;  %v638_v14 = vld [vmem:[%s5240_s29 + $0xbc0] sm:$0xff]  ;;  %3071 = vmatprep.subr.bf16.mxu0 %v4745_v12  ;;  %v4872_v21 = vcombine.low %v646_v8, %v650_v9  ;;  %v271_v8 = vld [vmem:[%s5240_s29 + $0x48] sm:$0xff] }
  0x7a   : > { %v642_v15 = vld [vmem:[%s5240_s29 + $0xbe0] sm:$0xff]  ;;  %3072 = vmatpush1.bf16.msra.mxu0 %v4744_v19  ;;  %v275_v9 = vld [vmem:[%s5240_s29 + $0x68] sm:$0xff] }
  0x7b   : > { %v4865_v23 = vcombine.high %v638_v14, %v642_v15  ;;  %3112 = vmatprep.subr.bf16.mxu1 %v4873_v13  ;;  %v630_v25 = vld [vmem:[%s5240_s29 + $0xb80] sm:$0xff]  ;;  %v4864_v28 = vcombine.low %v638_v14, %v642_v15  ;;  %v4499_v13 = vcombine.high %v271_v8, %v275_v9  ;;  %v355_v1 = vld [vmem:[%s5240_s29 + $0x2e8] sm:$0xff] }
  0x7c   : > { %v634_v54 = vld [vmem:[%s5240_s29 + $0xba0] sm:$0xff]  ;;  %3113 = vmatpush1.bf16.msra.mxu1 %v4872_v21  ;;  %v4498_v21 = vcombine.low %v271_v8, %v275_v9  ;;  %v343_v8 = vld [vmem:[%s5240_s29 + $0x288] sm:$0xff] }
  0x7d   : > { %3073 = vmatprep.subr.bf16.mxu0 %v4865_v23  ;;  %v4857_v31 = vcombine.high %v630_v25, %v634_v54  ;;  %3139 = vmatprep.subr.bf16.mxu1 %v4547_v24  ;;  %v622_v33 = vld [vmem:[%s5240_s29 + $0xb40] sm:$0xff]  ;;  %v4856_v38 = vcombine.low %v630_v25, %v634_v54  ;;  %v4491_v24 = vcombine.high %v263_v16, %v267_v18  ;;  %v447_v25 = vld [vmem:[%s5240_s29 + $0x5c8] sm:$0xff] }
  0x7e   : > { %v626_v34 = vld [vmem:[%s5240_s29 + $0xb60] sm:$0xff]  ;;  %3074 = vmatpush2.bf16.msra.mxu0 %v4864_v28  ;;  %v451_v54 = vld [vmem:[%s5240_s29 + $0x5e8] sm:$0xff] }
  0x7f   : > { %3131 = vmatmul.mubr.bf16.vlgmr.msra.gmra.mxu1 %v5383_v29  ;;  %3075 = vmatprep.subr.bf16.mxu0 %v4857_v31  ;;  %v4849_v40 = vcombine.high %v622_v33, %v626_v34  ;;  %v614_v42 = vld [vmem:[%s5240_s29 + $0xb00] sm:$0xff]  ;;  %v4848_v46 = vcombine.low %v622_v33, %v626_v34  ;;  %v4675_v31 = vcombine.high %v447_v25, %v451_v54  ;;  %v439_v33 = vld [vmem:[%s5240_s29 + $0x588] sm:$0xff] }
  0x80   : > { %3140 = vmatpush1.bf16.msra.mxu1 %v4546_v30  ;;  %v618_v43 = vld [vmem:[%s5240_s29 + $0xb20] sm:$0xff]  ;;  %3171 = vmatprep.mubr.bf16.mxu1 %v5281_v59  ;;  %v4490_v30 = vcombine.low %v263_v16, %v267_v18  ;;  %v443_v34 = vld [vmem:[%s5240_s29 + $0x5a8] sm:$0xff] }
  0x81   : > { %3141 = vmatprep.subr.bf16.mxu1 %v4539_v32  ;;  %v4841_v48 = vcombine.high %v614_v42, %v618_v43  ;;  %v606_v50 = vld [vmem:[%s5240_s29 + $0xac0] sm:$0xff]  ;;  %v4840_v56 = vcombine.low %v614_v42, %v618_v43  ;;  %v4611_v32 = vcombine.high %v383_v26, %v387_v27  ;;  %v431_v43 = vld [vmem:[%s5240_s29 + $0x548] sm:$0xff] }
  0x82   : > { %3076 = vmatpush2.bf16.msra.mxu0 %v4856_v38  ;;  %v610_v51 = vld [vmem:[%s5240_s29 + $0xae0] sm:$0xff]  ;;  %v379_v38 = vld [vmem:[%s5240_s29 + $0x3a8] sm:$0xff] }
  0x83   : > { %3077 = vmatprep.subr.bf16.mxu0 %v4849_v40  ;;  %v4833_v58 = vcombine.high %v606_v50, %v610_v51  ;;  %v598_v62 = vld [vmem:[%s5240_s29 + $0xa80] sm:$0xff]  ;;  %v4832_v2 = vcombine.low %v606_v50, %v610_v51  ;;  %v4610_v40 = vcombine.low %v383_v26, %v387_v27  ;;  %v4603_v42 = vcombine.high %v375_v37, %v379_v38  ;;  %v423_v50 = vld [vmem:[%s5240_s29 + $0x508] sm:$0xff] }
  0x84   : > { %3142 = vmatpush1.bf16.msra.mxu1 %v4538_v39  ;;  %v602_v63 = vld [vmem:[%s5240_s29 + $0xaa0] sm:$0xff]  ;;  %v4674_v39 = vcombine.low %v447_v25, %v451_v54  ;;  %v427_v51 = vld [vmem:[%s5240_s29 + $0x528] sm:$0xff] }
  0x85   : > { %3143 = vmatprep.subr.bf16.mxu1 %v4531_v41  ;;  %v4825_v4 = vcombine.high %v598_v62, %v602_v63  ;;  %v590_v6 = vld [vmem:[%s5240_s29 + $0xa40] sm:$0xff]  ;;  %v4824_v10 = vcombine.low %v598_v62, %v602_v63  ;;  %v4667_v41 = vcombine.high %v439_v33, %v443_v34  ;;  %v415_v62 = vld [vmem:[%s5240_s29 + $0x4c8] sm:$0xff] }
  0x86   : > { %3078 = vmatpush2.bf16.msra.mxu0 %v4848_v46  ;;  %v594_v7 = vld [vmem:[%s5240_s29 + $0xa60] sm:$0xff]  ;;  %v4666_v46 = vcombine.low %v439_v33, %v443_v34  ;;  %v419_v63 = vld [vmem:[%s5240_s29 + $0x4e8] sm:$0xff] }
  0x87   : > { %3079 = vmatprep.subr.bf16.mxu0 %v4841_v48  ;;  %v4817_v12 = vcombine.high %v590_v6, %v594_v7  ;;  %v582_v14 = vld [vmem:[%s5240_s29 + $0xa00] sm:$0xff]  ;;  %v4816_v19 = vcombine.low %v590_v6, %v594_v7  ;;  %v4659_v48 = vcombine.high %v431_v43, %v435_v44  ;;  %v407_v6 = vld [vmem:[%s5240_s29 + $0x488] sm:$0xff] }
  0x88   : > { %3144 = vmatpush1.bf16.msra.mxu1 %v4530_v47  ;;  %v586_v15 = vld [vmem:[%s5240_s29 + $0xa20] sm:$0xff]  ;;  %v4602_v47 = vcombine.low %v375_v37, %v379_v38  ;;  %v411_v7 = vld [vmem:[%s5240_s29 + $0x4a8] sm:$0xff] }
  0x89   : > { %3145 = vmatprep.subr.bf16.mxu1 %v4523_v49  ;;  %v4809_v23 = vcombine.high %v582_v14, %v586_v15  ;;  %v4808_v28 = vcombine.low %v582_v14, %v586_v15  ;;  %v4595_v49 = vcombine.high %v367_v22, %v371_v45  ;;  %v347_v9 = vld [vmem:[%s5240_s29 + $0x2a8] sm:$0xff] }
  0x8a   : > { %3080 = vmatpush2.bf16.msra.mxu0 %v4840_v56  ;;  %v4658_v56 = vcombine.low %v431_v43, %v435_v44  ;;  %v399_v14 = vld [vmem:[%s5240_s29 + $0x448] sm:$0xff] }
  0x8b   : > { %3081 = vmatprep.subr.bf16.mxu0 %v4833_v58  ;;  %v4651_v58 = vcombine.high %v423_v50, %v427_v51  ;;  %v403_v15 = vld [vmem:[%s5240_s29 + $0x468] sm:$0xff] }
  0x8c   : > { %3146 = vmatpush1.bf16.msra.mxu1 %v4522_v57  ;;  %v4594_v57 = vcombine.low %v367_v22, %v371_v45  ;;  %v335_v16 = vld [vmem:[%s5240_s29 + $0x248] sm:$0xff] }
  0x8d   : > { %3147 = vmatprep.subr.bf16.mxu1 %v4515_v61  ;;  %v4587_v61 = vcombine.high %v359_v52, %v363_v53  ;;  %v339_v18 = vld [vmem:[%s5240_s29 + $0x268] sm:$0xff] }
  0x8e   : > { %3082 = vmatpush2.bf16.msra.mxu0 %v4832_v2  ;;  %v4650_v2 = vcombine.low %v423_v50, %v427_v51  ;;  %v391_v25 = vld [vmem:[%s5240_s29 + $0x408] sm:$0xff] }
  0x8f   : > { %3083 = vmatprep.subr.bf16.mxu0 %v4825_v4  ;;  %v4643_v4 = vcombine.high %v415_v62, %v419_v63  ;;  %v395_v54 = vld [vmem:[%s5240_s29 + $0x428] sm:$0xff] }
  0x90   : > { %3148 = vmatpush1.bf16.msra.mxu1 %v4514_v3  ;;  %v4586_v3 = vcombine.low %v359_v52, %v363_v53  ;;  %v327_v26 = vld [vmem:[%s5240_s29 + $0x208] sm:$0xff] }
  0x91   : > { %3149 = vmatprep.subr.bf16.mxu1 %v4507_v5  ;;  %v4579_v5 = vcombine.high %v351_v0, %v355_v1  ;;  %v331_v27 = vld [vmem:[%s5240_s29 + $0x228] sm:$0xff] }
  0x92   : > { %3084 = vmatpush2.bf16.msra.mxu0 %v4824_v10  ;;  %v4642_v10 = vcombine.low %v415_v62, %v419_v63  ;;  %v511_v33 = vld [vmem:[%s5240_s29 + $0x7c8] sm:$0xff] }
  0x93   : > { %3085 = vmatprep.subr.bf16.mxu0 %v4817_v12  ;;  %v4635_v12 = vcombine.high %v407_v6, %v411_v7  ;;  %v515_v34 = vld [vmem:[%s5240_s29 + $0x7e8] sm:$0xff] }
  0x94   : > { %3150 = vmatpush1.bf16.msra.mxu1 %v4506_v11  ;;  %v4578_v11 = vcombine.low %v351_v0, %v355_v1  ;;  %v575_v37 = vld [vmem:[%s5240_s29 + $0x9c8] sm:$0xff] }
  0x95   : > { %3151 = vmatprep.subr.bf16.mxu1 %v4499_v13  ;;  %v4571_v13 = vcombine.high %v343_v8, %v347_v9  ;;  %v579_v38 = vld [vmem:[%s5240_s29 + $0x9e8] sm:$0xff] }
  0x96   : > { %3086 = vmatpush2.bf16.msra.mxu0 %v4816_v19  ;;  %v4634_v19 = vcombine.low %v407_v6, %v411_v7  ;;  %v503_v43 = vld [vmem:[%s5240_s29 + $0x788] sm:$0xff] }
  0x97   : > { %3087 = vmatprep.subr.bf16.mxu0 %v4809_v23  ;;  %v4627_v23 = vcombine.high %v399_v14, %v403_v15  ;;  %v507_v44 = vld [vmem:[%s5240_s29 + $0x7a8] sm:$0xff] }
  0x98   : > { %3152 = vmatpush1.bf16.msra.mxu1 %v4498_v21  ;;  %v4570_v21 = vcombine.low %v343_v8, %v347_v9  ;;  %v567_v22 = vld [vmem:[%s5240_s29 + $0x988] sm:$0xff] }
  0x99   : > { %3153 = vmatprep.subr.bf16.mxu1 %v4491_v24  ;;  %v4563_v24 = vcombine.high %v335_v16, %v339_v18  ;;  %v571_v45 = vld [vmem:[%s5240_s29 + $0x9a8] sm:$0xff] }
  0x9a   : > { %3088 = vmatpush2.bf16.msra.mxu0 %v4808_v28  ;;  %v4626_v28 = vcombine.low %v399_v14, %v403_v15  ;;  %v495_v50 = vld [vmem:[%s5240_s29 + $0x748] sm:$0xff] }
  0x9b   : > { %3180 = vmatprep.subr.bf16.mxu0 %v4675_v31  ;;  %v4619_v31 = vcombine.high %v391_v25, %v395_v54  ;;  %v499_v51 = vld [vmem:[%s5240_s29 + $0x768] sm:$0xff] }
  0x9c   : > { %3154 = vmatpush1.bf16.msra.mxu1 %v4490_v30  ;;  %v4562_v30 = vcombine.low %v335_v16, %v339_v18  ;;  %v559_v52 = vld [vmem:[%s5240_s29 + $0x948] sm:$0xff] }
  0x9d   : > { %3155 = vmatprep.subr.bf16.mxu1 %v4611_v32  ;;  %3090 = vmatmul.mubr.bf16.vlgmr.msra.gmra.mxu0 %v5419_v36  ;;  %v4555_v32 = vcombine.high %v327_v26, %v331_v27  ;;  %v563_v53 = vld [vmem:[%s5240_s29 + $0x968] sm:$0xff] }
  0x9e   : > { %3181 = vmatpush1.bf16.msra.mxu0 %v4674_v39  ;;  %3212 = vmatprep.mubr.bf16.mxu0 %v5285_v60  ;;  %v4618_v39 = vcombine.low %v391_v25, %v395_v54  ;;  %v487_v62 = vld [vmem:[%s5240_s29 + $0x708] sm:$0xff] }
  0x9f   : > { %3182 = vmatprep.subr.bf16.mxu0 %v4667_v41  ;;  %v4739_v41 = vcombine.high %v511_v33, %v515_v34  ;;  %v491_v63 = vld [vmem:[%s5240_s29 + $0x728] sm:$0xff] }
  0xa0   : > { %3156 = vmatpush2.bf16.msra.mxu1 %v4610_v40  ;;  %v4554_v40 = vcombine.low %v327_v26, %v331_v27  ;;  %v551_v0 = vld [vmem:[%s5240_s29 + $0x908] sm:$0xff] }
  0xa1   : > { %3157 = vmatprep.subr.bf16.mxu1 %v4603_v42  ;;  %v4803_v42 = vcombine.high %v575_v37, %v579_v38  ;;  %v555_v1 = vld [vmem:[%s5240_s29 + $0x928] sm:$0xff] }
  0xa2   : > { %3183 = vmatpush1.bf16.msra.mxu0 %v4666_v46  ;;  %v4738_v46 = vcombine.low %v511_v33, %v515_v34  ;;  %v479_v6 = vld [vmem:[%s5240_s29 + $0x6c8] sm:$0xff] }
  0xa3   : > { %3184 = vmatprep.subr.bf16.mxu0 %v4659_v48  ;;  %v4731_v48 = vcombine.high %v503_v43, %v507_v44  ;;  %v483_v7 = vld [vmem:[%s5240_s29 + $0x6e8] sm:$0xff] }
  0xa4   : > { %3158 = vmatpush2.bf16.msra.mxu1 %v4602_v47  ;;  %v4802_v47 = vcombine.low %v575_v37, %v579_v38  ;;  %v543_v8 = vld [vmem:[%s5240_s29 + $0x8c8] sm:$0xff] }
  0xa5   : > { %3159 = vmatprep.subr.bf16.mxu1 %v4595_v49  ;;  %v4795_v49 = vcombine.high %v567_v22, %v571_v45  ;;  %v547_v9 = vld [vmem:[%s5240_s29 + $0x8e8] sm:$0xff] }
  0xa6   : > { %3185 = vmatpush1.bf16.msra.mxu0 %v4658_v56  ;;  %v4730_v56 = vcombine.low %v503_v43, %v507_v44  ;;  %v471_v14 = vld [vmem:[%s5240_s29 + $0x688] sm:$0xff] }
  0xa7   : > { %3186 = vmatprep.subr.bf16.mxu0 %v4651_v58  ;;  %v4723_v58 = vcombine.high %v495_v50, %v499_v51  ;;  %v475_v15 = vld [vmem:[%s5240_s29 + $0x6a8] sm:$0xff] }
  0xa8   : > { %3160 = vmatpush2.bf16.msra.mxu1 %v4594_v57  ;;  %v4794_v57 = vcombine.low %v567_v22, %v571_v45  ;;  %v535_v16 = vld [vmem:[%s5240_s29 + $0x888] sm:$0xff] }
  0xa9   : > { %3161 = vmatprep.subr.bf16.mxu1 %v4587_v61  ;;  %v4787_v61 = vcombine.high %v559_v52, %v563_v53  ;;  %v539_v18 = vld [vmem:[%s5240_s29 + $0x8a8] sm:$0xff] }
  0xaa   : > { %3187 = vmatpush1.bf16.msra.mxu0 %v4650_v2  ;;  %v4722_v2 = vcombine.low %v495_v50, %v499_v51  ;;  %v463_v25 = vld [vmem:[%s5240_s29 + $0x648] sm:$0xff] }
  0xab   : > { %3188 = vmatprep.subr.bf16.mxu0 %v4643_v4  ;;  %v4715_v4 = vcombine.high %v487_v62, %v491_v63  ;;  %v467_v54 = vld [vmem:[%s5240_s29 + $0x668] sm:$0xff] }
  0xac   : > { %3162 = vmatpush2.bf16.msra.mxu1 %v4586_v3  ;;  %v4786_v3 = vcombine.low %v559_v52, %v563_v53  ;;  %v527_v26 = vld [vmem:[%s5240_s29 + $0x848] sm:$0xff] }
  0xad   : > { %3163 = vmatprep.subr.bf16.mxu1 %v4579_v5  ;;  %v4779_v5 = vcombine.high %v551_v0, %v555_v1  ;;  %v531_v27 = vld [vmem:[%s5240_s29 + $0x868] sm:$0xff] }
  0xae   : > { %3189 = vmatpush1.bf16.msra.mxu0 %v4642_v10  ;;  %v4714_v10 = vcombine.low %v487_v62, %v491_v63  ;;  %v455_v33 = vld [vmem:[%s5240_s29 + $0x608] sm:$0xff] }
  0xaf   : > { %3190 = vmatprep.subr.bf16.mxu0 %v4635_v12  ;;  %v4707_v12 = vcombine.high %v479_v6, %v483_v7  ;;  %v459_v34 = vld [vmem:[%s5240_s29 + $0x628] sm:$0xff] }
  0xb0   : > { %3164 = vmatpush2.bf16.msra.mxu1 %v4578_v11  ;;  %v4778_v11 = vcombine.low %v551_v0, %v555_v1  ;;  %v519_v37 = vld [vmem:[%s5240_s29 + $0x808] sm:$0xff] }
  0xb1   : > { %3165 = vmatprep.subr.bf16.mxu1 %v4571_v13  ;;  %v4771_v13 = vcombine.high %v543_v8, %v547_v9  ;;  %v523_v38 = vld [vmem:[%s5240_s29 + $0x828] sm:$0xff] }
  0xb2   : > { %3191 = vmatpush1.bf16.msra.mxu0 %v4634_v19  ;;  %v4706_v19 = vcombine.low %v479_v6, %v483_v7  ;;  %v703_v43 = vld [vmem:[%s5240_s29 + $0xdc8] sm:$0xff] }
  0xb3   : > { %3192 = vmatprep.subr.bf16.mxu0 %v4627_v23  ;;  %v4699_v23 = vcombine.high %v471_v14, %v475_v15  ;;  %v707_v44 = vld [vmem:[%s5240_s29 + $0xde8] sm:$0xff] }
  0xb4   : > { %3166 = vmatpush2.bf16.msra.mxu1 %v4570_v21  ;;  %v4770_v21 = vcombine.low %v543_v8, %v547_v9  ;;  %v639_v22 = vld [vmem:[%s5240_s29 + $0xbc8] sm:$0xff] }
  0xb5   : > { %3167 = vmatprep.subr.bf16.mxu1 %v4563_v24  ;;  %v4763_v24 = vcombine.high %v535_v16, %v539_v18  ;;  %v643_v45 = vld [vmem:[%s5240_s29 + $0xbe8] sm:$0xff] }
  0xb6   : > { %3193 = vmatpush1.bf16.msra.mxu0 %v4626_v28  ;;  %v4698_v28 = vcombine.low %v471_v14, %v475_v15  ;;  %v695_v50 = vld [vmem:[%s5240_s29 + $0xd88] sm:$0xff] }
  0xb7   : > { %3194 = vmatprep.subr.bf16.mxu0 %v4619_v31  ;;  %v4691_v31 = vcombine.high %v463_v25, %v467_v54  ;;  %v699_v51 = vld [vmem:[%s5240_s29 + $0xda8] sm:$0xff] }
  0xb8   : > { %3168 = vmatpush2.bf16.msra.mxu1 %v4562_v30  ;;  %v4762_v30 = vcombine.low %v535_v16, %v539_v18  ;;  %v631_v52 = vld [vmem:[%s5240_s29 + $0xb88] sm:$0xff] }
  0xb9   : > { %3169 = vmatprep.subr.bf16.mxu1 %v4555_v32  ;;  %v4755_v32 = vcombine.high %v527_v26, %v531_v27  ;;  %v635_v53 = vld [vmem:[%s5240_s29 + $0xba8] sm:$0xff] }
  0xba   : > { %3195 = vmatpush1.bf16.msra.mxu0 %v4618_v39  ;;  %v4690_v39 = vcombine.low %v463_v25, %v467_v54  ;;  %v687_v62 = vld [vmem:[%s5240_s29 + $0xd48] sm:$0xff] }
  0xbb   : > { %3196 = vmatprep.subr.bf16.mxu0 %v4739_v41  ;;  %v4683_v41 = vcombine.high %v455_v33, %v459_v34  ;;  %v691_v63 = vld [vmem:[%s5240_s29 + $0xd68] sm:$0xff] }
  0xbc   : > { %3170 = vmatpush2.bf16.msra.mxu1 %v4554_v40  ;;  %v4754_v40 = vcombine.low %v527_v26, %v531_v27  ;;  %v623_v0 = vld [vmem:[%s5240_s29 + $0xb48] sm:$0xff] }
  0xbd   : > { %3221 = vmatprep.subr.bf16.mxu1 %v4803_v42  ;;  %v4747_v42 = vcombine.high %v519_v37, %v523_v38  ;;  %v627_v1 = vld [vmem:[%s5240_s29 + $0xb68] sm:$0xff] }
  0xbe   : > { %3197 = vmatpush2.bf16.msra.mxu0 %v4738_v46  ;;  %v4682_v46 = vcombine.low %v455_v33, %v459_v34  ;;  %v679_v6 = vld [vmem:[%s5240_s29 + $0xd08] sm:$0xff] }
  0xbf   : > { %3172 = vmatmul.mubr.bf16.vlgmr.msra.gmra.mxu1 %v5331_v17  ;;  %3198 = vmatprep.subr.bf16.mxu0 %v4731_v48  ;;  %v4931_v48 = vcombine.high %v703_v43, %v707_v44  ;;  %v683_v7 = vld [vmem:[%s5240_s29 + $0xd28] sm:$0xff] }
  0xc0   : > { %3222 = vmatpush1.bf16.msra.mxu1 %v4802_v47  ;;  %3253 = vmatprep.mubr.bf16.mxu1 %v5349_v55  ;;  %v4746_v47 = vcombine.low %v519_v37, %v523_v38  ;;  %v615_v8 = vld [vmem:[%s5240_s29 + $0xb08] sm:$0xff] }
  0xc1   : > { %3223 = vmatprep.subr.bf16.mxu1 %v4795_v49  ;;  %v4867_v49 = vcombine.high %v639_v22, %v643_v45  ;;  %v619_v9 = vld [vmem:[%s5240_s29 + $0xb28] sm:$0xff] }
  0xc2   : > { %3199 = vmatpush2.bf16.msra.mxu0 %v4730_v56  ;;  %v4930_v56 = vcombine.low %v703_v43, %v707_v44  ;;  %v671_v14 = vld [vmem:[%s5240_s29 + $0xcc8] sm:$0xff] }
  0xc3   : > { %3200 = vmatprep.subr.bf16.mxu0 %v4723_v58  ;;  %v4923_v58 = vcombine.high %v695_v50, %v699_v51  ;;  %v675_v15 = vld [vmem:[%s5240_s29 + $0xce8] sm:$0xff] }
  0xc4   : > { %3224 = vmatpush1.bf16.msra.mxu1 %v4794_v57  ;;  %v4866_v57 = vcombine.low %v639_v22, %v643_v45  ;;  %v607_v16 = vld [vmem:[%s5240_s29 + $0xac8] sm:$0xff] }
  0xc5   : > { %3225 = vmatprep.subr.bf16.mxu1 %v4787_v61  ;;  %v4859_v61 = vcombine.high %v631_v52, %v635_v53  ;;  %v611_v18 = vld [vmem:[%s5240_s29 + $0xae8] sm:$0xff] }
  0xc6   : > { %3201 = vmatpush2.bf16.msra.mxu0 %v4722_v2  ;;  %v4922_v2 = vcombine.low %v695_v50, %v699_v51  ;;  %v663_v25 = vld [vmem:[%s5240_s29 + $0xc88] sm:$0xff]  ;;  %v320_v50 = vld [vmem:[%s5240_s29 + $0x1d0] sm:$0xff] }
  0xc7   : > { %3202 = vmatprep.subr.bf16.mxu0 %v4715_v4  ;;  %v4915_v4 = vcombine.high %v687_v62, %v691_v63  ;;  %v667_v54 = vld [vmem:[%s5240_s29 + $0xca8] sm:$0xff]  ;;  %v324_v51 = vld [vmem:[%s5240_s29 + $0x1f0] sm:$0xff] }
  0xc8   : > { %3226 = vmatpush1.bf16.msra.mxu1 %v4786_v3  ;;  %v4858_v3 = vcombine.low %v631_v52, %v635_v53  ;;  %v599_v26 = vld [vmem:[%s5240_s29 + $0xa88] sm:$0xff]  ;;  %v448_v52 = vld [vmem:[%s5240_s29 + $0x5d0] sm:$0xff] }
  0xc9   : > { %3227 = vmatprep.subr.bf16.mxu1 %v4779_v5  ;;  %v4851_v5 = vcombine.high %v623_v0, %v627_v1  ;;  %v603_v27 = vld [vmem:[%s5240_s29 + $0xaa8] sm:$0xff]  ;;  %v452_v53 = vld [vmem:[%s5240_s29 + $0x5f0] sm:$0xff] }
  0xca   : > { %3203 = vmatpush2.bf16.msra.mxu0 %v4714_v10  ;;  %v4914_v10 = vcombine.low %v687_v62, %v691_v63  ;;  %v655_v33 = vld [vmem:[%s5240_s29 + $0xc48] sm:$0xff]  ;;  %v312_v62 = vld [vmem:[%s5240_s29 + $0x190] sm:$0xff] }
  0xcb   : > { %3204 = vmatprep.subr.bf16.mxu0 %v4707_v12  ;;  %v4907_v12 = vcombine.high %v679_v6, %v683_v7  ;;  %v659_v34 = vld [vmem:[%s5240_s29 + $0xc68] sm:$0xff]  ;;  %v316_v63 = vld [vmem:[%s5240_s29 + $0x1b0] sm:$0xff] }
  0xcc   : > { %3228 = vmatpush1.bf16.msra.mxu1 %v4778_v11  ;;  %v4850_v11 = vcombine.low %v623_v0, %v627_v1  ;;  %v591_v37 = vld [vmem:[%s5240_s29 + $0xa48] sm:$0xff]  ;;  %v440_v0 = vld [vmem:[%s5240_s29 + $0x590] sm:$0xff] }
  0xcd   : > { %3229 = vmatprep.subr.bf16.mxu1 %v4771_v13  ;;  %v4843_v13 = vcombine.high %v615_v8, %v619_v9  ;;  %v595_v38 = vld [vmem:[%s5240_s29 + $0xa68] sm:$0xff]  ;;  %v444_v1 = vld [vmem:[%s5240_s29 + $0x5b0] sm:$0xff] }
  0xce   : > { %3205 = vmatpush2.bf16.msra.mxu0 %v4706_v19  ;;  %v4906_v19 = vcombine.low %v679_v6, %v683_v7  ;;  %v647_v43 = vld [vmem:[%s5240_s29 + $0xc08] sm:$0xff]  ;;  %v304_v6 = vld [vmem:[%s5240_s29 + $0x150] sm:$0xff] }
  0xcf   : > { %3206 = vmatprep.subr.bf16.mxu0 %v4699_v23  ;;  %v4899_v23 = vcombine.high %v671_v14, %v675_v15  ;;  %v651_v44 = vld [vmem:[%s5240_s29 + $0xc28] sm:$0xff]  ;;  %v308_v7 = vld [vmem:[%s5240_s29 + $0x170] sm:$0xff] }
  0xd0   : > { %3230 = vmatpush1.bf16.msra.mxu1 %v4770_v21  ;;  %v4842_v21 = vcombine.low %v615_v8, %v619_v9  ;;  %v583_v22 = vld [vmem:[%s5240_s29 + $0xa08] sm:$0xff]  ;;  %v432_v8 = vld [vmem:[%s5240_s29 + $0x550] sm:$0xff] }
  0xd1   : > { %3231 = vmatprep.subr.bf16.mxu1 %v4763_v24  ;;  %v4835_v24 = vcombine.high %v607_v16, %v611_v18  ;;  %v587_v45 = vld [vmem:[%s5240_s29 + $0xa28] sm:$0xff]  ;;  %v436_v9 = vld [vmem:[%s5240_s29 + $0x570] sm:$0xff] }
  0xd2   : > { %3207 = vmatpush2.bf16.msra.mxu0 %v4698_v28  ;;  %v4898_v28 = vcombine.low %v671_v14, %v675_v15  ;;  %v296_v14 = vld [vmem:[%s5240_s29 + $0x110] sm:$0xff] }
  0xd3   : > { %3208 = vmatprep.subr.bf16.mxu0 %v4691_v31  ;;  %v4891_v31 = vcombine.high %v663_v25, %v667_v54  ;;  %v300_v15 = vld [vmem:[%s5240_s29 + $0x130] sm:$0xff] }
  0xd4   : > { %3232 = vmatpush1.bf16.msra.mxu1 %v4762_v30  ;;  %v4834_v30 = vcombine.low %v607_v16, %v611_v18  ;;  %v428_v16 = vld [vmem:[%s5240_s29 + $0x530] sm:$0xff]  ;;  %v4532_v18 = vcombine.low %v304_v6, %v308_v7 }
  0xd5   : > { %3233 = vmatprep.subr.bf16.mxu1 %v4755_v32  ;;  %v4827_v32 = vcombine.high %v599_v26, %v603_v27 }
  0xd6   : > { %3209 = vmatpush2.bf16.msra.mxu0 %v4690_v39  ;;  %v4890_v39 = vcombine.low %v663_v25, %v667_v54  ;;  %v292_v25 = vld [vmem:[%s5240_s29 + $0xf0] sm:$0xff] }
  0xd7   : > { %3210 = vmatprep.subr.bf16.mxu0 %v4683_v41  ;;  %v4883_v41 = vcombine.high %v655_v33, %v659_v34  ;;  %v416_v54 = vld [vmem:[%s5240_s29 + $0x4d0] sm:$0xff] }
  0xd8   : > { %3234 = vmatpush1.bf16.msra.mxu1 %v4754_v40  ;;  %v4826_v40 = vcombine.low %v599_v26, %v603_v27  ;;  %v420_v26 = vld [vmem:[%s5240_s29 + $0x4f0] sm:$0xff]  ;;  %v4524_v27 = vcombine.low %v296_v14, %v300_v15 }
  0xd9   : > { %3235 = vmatprep.subr.bf16.mxu1 %v4747_v42  ;;  %v4819_v42 = vcombine.high %v591_v37, %v595_v38 }
  0xda   : > { %3211 = vmatpush2.bf16.msra.mxu0 %v4682_v46  ;;  %v4882_v46 = vcombine.low %v655_v33, %v659_v34  ;;  %v284_v33 = vld [vmem:[%s5240_s29 + $0xb0] sm:$0xff] }
  0xdb   : > { %3262 = vmatprep.subr.bf16.mxu0 %v4931_v48  ;;  %v4875_v48 = vcombine.high %v647_v43, %v651_v44  ;;  %v408_v34 = vld [vmem:[%s5240_s29 + $0x490] sm:$0xff] }
  0xdc   : > { %3236 = vmatpush1.bf16.msra.mxu1 %v4746_v47  ;;  %v4818_v47 = vcombine.low %v591_v37, %v595_v38  ;;  %v412_v37 = vld [vmem:[%s5240_s29 + $0x4b0] sm:$0xff] }
  0xdd   : > { %3237 = vmatprep.subr.bf16.mxu1 %v4867_v49  ;;  %3213 = vmatmul.mubr.bf16.vlgmr.msra.gmra.mxu0 %v5337_v20  ;;  %v4811_v49 = vcombine.high %v583_v22, %v587_v45 }
  0xde   : > { %3263 = vmatpush1.bf16.msra.mxu0 %v4930_v56  ;;  %3294 = vmatprep.mubr.bf16.mxu0 %v5188_v35  ;;  %v4874_v56 = vcombine.low %v647_v43, %v651_v44  ;;  %v276_v43 = vld [vmem:[%s5240_s29 + $0x70] sm:$0xff] }
  0xdf   : > { %3264 = vmatprep.subr.bf16.mxu0 %v4923_v58  ;;  %v4549_v58 = vcombine.high %v320_v50, %v324_v51  ;;  %v400_v44 = vld [vmem:[%s5240_s29 + $0x450] sm:$0xff] }
  0xe0   : > { %3238 = vmatpush2.bf16.msra.mxu1 %v4866_v57  ;;  %v4810_v57 = vcombine.low %v583_v22, %v587_v45  ;;  %v404_v22 = vld [vmem:[%s5240_s29 + $0x470] sm:$0xff] }
  0xe1   : > { %3239 = vmatprep.subr.bf16.mxu1 %v4859_v61  ;;  %v4677_v61 = vcombine.high %v448_v52, %v452_v53 }
  0xe2   : > { %3265 = vmatpush1.bf16.msra.mxu0 %v4922_v2  ;;  %v4548_v2 = vcombine.low %v320_v50, %v324_v51  ;;  %v268_v50 = vld [vmem:[%s5240_s29 + $0x30] sm:$0xff] }
  0xe3   : > { %3266 = vmatprep.subr.bf16.mxu0 %v4915_v4  ;;  %v4541_v4 = vcombine.high %v312_v62, %v316_v63  ;;  %v392_v51 = vld [vmem:[%s5240_s29 + $0x410] sm:$0xff] }
  0xe4   : > { %3240 = vmatpush2.bf16.msra.mxu1 %v4858_v3  ;;  %v4676_v3 = vcombine.low %v448_v52, %v452_v53  ;;  %v396_v52 = vld [vmem:[%s5240_s29 + $0x430] sm:$0xff] }
  0xe5   : > { %3241 = vmatprep.subr.bf16.mxu1 %v4851_v5  ;;  %v4669_v5 = vcombine.high %v440_v0, %v444_v1 }
  0xe6   : > { %3267 = vmatpush1.bf16.msra.mxu0 %v4914_v10  ;;  %v4540_v10 = vcombine.low %v312_v62, %v316_v63  ;;  %v388_v62 = vld [vmem:[%s5240_s29 + $0x3f0] sm:$0xff] }
  0xe7   : > { %3268 = vmatprep.subr.bf16.mxu0 %v4907_v12  ;;  %v4533_v12 = vcombine.high %v304_v6, %v308_v7  ;;  %v512_v63 = vld [vmem:[%s5240_s29 + $0x7d0] sm:$0xff] }
  0xe8   : > { %3242 = vmatpush2.bf16.msra.mxu1 %v4850_v11  ;;  %v4668_v11 = vcombine.low %v440_v0, %v444_v1  ;;  %v516_v0 = vld [vmem:[%s5240_s29 + $0x7f0] sm:$0xff] }
  0xe9   : > { %3243 = vmatprep.subr.bf16.mxu1 %v4843_v13  ;;  %v4661_v13 = vcombine.high %v432_v8, %v436_v9  ;;  %v380_v6 = vld [vmem:[%s5240_s29 + $0x3b0] sm:$0xff] }
  0xea   : > { %3269 = vmatpush1.bf16.msra.mxu0 %v4906_v19  ;;  %v4660_v19 = vcombine.low %v432_v8, %v436_v9  ;;  %v504_v7 = vld [vmem:[%s5240_s29 + $0x790] sm:$0xff] }
  0xeb   : > { %3270 = vmatprep.subr.bf16.mxu0 %v4899_v23  ;;  %v508_v8 = vld [vmem:[%s5240_s29 + $0x7b0] sm:$0xff] }
  0xec   : > { %3244 = vmatpush2.bf16.msra.mxu1 %v4842_v21  ;;  %v4525_v21 = vcombine.high %v296_v14, %v300_v15  ;;  %v372_v14 = vld [vmem:[%s5240_s29 + $0x370] sm:$0xff] }
  0xed   : > { %3245 = vmatprep.subr.bf16.mxu1 %v4835_v24  ;;  %v288_v24 = vld [vmem:[%s5240_s29 + $0xd0] sm:$0xff] }
  0xee   : > { %3271 = vmatpush1.bf16.msra.mxu0 %v4898_v28  ;;  %v4516_v38 = vcombine.low %v288_v24, %v292_v25 }
  0xef   : > { %3272 = vmatprep.subr.bf16.mxu0 %v4891_v31  ;;  %v4645_v31 = vcombine.high %v416_v54, %v420_v26 }
  0xf0   : > { %3246 = vmatpush2.bf16.msra.mxu1 %v4834_v30  ;;  %v4517_v30 = vcombine.high %v288_v24, %v292_v25 }
  0xf1   : > { %3247 = vmatprep.subr.bf16.mxu1 %v4827_v32  ;;  %v280_v32 = vld [vmem:[%s5240_s29 + $0x90] sm:$0xff] }
  0xf2   : > { %3273 = vmatpush1.bf16.msra.mxu0 %v4890_v39  ;;  %v4644_v39 = vcombine.low %v416_v54, %v420_v26  ;;  %v4508_v45 = vcombine.low %v280_v32, %v284_v33  ;;  %v360_v26 = vld [vmem:[%s5240_s29 + $0x310] sm:$0xff] }
  0xf3   : > { %3274 = vmatprep.subr.bf16.mxu0 %v4883_v41  ;;  %v4637_v41 = vcombine.high %v408_v34, %v412_v37 }
  0xf4   : > { %3248 = vmatpush2.bf16.msra.mxu1 %v4826_v40  ;;  %v4509_v40 = vcombine.high %v280_v32, %v284_v33 }
  0xf5   : > { %3249 = vmatprep.subr.bf16.mxu1 %v4819_v42  ;;  %v272_v42 = vld [vmem:[%s5240_s29 + $0x50] sm:$0xff] }
  0xf6   : > { %3275 = vmatpush1.bf16.msra.mxu0 %v4882_v46  ;;  %v4636_v46 = vcombine.low %v408_v34, %v412_v37  ;;  %v4500_v53 = vcombine.low %v272_v42, %v276_v43 }
  0xf7   : > { %3276 = vmatprep.subr.bf16.mxu0 %v4875_v48  ;;  %v4629_v48 = vcombine.high %v400_v44, %v404_v22 }
  0xf8   : > { %3250 = vmatpush2.bf16.msra.mxu1 %v4818_v47  ;;  %v4501_v47 = vcombine.high %v272_v42, %v276_v43  ;;  %v356_v42 = vld [vmem:[%s5240_s29 + $0x2f0] sm:$0xff] }
  0xf9   : > { %3251 = vmatprep.subr.bf16.mxu1 %v4811_v49  ;;  %v264_v49 = vld [vmem:[%s5240_s29 + $0x10] sm:$0xff] }
  0xfa   : > { %3277 = vmatpush1.bf16.msra.mxu0 %v4874_v56  ;;  %v4628_v56 = vcombine.low %v400_v44, %v404_v22  ;;  %v4492_v1 = vcombine.low %v264_v49, %v268_v50  ;;  %v480_v43 = vld [vmem:[%s5240_s29 + $0x6d0] sm:$0xff] }
  0xfb   : > { %3303 = vmatprep.subr.bf16.mxu0 %v4549_v58  ;;  %v4621_v58 = vcombine.high %v392_v51, %v396_v52  ;;  %v484_v44 = vld [vmem:[%s5240_s29 + $0x6f0] sm:$0xff] }
  0xfc   : > { %3252 = vmatpush2.bf16.msra.mxu1 %v4810_v57  ;;  %v4493_v57 = vcombine.high %v264_v49, %v268_v50  ;;  %v348_v49 = vld [vmem:[%s5240_s29 + $0x2b0] sm:$0xff] }
  0xfd   : > { %3344 = vmatprep.subr.bf16.mxu1 %v4677_v61  ;;  %3295 = vmatmul.mubr.bf16.vlgmr.msra.gmra.mxu0 %v5383_v29  ;;  %v424_v29 = vld [vmem:[%s5240_s29 + $0x510] sm:$0xff] }
  0xfe   : > { %3304 = vmatpush1.bf16.msra.mxu0 %v4548_v2  ;;  %3335 = vmatprep.mubr.bf16.mxu0 %v5281_v59  ;;  %v4653_v23 = vcombine.high %v424_v29, %v428_v16  ;;  %v4652_v28 = vcombine.low %v424_v29, %v428_v16  ;;  %v384_v61 = vld [vmem:[%s5240_s29 + $0x3d0] sm:$0xff]  ;;  %v4620_v2 = vcombine.low %v392_v51, %v396_v52 }
  0xff   : > { %3254 = vmatmul.mubr.bf16.vlgmr.msra.gmra.mxu1 %v5419_v36  ;;  %3305 = vmatprep.subr.bf16.mxu0 %v4541_v4  ;;  %v4741_v4 = vcombine.high %v512_v63, %v516_v0  ;;  %v4612_v9 = vcombine.low %v384_v61, %v388_v62  ;;  %v496_v29 = vld [vmem:[%s5240_s29 + $0x750] sm:$0xff] }
 0x100   : > { %3345 = vmatpush1.bf16.msra.mxu1 %v4676_v3  ;;  %3376 = vmatprep.mubr.bf16.mxu1 %v5285_v60  ;;  %v4613_v3 = vcombine.high %v384_v61, %v388_v62  ;;  %v500_v16 = vld [vmem:[%s5240_s29 + $0x770] sm:$0xff] }
 0x101   : > { %3346 = vmatprep.subr.bf16.mxu1 %v4669_v5  ;;  %v376_v5 = vld [vmem:[%s5240_s29 + $0x390] sm:$0xff]  ;;  %v4725_v54 = vcombine.high %v496_v29, %v500_v16  ;;  %v4724_v37 = vcombine.low %v496_v29, %v500_v16 }
 0x102   : > { %3306 = vmatpush1.bf16.msra.mxu0 %v4540_v10  ;;  %v4740_v10 = vcombine.low %v512_v63, %v516_v0  ;;  %v472_v50 = vld [vmem:[%s5240_s29 + $0x690] sm:$0xff] }
 0x103   : > { %3307 = vmatprep.subr.bf16.mxu0 %v4533_v12  ;;  %v4733_v12 = vcombine.high %v504_v7, %v508_v8  ;;  %v476_v51 = vld [vmem:[%s5240_s29 + $0x6b0] sm:$0xff] }
 0x104   : > { %3347 = vmatpush1.bf16.msra.mxu1 %v4668_v11  ;;  %v4605_v11 = vcombine.high %v376_v5, %v380_v6  ;;  %v340_v61 = vld [vmem:[%s5240_s29 + $0x270] sm:$0xff] }
 0x105   : > { %3348 = vmatprep.subr.bf16.mxu1 %v4661_v13  ;;  %v368_v13 = vld [vmem:[%s5240_s29 + $0x350] sm:$0xff] }
 0x106   : > { %3308 = vmatpush1.bf16.msra.mxu0 %v4532_v18  ;;  %v4597_v24 = vcombine.high %v368_v13, %v372_v14  ;;  %v4596_v33 = vcombine.low %v368_v13, %v372_v14  ;;  %v464_v62 = vld [vmem:[%s5240_s29 + $0x650] sm:$0xff] }
 0x107   : > { %3309 = vmatprep.subr.bf16.mxu0 %v4525_v21  ;;  %v468_v63 = vld [vmem:[%s5240_s29 + $0x670] sm:$0xff] }
 0x108   : > { %3349 = vmatpush1.bf16.msra.mxu1 %v4660_v19  ;;  %v4604_v19 = vcombine.low %v376_v5, %v380_v6  ;;  %v332_v5 = vld [vmem:[%s5240_s29 + $0x230] sm:$0xff] }
 0x109   : > { %3350 = vmatprep.subr.bf16.mxu1 %v4653_v23  ;;  %v4732_v23 = vcombine.low %v504_v7, %v508_v8  ;;  %v456_v6 = vld [vmem:[%s5240_s29 + $0x610] sm:$0xff] }
 0x10a   : > { %3310 = vmatpush1.bf16.msra.mxu0 %v4524_v27  ;;  %v364_v27 = vld [vmem:[%s5240_s29 + $0x330] sm:$0xff] }
 0x10b   : > { %3311 = vmatprep.subr.bf16.mxu0 %v4517_v30  ;;  %v488_v30 = vld [vmem:[%s5240_s29 + $0x710] sm:$0xff]  ;;  %v4588_v22 = vcombine.low %v360_v26, %v364_v27 }
 0x10c   : > { %3351 = vmatpush1.bf16.msra.mxu1 %v4652_v28  ;;  %v460_v7 = vld [vmem:[%s5240_s29 + $0x630] sm:$0xff] }
 0x10d   : > { %3352 = vmatprep.subr.bf16.mxu1 %v4645_v31  ;;  %v492_v31 = vld [vmem:[%s5240_s29 + $0x730] sm:$0xff] }
 0x10e   : > { %3312 = vmatpush1.bf16.msra.mxu0 %v4516_v38  ;;  %v4589_v38 = vcombine.high %v360_v26, %v364_v27  ;;  %v580_v13 = vld [vmem:[%s5240_s29 + $0x9f0] sm:$0xff] }
 0x10f   : > { %3313 = vmatprep.subr.bf16.mxu0 %v4509_v40  ;;  %v4717_v40 = vcombine.high %v488_v30, %v492_v31  ;;  %v704_v14 = vld [vmem:[%s5240_s29 + $0xdd0] sm:$0xff] }
 0x110   : > { %3353 = vmatpush1.bf16.msra.mxu1 %v4644_v39  ;;  %v708_v29 = vld [vmem:[%s5240_s29 + $0xdf0] sm:$0xff] }
 0x111   : > { %3354 = vmatprep.subr.bf16.mxu1 %v4637_v41  ;;  %v352_v41 = vld [vmem:[%s5240_s29 + $0x2d0] sm:$0xff] }
 0x112   : > { %3314 = vmatpush1.bf16.msra.mxu0 %v4508_v45  ;;  %v4716_v45 = vcombine.low %v488_v30, %v492_v31  ;;  %v4580_v52 = vcombine.low %v352_v41, %v356_v42  ;;  %v572_v26 = vld [vmem:[%s5240_s29 + $0x9b0] sm:$0xff]  ;;  %v4932_v31 = vcombine.low %v704_v14, %v708_v29 }
 0x113   : > { %3315 = vmatprep.subr.bf16.mxu0 %v4501_v47  ;;  %v4709_v47 = vcombine.high %v480_v43, %v484_v44  ;;  %v696_v27 = vld [vmem:[%s5240_s29 + $0xd90] sm:$0xff] }
 0x114   : > { %3355 = vmatpush1.bf16.msra.mxu1 %v4636_v46  ;;  %v4581_v46 = vcombine.high %v352_v41, %v356_v42 }
 0x115   : > { %3356 = vmatprep.subr.bf16.mxu1 %v4629_v48  ;;  %v344_v48 = vld [vmem:[%s5240_s29 + $0x290] sm:$0xff] }
 0x116   : > { %3316 = vmatpush1.bf16.msra.mxu0 %v4500_v53  ;;  %v4708_v53 = vcombine.low %v480_v43, %v484_v44  ;;  %v4572_v0 = vcombine.low %v344_v48, %v348_v49 }
 0x117   : > { %3317 = vmatprep.subr.bf16.mxu0 %v4493_v57  ;;  %v4701_v57 = vcombine.high %v472_v50, %v476_v51 }
 0x118   : > { %3357 = vmatpush1.bf16.msra.mxu1 %v4628_v56  ;;  %v4573_v56 = vcombine.high %v344_v48, %v348_v49  ;;  %v684_v48 = vld [vmem:[%s5240_s29 + $0xd30] sm:$0xff] }
 0x119   : > { %3358 = vmatprep.subr.bf16.mxu1 %v4621_v58  ;;  %v336_v58 = vld [vmem:[%s5240_s29 + $0x250] sm:$0xff] }
 0x11a   : > { %3318 = vmatpush1.bf16.msra.mxu0 %v4492_v1  ;;  %v4700_v1 = vcombine.low %v472_v50, %v476_v51  ;;  %v4564_v8 = vcombine.low %v336_v58, %v340_v61 }
 0x11b   : > { %3319 = vmatprep.subr.bf16.mxu0 %v4613_v3  ;;  %v4693_v3 = vcombine.high %v464_v62, %v468_v63 }
 0x11c   : > { %3359 = vmatpush1.bf16.msra.mxu1 %v4620_v2  ;;  %v4565_v2 = vcombine.high %v336_v58, %v340_v61  ;;  %v548_v58 = vld [vmem:[%s5240_s29 + $0x8f0] sm:$0xff] }
 0x11d   : > { %3360 = vmatprep.subr.bf16.mxu1 %v4741_v4  ;;  %v5563_v15 = vpop.f32.mrf.mxu0  ;;  %v328_v4 = vld [vmem:[%s5240_s29 + $0x210] sm:$0xff] }
 0x11e   : > { %3320 = vmatpush2.bf16.msra.mxu0 %v4612_v9  ;;  %v4692_v9 = vcombine.low %v464_v62, %v468_v63  ;;  %v4556_v16 = vcombine.low %v328_v4, %v332_v5  ;;  %v672_v61 = vld [vmem:[%s5240_s29 + $0xcd0] sm:$0xff] }
 0x11f   : > { %v5567_v18 = vpop.f32.mrf.mxu1  ;;  %v5569_v21 = vpop.f32.mrf.mxu0  ;;  %3321 = vmatprep.subr.bf16.mxu0 %v4605_v11  ;;  %v4685_v11 = vcombine.high %v456_v6, %v460_v7  ;;  %v676_v62 = vld [vmem:[%s5240_s29 + $0xcf0] sm:$0xff] }
 0x120   : > { %3361 = vmatpush2.bf16.msra.mxu1 %v4740_v10  ;;  %v4557_v10 = vcombine.high %v328_v4, %v332_v5  ;;  %v540_v4 = vld [vmem:[%s5240_s29 + $0x8b0] sm:$0xff] }
 0x121   : > { %v5571_v25 = vpop.f32.mrf.mxu1  ;;  %3362 = vmatprep.subr.bf16.mxu1 %v4733_v12  ;;  %v3013_v28 = vpop.f32.mrf.mxu0  ;;  %v576_v12 = vld [vmem:[%s5240_s29 + $0x9d0] sm:$0xff] }
 0x122   : > { %3322 = vmatpush2.bf16.msra.mxu0 %v4604_v19  ;;  %v4684_v19 = vcombine.low %v456_v6, %v460_v7  ;;  %v700_v28 = vld [vmem:[%s5240_s29 + $0xdb0] sm:$0xff]  ;;  %v4804_v30 = vcombine.low %v576_v12, %v580_v13 }
 0x123   : > { %v3054_v32 = vpop.f32.mrf.mxu1  ;;  %v3014_v34 = vpop.f32.mrf.mxu0  ;;  %3323 = vmatprep.subr.bf16.mxu0 %v4597_v24  ;;  %v4933_v24 = vcombine.high %v704_v14, %v708_v29  ;;  %v4924_v42 = vcombine.low %v696_v27, %v700_v28  ;;  %v664_v5 = vld [vmem:[%s5240_s29 + $0xc90] sm:$0xff] }
 0x124   : > { %3363 = vmatpush2.bf16.msra.mxu1 %v4732_v23  ;;  %v4805_v23 = vcombine.high %v576_v12, %v580_v13  ;;  %v560_v34 = vld [vmem:[%s5240_s29 + $0x950] sm:$0xff] }
 0x125   : > { %v3055_v39 = vpop.f32.mrf.mxu1  ;;  %3364 = vmatprep.subr.bf16.mxu1 %v4725_v54  ;;  %v568_v54 = vld [vmem:[%s5240_s29 + $0x990] sm:$0xff] }
 0x126   : > { %3324 = vmatpush2.bf16.msra.mxu0 %v4596_v33  ;;  %v4797_v32 = vcombine.high %v568_v54, %v572_v26  ;;  %v4925_v33 = vcombine.high %v696_v27, %v700_v28  ;;  %v692_v39 = vld [vmem:[%s5240_s29 + $0xd70] sm:$0xff]  ;;  %v4796_v41 = vcombine.low %v568_v54, %v572_v26 }
 0x127   : > { %3325 = vmatprep.subr.bf16.mxu0 %v4589_v38  ;;  %v688_v38 = vld [vmem:[%s5240_s29 + $0xd50] sm:$0xff] }
 0x128   : > { %3365 = vmatpush2.bf16.msra.mxu1 %v4724_v37  ;;  %v564_v37 = vld [vmem:[%s5240_s29 + $0x970] sm:$0xff]  ;;  %v4916_v51 = vcombine.low %v688_v38, %v692_v39 }
 0x129   : > { %3366 = vmatprep.subr.bf16.mxu1 %v4717_v40  ;;  %v4789_v43 = vcombine.high %v560_v34, %v564_v37  ;;  %v4788_v50 = vcombine.low %v560_v34, %v564_v37  ;;  %v668_v6 = vld [vmem:[%s5240_s29 + $0xcb0] sm:$0xff]  ;;  %v321_v37 = vld [vmem:[%s5240_s29 + $0x1d8] sm:$0xff] }
 0x12a   : > { %3326 = vmatpush2.bf16.msra.mxu0 %v4588_v22  ;;  %v4917_v22 = vcombine.high %v688_v38, %v692_v39  ;;  %v532_v12 = vld [vmem:[%s5240_s29 + $0x870] sm:$0xff]  ;;  %v325_v38 = vld [vmem:[%s5240_s29 + $0x1f8] sm:$0xff] }
 0x12b   : > { %3327 = vmatprep.subr.bf16.mxu0 %v4581_v46  ;;  %v556_v46 = vld [vmem:[%s5240_s29 + $0x930] sm:$0xff] }
 0x12c   : > { %3367 = vmatpush2.bf16.msra.mxu1 %v4716_v45  ;;  %v552_v45 = vld [vmem:[%s5240_s29 + $0x910] sm:$0xff] }
 0x12d   : > { %3368 = vmatprep.subr.bf16.mxu1 %v4709_v47  ;;  %v680_v47 = vld [vmem:[%s5240_s29 + $0xd10] sm:$0xff]  ;;  %v4780_v63 = vcombine.low %v552_v45, %v556_v46 }
 0x12e   : > { %3328 = vmatpush2.bf16.msra.mxu0 %v4580_v52  ;;  %v4781_v52 = vcombine.high %v552_v45, %v556_v46  ;;  %v656_v13 = vld [vmem:[%s5240_s29 + $0xc50] sm:$0xff]  ;;  %v313_v46 = vld [vmem:[%s5240_s29 + $0x198] sm:$0xff] }
 0x12f   : > { %3329 = vmatprep.subr.bf16.mxu0 %v4573_v56  ;;  %v4909_v56 = vcombine.high %v680_v47, %v684_v48  ;;  %v660_v14 = vld [vmem:[%s5240_s29 + $0xc70] sm:$0xff] }
 0x130   : > { %3369 = vmatpush2.bf16.msra.mxu1 %v4708_v53  ;;  %v524_v54 = vld [vmem:[%s5240_s29 + $0x830] sm:$0xff] }
 0x131   : > { %3370 = vmatprep.subr.bf16.mxu1 %v4701_v57  ;;  %v544_v57 = vld [vmem:[%s5240_s29 + $0x8d0] sm:$0xff] }
 0x132   : > { %3330 = vmatpush2.bf16.msra.mxu0 %v4572_v0  ;;  %v4908_v0 = vcombine.low %v680_v47, %v684_v48  ;;  %v4772_v7 = vcombine.low %v544_v57, %v548_v58  ;;  %v648_v26 = vld [vmem:[%s5240_s29 + $0xc10] sm:$0xff]  ;;  %v317_v47 = vld [vmem:[%s5240_s29 + $0x1b8] sm:$0xff] }
 0x133   : > { %3331 = vmatprep.subr.bf16.mxu0 %v4565_v2  ;;  %v4901_v2 = vcombine.high %v672_v61, %v676_v62  ;;  %v652_v27 = vld [vmem:[%s5240_s29 + $0xc30] sm:$0xff] }
 0x134   : > { %3371 = vmatpush2.bf16.msra.mxu1 %v4700_v1  ;;  %v4773_v1 = vcombine.high %v544_v57, %v548_v58  ;;  %v644_v34 = vld [vmem:[%s5240_s29 + $0xbf0] sm:$0xff]  ;;  %v305_v58 = vld [vmem:[%s5240_s29 + $0x158] sm:$0xff] }
 0x135   : > { %3372 = vmatprep.subr.bf16.mxu1 %v4693_v3  ;;  %v536_v3 = vld [vmem:[%s5240_s29 + $0x890] sm:$0xff] }
 0x136   : > { %3332 = vmatpush2.bf16.msra.mxu0 %v4564_v8  ;;  %v4900_v8 = vcombine.low %v672_v61, %v676_v62  ;;  %v4764_v29 = vcombine.low %v536_v3, %v540_v4  ;;  %v636_v45 = vld [vmem:[%s5240_s29 + $0xbb0] sm:$0xff]  ;;  %v309_v61 = vld [vmem:[%s5240_s29 + $0x178] sm:$0xff]  ;;  %v3053_v62 = vadd.f32 %v5571_v25, %v5569_v21 }
 0x137   : > { %3333 = vmatprep.subr.bf16.mxu0 %v4557_v10  ;;  %v4893_v10 = vcombine.high %v664_v5, %v668_v6  ;;  %v4535_v25 = vcombine.high %v305_v58, %v309_v61 }
 0x138   : > { %3373 = vmatpush2.bf16.msra.mxu1 %v4692_v9  ;;  %v4765_v9 = vcombine.high %v536_v3, %v540_v4 }
 0x139   : > { %3374 = vmatprep.subr.bf16.mxu1 %v4685_v11  ;;  %v528_v11 = vld [vmem:[%s5240_s29 + $0x850] sm:$0xff] }
 0x13a   : > { %3334 = vmatpush2.bf16.msra.mxu0 %v4556_v16  ;;  %v4892_v16 = vcombine.low %v664_v5, %v668_v6  ;;  %v4756_v28 = vcombine.low %v528_v11, %v532_v12  ;;  %v616_v5 = vld [vmem:[%s5240_s29 + $0xb10] sm:$0xff] }
 0x13b   : > { %3385 = vmatprep.subr.bf16.mxu0 %v4805_v23  ;;  %v4885_v23 = vcombine.high %v656_v13, %v660_v14  ;;  %v620_v6 = vld [vmem:[%s5240_s29 + $0xb30] sm:$0xff] }
 0x13c   : > { %3375 = vmatpush2.bf16.msra.mxu1 %v4684_v19  ;;  %v4757_v19 = vcombine.high %v528_v11, %v532_v12 }
 0x13d   : > { %3426 = vmatprep.subr.bf16.mxu1 %v4933_v24  ;;  %3336 = vmatmul.mubr.bf16.vlgmr.msra.gmra.mxu0 %v5331_v17  ;;  %v520_v24 = vld [vmem:[%s5240_s29 + $0x810] sm:$0xff] }
 0x13e   : > { %3386 = vmatpush1.bf16.msra.mxu0 %v4804_v30  ;;  %3417 = vmatprep.mubr.bf16.mxu0 %v5349_v55  ;;  %v4884_v30 = vcombine.low %v656_v13, %v660_v14  ;;  %v4748_v39 = vcombine.low %v520_v24, %v524_v54  ;;  %v4534_v14 = vcombine.low %v305_v58, %v309_v61  ;;  %v449_v61 = vld [vmem:[%s5240_s29 + $0x5d8] sm:$0xff] }
 0x13f   : > { %v5606_v40 = vpop.f32.mrf.mxu1  ;;  %3377 = vmatmul.mubr.bf16.vlgmr.msra.gmra.mxu1 %v5337_v20  ;;  %3387 = vmatprep.subr.bf16.mxu0 %v4797_v32  ;;  %v4877_v32 = vcombine.high %v648_v26, %v652_v27 }
 0x140   : > { %3427 = vmatpush1.bf16.msra.mxu1 %v4932_v31  ;;  %3458 = vmatprep.mubr.bf16.mxu1 %v5188_v35  ;;  %v4749_v31 = vcombine.high %v520_v24, %v524_v54  ;;  %v289_v24 = vld [vmem:[%s5240_s29 + $0xd8] sm:$0xff] }
 0x141   : > { %v5609_v44 = vpop.f32.mrf.mxu1  ;;  %3428 = vmatprep.subr.bf16.mxu1 %v4925_v33  ;;  %v640_v33 = vld [vmem:[%s5240_s29 + $0xbd0] sm:$0xff]  ;;  %v293_v54 = vld [vmem:[%s5240_s29 + $0xf8] sm:$0xff] }
 0x142   : > { %3388 = vmatpush1.bf16.msra.mxu0 %v4796_v41  ;;  %v4876_v41 = vcombine.low %v648_v26, %v652_v27  ;;  %v4868_v48 = vcombine.low %v640_v33, %v644_v34 }
 0x143   : > { %v3136_v49 = vpop.f32.mrf.mxu1  ;;  %3389 = vmatprep.subr.bf16.mxu0 %v4789_v43  ;;  %v4551_v43 = vcombine.high %v321_v37, %v325_v38 }
 0x144   : > { %3429 = vmatpush1.bf16.msra.mxu1 %v4924_v42  ;;  %v4869_v42 = vcombine.high %v640_v33, %v644_v34  ;;  %v4550_v49 = vcombine.low %v321_v37, %v325_v38  ;;  %v285_v33 = vld [vmem:[%s5240_s29 + $0xb8] sm:$0xff]  ;;  %v4518_v37 = vcombine.low %v289_v24, %v293_v54 }
 0x145   : > { %v3137_v53 = vpop.f32.mrf.mxu1  ;;  %3430 = vmatprep.subr.bf16.mxu1 %v4917_v22  ;;  %v632_v22 = vld [vmem:[%s5240_s29 + $0xb90] sm:$0xff] }
 0x146   : > { %3390 = vmatpush1.bf16.msra.mxu0 %v4788_v50  ;;  %v4861_v50 = vcombine.high %v632_v22, %v636_v45  ;;  %v624_v53 = vld [vmem:[%s5240_s29 + $0xb50] sm:$0xff] }
 0x147   : > { %3391 = vmatprep.subr.bf16.mxu0 %v4781_v52  ;;  %v4543_v52 = vcombine.high %v313_v46, %v317_v47 }
 0x148   : > { %3431 = vmatpush1.bf16.msra.mxu1 %v4916_v51  ;;  %v3051_v51 = vadd.f32 %v5567_v18, %v5563_v15  ;;  %v250_v15 = vld [vmem:[#allocation2 + $0x30] sm:$0xff] }
 0x149   : > { %3432 = vmatprep.subr.bf16.mxu1 %v4909_v56  ;;  %v628_v56 = vld [vmem:[%s5240_s29 + $0xb70] sm:$0xff] }
 0x14a   : > { %3392 = vmatpush1.bf16.msra.mxu0 %v4780_v63  ;;  %v4853_v3 = vcombine.high %v624_v53, %v628_v56 }
 0x14b   : > { %3393 = vmatprep.subr.bf16.mxu0 %v4773_v1  ;;  %v4860_v1 = vcombine.low %v632_v22, %v636_v45  ;;  %v277_v22 = vld [vmem:[%s5240_s29 + $0x78] sm:$0xff] }
 0x14c   : > { %3433 = vmatpush1.bf16.msra.mxu1 %v4908_v0  ;;  %v5650_v0 = vld [vmem:[%s5235_s25 + $0x18] ss:$0 sps:$4 sm:$0xff]  }
 0x14d   : > { %3434 = vmatprep.subr.bf16.mxu1 %v4901_v2  ;;  %v4542_v2 = vcombine.low %v313_v46, %v317_v47 }
 0x14e   : > { %3394 = vmatpush1.bf16.msra.mxu0 %v4772_v7  ;;  %v251_v7 = vld [vmem:[#allocation2] sm:$0xff] }
 0x14f   : > { %3395 = vmatprep.subr.bf16.mxu0 %v4765_v9  ;;  %v297_v9 = vld [vmem:[%s5240_s29 + $0x118] sm:$0xff] }
 0x150   : > { %3435 = vmatpush1.bf16.msra.mxu1 %v4900_v8 }
 0x151   : > { %3436 = vmatprep.subr.bf16.mxu1 %v4893_v10  ;;  %v301_v10 = vld [vmem:[%s5240_s29 + $0x138] sm:$0xff] }
 0x152   : > { %3396 = vmatpush1.bf16.msra.mxu0 %v4764_v29  ;;  %v4845_v29 = vcombine.high %v616_v5, %v620_v6  ;;  %v4526_v26 = vcombine.low %v297_v9, %v301_v10 }
 0x153   : > { %3397 = vmatprep.subr.bf16.mxu0 %v4757_v19  ;;  %v608_v19 = vld [vmem:[%s5240_s29 + $0xad0] sm:$0xff] }
 0x154   : > { %3437 = vmatpush1.bf16.msra.mxu1 %v4892_v16  ;;  %v4527_v16 = vcombine.high %v297_v9, %v301_v10  ;;  %v433_v10 = vld [vmem:[%s5240_s29 + $0x558] sm:$0xff] }
 0x155   : > { %3438 = vmatprep.subr.bf16.mxu1 %v4885_v23  ;;  %v612_v23 = vld [vmem:[%s5240_s29 + $0xaf0] sm:$0xff] }
 0x156   : > { %3398 = vmatpush1.bf16.msra.mxu0 %v4756_v28  ;;  %v4837_v27 = vcombine.high %v608_v19, %v612_v23  ;;  %v4519_v28 = vcombine.high %v289_v24, %v293_v54  ;;  %v4836_v34 = vcombine.low %v608_v19, %v612_v23  ;;  %v425_v23 = vld [vmem:[%s5240_s29 + $0x518] sm:$0xff] }
 0x157   : > { %3399 = vmatprep.subr.bf16.mxu0 %v4749_v31  ;;  %v604_v31 = vld [vmem:[%s5240_s29 + $0xab0] sm:$0xff]  ;;  %v429_v24 = vld [vmem:[%s5240_s29 + $0x538] sm:$0xff] }
 0x158   : > { %3439 = vmatpush1.bf16.msra.mxu1 %v4884_v30  ;;  %v600_v30 = vld [vmem:[%s5240_s29 + $0xa90] sm:$0xff]  ;;  %v361_v54 = vld [vmem:[%s5240_s29 + $0x318] sm:$0xff] }
 0x159   : > { %3440 = vmatprep.subr.bf16.mxu1 %v4877_v32  ;;  %v281_v32 = vld [vmem:[%s5240_s29 + $0x98] sm:$0xff]  ;;  %v4829_v38 = vcombine.high %v600_v30, %v604_v31  ;;  %v4828_v45 = vcombine.low %v600_v30, %v604_v31 }
 0x15a   : > { %3400 = vmatpush1.bf16.msra.mxu0 %v4748_v39  ;;  %v4511_v39 = vcombine.high %v281_v32, %v285_v33  ;;  %v4510_v46 = vcombine.low %v281_v32, %v285_v33  ;;  %v417_v32 = vld [vmem:[%s5240_s29 + $0x4d8] sm:$0xff] }
 0x15b   : > { %3401 = vmatprep.subr.bf16.mxu0 %v4869_v42  ;;  %v596_v42 = vld [vmem:[%s5240_s29 + $0xa70] sm:$0xff]  ;;  %v421_v33 = vld [vmem:[%s5240_s29 + $0x4f8] sm:$0xff] }
 0x15c   : > { %3441 = vmatpush1.bf16.msra.mxu1 %v4876_v41  ;;  %v592_v41 = vld [vmem:[%s5240_s29 + $0xa50] sm:$0xff] }
 0x15d   : > { %3467 = vmatprep.subr.bf16.mxu1 %v4551_v43  ;;  %v3091_v57 = vpop.f32.mrf.mxu0  ;;  %v273_v43 = vld [vmem:[%s5240_s29 + $0x58] sm:$0xff]  ;;  %v4821_v47 = vcombine.high %v592_v41, %v596_v42 }
 0x15e   : > { %v3092_v63 = vadd.f32 %v3091_v57, %v3051_v51  ;;  %3402 = vmatpush2.bf16.msra.mxu0 %v4868_v48  ;;  %v4503_v48 = vcombine.high %v273_v43, %v277_v22  ;;  %v265_v51 = vld [vmem:[%s5240_s29 + $0x18] sm:$0xff] }
 0x15f   : > { %3459 = vmatmul.mubr.bf16.vlgmr.msra.gmra.mxu1 %v5650_v0  ;;  %v3093_v18 = vpop.f32.mrf.mxu0  ;;  %3403 = vmatprep.subr.bf16.mxu0 %v4861_v50  ;;  %v588_v50 = vld [vmem:[%s5240_s29 + $0xa30] sm:$0xff] }
 0x160   : > { %3468 = vmatpush1.bf16.msra.mxu1 %v4550_v49  ;;  %v3133_v4 = vadd.f32 %v5606_v40, %v3092_v63  ;;  %v3094_v21 = vadd.f32 %v3093_v18, %v3053_v62  ;;  %3499 = vmatprep.mubr.bf16.mxu1 %v5281_v59  ;;  %v4852_v40 = vcombine.low %v624_v53, %v628_v56  ;;  %v584_v49 = vld [vmem:[%s5240_s29 + $0xa10] sm:$0xff]  ;;  %v453_v62 = vld [vmem:[%s5240_s29 + $0x5f8] sm:$0xff] }
 0x161   : > { %3469 = vmatprep.subr.bf16.mxu1 %v4543_v52  ;;  %v3095_v8 = vpop.f32.mrf.mxu0  ;;  %v269_v52 = vld [vmem:[%s5240_s29 + $0x38] sm:$0xff]  ;;  %v4820_v53 = vcombine.low %v592_v41, %v596_v42  ;;  %v4502_v56 = vcombine.low %v273_v43, %v277_v22  ;;  %v4813_v57 = vcombine.high %v584_v49, %v588_v50  ;;  %v4647_v41 = vcombine.high %v417_v32, %v421_v33 }
 0x162   : > { %v3631_v11 = vadd.f32 %v3133_v4, %v250_v15  ;;  %v3135_v12 = vadd.f32 %v5609_v44, %v3094_v21  ;;  %3404 = vmatpush2.bf16.msra.mxu0 %v4860_v1  ;;  %v4844_v44 = vcombine.low %v616_v5, %v620_v6  ;;  %v4495_v58 = vcombine.high %v265_v51, %v269_v52  ;;  %v385_v63 = vld [vmem:[%s5240_s29 + $0x3d8] sm:$0xff] }
 0x163   : > { %v3096_v13 = vpop.f32.mrf.mxu0  ;;  %3405 = vmatprep.subr.bf16.mxu0 %v4853_v3  ;;  %v389_v1 = vld [vmem:[%s5240_s29 + $0x3f8] sm:$0xff]  ;;  %v4812_v15 = vcombine.low %v584_v49, %v588_v50  ;;  %v4494_v18 = vcombine.low %v265_v51, %v269_v52  ;;  %v4678_v6 = vcombine.low %v449_v61, %v453_v62 }
 0x164   : > { %3470 = vmatpush1.bf16.msra.mxu1 %v4542_v2  ;;  %3639 = vst [vmem:[#allocation2 + $0x30] sm:$0xff] %v3631_v11  ;;  %v3632_v59 = vadd.f32 %v3135_v12, %v251_v7  ;;  %v4679_v2 = vcombine.high %v449_v61, %v453_v62  ;;  %v4615_v3 = vcombine.high %v385_v63, %v389_v1  ;;  %v441_v4 = vld [vmem:[%s5240_s29 + $0x598] sm:$0xff] }
 0x165   : > { %3471 = vmatprep.subr.bf16.mxu1 %v4535_v25  ;;  %v445_v21 = vld [vmem:[%s5240_s29 + $0x5b8] sm:$0xff]  ;;  %v4614_v7 = vcombine.low %v385_v63, %v389_v1 }
 0x166   : > { %3640 = vst [vmem:[#allocation2] sm:$0xff] %v3632_v59  ;;  %3406 = vmatpush2.bf16.msra.mxu0 %v4852_v40  ;;  %v377_v25 = vld [vmem:[%s5240_s29 + $0x398] sm:$0xff]  ;;  %v4671_v8 = vcombine.high %v441_v4, %v445_v21 }
 0x167   : > { %3407 = vmatprep.subr.bf16.mxu0 %v4845_v29  ;;  %v381_v5 = vld [vmem:[%s5240_s29 + $0x3b8] sm:$0xff] }
 0x168   : > { %3472 = vmatpush1.bf16.msra.mxu1 %v4534_v14  ;;  %v4607_v9 = vcombine.high %v377_v25, %v381_v5  ;;  %v437_v11 = vld [vmem:[%s5240_s29 + $0x578] sm:$0xff]  ;;  %v4670_v14 = vcombine.low %v441_v4, %v445_v21  ;;  %v4606_v29 = vcombine.low %v377_v25, %v381_v5 }
 0x169   : > { %3473 = vmatprep.subr.bf16.mxu1 %v4527_v16  ;;  %v369_v12 = vld [vmem:[%s5240_s29 + $0x358] sm:$0xff]  ;;  %v4663_v59 = vcombine.high %v433_v10, %v437_v11 }
 0x16a   : > { %3408 = vmatpush2.bf16.msra.mxu0 %v4844_v44  ;;  %v373_v40 = vld [vmem:[%s5240_s29 + $0x378] sm:$0xff] }
 0x16b   : > { %3409 = vmatprep.subr.bf16.mxu0 %v4837_v27  ;;  %v4599_v19 = vcombine.high %v369_v12, %v373_v40  ;;  %v365_v44 = vld [vmem:[%s5240_s29 + $0x338] sm:$0xff]  ;;  %v4662_v27 = vcombine.low %v433_v10, %v437_v11 }
 0x16c   : > { %3474 = vmatpush1.bf16.msra.mxu1 %v4526_v26  ;;  %v4591_v31 = vcombine.high %v361_v54, %v365_v44  ;;  %v409_v43 = vld [vmem:[%s5240_s29 + $0x498] sm:$0xff] }
 0x16d   : > { %3475 = vmatprep.subr.bf16.mxu1 %v4519_v28  ;;  %v4655_v28 = vcombine.high %v425_v23, %v429_v24  ;;  %v413_v22 = vld [vmem:[%s5240_s29 + $0x4b8] sm:$0xff] }
 0x16e   : > { %3410 = vmatpush2.bf16.msra.mxu0 %v4836_v34  ;;  %v353_v34 = vld [vmem:[%s5240_s29 + $0x2d8] sm:$0xff]  ;;  %v4639_v49 = vcombine.high %v409_v43, %v413_v22 }
 0x16f   : > { %3411 = vmatprep.subr.bf16.mxu0 %v4829_v38  ;;  %v4654_v38 = vcombine.low %v425_v23, %v429_v24  ;;  %v401_v51 = vld [vmem:[%s5240_s29 + $0x458] sm:$0xff] }
 0x170   : > { %3476 = vmatpush1.bf16.msra.mxu1 %v4518_v37  ;;  %v357_v37 = vld [vmem:[%s5240_s29 + $0x2f8] sm:$0xff] }
 0x171   : > { %3477 = vmatprep.subr.bf16.mxu1 %v4511_v39  ;;  %v4590_v39 = vcombine.low %v361_v54, %v365_v44  ;;  %v4583_v42 = vcombine.high %v353_v34, %v357_v37  ;;  %v405_v52 = vld [vmem:[%s5240_s29 + $0x478] sm:$0xff] }
 0x172   : > { %3412 = vmatpush2.bf16.msra.mxu0 %v4828_v45  ;;  %v345_v45 = vld [vmem:[%s5240_s29 + $0x298] sm:$0xff]  ;;  %v4631_v61 = vcombine.high %v401_v51, %v405_v52 }
 0x173   : > { %3413 = vmatprep.subr.bf16.mxu0 %v4821_v47  ;;  %v4646_v47 = vcombine.low %v417_v32, %v421_v33  ;;  %v393_v63 = vld [vmem:[%s5240_s29 + $0x418] sm:$0xff] }
 0x174   : > { %3478 = vmatpush1.bf16.msra.mxu1 %v4510_v46  ;;  %v349_v46 = vld [vmem:[%s5240_s29 + $0x2b8] sm:$0xff] }
 0x175   : > { %3479 = vmatprep.subr.bf16.mxu1 %v4503_v48  ;;  %v4582_v48 = vcombine.low %v353_v34, %v357_v37  ;;  %v4575_v50 = vcombine.high %v345_v45, %v349_v46  ;;  %v397_v1 = vld [vmem:[%s5240_s29 + $0x438] sm:$0xff] }
 0x176   : > { %3414 = vmatpush2.bf16.msra.mxu0 %v4820_v53  ;;  %v337_v53 = vld [vmem:[%s5240_s29 + $0x258] sm:$0xff]  ;;  %v4623_v4 = vcombine.high %v393_v63, %v397_v1 }
 0x177   : > { %3415 = vmatprep.subr.bf16.mxu0 %v4813_v57  ;;  %v4638_v57 = vcombine.low %v409_v43, %v413_v22  ;;  %v513_v25 = vld [vmem:[%s5240_s29 + $0x7d8] sm:$0xff] }
 0x178   : > { %3480 = vmatpush1.bf16.msra.mxu1 %v4502_v56  ;;  %v341_v56 = vld [vmem:[%s5240_s29 + $0x278] sm:$0xff] }
 0x179   : > { %3481 = vmatprep.subr.bf16.mxu1 %v4495_v58  ;;  %v4574_v58 = vcombine.low %v345_v45, %v349_v46  ;;  %v4567_v62 = vcombine.high %v337_v53, %v341_v56  ;;  %v517_v5 = vld [vmem:[%s5240_s29 + $0x7f8] sm:$0xff] }
 0x17a   : > { %3416 = vmatpush2.bf16.msra.mxu0 %v4812_v15  ;;  %v329_v15 = vld [vmem:[%s5240_s29 + $0x218] sm:$0xff]  ;;  %v4743_v10 = vcombine.high %v513_v25, %v517_v5 }
 0x17b   : > { %3508 = vmatprep.subr.bf16.mxu0 %v4679_v2  ;;  %v4630_v2 = vcombine.low %v401_v51, %v405_v52  ;;  %v497_v54 = vld [vmem:[%s5240_s29 + $0x758] sm:$0xff] }
 0x17c   : > { %3482 = vmatpush1.bf16.msra.mxu1 %v4494_v18  ;;  %v333_v18 = vld [vmem:[%s5240_s29 + $0x238] sm:$0xff] }
 0x17d   : > { %3483 = vmatprep.subr.bf16.mxu1 %v4615_v3  ;;  %3418 = vmatmul.mubr.bf16.vlgmr.msra.gmra.mxu0 %v5419_v36  ;;  %v4566_v3 = vcombine.low %v337_v53, %v341_v56  ;;  %v4559_v21 = vcombine.high %v329_v15, %v333_v18  ;;  %v501_v44 = vld [vmem:[%s5240_s29 + $0x778] sm:$0xff] }
 0x17e   : > { %3509 = vmatpush1.bf16.msra.mxu0 %v4678_v6  ;;  %3540 = vmatprep.mubr.bf16.mxu0 %v5285_v60  ;;  %v4598_v60 = vcombine.low %v369_v12, %v373_v40  ;;  %v577_v6 = vld [vmem:[%s5240_s29 + $0x9d8] sm:$0xff]  ;;  %v4727_v32 = vcombine.high %v497_v54, %v501_v44 }
 0x17f   : > { %v5689_v13 = vpop.f32.mrf.mxu1  ;;  %3510 = vmatprep.subr.bf16.mxu0 %v4671_v8  ;;  %v4622_v8 = vcombine.low %v393_v63, %v397_v1  ;;  %v505_v12 = vld [vmem:[%s5240_s29 + $0x798] sm:$0xff] }
 0x180   : > { %3484 = vmatpush2.bf16.msra.mxu1 %v4614_v7  ;;  %v581_v7 = vld [vmem:[%s5240_s29 + $0x9f8] sm:$0xff] }
 0x181   : > { %v5692_v16 = vpop.f32.mrf.mxu1  ;;  %3485 = vmatprep.subr.bf16.mxu1 %v4607_v9  ;;  %v4558_v9 = vcombine.low %v329_v15, %v333_v18  ;;  %v4807_v11 = vcombine.high %v577_v6, %v581_v7  ;;  %v509_v40 = vld [vmem:[%s5240_s29 + $0x7b8] sm:$0xff] }
 0x182   : > { %3511 = vmatpush1.bf16.msra.mxu0 %v4670_v14  ;;  %v569_v14 = vld [vmem:[%s5240_s29 + $0x998] sm:$0xff]  ;;  %v4735_v23 = vcombine.high %v505_v12, %v509_v40 }
 0x183   : > { %v3177_v26 = vpop.f32.mrf.mxu1  ;;  %3512 = vmatprep.subr.bf16.mxu0 %v4663_v59  ;;  %v4742_v59 = vcombine.low %v513_v25, %v517_v5  ;;  %v489_v34 = vld [vmem:[%s5240_s29 + $0x718] sm:$0xff] }
 0x184   : > { %3486 = vmatpush2.bf16.msra.mxu1 %v4606_v29  ;;  %v573_v29 = vld [vmem:[%s5240_s29 + $0x9b8] sm:$0xff] }
 0x185   : > { %v3178_v30 = vpop.f32.mrf.mxu1  ;;  %3487 = vmatprep.subr.bf16.mxu1 %v4599_v19  ;;  %v4806_v19 = vcombine.low %v577_v6, %v581_v7  ;;  %v4799_v24 = vcombine.high %v569_v14, %v573_v29  ;;  %v493_v37 = vld [vmem:[%s5240_s29 + $0x738] sm:$0xff] }
 0x186   : > { %3513 = vmatpush1.bf16.msra.mxu0 %v4662_v27  ;;  %v561_v27 = vld [vmem:[%s5240_s29 + $0x958] sm:$0xff]  ;;  %v4719_v22 = vcombine.high %v489_v34, %v493_v37 }
 0x187   : > { %3514 = vmatprep.subr.bf16.mxu0 %v4655_v28  ;;  %v4734_v28 = vcombine.low %v505_v12, %v509_v40  ;;  %v481_v46 = vld [vmem:[%s5240_s29 + $0x6d8] sm:$0xff] }
 0x188   : > { %3488 = vmatpush2.bf16.msra.mxu1 %v4598_v60  ;;  %v565_v60 = vld [vmem:[%s5240_s29 + $0x978] sm:$0xff] }
 0x189   : > { %3489 = vmatprep.subr.bf16.mxu1 %v4591_v31  ;;  %v4798_v31 = vcombine.low %v569_v14, %v573_v29  ;;  %v4791_v33 = vcombine.high %v561_v27, %v565_v60  ;;  %v4790_v43 = vcombine.low %v561_v27, %v565_v60  ;;  %v473_v53 = vld [vmem:[%s5240_s29 + $0x698] sm:$0xff] }
 0x18a   : > { %3515 = vmatpush1.bf16.msra.mxu0 %v4654_v38  ;;  %v477_v56 = vld [vmem:[%s5240_s29 + $0x6b8] sm:$0xff] }
 0x18b   : > { %3516 = vmatprep.subr.bf16.mxu0 %v4647_v41  ;;  %v4726_v41 = vcombine.low %v497_v54, %v501_v44  ;;  %v4703_v63 = vcombine.high %v473_v53, %v477_v56  ;;  %v465_v15 = vld [vmem:[%s5240_s29 + $0x658] sm:$0xff] }
 0x18c   : > { %3490 = vmatpush2.bf16.msra.mxu1 %v4590_v39  ;;  %v557_v39 = vld [vmem:[%s5240_s29 + $0x938] sm:$0xff] }
 0x18d   : > { %3491 = vmatprep.subr.bf16.mxu1 %v4583_v42  ;;  %v469_v18 = vld [vmem:[%s5240_s29 + $0x678] sm:$0xff] }
 0x18e   : > { %3517 = vmatpush1.bf16.msra.mxu0 %v4646_v47  ;;  %v485_v47 = vld [vmem:[%s5240_s29 + $0x6f8] sm:$0xff]  ;;  %v4695_v25 = vcombine.high %v465_v15, %v469_v18 }
 0x18f   : > { %3518 = vmatprep.subr.bf16.mxu0 %v4639_v49  ;;  %v4718_v49 = vcombine.low %v489_v34, %v493_v37  ;;  %v4711_v51 = vcombine.high %v481_v46, %v485_v47  ;;  %v457_v6 = vld [vmem:[%s5240_s29 + $0x618] sm:$0xff] }
 0x190   : > { %3492 = vmatpush2.bf16.msra.mxu1 %v4582_v48  ;;  %v549_v48 = vld [vmem:[%s5240_s29 + $0x8f8] sm:$0xff] }
 0x191   : > { %3493 = vmatprep.subr.bf16.mxu1 %v4575_v50  ;;  %v461_v7 = vld [vmem:[%s5240_s29 + $0x638] sm:$0xff] }
 0x192   : > { %3519 = vmatpush1.bf16.msra.mxu0 %v4638_v57  ;;  %v537_v57 = vld [vmem:[%s5240_s29 + $0x898] sm:$0xff]  ;;  %v4687_v12 = vcombine.high %v457_v6, %v461_v7 }
 0x193   : > { %3520 = vmatprep.subr.bf16.mxu0 %v4631_v61  ;;  %v4710_v61 = vcombine.low %v481_v46, %v485_v47  ;;  %v705_v14 = vld [vmem:[%s5240_s29 + $0xdd8] sm:$0xff] }
 0x194   : > { %3494 = vmatpush2.bf16.msra.mxu1 %v4574_v58  ;;  %v541_v58 = vld [vmem:[%s5240_s29 + $0x8b8] sm:$0xff] }
 0x195   : > { %3495 = vmatprep.subr.bf16.mxu1 %v4567_v62  ;;  %v4767_v1 = vcombine.high %v537_v57, %v541_v58  ;;  %v709_v29 = vld [vmem:[%s5240_s29 + $0xdf8] sm:$0xff] }
 0x196   : > { %3521 = vmatpush1.bf16.msra.mxu0 %v4630_v2  ;;  %v529_v2 = vld [vmem:[%s5240_s29 + $0x858] sm:$0xff]  ;;  %v4935_v54 = vcombine.high %v705_v14, %v709_v29 }
 0x197   : > { %3522 = vmatprep.subr.bf16.mxu0 %v4623_v4  ;;  %v4702_v4 = vcombine.low %v473_v53, %v477_v56  ;;  %v697_v27 = vld [vmem:[%s5240_s29 + $0xd98] sm:$0xff] }
 0x198   : > { %3496 = vmatpush2.bf16.msra.mxu1 %v4566_v3  ;;  %v533_v3 = vld [vmem:[%s5240_s29 + $0x878] sm:$0xff] }
 0x199   : > { %3497 = vmatprep.subr.bf16.mxu1 %v4559_v21  ;;  %v4766_v21 = vcombine.low %v537_v57, %v541_v58  ;;  %v4759_v5 = vcombine.high %v529_v2, %v533_v3  ;;  %v701_v60 = vld [vmem:[%s5240_s29 + $0xdb8] sm:$0xff] }
 0x19a   : > { %3523 = vmatpush1.bf16.msra.mxu0 %v4622_v8  ;;  %v521_v8 = vld [vmem:[%s5240_s29 + $0x818] sm:$0xff]  ;;  %v4927_v34 = vcombine.high %v697_v27, %v701_v60  ;;  %v4926_v46 = vcombine.low %v697_v27, %v701_v60 }
 0x19b   : > { %3524 = vmatprep.subr.bf16.mxu0 %v4743_v10  ;;  %v4694_v10 = vcombine.low %v465_v15, %v469_v18  ;;  %v621_v57 = vld [vmem:[%s5240_s29 + $0xb38] sm:$0xff] }
 0x19c   : > { %3498 = vmatpush2.bf16.msra.mxu1 %v4558_v9  ;;  %v525_v9 = vld [vmem:[%s5240_s29 + $0x838] sm:$0xff] }
 0x19d   : > { %3549 = vmatprep.subr.bf16.mxu1 %v4807_v11  ;;  %v5724_v26 = vpop.f32.mrf.mxu0  ;;  %v4758_v11 = vcombine.low %v529_v2, %v533_v3  ;;  %v4751_v40 = vcombine.high %v521_v8, %v525_v9  ;;  %v673_v3 = vld [vmem:[%s5240_s29 + $0xcd8] sm:$0xff] }
 0x19e   : > { %3525 = vmatpush2.bf16.msra.mxu0 %v4742_v59  ;;  %v641_v59 = vld [vmem:[%s5240_s29 + $0xbd8] sm:$0xff] }
 0x19f   : > { %3500 = vmatmul.mubr.bf16.vlgmr.msra.gmra.mxu1 %v5331_v17  ;;  %v5729_v30 = vpop.f32.mrf.mxu0  ;;  %3526 = vmatprep.subr.bf16.mxu0 %v4735_v23  ;;  %v553_v17 = vld [vmem:[%s5240_s29 + $0x918] sm:$0xff]  ;;  %v4686_v23 = vcombine.low %v457_v6, %v461_v7 }
 0x1a0   : > { %3550 = vmatpush1.bf16.msra.mxu1 %v4806_v19  ;;  %3581 = vmatprep.mubr.bf16.mxu1 %v5349_v55  ;;  %v4783_v45 = vcombine.high %v553_v17, %v557_v39  ;;  %v545_v55 = vld [vmem:[%s5240_s29 + $0x8d8] sm:$0xff]  ;;  %v4782_v50 = vcombine.low %v553_v17, %v557_v39  ;;  %v3215_v39 = vadd.f32 %v5724_v26, %v5689_v13 }
 0x1a1   : > { %3551 = vmatprep.subr.bf16.mxu1 %v4799_v24  ;;  %v3218_v38 = vpop.f32.mrf.mxu0  ;;  %v4775_v52 = vcombine.high %v545_v55, %v549_v48  ;;  %v4774_v62 = vcombine.low %v545_v55, %v549_v48  ;;  %v645_v19 = vld [vmem:[%s5240_s29 + $0xbf8] sm:$0xff]  ;;  %v4750_v24 = vcombine.low %v521_v8, %v525_v9  ;;  %v3217_v47 = vadd.f32 %v5729_v30, %v5692_v16  ;;  %v253_v16 = vld [vmem:[#allocation2 + $0x10] sm:$0xff] }
 0x1a2   : > { %3527 = vmatpush2.bf16.msra.mxu0 %v4734_v28  ;;  %v4871_v44 = vcombine.high %v641_v59, %v645_v19  ;;  %v633_v28 = vld [vmem:[%s5240_s29 + $0xb98] sm:$0xff] }
 0x1a3   : > { %v3219_v42 = vpop.f32.mrf.mxu0  ;;  %3528 = vmatprep.subr.bf16.mxu0 %v4727_v32  ;;  %v4934_v32 = vcombine.low %v705_v14, %v709_v29  ;;  %v689_v38 = vld [vmem:[%s5240_s29 + $0xd58] sm:$0xff] }
 0x1a4   : > { %3552 = vmatpush1.bf16.msra.mxu1 %v4798_v31  ;;  %v637_v31 = vld [vmem:[%s5240_s29 + $0xbb8] sm:$0xff] }
 0x1a5   : > { %3553 = vmatprep.subr.bf16.mxu1 %v4791_v33  ;;  %v4870_v33 = vcombine.low %v641_v59, %v645_v19  ;;  %v4863_v37 = vcombine.high %v633_v28, %v637_v31  ;;  %v693_v17 = vld [vmem:[%s5240_s29 + $0xd78] sm:$0xff] }
 0x1a6   : > { %3529 = vmatpush2.bf16.msra.mxu0 %v4726_v41  ;;  %v625_v42 = vld [vmem:[%s5240_s29 + $0xb58] sm:$0xff] }
 0x1a7   : > { %3530 = vmatprep.subr.bf16.mxu0 %v4719_v22  ;;  %v252_v26 = vld [vmem:[#allocation2 + $0x18] sm:$0xff] }
 0x1a8   : > { %3554 = vmatpush1.bf16.msra.mxu1 %v4790_v43  ;;  %v629_v43 = vld [vmem:[%s5240_s29 + $0xb78] sm:$0xff] }
 0x1a9   : > { %3555 = vmatprep.subr.bf16.mxu1 %v4783_v45  ;;  %v4862_v45 = vcombine.low %v633_v28, %v637_v31  ;;  %v4854_v58 = vcombine.low %v625_v42, %v629_v43 }
 0x1aa   : > { %3531 = vmatpush2.bf16.msra.mxu0 %v4718_v49  ;;  %v4855_v49 = vcombine.high %v625_v42, %v629_v43 }
 0x1ab   : > { %3532 = vmatprep.subr.bf16.mxu0 %v4711_v51  ;;  %v685_v51 = vld [vmem:[%s5240_s29 + $0xd38] sm:$0xff] }
 0x1ac   : > { %3556 = vmatpush1.bf16.msra.mxu1 %v4782_v50  ;;  %v681_v50 = vld [vmem:[%s5240_s29 + $0xd18] sm:$0xff] }
 0x1ad   : > { %3557 = vmatprep.subr.bf16.mxu1 %v4775_v52  ;;  %v4911_v15 = vcombine.high %v681_v50, %v685_v51  ;;  %v4910_v6 = vcombine.low %v681_v50, %v685_v51 }
 0x1ae   : > { %3533 = vmatpush2.bf16.msra.mxu0 %v4710_v61  ;;  %v4918_v61 = vcombine.low %v689_v38, %v693_v17 }
 0x1af   : > { %3534 = vmatprep.subr.bf16.mxu0 %v4703_v63 }
 0x1b0   : > { %3558 = vmatpush1.bf16.msra.mxu1 %v4774_v62 }
 0x1b1   : > { %3559 = vmatprep.subr.bf16.mxu1 %v4767_v1 }
 0x1b2   : > { %3535 = vmatpush2.bf16.msra.mxu0 %v4702_v4  ;;  %v677_v4 = vld [vmem:[%s5240_s29 + $0xcf8] sm:$0xff] }
 0x1b3   : > { %3536 = vmatprep.subr.bf16.mxu0 %v4695_v25  ;;  %v609_v25 = vld [vmem:[%s5240_s29 + $0xad8] sm:$0xff]  ;;  %v4903_v8 = vcombine.high %v673_v3, %v677_v4  ;;  %v4902_v14 = vcombine.low %v673_v3, %v677_v4 }
 0x1b4   : > { %3560 = vmatpush1.bf16.msra.mxu1 %v4766_v21 }
 0x1b5   : > { %3561 = vmatprep.subr.bf16.mxu1 %v4759_v5  ;;  %v613_v5 = vld [vmem:[%s5240_s29 + $0xaf8] sm:$0xff] }
 0x1b6   : > { %3537 = vmatpush2.bf16.msra.mxu0 %v4694_v10  ;;  %v4839_v9 = vcombine.high %v609_v25, %v613_v5  ;;  %v665_v10 = vld [vmem:[%s5240_s29 + $0xc98] sm:$0xff]  ;;  %v4838_v29 = vcombine.low %v609_v25, %v613_v5 }
 0x1b7   : > { %3538 = vmatprep.subr.bf16.mxu0 %v4687_v12  ;;  %v601_v12 = vld [vmem:[%s5240_s29 + $0xa98] sm:$0xff] }
 0x1b8   : > { %3562 = vmatpush1.bf16.msra.mxu1 %v4758_v11  ;;  %v669_v11 = vld [vmem:[%s5240_s29 + $0xcb8] sm:$0xff] }
 0x1b9   : > { %3563 = vmatprep.subr.bf16.mxu1 %v4751_v40  ;;  %v605_v40 = vld [vmem:[%s5240_s29 + $0xab8] sm:$0xff]  ;;  %v4895_v59 = vcombine.high %v665_v10, %v669_v11  ;;  %v4894_v27 = vcombine.low %v665_v10, %v669_v11 }
 0x1ba   : > { %3539 = vmatpush2.bf16.msra.mxu0 %v4686_v23  ;;  %v4831_v19 = vcombine.high %v601_v12, %v605_v40  ;;  %v657_v23 = vld [vmem:[%s5240_s29 + $0xc58] sm:$0xff]  ;;  %v4830_v60 = vcombine.low %v601_v12, %v605_v40  ;;  %v256_v12 = vld [vmem:[#allocation2 + $0x28] sm:$0xff] }
 0x1bb   : > { %3590 = vmatprep.subr.bf16.mxu0 %v4935_v54  ;;  %v593_v54 = vld [vmem:[%s5240_s29 + $0xa58] sm:$0xff] }
 0x1bc   : > { %3564 = vmatpush1.bf16.msra.mxu1 %v4750_v24  ;;  %v661_v24 = vld [vmem:[%s5240_s29 + $0xc78] sm:$0xff] }
 0x1bd   : > { %3565 = vmatprep.subr.bf16.mxu1 %v4871_v44  ;;  %v3296_v41 = vpop.f32.mrf.mxu0  ;;  %3541 = vmatmul.mubr.bf16.vlgmr.msra.gmra.mxu0 %v5337_v20  ;;  %v4919_v20 = vcombine.high %v689_v38, %v693_v17  ;;  %v597_v44 = vld [vmem:[%s5240_s29 + $0xa78] sm:$0xff]  ;;  %v4887_v28 = vcombine.high %v657_v23, %v661_v24  ;;  %v4886_v38 = vcombine.low %v657_v23, %v661_v24 }
 0x1be   : > { %3591 = vmatpush1.bf16.msra.mxu0 %v4934_v32  ;;  %3622 = vmatprep.mubr.bf16.mxu0 %v5188_v35  ;;  %v617_v35 = vld [vmem:[%s5240_s29 + $0xb18] sm:$0xff]  ;;  %v4823_v31 = vcombine.high %v593_v54, %v597_v44  ;;  %v4822_v17 = vcombine.low %v593_v54, %v597_v44 }
 0x1bf   : > { %v3255_v22 = vpop.f32.mrf.mxu1  ;;  %v3298_v13 = vpop.f32.mrf.mxu0  ;;  %3592 = vmatprep.subr.bf16.mxu0 %v4927_v34  ;;  %v4847_v2 = vcombine.high %v617_v35, %v621_v57  ;;  %v4846_v7 = vcombine.low %v617_v35, %v621_v57  ;;  %v649_v32 = vld [vmem:[%s5240_s29 + $0xc18] sm:$0xff]  ;;  %v254_v57 = vld [vmem:[#allocation2 + $0x8] sm:$0xff] }
 0x1c0   : > { %v3256_v55 = vadd.f32 %v3255_v22, %v3215_v39  ;;  %3566 = vmatpush2.bf16.msra.mxu1 %v4870_v33  ;;  %v653_v33 = vld [vmem:[%s5240_s29 + $0xc38] sm:$0xff] }
 0x1c1   : > { %v3257_v48 = vpop.f32.mrf.mxu1  ;;  %3567 = vmatprep.subr.bf16.mxu1 %v4863_v37  ;;  %v3300_v56 = vpop.f32.mrf.mxu0  ;;  %v585_v34 = vld [vmem:[%s5240_s29 + $0xa18] sm:$0xff]  ;;  %v4879_v39 = vcombine.high %v649_v32, %v653_v33  ;;  %v4878_v42 = vcombine.low %v649_v32, %v653_v33 }
 0x1c2   : > { %v3297_v52 = vadd.f32 %v3296_v41, %v3256_v55  ;;  %v3258_v53 = vadd.f32 %v3257_v48, %v3217_v47  ;;  %3593 = vmatpush1.bf16.msra.mxu0 %v4926_v46  ;;  %v589_v37 = vld [vmem:[%s5240_s29 + $0xa38] sm:$0xff] }
 0x1c3   : > { %v3259_v30 = vpop.f32.mrf.mxu1  ;;  %v3301_v1 = vpop.f32.mrf.mxu0  ;;  %3594 = vmatprep.subr.bf16.mxu0 %v4919_v20  ;;  %v4815_v41 = vcombine.high %v585_v34, %v589_v37  ;;  %v4814_v43 = vcombine.low %v585_v34, %v589_v37 }
 0x1c4   : > { %v3633_v62 = vadd.f32 %v3297_v52, %v252_v26  ;;  %v3299_v63 = vadd.f32 %v3298_v13, %v3258_v53  ;;  %3568 = vmatpush2.bf16.msra.mxu1 %v4862_v45  ;;  %v255_v30 = vld [vmem:[#allocation2 + $0x20] sm:$0xff] }
 0x1c5   : > { %v3260_v18 = vpop.f32.mrf.mxu1  ;;  %3569 = vmatprep.subr.bf16.mxu1 %v4855_v49 }
 0x1c6   : > { %3641 = vst [vmem:[#allocation2 + $0x18] sm:$0xff] %v3633_v62  ;;  %v3634_v21 = vadd.f32 %v3299_v63, %v253_v16  ;;  %3595 = vmatpush1.bf16.msra.mxu0 %v4918_v61 }
 0x1c7   : > { %3596 = vmatprep.subr.bf16.mxu0 %v4911_v15 }
 0x1c8   : > { %3642 = vst [vmem:[#allocation2 + $0x10] sm:$0xff] %v3634_v21  ;;  %3570 = vmatpush2.bf16.msra.mxu1 %v4854_v58 }
 0x1c9   : > { %3571 = vmatprep.subr.bf16.mxu1 %v4847_v2 }
 0x1ca   : > { %3597 = vmatpush1.bf16.msra.mxu0 %v4910_v6 }
 0x1cb   : > { %3598 = vmatprep.subr.bf16.mxu0 %v4903_v8 }
 0x1cc   : > { %3572 = vmatpush2.bf16.msra.mxu1 %v4846_v7 }
 0x1cd   : > { %3573 = vmatprep.subr.bf16.mxu1 %v4839_v9 }
 0x1ce   : > { %3599 = vmatpush1.bf16.msra.mxu0 %v4902_v14 }
 0x1cf   : > { %3600 = vmatprep.subr.bf16.mxu0 %v4895_v59 }
 0x1d0   : > { %3574 = vmatpush2.bf16.msra.mxu1 %v4838_v29 }
 0x1d1   : > { %3575 = vmatprep.subr.bf16.mxu1 %v4831_v19  ;;  %v257_v19 = vld [vmem:[#allocation2 + $0x38] sm:$0xff] }
 0x1d2   : > { %3601 = vmatpush1.bf16.msra.mxu0 %v4894_v27 }
 0x1d3   : > { %3602 = vmatprep.subr.bf16.mxu0 %v4887_v28 }
 0x1d4   : > { %3576 = vmatpush2.bf16.msra.mxu1 %v4830_v60 }
 0x1d5   : > { %3577 = vmatprep.subr.bf16.mxu1 %v4823_v31 }
 0x1d6   : > { %3603 = vmatpush1.bf16.msra.mxu0 %v4886_v38 }
 0x1d7   : > { %3604 = vmatprep.subr.bf16.mxu0 %v4879_v39 }
 0x1d8   : > { %3578 = vmatpush2.bf16.msra.mxu1 %v4822_v17 }
 0x1d9   : > { %3579 = vmatprep.subr.bf16.mxu1 %v4815_v41 }
 0x1da   : > { %3605 = vmatpush1.bf16.msra.mxu0 %v4878_v42 }
 0x1dc   : > { %3580 = vmatpush2.bf16.msra.mxu1 %v4814_v43 }
 0x1dd   : > { %3623 = vmatmul.mubr.bf16.vlgmr.msra.gmra.mxu0 %v5650_v0 }
 0x1df   : > { %3582 = vmatmul.mubr.bf16.vlgmr.msra.gmra.mxu1 %v5419_v36 }
 0x1fd   : > { %v3337_v22 = vpop.f32.mrf.mxu0 }
 0x1ff   : > { %v3378_v45 = vpop.f32.mrf.mxu1  ;;  %v3339_v46 = vpop.f32.mrf.mxu0 }
 0x200   : > { %v3379_v52 = vadd.f32 %v3378_v45, %v3337_v22 }
 0x201   : > { %v3380_v47 = vpop.f32.mrf.mxu1  ;;  %v3341_v55 = vpop.f32.mrf.mxu0 }
 0x202   : > { %v3381_v56 = vadd.f32 %v3380_v47, %v3339_v46 }
 0x203   : > { %v3382_v13 = vpop.f32.mrf.mxu1  ;;  %v3342_v20 = vpop.f32.mrf.mxu0 }
 0x205   : > { %v3383_v26 = vpop.f32.mrf.mxu1 }
 0x21f   : > { %v3460_v48 = vpop.f32.mrf.mxu1 }
 0x221   : > { %v3462_v49 = vpop.f32.mrf.mxu1 }
 0x223   : > { %v3464_v50 = vpop.f32.mrf.mxu1 }
 0x225   : > { %v3465_v51 = vpop.f32.mrf.mxu1 }
 0x23d   : > { %v3419_v53 = vpop.f32.mrf.mxu0 }
 0x23e   : > { %v3420_v35 = vadd.f32 %v3419_v53, %v3379_v52 }
 0x23f   : > { %v3421_v0 = vpop.f32.mrf.mxu0 }
 0x240   : > { %v3461_v16 = vadd.f32 %v3460_v48, %v3420_v35  ;;  %v3422_v36 = vadd.f32 %v3421_v0, %v3381_v56 }
 0x241   : > { %v3423_v58 = vpop.f32.mrf.mxu0 }
 0x242   : > { %v3635_v61 = vadd.f32 %v3461_v16, %v254_v57  ;;  %v3463_v62 = vadd.f32 %v3462_v49, %v3422_v36 }
 0x243   : > { %v3424_v63 = vpop.f32.mrf.mxu0 }
 0x244   : > { %3643 = vst [vmem:[#allocation2 + $0x8] sm:$0xff] %v3635_v61  ;;  %v3636_v1 = vadd.f32 %v3463_v62, %v255_v30 }
 0x246   : > { %3644 = vst [vmem:[#allocation2 + $0x20] sm:$0xff] %v3636_v1 }
 0x25f   : > { %v3501_v15 = vpop.f32.mrf.mxu1 }
 0x261   : > { %v3503_v18 = vpop.f32.mrf.mxu1 }
 0x263   : > { %v3505_v2 = vpop.f32.mrf.mxu1 }
 0x265   : > { %v3506_v3 = vpop.f32.mrf.mxu1 }
 0x27d   : > { %v3542_v4 = vpop.f32.mrf.mxu0 }
 0x27e   : > { %v3543_v6 = vadd.f32 %v3542_v4, %v3501_v15 }
 0x27f   : > { %v3544_v21 = vpop.f32.mrf.mxu0 }
 0x280   : > { %v3545_v9 = vadd.f32 %v3544_v21, %v3503_v18 }
 0x281   : > { %v3546_v25 = vpop.f32.mrf.mxu0 }
 0x283   : > { %v3547_v5 = vpop.f32.mrf.mxu0 }
 0x29d   : > { %v3624_v7 = vpop.f32.mrf.mxu0 }
 0x29f   : > { %v3583_v8 = vpop.f32.mrf.mxu1  ;;  %v3626_v11 = vpop.f32.mrf.mxu0 }
 0x2a0   : > { %v3584_v10 = vadd.f32 %v3583_v8, %v3543_v6 }
 0x2a1   : > { %v3585_v40 = vpop.f32.mrf.mxu1  ;;  %v3628_v59 = vpop.f32.mrf.mxu0 }
 0x2a2   : > { %v3625_v14 = vadd.f32 %v3624_v7, %v3584_v10  ;;  %v3586_v29 = vadd.f32 %v3585_v40, %v3545_v9 }
 0x2a3   : > { %v3587_v23 = vpop.f32.mrf.mxu1  ;;  %v3629_v44 = vpop.f32.mrf.mxu0 }
 0x2a4   : > { %v3637_v24 = vadd.f32 %v3625_v14, %v256_v12  ;;  %v3627_v54 = vadd.f32 %v3626_v11, %v3586_v29  ;;  %3650 = sbr.rel (%p4936_p6) target bundleno = 1155 (0x483), region = 48 }
 0x2a5   : > { %v3588_v27 = vpop.f32.mrf.mxu1 }
 0x2a6   : > { %3645 = vst [vmem:[#allocation2 + $0x28] sm:$0xff] %v3637_v24  ;;  %v3638_v60 = vadd.f32 %v3627_v54, %v257_v19 }
 0x2a8   : > { %3646 = vst [vmem:[#allocation2 + $0x38] sm:$0xff] %v3638_v60 }
 0x2a9   : > { %v5115_v28 = vld [vmem:[%s6023_s3 + $0x78] sm:$0xff]   ;;  %v5119_v34 = vld [vmem:[%s6023_s3 + $0x70] sm:$0xff]   ;;  %v5123_v39 = vld [vmem:[%s6023_s3 + $0x68] sm:$0xff]   ;;  %v3661_v26 = vlaneseq }
 0x2aa   : > { %v5116_v31 = vld [vmem:[%s6023_s3 + $0xf8] sm:$0xff]   ;;  %5005 = vmatprep.subr.bf16.mxu0 %v5115_v28  ;;  %v5120_v37 = vld [vmem:[%s6023_s3 + $0xf0] sm:$0xff]   ;;  %v5124_v41 = vld [vmem:[%s6023_s3 + $0xe8] sm:$0xff]  }
 0x2ab   : > { %v5117_v32 = vld [vmem:[%s6023_s3 + $0x38] sm:$0xff]   ;;  %5027 = vmatprep.subr.bf16.mxu1 %v5116_v31  ;;  %v5121_v38 = vld [vmem:[%s6023_s3 + $0x30] sm:$0xff]   ;;  %v5125_v42 = vld [vmem:[%s6023_s3 + $0x28] sm:$0xff]   ;;  %v5863_v52 = vshrl.u32 %v3661_v26, 7 }
 0x2ac   : > { %v5118_v33 = vld [vmem:[%s6023_s3 + $0xb8] sm:$0xff]   ;;  %5006 = vmatpush3.bf16.msra.mxu0 %v5117_v32  ;;  %v5122_v17 = vld [vmem:[%s6023_s3 + $0xb0] sm:$0xff]   ;;  %v5126_v43 = vld [vmem:[%s6023_s3 + $0xa8] sm:$0xff]  }
 0x2ad   : > { %5028 = vmatpush3.bf16.msra.mxu1 %v5118_v33  ;;  %5007 = vmatprep.subr.bf16.mxu0 %v5119_v34  ;;  %v5127_v22 = vld [vmem:[%s6023_s3 + $0x60] sm:$0xff]   ;;  %v5131_v55 = vld [vmem:[%s6023_s3 + $0x58] sm:$0xff]   ;;  %v5135_v49 = vld [vmem:[%s6023_s3 + $0x50] sm:$0xff]   ;;  %v3667_v0 = vsub.s32 1, %v5863_v52  ;;  %v3675_v36 = vsub.s32 3, %v5863_v52  ;;  %v3663_v58 = vsub.s32 0, %v5863_v52 }
 0x2ae   : > { %5029 = vmatprep.subr.bf16.mxu1 %v5120_v37  ;;  %v5128_v45 = vld [vmem:[%s6023_s3 + $0xe0] sm:$0xff]   ;;  %v5132_v13 = vld [vmem:[%s6023_s3 + $0xd8] sm:$0xff]   ;;  %v5136_v50 = vld [vmem:[%s6023_s3 + $0xd0] sm:$0xff]   ;;  %v3671_v62 = vsub.s32 2, %v5863_v52  ;;  %vm4408_vm0 = vcmp.lt.s32.totalorder %v5863_v52, 2 }
 0x2af   : > { %v5129_v46 = vld [vmem:[%s6023_s3 + $0x20] sm:$0xff]   ;;  %v5133_v20 = vld [vmem:[%s6023_s3 + $0x18] sm:$0xff]   ;;  %v5137_v51 = vld [vmem:[%s6023_s3 + $0x10] sm:$0xff]  }
 0x2b0   : > { %5008 = vmatpush3.bf16.msra.mxu0 %v5121_v38  ;;  %v5130_v47 = vld [vmem:[%s6023_s3 + $0xa0] sm:$0xff]   ;;  %v5134_v48 = vld [vmem:[%s6023_s3 + $0x98] sm:$0xff]   ;;  %v5138_v53 = vld [vmem:[%s6023_s3 + $0x90] sm:$0xff]  }
 0x2b1   : > { %5030 = vmatpush3.bf16.msra.mxu1 %v5122_v17  ;;  %5009 = vmatprep.subr.bf16.mxu0 %v5123_v39  ;;  %v5139_v56 = vld [vmem:[%s6023_s3 + $0x48] sm:$0xff]   ;;  %v5143_v30 = vld [vmem:[%s6023_s3 + $0x40] sm:$0xff]   ;;  %v3654_v2 = vld [vmem:[#allocation2 + $0x10] sm:$0xff] }
 0x2b2   : > { %5031 = vmatprep.subr.bf16.mxu1 %v5124_v41  ;;  %v5140_v35 = vld [vmem:[%s6023_s3 + $0xc8] sm:$0xff]   ;;  %v5144_v61 = vld [vmem:[%s6023_s3 + $0xc0] sm:$0xff]   ;;  %v3651_v21 = vld [vmem:[#allocation2 + $0x30] sm:$0xff] }
 0x2b3   : > { %v5141_v57 = vld [vmem:[%s6023_s3 + $0x8] sm:$0xff]   ;;  %v5145_v63 = vld [vmem:[%s6023_s3] sm:$0xff]   ;;  %v3653_v5 = vld [vmem:[#allocation2 + $0x18] sm:$0xff] }
 0x2b4   : > { %5010 = vmatpush3.bf16.msra.mxu0 %v5125_v42  ;;  %v5142_v16 = vld [vmem:[%s6023_s3 + $0x88] sm:$0xff]   ;;  %v5146_v1 = vld [vmem:[%s6023_s3 + $0x80] sm:$0xff]   ;;  %v5147_v7 = vld [vmem:[%s6023_s3 + $0x178] sm:$0xff]  }
 0x2b5   : > { %5032 = vmatpush3.bf16.msra.mxu1 %v5126_v43  ;;  %5011 = vmatprep.subr.bf16.mxu0 %v5127_v22  ;;  %v3652_v15 = vld [vmem:[#allocation2] sm:$0xff]  ;;  %v5148_v12 = vld [vmem:[%s6023_s3 + $0x1f8] sm:$0xff]   ;;  %v5151_v60 = vld [vmem:[%s6023_s3 + $0x170] sm:$0xff]  }
 0x2b6   : > { %5033 = vmatprep.subr.bf16.mxu1 %v5128_v45  ;;  %v5899_v18 = vld [vmem:[%s6022_s2] sm:$0xff]  ;;  %v5149_v19 = vld [vmem:[%s6023_s3 + $0x138] sm:$0xff]   ;;  %v5152_v28 = vld [vmem:[%s6023_s3 + $0x1f0] sm:$0xff]  }
 0x2b7   : > { %v3668_v3 = vrot.slane %v5899_v18, %v3667_v0  ;;  %v3676_v4 = vrot.slane %v5899_v18, %v3675_v36  ;;  %v3664_v25 = vrot.slane %v5899_v18, %v3663_v58  ;;  %v3672_v6 = vrot.slane %v5899_v18, %v3671_v62  ;;  %v5150_v23 = vld [vmem:[%s6023_s3 + $0x1b8] sm:$0xff]   ;;  %v5153_v31 = vld [vmem:[%s6023_s3 + $0x130] sm:$0xff]   ;;  %v5155_v33 = vld [vmem:[%s6023_s3 + $0x168] sm:$0xff]  }
 0x2b8   : > { %5012 = vmatpush3.bf16.msra.mxu0 %v5129_v46  ;;  %v5154_v32 = vld [vmem:[%s6023_s3 + $0x1b0] sm:$0xff]   ;;  %v5156_v34 = vld [vmem:[%s6023_s3 + $0x1e8] sm:$0xff]   ;;  %v5159_v17 = vld [vmem:[%s6023_s3 + $0x160] sm:$0xff]  }
 0x2b9   : > { %5034 = vmatpush3.bf16.msra.mxu1 %v5130_v47  ;;  %5013 = vmatprep.subr.bf16.mxu0 %v5131_v55  ;;  %v3702_v8 = vadd.f32 %v3668_v3, %v3652_v15  ;;  %v3704_v9 = vadd.f32 %v3676_v4, %v3654_v2  ;;  %v3701_v10 = vadd.f32 %v3664_v25, %v3651_v21  ;;  %v5157_v37 = vld [vmem:[%s6023_s3 + $0x128] sm:$0xff]   ;;  %v5160_v39 = vld [vmem:[%s6023_s3 + $0x1e0] sm:$0xff]   ;;  %v5163_v43 = vld [vmem:[%s6023_s3 + $0x158] sm:$0xff]  }
 0x2ba   : > { %5035 = vmatprep.subr.bf16.mxu1 %v5132_v13  ;;  %v3703_v11 = vadd.f32 %v3672_v6, %v3653_v5  ;;  %v5158_v38 = vld [vmem:[%s6023_s3 + $0x1a8] sm:$0xff]   ;;  %v5161_v41 = vld [vmem:[%s6023_s3 + $0x120] sm:$0xff]   ;;  %v5164_v22 = vld [vmem:[%s6023_s3 + $0x1d8] sm:$0xff]  }
 0x2bb   : > { %v3710_v40 = vmax.f32 %v3702_v8, 0.0  ;;  %v3712_v14 = vmax.f32 %v3704_v9, 0.0  ;;  %v3709_v29 = vmax.f32 %v3701_v10, 0.0  ;;  %v5162_v42 = vld [vmem:[%s6023_s3 + $0x1a0] sm:$0xff]   ;;  %v5165_v45 = vld [vmem:[%s6023_s3 + $0x118] sm:$0xff]   ;;  %v5167_v47 = vld [vmem:[%s6023_s3 + $0x150] sm:$0xff]  }
 0x2bc   : > { %5014 = vmatpush3.bf16.msra.mxu0 %v5133_v20  ;;  %v3711_v59 = vmax.f32 %v3703_v11, 0.0  ;;  %v5166_v46 = vld [vmem:[%s6023_s3 + $0x198] sm:$0xff]   ;;  %v5168_v55 = vld [vmem:[%s6023_s3 + $0x1d0] sm:$0xff]   ;;  %v3683_v20 = vsub.s32 5, %v5863_v52  ;;  %v5175_v0 = vld [vmem:[%s6023_s3 + $0x140] sm:$0xff]  }
 0x2bd   : > { %5036 = vmatpush3.bf16.msra.mxu1 %v5134_v48  ;;  %5015 = vmatprep.subr.bf16.mxu0 %v5135_v49  ;;  %v3718_v24 = vpack.c.bf16 %v3710_v40, %v3710_v40  ;;  %v3720_v54 = vpack.c.bf16 %v3712_v14, %v3712_v14  ;;  %v3717_v44 = vpack.c.bf16 %v3709_v29, %v3709_v29  ;;  %v5169_v13 = vld [vmem:[%s6023_s3 + $0x110] sm:$0xff]   ;;  %v3691_v49 = vsub.s32 7, %v5863_v52  ;;  %v5177_v62 = vld [vmem:[%s6023_s3 + $0x100] sm:$0xff]   ;;  %v3655_v4 = vld [vmem:[#allocation2 + $0x8] sm:$0xff] }
 0x2be   : > { %5037 = vmatprep.subr.bf16.mxu1 %v5136_v50  ;;  %v3719_v27 = vpack.c.bf16 %v3711_v59, %v3711_v59  ;;  %v5170_v48 = vld [vmem:[%s6023_s3 + $0x190] sm:$0xff]   ;;  %v5171_v50 = vld [vmem:[%s6023_s3 + $0x148] sm:$0xff]   ;;  %v5178_v15 = vld [vmem:[%s6023_s3 + $0x180] sm:$0xff]   ;;  %v5189_v40 = vmov 6  }
 0x2bf   : > { %4276 = vmatprep.mubr.bf16.mxu0 %v3718_v24  ;;  %4316 = vmatprep.mubr.bf16.mxu1 %v3720_v54  ;;  %v3692_v36 = vrot.slane %v5899_v18, %v3691_v49  ;;  %v3657_v21 = vld [vmem:[#allocation2 + $0x28] sm:$0xff] }
 0x2c0   : > { %5016 = vmatpush3.bf16.msra.mxu0 %v5137_v51  ;;  %v3679_v51 = vsub.s32 4, %v5863_v52  ;;  %5114 = vset.pattern.permute.xlu0 %v5189_v40 }
 0x2c1   : > { %5038 = vmatpush3.bf16.msra.mxu1 %v5138_v53  ;;  %5017 = vmatprep.subr.bf16.mxu0 %v5139_v56  ;;  %v5172_v53 = vld [vmem:[%s6023_s3 + $0x1c8] sm:$0xff]   ;;  %v3687_v56 = vsub.s32 6, %v5863_v52 }
 0x2c2   : > { %5039 = vmatprep.subr.bf16.mxu1 %v5140_v35  ;;  %v5173_v35 = vld [vmem:[%s6023_s3 + $0x108] sm:$0xff]   ;;  %v3680_v58 = vrot.slane %v5899_v18, %v3679_v51 }
 0x2c4   : > { %5018 = vmatpush3.bf16.msra.mxu0 %v5141_v57  ;;  %v5174_v57 = vld [vmem:[%s6023_s3 + $0x188] sm:$0xff]   ;;  %v3705_v25 = vadd.f32 %v3680_v58, %v3655_v4 }
 0x2c5   : > { %5040 = vmatpush3.bf16.msra.mxu1 %v5142_v16  ;;  %5019 = vmatprep.subr.bf16.mxu0 %v5143_v30  ;;  %v3684_v16 = vrot.slane %v5899_v18, %v3683_v20  ;;  %v5176_v30 = vld [vmem:[%s6023_s3 + $0x1c0] sm:$0xff]  }
 0x2c6   : > { %5041 = vmatprep.subr.bf16.mxu1 %v5144_v61  ;;  %v3688_v61 = vrot.slane %v5899_v18, %v3687_v56 }
 0x2c8   : > { %5020 = vmatpush3.bf16.msra.mxu0 %v5145_v63  ;;  %v3656_v63 = vld [vmem:[#allocation2 + $0x20] sm:$0xff]  ;;  %v3707_v18 = vadd.f32 %v3688_v61, %v3657_v21 }
 0x2c9   : > { %5042 = vmatpush3.bf16.msra.mxu1 %v5146_v1  ;;  %5049 = vmatprep.subr.bf16.mxu0 %v5147_v7  ;;  %v3658_v1 = vld [vmem:[#allocation2 + $0x38] sm:$0xff]  ;;  %v3706_v2 = vadd.f32 %v3684_v16, %v3656_v63  ;;  %v3713_v7 = vmax.f32 %v3705_v25, 0.0 }
 0x2ca   : > { %5071 = vmatprep.subr.bf16.mxu1 %v5148_v12  ;;  %v3708_v3 = vadd.f32 %v3692_v36, %v3658_v1  ;;  %v3715_v8 = vmax.f32 %v3707_v18, 0.0 }
 0x2cb   : > { %4277 = vmatmul.mubr.bf16.vlgmr.msra.gmra.mxu0 %v3717_v44  ;;  %v3714_v5 = vmax.f32 %v3706_v2, 0.0  ;;  %v3721_v11 = vpack.c.bf16 %v3713_v7, %v3713_v7 }
 0x2cc   : > { %4317 = vmatmul.mubr.bf16.vlgmr.msra.gmra.mxu1 %v3719_v27  ;;  %5050 = vmatpush3.bf16.msra.mxu0 %v5149_v19  ;;  %v3716_v6 = vmax.f32 %v3708_v3, 0.0  ;;  %v3723_v12 = vpack.c.bf16 %v3715_v8, %v3715_v8 }
 0x2cd   : > { %5072 = vmatpush3.bf16.msra.mxu1 %v5150_v23  ;;  %5051 = vmatprep.subr.bf16.mxu0 %v5151_v60  ;;  %v3722_v9 = vpack.c.bf16 %v3714_v5, %v3714_v5  ;;  %v4937_v60 = vld [vmem:[%s6024_s4] ss:$0 sm:$0xff] }
 0x2ce   : > { %5073 = vmatprep.subr.bf16.mxu1 %v5152_v28  ;;  %v3724_v10 = vpack.c.bf16 %v3716_v6, %v3716_v6 }
 0x2cf   : > { %4356 = vmatprep.mubr.bf16.mxu0 %v3722_v9 }
 0x2d0   : > { %5052 = vmatpush3.bf16.msra.mxu0 %v5153_v31  ;;  %4396 = vmatprep.mubr.bf16.mxu1 %v3724_v10 }
 0x2d1   : > { %5074 = vmatpush3.bf16.msra.mxu1 %v5154_v32  ;;  %5053 = vmatprep.subr.bf16.mxu0 %v5155_v33  ;;  %v4407_v32 = vand.u32 127, %v3661_v26 }
 0x2d2   : > { %5075 = vmatprep.subr.bf16.mxu1 %v5156_v34 }
 0x2d3   : > { %vm4409_vm1 = vcmp.lt.s32.totalorder %v4407_v32, 6 }
 0x2d4   : > { %5054 = vmatpush3.bf16.msra.mxu0 %v5157_v37  ;;  %vm4410_vm2 = vmand %vm4408_vm0, %vm4409_vm1 }
 0x2d5   : > { %5076 = vmatpush3.bf16.msra.mxu1 %v5158_v38  ;;  %5055 = vmatprep.subr.bf16.mxu0 %v5159_v17 }
 0x2d6   : > { %5077 = vmatprep.subr.bf16.mxu1 %v5160_v39 }
 0x2d8   : > { %5056 = vmatpush3.bf16.msra.mxu0 %v5161_v41 }
 0x2d9   : > { %5078 = vmatpush3.bf16.msra.mxu1 %v5162_v42  ;;  %5057 = vmatprep.subr.bf16.mxu0 %v5163_v43 }
 0x2da   : > { %5079 = vmatprep.subr.bf16.mxu1 %v5164_v22 }
 0x2dc   : > { %5058 = vmatpush3.bf16.msra.mxu0 %v5165_v45 }
 0x2dd   : > { %5080 = vmatpush3.bf16.msra.mxu1 %v5166_v46  ;;  %5059 = vmatprep.subr.bf16.mxu0 %v5167_v47 }
 0x2de   : > { %5081 = vmatprep.subr.bf16.mxu1 %v5168_v55 }
 0x2e0   : > { %5060 = vmatpush3.bf16.msra.mxu0 %v5169_v13 }
 0x2e1   : > { %5082 = vmatpush3.bf16.msra.mxu1 %v5170_v48  ;;  %5061 = vmatprep.subr.bf16.mxu0 %v5171_v50 }
 0x2e2   : > { %5083 = vmatprep.subr.bf16.mxu1 %v5172_v53 }
 0x2e4   : > { %5062 = vmatpush3.bf16.msra.mxu0 %v5173_v35 }
 0x2e5   : > { %5084 = vmatpush3.bf16.msra.mxu1 %v5174_v57  ;;  %5063 = vmatprep.subr.bf16.mxu0 %v5175_v0 }
 0x2e6   : > { %5085 = vmatprep.subr.bf16.mxu1 %v5176_v30 }
 0x2e8   : > { %5064 = vmatpush3.bf16.msra.mxu0 %v5177_v62 }
 0x2e9   : > { %5086 = vmatpush3.bf16.msra.mxu1 %v5178_v15 }
 0x2eb   : > { %4357 = vmatmul.mubr.bf16.vlgmr.msra.gmra.mxu0 %v3721_v11 }
 0x2ec   : > { %4397 = vmatmul.mubr.bf16.vlgmr.msra.gmra.mxu1 %v3723_v12 }
 0x38b   : > { %v5021_v14 = vpop.f32.mrf.mxu0 }
 0x38c   : > { %v5043_v29 = vpop.f32.mrf.mxu1 }
 0x38d   : > { %v5022_v59 = vpop.f32.mrf.mxu0 }
 0x38e   : > { %v5044_v19 = vpop.f32.mrf.mxu1  ;;  %v5023_v27 = vadd.f32 %v5022_v59, %v5021_v14 }
 0x38f   : > { %v5024_v23 = vpop.f32.mrf.mxu0  ;;  %v5045_v31 = vadd.f32 %v5044_v19, %v5043_v29 }
 0x390   : > { %v5046_v24 = vpop.f32.mrf.mxu1  ;;  %v4279_v28 = vadd.f32 %v5023_v27, %v4937_v60 }
 0x391   : > { %v5025_v54 = vpop.f32.mrf.mxu0 }
 0x392   : > { %v5047_v44 = vpop.f32.mrf.mxu1  ;;  %v4319_v17 = vadd.f32 %v5045_v31, %v4279_v28 }
 0x3ab   : > { %v5065_v33 = vpop.f32.mrf.mxu0 }
 0x3ac   : > { %v5087_v34 = vpop.f32.mrf.mxu1 }
 0x3ad   : > { %v5066_v37 = vpop.f32.mrf.mxu0 }
 0x3ae   : > { %v5088_v38 = vpop.f32.mrf.mxu1  ;;  %v5067_v39 = vadd.f32 %v5066_v37, %v5065_v33 }
 0x3af   : > { %v5068_v41 = vpop.f32.mrf.mxu0  ;;  %v5089_v22 = vadd.f32 %v5088_v38, %v5087_v34 }
 0x3b0   : > { %v5090_v42 = vpop.f32.mrf.mxu1  ;;  %v4359_v43 = vadd.f32 %v5067_v39, %v4319_v17 }
 0x3b1   : > { %v5069_v45 = vpop.f32.mrf.mxu0 }
 0x3b2   : > { %v5091_v46 = vpop.f32.mrf.mxu1  ;;  %v4399_v47 = vadd.f32 %v5089_v22, %v4359_v43 }
 0x3b4   : > { %v4411_v55 = vsel %vm4410_vm2, %v4399_v47, 0.0 }
 0x3b5   : > { %4412 = vadd.xlane.f32.xlu0 %v4411_v55 }
 0x3cb   : > { %4426 = vperm.xlu0 %5114, %v4399_v47  }
 0x43e   : > { %v4413_v26 = vpop.xlane.xlu0 %4412 }
 0x43f   : > { %v4414_v13 = vrot.slane %v4413_v26, 4 }
 0x441   : > { %v4415_v20 = vadd.f32 %v4414_v13, %v4413_v26 }
 0x443   : > { %v4416_v48 = vrot.slane %v4415_v20, 2 }
 0x445   : > { %v4417_v49 = vadd.f32 %v4416_v48, %v4415_v20 }
 0x446   : > { %v4427_v52 = vpop.permute.xlu0 %4426 }
 0x447   : > { %v4418_v50 = vrot.slane %v4417_v49, 1  ;;  %v4429_v53 = vadd.f32 %v4427_v52, %v4399_v47 }
 0x449   : > { %v4419_v51 = vadd.f32 %v4418_v50, %v4417_v49 }
 0x44b   : > { %5093 = vpush %v4419_v51 }
 0x47c   : > { %s5094_s17 = spop %5093 }
 0x47d   : > { %s4423_s19 = smul.f32 0.083333336, %s5094_s17 }
 0x47f   : > { %v4430_v56 = vstv %s4423_s19 }
 0x480   : > { %v4431_v35 = vsub.f32 %v4429_v53, %v4430_v56 }
 0x482   : > { %4432 = vst [vmem:[%s6025_s5] sm:$0xff] %v4431_v35 }
 0x483 PF: > { %s15_s18 = sadd.s32 1, %s5185_s18  }
 0x484   : > { %p12_p7 = scmp.ge.s32.totalorder %s15_s18, 9  }
 0x486   :  { %14 = sbr.rel (!%p12_p7) target bundleno = 1 (0x1), region = 77 }

</bundles_post_ra>
